<compile_context>
chip_gen: v5e
topology: v5e:2x2
jax: 0.10.0
libtpu: 0.0.40
codegen_flags: <defaults>
</compile_context>

<pallas_src>
import jax
import jax.numpy as jnp
from jax.experimental import pallas as pl
from jax.experimental.pallas import tpu as pltpu

EPS = 1e-5


# ----------------------------- Pallas kernels ------------------------------ #

def conv3x3_kernel(xw_ref, w_ref, b_ref, o_ref, sum_ref, ssq_ref):
    # xw_ref : (1, Hin, Wp, Cin)  W-upsampled + W-padded input (Wp = 2*Win + 2), one image
    # w_ref  : (9*Cin, Cout)      HWIO weights flattened (kh, kw, cin)-major
    # b_ref  : (1, Cout)          conv bias
    # o_ref  : (1, Cout, P)       conv output, transposed / NCHW-flat (P = 2Hin * 2Win)
    # sum_ref, ssq_ref : (1, 1, Cout)  per-image per-channel sum / sum-of-squares
    Hin = xw_ref.shape[1]
    Wp = xw_ref.shape[2]
    Cin = xw_ref.shape[3]
    Hup = 2 * Hin
    Wup = Wp - 2
    P = Hup * Wup

    x = xw_ref[0]                                           # (Hin, Wp, Cin)

    # Nearest x2 upsample along H: leading-dim broadcast + layout-preserving reshape
    # (only the leading, non-tiled dims change; the (Wp, Cin) minor tile is untouched).
    xu = jnp.broadcast_to(x[:, None, :, :], (Hin, 2, Wp, Cin)).reshape(Hup, Wp, Cin)
    # Zero pad along H (leading-dim concat only).
    zrow = jnp.zeros((1, Wp, Cin), xu.dtype)
    xp = jnp.concatenate([zrow, xu, zrow], axis=0)          # (Hup + 2, Wp, Cin)

    # im2col: 9 shifted views concatenated along channels -> one K = 9*Cin MXU matmul.
    cols = []
    for kh in range(3):
        for kw in range(3):
            cols.append(xp[kh:kh + Hup, kw:kw + Wup, :])
    patch = jnp.concatenate(cols, axis=-1).reshape(P, 9 * Cin)

    acc = jnp.dot(patch, w_ref[...], preferred_element_type=jnp.float32)
    acc = acc + b_ref[...]                                  # (P, Cout), f32

    # BatchNorm batch statistics, fused into the conv pass (no HBM re-read).
    sum_ref[0] = jnp.sum(acc, axis=0, keepdims=True)        # (1, Cout)
    ssq_ref[0] = jnp.sum(acc * acc, axis=0, keepdims=True)  # (1, Cout)

    # Store transposed: lane-dense (Cout, P), already NCHW-flat order.
    o_ref[0] = acc.T.astype(o_ref.dtype)


def bn_relu_kernel(y_ref, scale_ref, shift_ref, o_ref):
    # y_ref  : (1, Cout, TILE_P) conv intermediate tile (NCHW-flat)
    # scale_ref / shift_ref : (Cout, 1) folded BN affine parameters
    # o_ref  : (1, Cout, TILE_P)
    y = y_ref[0]                                            # (Cout, TILE_P)
    out = y * scale_ref[...] + shift_ref[...]
    o_ref[0] = jnp.maximum(out, 0.0).astype(o_ref.dtype)


# ------------------------------ Python wrapper ------------------------------ #

def _pick_tile_p(P):
    for t in (2048, 1024, 512, 256, 128):
        if P % t == 0:
            return t
    return P


def up_conv(x_nchw, w_hwio, bias, gamma, beta):
    N, Cin, Hin, Win = x_nchw.shape
    Cout = w_hwio.shape[-1]
    Hup, Wup = 2 * Hin, 2 * Win
    P = Hup * Wup
    Wp = Wup + 2

    # Small wrapper-side prep on the pre-upsample tensor only:
    # NCHW -> NHWC, nearest x2 along W, zero pad along W (2x inflation, not 4x).
    x = jnp.transpose(x_nchw, (0, 2, 3, 1))                 # (N, Hin, Win, Cin)
    x = jnp.repeat(x, 2, axis=2)                            # (N, Hin, Wup, Cin)
    x = jnp.pad(x, ((0, 0), (0, 0), (1, 1), (0, 0)))        # (N, Hin, Wp, Cin)

    w_flat = w_hwio.reshape(9 * Cin, Cout)                  # (kh, kw, cin)-major
    bias2d = bias.reshape(1, Cout)

    conv_t, sums, ssqs = pl.pallas_call(
        conv3x3_kernel,
        out_shape=(
            jax.ShapeDtypeStruct((N, Cout, P), jnp.float32),
            jax.ShapeDtypeStruct((N, 1, Cout), jnp.float32),
            jax.ShapeDtypeStruct((N, 1, Cout), jnp.float32),
        ),
        grid=(N,),
        in_specs=[
            pl.BlockSpec((1, Hin, Wp, Cin), lambda n: (n, 0, 0, 0)),
            pl.BlockSpec((9 * Cin, Cout), lambda n: (0, 0)),
            pl.BlockSpec((1, Cout), lambda n: (0, 0)),
        ],
        out_specs=(
            pl.BlockSpec((1, Cout, P), lambda n: (n, 0, 0)),
            pl.BlockSpec((1, 1, Cout), lambda n: (n, 0, 0)),
            pl.BlockSpec((1, 1, Cout), lambda n: (n, 0, 0)),
        ),
        compiler_params=pltpu.CompilerParams(
            dimension_semantics=("parallel",),
            vmem_limit_bytes=64 * 1024 * 1024),
    )(x, w_flat, bias2d)

    # Tiny per-channel BN statistics math (training-mode batch stats, biased variance).
    count = N * P
    mean = jnp.sum(sums, axis=(0, 1)) / count               # (Cout,)
    var = jnp.maximum(jnp.sum(ssqs, axis=(0, 1)) / count - mean * mean, 0.0)
    inv = jax.lax.rsqrt(var + EPS)
    scale = (gamma * inv).reshape(Cout, 1).astype(jnp.float32)
    shift = (beta - mean * gamma * inv).reshape(Cout, 1).astype(jnp.float32)

    TILE_P = _pick_tile_p(P)
    y = pl.pallas_call(
        bn_relu_kernel,
        out_shape=jax.ShapeDtypeStruct((N, Cout, P), jnp.float32),
        grid=(N, P // TILE_P),
        in_specs=[
            pl.BlockSpec((1, Cout, TILE_P), lambda n, p: (n, 0, p)),
            pl.BlockSpec((Cout, 1), lambda n, p: (0, 0)),
            pl.BlockSpec((Cout, 1), lambda n, p: (0, 0)),
        ],
        out_specs=pl.BlockSpec((1, Cout, TILE_P), lambda n, p: (n, 0, p)),
        compiler_params=pltpu.CompilerParams(
            dimension_semantics=("parallel", "parallel")),
    )(conv_t, scale, shift)

    # Output is already NCHW-flat; this reshape is a free row-major split (no copy).
    return y.reshape(N, Cout, Hup, Wup)


# --------------------------- Pure-JAX reference ----------------------------- #

def up_conv_ref(x_nchw, w_hwio, bias, gamma, beta):
    x = jnp.transpose(x_nchw, (0, 2, 3, 1))
    x = jnp.repeat(jnp.repeat(x, 2, axis=1), 2, axis=2)
    conv = jax.lax.conv_general_dilated(
        x, w_hwio, window_strides=(1, 1), padding=((1, 1), (1, 1)),
        dimension_numbers=("NHWC", "HWIO", "NHWC")) + bias
    mean = jnp.mean(conv, axis=(0, 1, 2), keepdims=True)
    var = jnp.var(conv, axis=(0, 1, 2), keepdims=True)      # biased, like torch BN fwd
    y = (conv - mean) * jax.lax.rsqrt(var + EPS) * gamma + beta
    y = jnp.maximum(y, 0.0)
    return jnp.transpose(y, (0, 3, 1, 2))


# ---------------------------------- main ------------------------------------ #

if __name__ == "__main__":
    key = jax.random.PRNGKey(0)
    k_x, k_w, k_b = jax.random.split(key, 3)

    N, Cin, Hin, Win = 2, 4, 16, 16
    Cout = 8

    x = jax.random.normal(k_x, (N, Cin, Hin, Win), dtype=jnp.float32)

    # Parameter shapes from nn.Conv2d(Cin, Cout, 3, padding=1, bias=True) + BatchNorm2d(Cout).
    w_hwio = jax.random.normal(k_w, (3, 3, Cin, Cout), dtype=jnp.float32) * 0.1
    bias = jax.random.normal(k_b, (Cout,), dtype=jnp.float32) * 0.1
    gamma = jnp.ones((Cout,), dtype=jnp.float32)   # BatchNorm2d default weight
    beta = jnp.zeros((Cout,), dtype=jnp.float32)   # BatchNorm2d default bias

    out = jax.block_until_ready(up_conv(x, w_hwio, bias, gamma, beta))
    ref = jax.block_until_ready(up_conv_ref(x, w_hwio, bias, gamma, beta))

    assert out.shape == (N, Cout, 2 * Hin, 2 * Win), out.shape
    err = float(jnp.max(jnp.abs(out - ref)))
    assert jnp.allclose(out, ref, rtol=1e-4, atol=1e-4), err

    print("KERNEL_OK")
</pallas_src>

<mosaic_0001>
module attributes {stable_mosaic.version = 11 : i64} {
  func.func @conv3x3_kernel(%arg0: i32, %arg1: memref<1x16x34x4xf32, #tpu.memory_space<vmem>>, %arg2: memref<36x8xf32, #tpu.memory_space<vmem>>, %arg3: memref<1x8xf32, #tpu.memory_space<vmem>>, %arg4: memref<1x8x1024xf32, #tpu.memory_space<vmem>>, %arg5: memref<1x1x8xf32, #tpu.memory_space<vmem>>, %arg6: memref<1x1x8xf32, #tpu.memory_space<vmem>>) attributes {dimension_semantics = [#tpu.dimension_semantics<parallel>], iteration_bounds = array<i64: 2>, scalar_prefetch = 0 : i64, scratch_operands = 0 : i64, tpu.core_type = #tpu.core_type<tc>, window_params = [{transform_indices = @transform_0, window_bounds = array<i64: 1, 16, 34, 4>}, {pipeline_mode = #tpu.pipeline_mode<synchronous>, transform_indices = @transform_1, window_bounds = array<i64: 36, 8>}, {pipeline_mode = #tpu.pipeline_mode<synchronous>, transform_indices = @transform_2, window_bounds = array<i64: 1, 8>}, {transform_indices = @transform_3, window_bounds = array<i64: 1, 8, 1024>}, {transform_indices = @transform_4, window_bounds = array<i64: 1, 1, 8>}, {transform_indices = @transform_5, window_bounds = array<i64: 1, 1, 8>}]} {
    %c0 = arith.constant 0 : index
    %c0_0 = arith.constant 0 : index
    %c0_1 = arith.constant 0 : index
    %c0_2 = arith.constant 0 : index
    %0 = vector.load %arg1[%c0, %c0_0, %c0_1, %c0_2] : memref<1x16x34x4xf32, #tpu.memory_space<vmem>>, vector<1x16x34x4xf32>
    %1 = vector.shape_cast %0 : vector<1x16x34x4xf32> to vector<16x34x4xf32>
    %2 = vector.shape_cast %1 : vector<16x34x4xf32> to vector<16x1x34x4xf32>
    %3 = vector.shape_cast %2 : vector<16x1x34x4xf32> to vector<16x1x34x4xf32>
    %4 = vector.broadcast %3 : vector<16x1x34x4xf32> to vector<16x2x34x4xf32>
    %5 = vector.shape_cast %4 : vector<16x2x34x4xf32> to vector<32x34x4xf32>
    %cst = arith.constant 0.000000e+00 : f32
    %6 = vector.broadcast %cst : f32 to vector<1x34x4xf32>
    %7 = tpu.concatenate %6, %5, %6 in 0 : vector<1x34x4xf32>, vector<32x34x4xf32>, vector<1x34x4xf32> -> vector<34x34x4xf32>
    %8 = vector.extract_strided_slice %7 {offsets = [0, 0, 0], sizes = [32, 32, 4], strides = [1, 1, 1]} : vector<34x34x4xf32> to vector<32x32x4xf32>
    %9 = vector.extract_strided_slice %7 {offsets = [0, 1, 0], sizes = [32, 32, 4], strides = [1, 1, 1]} : vector<34x34x4xf32> to vector<32x32x4xf32>
    %10 = vector.extract_strided_slice %7 {offsets = [0, 2, 0], sizes = [32, 32, 4], strides = [1, 1, 1]} : vector<34x34x4xf32> to vector<32x32x4xf32>
    %11 = vector.extract_strided_slice %7 {offsets = [1, 0, 0], sizes = [32, 32, 4], strides = [1, 1, 1]} : vector<34x34x4xf32> to vector<32x32x4xf32>
    %12 = vector.extract_strided_slice %7 {offsets = [1, 1, 0], sizes = [32, 32, 4], strides = [1, 1, 1]} : vector<34x34x4xf32> to vector<32x32x4xf32>
    %13 = vector.extract_strided_slice %7 {offsets = [1, 2, 0], sizes = [32, 32, 4], strides = [1, 1, 1]} : vector<34x34x4xf32> to vector<32x32x4xf32>
    %14 = vector.extract_strided_slice %7 {offsets = [2, 0, 0], sizes = [32, 32, 4], strides = [1, 1, 1]} : vector<34x34x4xf32> to vector<32x32x4xf32>
    %15 = vector.extract_strided_slice %7 {offsets = [2, 1, 0], sizes = [32, 32, 4], strides = [1, 1, 1]} : vector<34x34x4xf32> to vector<32x32x4xf32>
    %16 = vector.extract_strided_slice %7 {offsets = [2, 2, 0], sizes = [32, 32, 4], strides = [1, 1, 1]} : vector<34x34x4xf32> to vector<32x32x4xf32>
    %17 = tpu.concatenate %8, %9, %10, %11, %12, %13, %14, %15, %16 in 2 : vector<32x32x4xf32>, vector<32x32x4xf32>, vector<32x32x4xf32>, vector<32x32x4xf32>, vector<32x32x4xf32>, vector<32x32x4xf32>, vector<32x32x4xf32>, vector<32x32x4xf32>, vector<32x32x4xf32> -> vector<32x32x36xf32>
    %18 = vector.shape_cast %17 : vector<32x32x36xf32> to vector<1024x36xf32>
    %c0_3 = arith.constant 0 : index
    %c0_4 = arith.constant 0 : index
    %19 = vector.load %arg2[%c0_3, %c0_4] : memref<36x8xf32, #tpu.memory_space<vmem>>, vector<36x8xf32>
    %cst_5 = arith.constant dense<0.000000e+00> : vector<1024x8xf32>
    %20 = tpu.matmul %18, %19, %cst_5 {dimension_numbers = #tpu.dot_dimension_numbers<[1], [0], [0], [1], [0, 0, 1, 1], [], []>} : vector<1024x36xf32>, vector<36x8xf32>, vector<1024x8xf32> -> vector<1024x8xf32>
    %c0_6 = arith.constant 0 : index
    %c0_7 = arith.constant 0 : index
    %21 = vector.load %arg3[%c0_6, %c0_7] : memref<1x8xf32, #tpu.memory_space<vmem>>, vector<1x8xf32>
    %22 = vector.broadcast %21 : vector<1x8xf32> to vector<1024x8xf32>
    %23 = arith.addf %20, %22 : vector<1024x8xf32>
    %cst_8 = arith.constant dense<0.000000e+00> : vector<8xf32>
    %24 = vector.multi_reduction <add>, %23, %cst_8 [0] : vector<1024x8xf32> to vector<8xf32>
    %25 = vector.shape_cast %24 : vector<8xf32> to vector<1x8xf32>
    %c0_9 = arith.constant 0 : index
    %c0_10 = arith.constant 0 : index
    %c0_11 = arith.constant 0 : index
    %26 = vector.load %arg5[%c0_9, %c0_10, %c0_11] : memref<1x1x8xf32, #tpu.memory_space<vmem>>, vector<1x1x8xf32>
    %27 = vector.shape_cast %26 : vector<1x1x8xf32> to vector<1x8xf32>
    %28 = vector.shape_cast %25 : vector<1x8xf32> to vector<1x1x8xf32>
    tpu.vector_store %arg5[%c0_9, %c0_10, %c0_11], %28 {strides = array<i32>} : memref<1x1x8xf32, #tpu.memory_space<vmem>>, vector<1x1x8xf32>,
    %29 = arith.mulf %23, %23 : vector<1024x8xf32>
    %cst_12 = arith.constant dense<0.000000e+00> : vector<8xf32>
    %30 = vector.multi_reduction <add>, %29, %cst_12 [0] : vector<1024x8xf32> to vector<8xf32>
    %31 = vector.shape_cast %30 : vector<8xf32> to vector<1x8xf32>
    %c0_13 = arith.constant 0 : index
    %c0_14 = arith.constant 0 : index
    %c0_15 = arith.constant 0 : index
    %32 = vector.load %arg6[%c0_13, %c0_14, %c0_15] : memref<1x1x8xf32, #tpu.memory_space<vmem>>, vector<1x1x8xf32>
    %33 = vector.shape_cast %32 : vector<1x1x8xf32> to vector<1x8xf32>
    %34 = vector.shape_cast %31 : vector<1x8xf32> to vector<1x1x8xf32>
    tpu.vector_store %arg6[%c0_13, %c0_14, %c0_15], %34 {strides = array<i32>} : memref<1x1x8xf32, #tpu.memory_space<vmem>>, vector<1x1x8xf32>,
    %35 = tpu.transpose %23, [1, 0] : vector<1024x8xf32> -> vector<8x1024xf32>
    %c0_16 = arith.constant 0 : index
    %c0_17 = arith.constant 0 : index
    %c0_18 = arith.constant 0 : index
    %36 = vector.load %arg4[%c0_16, %c0_17, %c0_18] : memref<1x8x1024xf32, #tpu.memory_space<vmem>>, vector<1x8x1024xf32>
    %37 = vector.shape_cast %36 : vector<1x8x1024xf32> to vector<8x1024xf32>
    %38 = vector.shape_cast %35 : vector<8x1024xf32> to vector<1x8x1024xf32>
    tpu.vector_store %arg4[%c0_16, %c0_17, %c0_18], %38 {strides = array<i32>} : memref<1x8x1024xf32, #tpu.memory_space<vmem>>, vector<1x8x1024xf32>,
    return
  }
  func.func @transform_0(%arg0: i32) -> (i32, i32, i32, i32) {
    %c0_i32 = arith.constant 0 : i32
    %c0_i32_0 = arith.constant 0 : i32
    %c0_i32_1 = arith.constant 0 : i32
    %c0_i32_2 = arith.constant 0 : i32
    return %arg0, %c0_i32, %c0_i32_0, %c0_i32_1 : i32, i32, i32, i32
  }
  func.func @transform_1(%arg0: i32) -> (i32, i32) {
    %c0_i32 = arith.constant 0 : i32
    %c0_i32_0 = arith.constant 0 : i32
    %c0_i32_1 = arith.constant 0 : i32
    return %c0_i32, %c0_i32_0 : i32, i32
  }
  func.func @transform_2(%arg0: i32) -> (i32, i32) {
    %c0_i32 = arith.constant 0 : i32
    %c0_i32_0 = arith.constant 0 : i32
    %c0_i32_1 = arith.constant 0 : i32
    return %c0_i32, %c0_i32_0 : i32, i32
  }
  func.func @transform_3(%arg0: i32) -> (i32, i32, i32) {
    %c0_i32 = arith.constant 0 : i32
    %c0_i32_0 = arith.constant 0 : i32
    %c0_i32_1 = arith.constant 0 : i32
    return %arg0, %c0_i32, %c0_i32_0 : i32, i32, i32
  }
  func.func @transform_4(%arg0: i32) -> (i32, i32, i32) {
    %c0_i32 = arith.constant 0 : i32
    %c0_i32_0 = arith.constant 0 : i32
    %c0_i32_1 = arith.constant 0 : i32
    return %arg0, %c0_i32, %c0_i32_0 : i32, i32, i32
  }
  func.func @transform_5(%arg0: i32) -> (i32, i32, i32) {
    %c0_i32 = arith.constant 0 : i32
    %c0_i32_0 = arith.constant 0 : i32
    %c0_i32_1 = arith.constant 0 : i32
    return %arg0, %c0_i32, %c0_i32_0 : i32, i32, i32
  }
}

</mosaic_0001>

<bundles_post_ra>
// kernel: tpu_custom_call.1
= control target key start
LH: loop header
LB: loop body
LE: loop exit
PB: predicated region body
PF: predicated region fallthrough
CT: control target
= control target key end

     0   :  { %11 = vsyncpa [#allocation3], 0  ;;  %s12499_s0 = inlined_call_operand.vmem [shape: f32[2,16,34,4], index: 0, kind: input, shape index: {}]   ;;  %s12500_s1 = inlined_call_operand.vmem [shape: f32[36,8], index: 1, kind: input, shape index: {}]   ;;  %s12501_s2 = inlined_call_operand.vmem [shape: f32[1,8], index: 2, kind: input, shape index: {}]   ;;  %s12502_s3 = inlined_call_operand.hbm [shape: f32[2,8,1024], index: 3, kind: output, shape index: {0}]   ;;  %s12503_s4 = inlined_call_operand.hbm [shape: f32[2,1,8], index: 4, kind: output, shape index: {1}]   ;;  %s12504_s5 = inlined_call_operand.hbm [shape: f32[2,1,8], index: 5, kind: output, shape index: {2}]  }
   0x1   :  { %13 = vsyncpa [#allocation3 + $0x1], 0 }
   0x2   :  { %14 = vsyncpa [#allocation5], 0 }
   0x3   :  { %16 = vsyncpa [#allocation5 + $0x1], 0  ;;  %s5514_s18 = smov 0   ;;  %s5516_s19 = smov 0  }
   0x4   :  { %s5518_s20 = smov 0   ;;  %s5520_s21 = smov 0  }
   0x5 LB: > { %s5535_s22 = sadd.s32 4294967295, %s5473_s21   ;;  %s13173_s23 = sadd.s32 4294967294, %s5473_s21   ;;  %s5473_s21 = sphi %s5520_s21, %s14911_s21   ;;  %s5469_s20 = sphi %s5518_s20, %s14910_s20   ;;  %s5465_s19 = sphi %s5516_s19, %s14909_s19   ;;  %s5461_s18 = sphi %s5514_s18, %s14908_s18  }
   0x6   : > { %s5539_s24 = sadd.s32 1, %s5473_s21   ;;  %s97_s25 = sadd.s32 1, %s5469_s20 }
   0x7   : > { %s94_s26 = ssub.s32 %s5473_s21, %s5539_s24  ;;  %p107_p0 = scmp.ne.s32.totalorder %s5469_s20, %s5465_s19 }
   0x8   : > { %p95_p1 = scmp.eq.s32.totalorder %s94_s26, 0  ;;  %p108_p2 = scmp.eq.s32.totalorder %s5535_s22, 1 }
   0x9   : > { %p113_p3 = scmp.ne.s32.totalorder %s5465_s19, %s5461_s18  ;;  %p114_p4 = scmp.eq.s32.totalorder %s13173_s23, 1 }
   0xa   : > { %s5552_s27 = scalar_select %p95_p1, %s5469_s20, %s97_s25  }
   0xb   : > { %p5554_p5 = por %p108_p2, %p107_p0  ;;  %p5558_p6 = por %p114_p4, %p113_p3 }
   0xc   : > { %p5033_p7 = scmp.ge.s32.totalorder %s5473_s21, 1  ;;  %p198_p8 = scmp.lt.s32.totalorder %s5473_s21, 3 }
   0xe   : > { %p199_p9 = pnand %p5033_p7, %p198_p8 }
  0x10   : > { %202 = sbr.rel (%p199_p9) target bundleno = 2042 (0x7fa), region = 32 }
  0x15   : > { %p234_p10 = scmp.lt.s32.totalorder %s5535_s22, 1  ;;  %v12505_v0 = vmov 0.0   ;;  %s5476_s6 = smov 4   ;;  %vm400_vm0 = vcmask 1046528   ;;  %vm742_vm1 = vcmask 1045504   ;;  %vm2245_vm2 = vcmask 31744  }
  0x16   : > { %v5566_v1 = vrot.slane %v12505_v0, 1  ;;  %s5477_s11 = smov 8   ;;  %s5478_s12 = smov 12   ;;  %vm2311_vm3 = vcmask 64512   ;;  %vm2377_vm4 = vcmask 97280   ;;  %vm2506_vm5 = vcmask 130048  }
  0x17   : > { %s235_s30 = scalar_select %p234_p10, %s5535_s22, 1  ;;  %vm2635_vm6 = vcmask 162816   ;;  %vm2764_vm7 = vcmask 195584   ;;  %vm2893_vm8 = vcmask 228352   ;;  %vm3545_vm9 = vcmask 1043456  }
  0x18   : > { %13176 = vst [vmem:[#allocation9_spill] sm:$0xff] %v5566_v1  ;;  %547 = vrot.lane.b32.xlu0 %v5566_v1, %s5476_s6  ;;  %s5479_s13 = smov 16   ;;  %s5480_s14 = smov 20   ;;  %vm3022_vm10 = vcmask 261120   ;;  %vm3160_vm11 = vcmask 293888   ;;  %vm4211_vm12 = vcmask 57344  }
  0x19   : > { %s5186_s7 = smul.u32 640, %s235_s30  ;;  %s5481_s15 = smov 24  }
  0x1a   : > { %s5482_s16 = smov 28   ;;  %s5483_s17 = smov 32  }
  0x1b   : > { %s5574_s10 = scalar_lea.vmem %s12499_s0, %s5186_s7  ;;  %s12403_s26 = sand.u32 1, %s5465_s19  }
  0x1c   : > { %v5577_v2 = vld [vmem:[%s5574_s10 + $0x18] sm:$0xff]  ;;  %v5580_v3 = vld [vmem:[%s5574_s10 + $0x20] sm:$0x3]  ;;  %v5583_v4 = vld [vmem:[%s5574_s10 + $0x8] sm:$0xff]  ;;  %s4900_s7 = scalar_lea.hbm %s12503_s4, %s5535_s22  ;;  %s4872_s8 = sand.u32 1, %s5535_s22  }
  0x1d   : > { %v408_v5 = vrot.slane %v5577_v2, 1  ;;  %v410_v6 = vrot.slane %v5580_v3, 1  ;;  %v5588_v7 = vld [vmem:[%s5574_s10 + $0x10] sm:$0xff]  ;;  %v404_v8 = vrot.slane %v5583_v4, 1  ;;  %v5592_v9 = vld [vmem:[%s5574_s10] sm:$0xff]  ;;  %v5597_v12 = vld [vmem:[%s5574_s10 + $0x28] sm:$0xff] }
  0x1e   : > { %v406_v10 = vrot.slane %v5588_v7, 1  ;;  %v403_v11 = vrot.slane %v5592_v9, 1  ;;  %v5600_v13 = vld [vmem:[%s5574_s10 + $0x30] sm:$0xff]  ;;  %v5606_v15 = vld [vmem:[%s5574_s10 + $0x38] sm:$0xff]  ;;  %v412_v18 = vrot.slane %v5597_v12, 1  ;;  %v5633_v24 = vld [vmem:[%s5574_s10 + $0x40] sm:$0xff] }
  0x1f   : > { %v5603_v14 = vsel %vm400_vm0, %v408_v5, %v410_v6  ;;  %v413_v19 = vrot.slane %v5600_v13, 1  ;;  %v415_v20 = vrot.slane %v5606_v15, 1  ;;  %v5636_v25 = vld [vmem:[%s5574_s10 + $0x48] sm:$0x3]  ;;  %v5639_v26 = vld [vmem:[%s5574_s10 + $0x50] sm:$0xff]  ;;  %v5642_v27 = vld [vmem:[%s5574_s10 + $0x58] sm:$0xff] }
  0x20   : > { %13177 = vst [vmem:[#allocation10_spill] sm:$0xff] %v5603_v14  ;;  %555 = vrot.lane.b32.xlu2 %v5603_v14, %s5476_s6  ;;  %v5611_v16 = vsel %vm400_vm0, %v404_v8, %v406_v10  ;;  %v5614_v17 = vsel %vm400_vm0, %v403_v11, %v404_v8  ;;  %v5627_v22 = vsel %vm400_vm0, %v406_v10, %v408_v5  ;;  %v417_v28 = vrot.slane %v5633_v24, 1  ;;  %v5664_v35 = vld [vmem:[%s5574_s10 + $0x60] sm:$0xff]  ;;  %v5667_v36 = vld [vmem:[%s5574_s10 + $0x68] sm:$0xff]  ;;  %v5670_v37 = vld [vmem:[%s5574_s10 + $0x70] sm:$0x3] }
  0x21   : > { %13178 = vst [vmem:[#allocation11_spill] sm:$0xff] %v5611_v16  ;;  %551 = vrot.lane.b32.xlu1 %v5611_v16, %s5476_s6  ;;  %549 = vrot.lane.b32.xlu0 %v5614_v17, %s5476_s6  ;;  %v5624_v21 = vsel %vm400_vm0, %v412_v18, %v413_v19  ;;  %v5630_v23 = vsel %vm400_vm0, %v413_v19, %v415_v20  ;;  %v419_v29 = vrot.slane %v5636_v25, 1  ;;  %v421_v30 = vrot.slane %v5639_v26, 1  ;;  %v5691_v44 = vld [vmem:[%s5574_s10 + $0x80] sm:$0xff]  ;;  %v5694_v45 = vld [vmem:[%s5574_s10 + $0x88] sm:$0xff]  ;;  %s4873_s25 = scalar_lea.sflag [#allocation5], %s4872_s8 }
  0x22   : > { %13179 = vst [vmem:[#allocation12_spill] sm:$0xff] %v5614_v17  ;;  %v422_v31 = vrot.slane %v5642_v27, 1  ;;  %v5658_v33 = vsel %vm400_vm0, %v415_v20, %v417_v28  ;;  %v424_v38 = vrot.slane %v5664_v35, 1  ;;  %v426_v39 = vrot.slane %v5667_v36, 1  ;;  %v5697_v46 = vld [vmem:[%s5574_s10 + $0x78] sm:$0xff]  ;;  %v5700_v47 = vld [vmem:[%s5574_s10 + $0x90] sm:$0xff] }
  0x23   : > { %13180 = vst [vmem:[#allocation13_spill] sm:$0xff] %v5624_v21  ;;  %v5655_v32 = vsel %vm400_vm0, %v417_v28, %v419_v29  ;;  %v428_v40 = vrot.slane %v5670_v37, 1  ;;  %v431_v48 = vrot.slane %v5691_v44, 1  ;;  %v433_v49 = vrot.slane %v5694_v45, 1  ;;  %v5722_v55 = vld [vmem:[%s5574_s10 + $0xa0] sm:$0xff]  ;;  %v5725_v56 = vld [vmem:[%s5574_s10 + $0xa8] sm:$0xff] }
  0x24   : > { %13181 = vst [vmem:[#allocation14_spill] sm:$0xff] %v5627_v22  ;;  %v5661_v34 = vsel %vm400_vm0, %v421_v30, %v422_v31  ;;  %v5682_v41 = vsel %vm400_vm0, %v424_v38, %v426_v39  ;;  %v5685_v42 = vsel %vm400_vm0, %v422_v31, %v424_v38  ;;  %v430_v50 = vrot.slane %v5697_v46, 1  ;;  %v5728_v57 = vld [vmem:[%s5574_s10 + $0x98] sm:$0x3]  ;;  %v5731_v58 = vld [vmem:[%s5574_s10 + $0xb0] sm:$0xff]  ;;  %v5759_v11 = vld [vmem:[%s5574_s10 + $0xc8] sm:$0xff] }
  0x25   : > { %13182 = vst [vmem:[#allocation15_spill] sm:$0xff] %v5630_v23  ;;  %v5688_v43 = vsel %vm400_vm0, %v426_v39, %v428_v40  ;;  %v435_v51 = vrot.slane %v5700_v47, 1  ;;  %v5713_v52 = vsel %vm400_vm0, %v431_v48, %v433_v49  ;;  %v439_v59 = vrot.slane %v5722_v55, 1  ;;  %v5753_v8 = vld [vmem:[%s5574_s10 + $0xb8] sm:$0xff]  ;;  %v5756_v10 = vld [vmem:[%s5574_s10 + $0xc0] sm:$0x3] }
  0x26   : > { %13183 = vst [vmem:[#allocation16_spill] sm:$0xff] %v5655_v32  ;;  %v5716_v53 = vsel %vm400_vm0, %v430_v50, %v431_v48  ;;  %v440_v60 = vrot.slane %v5725_v56, 1  ;;  %v437_v61 = vrot.slane %v5728_v57, 1  ;;  %v442_v62 = vrot.slane %v5731_v58, 1  ;;  %v5762_v18 = vld [vmem:[%s5574_s10 + $0xd0] sm:$0xff]  ;;  %v5784_v39 = vld [vmem:[%s5574_s10 + $0xd8] sm:$0xff] }
  0x27   : > { %13184 = vst [vmem:[#allocation17_spill] sm:$0xff] %v5658_v33  ;;  %v5719_v54 = vsel %vm400_vm0, %v433_v49, %v435_v51  ;;  %v444_v19 = vrot.slane %v5753_v8, 1  ;;  %v446_v20 = vrot.slane %v5756_v10, 1  ;;  %v448_v28 = vrot.slane %v5759_v11, 1  ;;  %v5787_v40 = vld [vmem:[%s5574_s10 + $0xe0] sm:$0xff] }
  0x28   : > { %557 = vrot.lane.b32.xlu2 %v5624_v21, %s5476_s6  ;;  %13185 = vst [vmem:[#allocation18_spill] sm:$0xff] %v5661_v34  ;;  %v5744_v63 = vsel %vm400_vm0, %v439_v59, %v440_v60  ;;  %v5747_v5 = vsel %vm400_vm0, %v435_v51, %v437_v61  ;;  %v5750_v6 = vsel %vm400_vm0, %v440_v60, %v442_v62  ;;  %v449_v29 = vrot.slane %v5762_v18, 1  ;;  %v5790_v48 = vld [vmem:[%s5574_s10 + $0xe8] sm:$0x3]  ;;  %v5973_v21 = vld [vmem:[%s5574_s10 + $0x1a0] sm:$0xff] }
  0x29   : > { %553 = vrot.lane.b32.xlu1 %v5627_v22, %s5476_s6  ;;  %559 = vrot.lane.b32.xlu0 %v5630_v23, %s5476_s6  ;;  %13186 = vst [vmem:[#allocation19_spill] sm:$0xff] %v5682_v41  ;;  %v5775_v30 = vsel %vm400_vm0, %v444_v19, %v446_v20  ;;  %v5778_v31 = vsel %vm400_vm0, %v442_v62, %v444_v19  ;;  %v451_v49 = vrot.slane %v5784_v39, 1  ;;  %v453_v50 = vrot.slane %v5787_v40, 1  ;;  %v5811_v62 = vld [vmem:[%s5574_s10 + $0xf8] sm:$0xff]  ;;  %v5814_v19 = vld [vmem:[%s5574_s10 + $0x100] sm:$0xff] }
  0x2a   : > { %13187 = vst [vmem:[#allocation20_spill] sm:$0xff] %v5685_v42  ;;  %v5781_v38 = vsel %vm400_vm0, %v448_v28, %v449_v29  ;;  %v455_v51 = vrot.slane %v5790_v48, 1  ;;  %v5817_v20 = vld [vmem:[%s5574_s10 + $0xf0] sm:$0xff]  ;;  %v5820_v28 = vld [vmem:[%s5574_s10 + $0x108] sm:$0xff]  ;;  %v496_v14 = vrot.slane %v5973_v21, 1 }
  0x2b   : > { %13188 = vst [vmem:[#allocation21_spill] sm:$0xff] %v5688_v43  ;;  %v5802_v59 = vsel %vm400_vm0, %v451_v49, %v453_v50  ;;  %v5805_v60 = vsel %vm400_vm0, %v449_v29, %v451_v49  ;;  %v458_v29 = vrot.slane %v5811_v62, 1  ;;  %v460_v49 = vrot.slane %v5814_v19, 1  ;;  %v6000_v17 = vld [vmem:[%s5574_s10 + $0x1b0] sm:$0x3] }
  0x2c   : > { %13189 = vst [vmem:[#allocation22_spill] sm:$0xff] %v5713_v52  ;;  %v5808_v61 = vsel %vm400_vm0, %v453_v50, %v455_v51  ;;  %v457_v50 = vrot.slane %v5817_v20, 1  ;;  %v462_v51 = vrot.slane %v5820_v28, 1 }
  0x2d   : > { %13190 = vst [vmem:[#allocation23_spill] sm:$0xff] %v5716_v53  ;;  %v5833_v0 = vsel %vm400_vm0, %v458_v29, %v460_v49 }
  0x2e   : > { %13191 = vst [vmem:[#allocation24_spill] sm:$0xff] %v5719_v54  ;;  %v5836_v1 = vsel %vm400_vm0, %v457_v50, %v458_v29 }
  0x2f   : > { %13192 = vst [vmem:[#allocation25_spill] sm:$0xff] %v5744_v63 }
  0x30   : > { %563 = vrot.lane.b32.xlu2 %v5655_v32, %s5476_s6  ;;  %13193 = vst [vmem:[#allocation26_spill] sm:$0xff] %v5747_v5 }
  0x31   : > { %561 = vrot.lane.b32.xlu1 %v5658_v33, %s5476_s6  ;;  %565 = vrot.lane.b32.xlu0 %v5661_v34, %s5476_s6  ;;  %13194 = vst [vmem:[#allocation27_spill] sm:$0xff] %v5750_v6  ;;  %v5937_v34 = vld [vmem:[%s5574_s10 + $0x168] sm:$0xff]  ;;  %v5967_v33 = vld [vmem:[%s5574_s10 + $0x198] sm:$0xff] }
  0x32   : > { %13195 = vst [vmem:[#allocation28_spill] sm:$0xff] %v5775_v30 }
  0x33   : > { %13196 = vst [vmem:[#allocation29_spill] sm:$0xff] %v5778_v31 }
  0x34   : > { %13197 = vst [vmem:[#allocation30_spill] sm:$0xff] %v5781_v38 }
  0x35   : > { %13198 = vst [vmem:[#allocation31_spill] sm:$0xff] %v5802_v59 }
  0x36   : > { %13199 = vst [vmem:[#allocation32_spill] sm:$0xff] %v5805_v60 }
  0x37   : > { %13200 = vst [vmem:[#allocation33_spill] sm:$0xff] %v5808_v61 }
  0x38   : > { %569 = vrot.lane.b32.xlu2 %v5682_v41, %s5476_s6  ;;  %13201 = vst [vmem:[#allocation34_spill] sm:$0xff] %v5833_v0 }
  0x39   : > { %567 = vrot.lane.b32.xlu1 %v5685_v42, %s5476_s6  ;;  %571 = vrot.lane.b32.xlu0 %v5688_v43, %s5476_s6  ;;  %13202 = vst [vmem:[#allocation35_spill] sm:$0xff] %v5836_v1  ;;  %v5907_v43 = vld [vmem:[%s5574_s10 + $0x158] sm:$0xff]  ;;  %v5940_v42 = vld [vmem:[%s5574_s10 + $0x180] sm:$0xff] }
  0x3a   : > { %v489_v32 = vrot.slane %v5940_v42, 1  ;;  %13218 = vst [vmem:[#allocation51_spill] sm:$0xff] %v5967_v33 }
  0x3b   : > { %13220 = vst [vmem:[#allocation53_spill] sm:$0xff] %v5973_v21 }
  0x3c   : > { %13226 = vst [vmem:[#allocation59_spill] sm:$0xff] %v6000_v17 }
  0x40   : > { %575 = vrot.lane.b32.xlu2 %v5713_v52, %s5476_s6 }
  0x41   : > { %573 = vrot.lane.b32.xlu1 %v5716_v53, %s5476_s6  ;;  %577 = vrot.lane.b32.xlu0 %v5719_v54, %s5476_s6  ;;  %v5879_v54 = vld [vmem:[%s5574_s10 + $0x140] sm:$0xff] }
  0x42   : > { %v5910_v53 = vld [vmem:[%s5574_s10 + $0x160] sm:$0x3] }
  0x48   : > { %581 = vrot.lane.b32.xlu2 %v5744_v63, %s5476_s6 }
  0x49   : > { %579 = vrot.lane.b32.xlu1 %v5747_v5, %s5476_s6  ;;  %583 = vrot.lane.b32.xlu0 %v5750_v6, %s5476_s6  ;;  %v5882_v5 = vld [vmem:[%s5574_s10 + $0x148] sm:$0xff] }
  0x50   : > { %587 = vrot.lane.b32.xlu2 %v5775_v30, %s5476_s6  ;;  %v5851_v30 = vld [vmem:[%s5574_s10 + $0x128] sm:$0xff] }
  0x51   : > { %585 = vrot.lane.b32.xlu1 %v5778_v31, %s5476_s6  ;;  %589 = vrot.lane.b32.xlu0 %v5781_v38, %s5476_s6  ;;  %v5845_v38 = vld [vmem:[%s5574_s10 + $0x120] sm:$0xff]  ;;  %v469_v6 = vrot.slane %v5851_v30, 1 }
  0x58   : > { %593 = vrot.lane.b32.xlu2 %v5802_v59, %s5476_s6  ;;  %v5839_v59 = vsel %vm400_vm0, %v460_v49, %v462_v51  ;;  %v467_v49 = vrot.slane %v5845_v38, 1 }
  0x59   : > { %591 = vrot.lane.b32.xlu1 %v5805_v60, %s5476_s6  ;;  %595 = vrot.lane.b32.xlu0 %v5808_v61, %s5476_s6  ;;  %13203 = vst [vmem:[#allocation36_spill] sm:$0xff] %v5839_v59  ;;  %v5842_v61 = vld [vmem:[%s5574_s10 + $0x118] sm:$0xff]  ;;  %v5848_v60 = vld [vmem:[%s5574_s10 + $0x110] sm:$0x3] }
  0x5a   : > { %v466_v29 = vrot.slane %v5842_v61, 1  ;;  %v464_v50 = vrot.slane %v5848_v60, 1 }
  0x5c   : > { %v5864_v31 = vsel %vm400_vm0, %v466_v29, %v467_v49  ;;  %v5867_v63 = vsel %vm400_vm0, %v462_v51, %v464_v50  ;;  %v476_v50 = vrot.slane %v5882_v5, 1 }
  0x5d   : > { %13204 = vst [vmem:[#allocation37_spill] sm:$0xff] %v5864_v31 }
  0x5e   : > { %13205 = vst [vmem:[#allocation38_spill] sm:$0xff] %v5867_v63 }
  0x60   : > { %599 = vrot.lane.b32.xlu2 %v5833_v0, %s5476_s6  ;;  %v5870_v0 = vsel %vm400_vm0, %v467_v49, %v469_v6  ;;  %v475_v49 = vrot.slane %v5879_v54, 1 }
  0x61   : > { %597 = vrot.lane.b32.xlu1 %v5836_v1, %s5476_s6  ;;  %601 = vrot.lane.b32.xlu0 %v5839_v59, %s5476_s6  ;;  %13206 = vst [vmem:[#allocation39_spill] sm:$0xff] %v5870_v0  ;;  %v5873_v59 = vld [vmem:[%s5574_s10 + $0x130] sm:$0xff]  ;;  %v5876_v1 = vld [vmem:[%s5574_s10 + $0x138] sm:$0x3] }
  0x62   : > { %v471_v51 = vrot.slane %v5873_v59, 1  ;;  %v473_v29 = vrot.slane %v5876_v1, 1 }
  0x64   : > { %v5895_v52 = vsel %vm400_vm0, %v471_v51, %v473_v29  ;;  %v482_v29 = vrot.slane %v5910_v53, 1 }
  0x65   : > { %13207 = vst [vmem:[#allocation40_spill] sm:$0xff] %v5895_v52 }
  0x68   : > { %605 = vrot.lane.b32.xlu2 %v5864_v31, %s5476_s6  ;;  %v5898_v31 = vsel %vm400_vm0, %v469_v6, %v471_v51  ;;  %v480_v51 = vrot.slane %v5907_v43, 1 }
  0x69   : > { %603 = vrot.lane.b32.xlu1 %v5867_v63, %s5476_s6  ;;  %607 = vrot.lane.b32.xlu0 %v5870_v0, %s5476_s6  ;;  %13208 = vst [vmem:[#allocation41_spill] sm:$0xff] %v5898_v31  ;;  %v5901_v63 = vsel %vm400_vm0, %v475_v49, %v476_v50  ;;  %v5904_v0 = vld [vmem:[%s5574_s10 + $0x150] sm:$0xff] }
  0x6a   : > { %13209 = vst [vmem:[#allocation42_spill] sm:$0xff] %v5901_v63  ;;  %v478_v6 = vrot.slane %v5904_v0, 1 }
  0x6c   : > { %v5922_v49 = vsel %vm400_vm0, %v478_v6, %v480_v51  ;;  %v5925_v41 = vsel %vm400_vm0, %v476_v50, %v478_v6 }
  0x6d   : > { %13210 = vst [vmem:[#allocation43_spill] sm:$0xff] %v5922_v49 }
  0x6e   : > { %13211 = vst [vmem:[#allocation44_spill] sm:$0xff] %v5925_v41 }
  0x70   : > { %611 = vrot.lane.b32.xlu2 %v5895_v52, %s5476_s6  ;;  %v5928_v52 = vsel %vm400_vm0, %v480_v51, %v482_v29  ;;  %v484_v29 = vrot.slane %v5937_v34, 1 }
  0x71   : > { %609 = vrot.lane.b32.xlu1 %v5898_v31, %s5476_s6  ;;  %613 = vrot.lane.b32.xlu0 %v5901_v63, %s5476_s6  ;;  %13212 = vst [vmem:[#allocation45_spill] sm:$0xff] %v5928_v52  ;;  %v5931_v31 = vld [vmem:[%s5574_s10 + $0x170] sm:$0xff]  ;;  %v5934_v63 = vld [vmem:[%s5574_s10 + $0x178] sm:$0xff] }
  0x72   : > { %v485_v50 = vrot.slane %v5931_v31, 1  ;;  %v487_v6 = vrot.slane %v5934_v63, 1 }
  0x74   : > { %v5955_v23 = vsel %vm400_vm0, %v485_v50, %v487_v6 }
  0x75   : > { %13214 = vst [vmem:[#allocation47_spill] sm:$0xff] %v5955_v23 }
  0x78   : > { %617 = vrot.lane.b32.xlu2 %v5922_v49, %s5476_s6  ;;  %v5958_v49 = vsel %vm400_vm0, %v484_v29, %v485_v50 }
  0x79   : > { %615 = vrot.lane.b32.xlu1 %v5925_v41, %s5476_s6  ;;  %619 = vrot.lane.b32.xlu0 %v5928_v52, %s5476_s6  ;;  %13215 = vst [vmem:[#allocation48_spill] sm:$0xff] %v5958_v49  ;;  %v5961_v41 = vsel %vm400_vm0, %v487_v6, %v489_v32  ;;  %v5964_v52 = vld [vmem:[%s5574_s10 + $0x190] sm:$0xff]  ;;  %v494_v6 = vrot.slane %v5967_v33, 1 }
  0x7a   : > { %v5950_v51 = vpop.permute.xlu2 %555  ;;  %13216 = vst [vmem:[#allocation49_spill] sm:$0xff] %v5961_v41  ;;  %v493_v50 = vrot.slane %v5964_v52, 1 }
  0x7b   : > { %13213 = vst [vmem:[#allocation46_spill] sm:$0xff] %v5950_v51  ;;  %v5970_v51 = vld [vmem:[%s5574_s10 + $0x188] sm:$0x3] }
  0x7c   : > { %13217 = vst [vmem:[#allocation50_spill] sm:$0xff] %v5964_v52  ;;  %v491_v22 = vrot.slane %v5970_v51, 1  ;;  %v5988_v16 = vsel %vm400_vm0, %v493_v50, %v494_v6  ;;  %v6006_v52 = vld [vmem:[%s5574_s10 + $0x1c0] sm:$0xff] }
  0x7d   : > { %13219 = vst [vmem:[#allocation52_spill] sm:$0xff] %v5970_v51  ;;  %v503_v33 = vrot.slane %v6006_v52, 1 }
  0x7e   : > { %13222 = vst [vmem:[#allocation55_spill] sm:$0xff] %v5988_v16 }
  0x7f   : > { %13228 = vst [vmem:[#allocation61_spill] sm:$0xff] %v6006_v52 }
  0x80   : > { %623 = vrot.lane.b32.xlu2 %v5955_v23, %s5476_s6  ;;  %v5991_v23 = vsel %vm400_vm0, %v489_v32, %v491_v22  ;;  %v500_v32 = vrot.slane %v6000_v17, 1 }
  0x81   : > { %621 = vrot.lane.b32.xlu1 %v5958_v49, %s5476_s6  ;;  %625 = vrot.lane.b32.xlu0 %v5961_v41, %s5476_s6  ;;  %13223 = vst [vmem:[#allocation56_spill] sm:$0xff] %v5991_v23  ;;  %v5994_v49 = vsel %vm400_vm0, %v494_v6, %v496_v14  ;;  %v5997_v41 = vld [vmem:[%s5574_s10 + $0x1a8] sm:$0xff] }
  0x82   : > { %v5983_v29 = vpop.permute.xlu2 %557  ;;  %13224 = vst [vmem:[#allocation57_spill] sm:$0xff] %v5994_v49  ;;  %v498_v22 = vrot.slane %v5997_v41, 1 }
  0x83   : > { %13221 = vst [vmem:[#allocation54_spill] sm:$0xff] %v5983_v29  ;;  %v6003_v29 = vld [vmem:[%s5574_s10 + $0x1b8] sm:$0xff] }
  0x84   : > { %13225 = vst [vmem:[#allocation58_spill] sm:$0xff] %v5997_v41  ;;  %v502_v21 = vrot.slane %v6003_v29, 1  ;;  %v6032_v41 = vld [vmem:[%s5574_s10 + $0x1c8] sm:$0xff] }
  0x85   : > { %13227 = vst [vmem:[#allocation60_spill] sm:$0xff] %v6003_v29 }
  0x86   : > { %13234 = vst [vmem:[#allocation67_spill] sm:$0xff] %v6032_v41 }
  0x88   : > { %629 = vrot.lane.b32.xlu2 %v5988_v16, %s5476_s6  ;;  %v6023_v16 = vsel %vm400_vm0, %v498_v22, %v500_v32 }
  0x89   : > { %627 = vrot.lane.b32.xlu1 %v5991_v23, %s5476_s6  ;;  %631 = vrot.lane.b32.xlu0 %v5994_v49, %s5476_s6  ;;  %13231 = vst [vmem:[#allocation64_spill] sm:$0xff] %v6023_v16  ;;  %v6026_v23 = vsel %vm400_vm0, %v496_v14, %v498_v22  ;;  %v6029_v49 = vsel %vm400_vm0, %v502_v21, %v503_v33  ;;  %v505_v14 = vrot.slane %v6032_v41, 1  ;;  %v6065_v41 = vld [vmem:[%s5574_s10 + $0x1e8] sm:$0xff] }
  0x8a   : > { %v6016_v50 = vpop.permute.xlu0 %547  ;;  %v6018_v6 = vpop.permute.xlu2 %563  ;;  %13232 = vst [vmem:[#allocation65_spill] sm:$0xff] %v6026_v23 }
  0x8b   : > { %13229 = vst [vmem:[#allocation62_spill] sm:$0xff] %v6016_v50  ;;  %v6035_v50 = vld [vmem:[%s5574_s10 + $0x1d0] sm:$0xff] }
  0x8c   : > { %13230 = vst [vmem:[#allocation63_spill] sm:$0xff] %v6018_v6  ;;  %v6038_v6 = vld [vmem:[%s5574_s10 + $0x1d8] sm:$0x3]  ;;  %v507_v21 = vrot.slane %v6035_v50, 1 }
  0x8d   : > { %13233 = vst [vmem:[#allocation66_spill] sm:$0xff] %v6029_v49  ;;  %v509_v32 = vrot.slane %v6038_v6, 1 }
  0x8e   : > { %13235 = vst [vmem:[#allocation68_spill] sm:$0xff] %v6035_v50  ;;  %v6068_v50 = vld [vmem:[%s5574_s10 + $0x1f0] sm:$0xff] }
  0x8f   : > { %13236 = vst [vmem:[#allocation69_spill] sm:$0xff] %v6038_v6 }
  0x90   : > { %635 = vrot.lane.b32.xlu2 %v6023_v16, %s5476_s6  ;;  %v6056_v16 = vsel %vm400_vm0, %v505_v14, %v507_v21  ;;  %13243 = vst [vmem:[#allocation76_spill] sm:$0xff] %v6065_v41 }
  0x91   : > { %633 = vrot.lane.b32.xlu1 %v6026_v23, %s5476_s6  ;;  %637 = vrot.lane.b32.xlu0 %v6029_v49, %s5476_s6  ;;  %13240 = vst [vmem:[#allocation73_spill] sm:$0xff] %v6056_v16  ;;  %v6059_v23 = vsel %vm400_vm0, %v503_v33, %v505_v14  ;;  %v6062_v49 = vsel %vm400_vm0, %v507_v21, %v509_v32  ;;  %v512_v33 = vrot.slane %v6065_v41, 1  ;;  %v514_v14 = vrot.slane %v6068_v50, 1  ;;  %v6108_v41 = vld [vmem:[%s5574_s10 + $0x200] sm:$0x3] }
  0x92   : > { %v6048_v22 = vpop.permute.xlu2 %569  ;;  %13241 = vst [vmem:[#allocation74_spill] sm:$0xff] %v6059_v23 }
  0x93   : > { %13237 = vst [vmem:[#allocation70_spill] sm:$0xff] %v6048_v22  ;;  %v6051_v17 = vpop.permute.xlu1 %551  ;;  %v6053_v52 = vpop.permute.xlu0 %549  ;;  %v6071_v22 = vld [vmem:[%s5574_s10 + $0x1e0] sm:$0xff]  ;;  %v6093_v29 = vsel %vm400_vm0, %v512_v33, %v514_v14 }
  0x94   : > { %13238 = vst [vmem:[#allocation71_spill] sm:$0xff] %v6051_v17  ;;  %v6074_v17 = vld [vmem:[%s5574_s10 + $0x1f8] sm:$0xff]  ;;  %v511_v32 = vrot.slane %v6071_v22, 1 }
  0x95   : > { %13239 = vst [vmem:[#allocation72_spill] sm:$0xff] %v6053_v52  ;;  %v516_v52 = vrot.slane %v6074_v17, 1 }
  0x96   : > { %13242 = vst [vmem:[#allocation75_spill] sm:$0xff] %v6062_v49 }
  0x97   : > { %13244 = vst [vmem:[#allocation77_spill] sm:$0xff] %v6068_v50  ;;  %v6102_v50 = vld [vmem:[%s5574_s10 + $0x208] sm:$0xff] }
  0x98   : > { %13245 = vst [vmem:[#allocation78_spill] sm:$0xff] %v6071_v22  ;;  %641 = vrot.lane.b32.xlu2 %v6056_v16, %s5476_s6 }
  0x99   : > { %13246 = vst [vmem:[#allocation79_spill] sm:$0xff] %v6074_v17  ;;  %639 = vrot.lane.b32.xlu1 %v6059_v23, %s5476_s6  ;;  %643 = vrot.lane.b32.xlu0 %v6062_v49, %s5476_s6  ;;  %v6096_v23 = vsel %vm400_vm0, %v511_v32, %v512_v33  ;;  %v6099_v49 = vsel %vm400_vm0, %v514_v14, %v516_v52  ;;  %v520_v33 = vrot.slane %v6102_v50, 1 }
  0x9a   : > { %v6084_v21 = vpop.permute.xlu2 %575  ;;  %13250 = vst [vmem:[#allocation83_spill] sm:$0xff] %v6093_v29 }
  0x9b   : > { %13247 = vst [vmem:[#allocation80_spill] sm:$0xff] %v6084_v21  ;;  %v6088_v6 = vpop.permute.xlu1 %553  ;;  %v6090_v16 = vpop.permute.xlu0 %559  ;;  %v6105_v21 = vld [vmem:[%s5574_s10 + $0x210] sm:$0xff] }
  0x9c   : > { %13248 = vst [vmem:[#allocation81_spill] sm:$0xff] %v6088_v6  ;;  %v6111_v6 = vld [vmem:[%s5574_s10 + $0x218] sm:$0xff]  ;;  %v521_v14 = vrot.slane %v6105_v21, 1 }
  0x9d   : > { %13249 = vst [vmem:[#allocation82_spill] sm:$0xff] %v6090_v16  ;;  %v518_v16 = vrot.slane %v6108_v41, 1  ;;  %v523_v17 = vrot.slane %v6111_v6, 1 }
  0x9e   : > { %13251 = vst [vmem:[#allocation84_spill] sm:$0xff] %v6096_v23  ;;  %v6130_v51 = vsel %vm400_vm0, %v520_v33, %v521_v14 }
  0x9f   : > { %13252 = vst [vmem:[#allocation85_spill] sm:$0xff] %v6099_v49 }
  0xa0   : > { %13253 = vst [vmem:[#allocation86_spill] sm:$0xff] %v6102_v50  ;;  %647 = vrot.lane.b32.xlu2 %v6093_v29, %s5476_s6  ;;  %v6139_v50 = vld [vmem:[%s5574_s10 + $0x220] sm:$0xff] }
  0xa1   : > { %13254 = vst [vmem:[#allocation87_spill] sm:$0xff] %v6105_v21  ;;  %645 = vrot.lane.b32.xlu1 %v6096_v23, %s5476_s6  ;;  %649 = vrot.lane.b32.xlu0 %v6099_v49, %s5476_s6  ;;  %v6133_v23 = vsel %vm400_vm0, %v516_v52, %v518_v16  ;;  %v6136_v49 = vsel %vm400_vm0, %v521_v14, %v523_v17  ;;  %v6145_v21 = vld [vmem:[%s5574_s10 + $0x230] sm:$0xff]  ;;  %v525_v16 = vrot.slane %v6139_v50, 1 }
  0xa2   : > { %13255 = vst [vmem:[#allocation88_spill] sm:$0xff] %v6108_v41  ;;  %v6121_v32 = vpop.permute.xlu2 %581  ;;  %v529_v14 = vrot.slane %v6145_v21, 1 }
  0xa3   : > { %13256 = vst [vmem:[#allocation89_spill] sm:$0xff] %v6111_v6  ;;  %v6125_v22 = vpop.permute.xlu1 %561  ;;  %v6127_v29 = vpop.permute.xlu0 %565 }
  0xa4   : > { %13257 = vst [vmem:[#allocation90_spill] sm:$0xff] %v6121_v32  ;;  %v6142_v32 = vld [vmem:[%s5574_s10 + $0x228] sm:$0x3] }
  0xa5   : > { %13258 = vst [vmem:[#allocation91_spill] sm:$0xff] %v6125_v22  ;;  %v6148_v22 = vld [vmem:[%s5574_s10 + $0x238] sm:$0xff]  ;;  %v527_v52 = vrot.slane %v6142_v32, 1 }
  0xa6   : > { %13259 = vst [vmem:[#allocation92_spill] sm:$0xff] %v6127_v29  ;;  %v530_v29 = vrot.slane %v6148_v22, 1 }
  0xa7   : > { %13260 = vst [vmem:[#allocation93_spill] sm:$0xff] %v6130_v51 }
  0xa8   : > { %13261 = vst [vmem:[#allocation94_spill] sm:$0xff] %v6133_v23  ;;  %653 = vrot.lane.b32.xlu2 %v6130_v51, %s5476_s6  ;;  %v6167_v51 = vsel %vm400_vm0, %v525_v16, %v527_v52 }
  0xa9   : > { %13262 = vst [vmem:[#allocation95_spill] sm:$0xff] %v6136_v49  ;;  %651 = vrot.lane.b32.xlu1 %v6133_v23, %s5476_s6  ;;  %655 = vrot.lane.b32.xlu0 %v6136_v49, %s5476_s6  ;;  %v6170_v23 = vsel %vm400_vm0, %v523_v17, %v525_v16  ;;  %v6173_v49 = vsel %vm400_vm0, %v529_v14, %v530_v29 }
  0xaa   : > { %13263 = vst [vmem:[#allocation96_spill] sm:$0xff] %v6142_v32  ;;  %v6158_v33 = vpop.permute.xlu2 %587  ;;  %v6176_v32 = vld [vmem:[%s5574_s10 + $0x240] sm:$0xff] }
  0xab   : > { %13264 = vst [vmem:[#allocation97_spill] sm:$0xff] %v6145_v21  ;;  %v6162_v6 = vpop.permute.xlu1 %567  ;;  %v6164_v41 = vpop.permute.xlu0 %571  ;;  %v532_v17 = vrot.slane %v6176_v32, 1 }
  0xac   : > { %13265 = vst [vmem:[#allocation98_spill] sm:$0xff] %v6148_v22  ;;  %v6182_v22 = vld [vmem:[%s5574_s10 + $0x250] sm:$0x3] }
  0xad   : > { %13266 = vst [vmem:[#allocation99_spill] sm:$0xff] %v6158_v33  ;;  %v6179_v33 = vld [vmem:[%s5574_s10 + $0x248] sm:$0xff]  ;;  %v536_v14 = vrot.slane %v6182_v22, 1 }
  0xae   : > { %13267 = vst [vmem:[#allocation100_spill] sm:$0xff] %v6162_v6  ;;  %v534_v16 = vrot.slane %v6179_v33, 1 }
  0xaf   : > { %13268 = vst [vmem:[#allocation101_spill] sm:$0xff] %v6164_v41 }
  0xb0   : > { %13269 = vst [vmem:[#allocation102_spill] sm:$0xff] %v6167_v51  ;;  %659 = vrot.lane.b32.xlu2 %v6167_v51, %s5476_s6  ;;  %v6200_v51 = vsel %vm400_vm0, %v532_v17, %v534_v16 }
  0xb1   : > { %13270 = vst [vmem:[#allocation103_spill] sm:$0xff] %v6170_v23  ;;  %657 = vrot.lane.b32.xlu1 %v6170_v23, %s5476_s6  ;;  %661 = vrot.lane.b32.xlu0 %v6173_v49, %s5476_s6  ;;  %v6203_v23 = vsel %vm400_vm0, %v530_v29, %v532_v17 }
  0xb2   : > { %13271 = vst [vmem:[#allocation104_spill] sm:$0xff] %v6173_v49  ;;  %v6192_v52 = vpop.permute.xlu2 %593  ;;  %v6206_v49 = vsel %vm400_vm0, %v534_v16, %v536_v14 }
  0xb3   : > { %13272 = vst [vmem:[#allocation105_spill] sm:$0xff] %v6176_v32  ;;  %v6195_v41 = vpop.permute.xlu1 %573  ;;  %v6197_v6 = vpop.permute.xlu0 %577  ;;  %v6209_v32 = vld [vmem:[%s5574_s10 + $0x260] sm:$0xff] }
  0xb4   : > { %13273 = vst [vmem:[#allocation106_spill] sm:$0xff] %v6179_v33  ;;  %v6212_v33 = vld [vmem:[%s5574_s10 + $0x268] sm:$0xff]  ;;  %v539_v29 = vrot.slane %v6209_v32, 1 }
  0xb5   : > { %13274 = vst [vmem:[#allocation107_spill] sm:$0xff] %v6182_v22  ;;  %v6218_v22 = vld [vmem:[%s5574_s10 + $0x270] sm:$0xff]  ;;  %v541_v17 = vrot.slane %v6212_v33, 1 }
  0xb6   : > { %13275 = vst [vmem:[#allocation108_spill] sm:$0xff] %v6192_v52  ;;  %v6215_v52 = vld [vmem:[%s5574_s10 + $0x258] sm:$0xff] }
  0xb7   : > { %13276 = vst [vmem:[#allocation109_spill] sm:$0xff] %v6195_v41  ;;  %v538_v14 = vrot.slane %v6215_v52, 1 }
  0xb8   : > { %13277 = vst [vmem:[#allocation110_spill] sm:$0xff] %v6197_v6  ;;  %665 = vrot.lane.b32.xlu2 %v6200_v51, %s5476_s6  ;;  %v543_v6 = vrot.slane %v6218_v22, 1 }
  0xb9   : > { %13278 = vst [vmem:[#allocation111_spill] sm:$0xff] %v6200_v51  ;;  %663 = vrot.lane.b32.xlu1 %v6203_v23, %s5476_s6  ;;  %667 = vrot.lane.b32.xlu0 %v6206_v49, %s5476_s6  ;;  %v6237_v51 = vsel %vm400_vm0, %v539_v29, %v541_v17 }
  0xba   : > { %13279 = vst [vmem:[#allocation112_spill] sm:$0xff] %v6203_v23  ;;  %v6228_v16 = vpop.permute.xlu2 %599  ;;  %v6240_v23 = vsel %vm400_vm0, %v538_v14, %v539_v29  ;;  %v745_v29 = vrot.slane %v5592_v9, 2  ;;  %v750_v9 = vrot.slane %v5577_v2, 2  ;;  %v755_v2 = vrot.slane %v5600_v13, 2 }
  0xbb   : > { %13280 = vst [vmem:[#allocation113_spill] sm:$0xff] %v6206_v49  ;;  %v6232_v41 = vpop.permute.xlu1 %579  ;;  %v6234_v21 = vpop.permute.xlu0 %583  ;;  %v6243_v49 = vsel %vm400_vm0, %v541_v17, %v543_v6  ;;  %v746_v17 = vrot.slane %v5583_v4, 2  ;;  %v748_v4 = vrot.slane %v5588_v7, 2 }
  0xbc   : > { %13281 = vst [vmem:[#allocation114_spill] sm:$0xff] %v6212_v33  ;;  %v6246_v33 = vld [vmem:[%s5574_s10 + $0x278] sm:$0x3] }
  0xbd   : > { %13282 = vst [vmem:[#allocation115_spill] sm:$0xff] %v6218_v22 }
  0xbe   : > { %13283 = vst [vmem:[#allocation116_spill] sm:$0xff] %v6228_v16  ;;  %v545_v16 = vrot.slane %v6246_v33, 1 }
  0xbf   : > { %13284 = vst [vmem:[#allocation117_spill] sm:$0xff] %v6232_v41 }
  0xc0   : > { %13285 = vst [vmem:[#allocation118_spill] sm:$0xff] %v6234_v21  ;;  %671 = vrot.lane.b32.xlu2 %v6237_v51, %s5476_s6 }
  0xc1   : > { %13286 = vst [vmem:[#allocation119_spill] sm:$0xff] %v6237_v51  ;;  %669 = vrot.lane.b32.xlu1 %v6240_v23, %s5476_s6  ;;  %673 = vrot.lane.b32.xlu0 %v6243_v49, %s5476_s6  ;;  %v13292_v51 = vmov 0.0  }
  0xc2   : > { %13287 = vst [vmem:[#allocation120_spill] sm:$0xff] %v6240_v23  ;;  %v6254_v21 = vpop.permute.xlu2 %605  ;;  %v6264_v22 = vrot.slane %v13292_v51, 2  ;;  %v6267_v23 = vsel %vm400_vm0, %v543_v6, %v545_v16  ;;  %v752_v6 = vrot.slane %v5580_v3, 2  ;;  %v757_v3 = vrot.slane %v5606_v15, 2 }
  0xc3   : > { %13288 = vst [vmem:[#allocation121_spill] sm:$0xff] %v6243_v49  ;;  %v6259_v14 = vpop.permute.xlu1 %585  ;;  %v6261_v41 = vpop.permute.xlu0 %589  ;;  %v6270_v49 = vsel %vm742_vm1, %v745_v29, %v746_v17  ;;  %v764_v15 = vrot.slane %v5642_v27, 2  ;;  %v770_v27 = vrot.slane %v5670_v37, 2  ;;  %v775_v37 = vrot.slane %v5694_v45, 2 }
  0xc4   : > { %13289 = vst [vmem:[#allocation122_spill] sm:$0xff] %v6254_v21  ;;  %v6294_v21 = vsel %vm742_vm1, %v750_v9, %v752_v6  ;;  %v782_v45 = vrot.slane %v5725_v56, 2 }
  0xc5   : > { %13290 = vst [vmem:[#allocation123_spill] sm:$0xff] %v6259_v14  ;;  %v6291_v14 = vsel %vm742_vm1, %v746_v17, %v748_v4  ;;  %v754_v17 = vrot.slane %v5597_v12, 2  ;;  %v763_v12 = vrot.slane %v5639_v26, 2 }
  0xc6   : > { %13291 = vst [vmem:[#allocation124_spill] sm:$0xff] %v6261_v41 }
  0xc7   : > { %13293 = vst [vmem:[#allocation125_spill] sm:$0xff] %v6264_v22 }
  0xc8   : > { %889 = vrot.lane.b32.xlu2 %v6264_v22, %s5477_s11  ;;  %v6288_v22 = vsel %vm742_vm1, %v748_v4, %v750_v9  ;;  %v759_v4 = vrot.slane %v5633_v24, 2 }
  0xc9   : > { %675 = vrot.lane.b32.xlu1 %v6267_v23, %s5476_s6  ;;  %891 = vrot.lane.b32.xlu0 %v6270_v49, %s5477_s11 }
  0xca   : > { %v6280_v41 = vpop.permute.xlu2 %611  ;;  %v6319_v13 = vsel %vm742_vm1, %v757_v3, %v759_v4 }
  0xcb   : > { %13294 = vst [vmem:[#allocation126_spill] sm:$0xff] %v6280_v41  ;;  %v6283_v16 = vpop.permute.xlu1 %591  ;;  %v6285_v29 = vpop.permute.xlu0 %595 }
  0xcc   : > { %13295 = vst [vmem:[#allocation127_spill] sm:$0xff] %v6283_v16  ;;  %v6316_v16 = vsel %vm742_vm1, %v754_v17, %v755_v2 }
  0xcd   : > { %13296 = vst [vmem:[#allocation128_spill] sm:$0xff] %v6285_v29  ;;  %v6313_v29 = vsel %vm742_vm1, %v755_v2, %v757_v3  ;;  %v761_v2 = vrot.slane %v5636_v25, 2  ;;  %v766_v3 = vrot.slane %v5664_v35, 2  ;;  %v768_v25 = vrot.slane %v5667_v36, 2 }
  0xcf   : > { %v6344_v26 = vsel %vm742_vm1, %v764_v15, %v766_v3 }
  0xd0   : > { %895 = vrot.lane.b32.xlu2 %v6288_v22, %s5477_s11  ;;  %13303 = vst [vmem:[#allocation135_spill] sm:$0xff] %v6344_v26 }
  0xd1   : > { %893 = vrot.lane.b32.xlu1 %v6291_v14, %s5477_s11  ;;  %897 = vrot.lane.b32.xlu0 %v6294_v21, %s5477_s11 }
  0xd2   : > { %v6304_v7 = vpop.permute.xlu2 %617 }
  0xd3   : > { %13297 = vst [vmem:[#allocation129_spill] sm:$0xff] %v6304_v7  ;;  %v6308_v9 = vpop.permute.xlu1 %597  ;;  %v6310_v6 = vpop.permute.xlu0 %601  ;;  %v6341_v7 = vsel %vm742_vm1, %v759_v4, %v761_v2  ;;  %v772_v4 = vrot.slane %v5697_v46, 2 }
  0xd4   : > { %13298 = vst [vmem:[#allocation130_spill] sm:$0xff] %v6308_v9  ;;  %v6338_v9 = vsel %vm742_vm1, %v763_v12, %v764_v15  ;;  %v773_v12 = vrot.slane %v5691_v44, 2  ;;  %v777_v44 = vrot.slane %v5700_v47, 2  ;;  %v784_v47 = vrot.slane %v5731_v58, 2 }
  0xd5   : > { %13299 = vst [vmem:[#allocation131_spill] sm:$0xff] %v6310_v6  ;;  %v791_v58 = vrot.slane %v5762_v18, 2  ;;  %v797_v18 = vrot.slane %v5790_v48, 2  ;;  %v802_v48 = vrot.slane %v5814_v19, 2  ;;  %v811_v19 = vrot.slane %v5851_v30, 2 }
  0xd6   : > { %v6369_v36 = vsel %vm742_vm1, %v772_v4, %v773_v12  ;;  %v6387_v4 = vsel %vm742_vm1, %v775_v37, %v777_v44  ;;  %v817_v30 = vrot.slane %v5879_v54, 2 }
  0xd7   : > { %13308 = vst [vmem:[#allocation140_spill] sm:$0xff] %v6369_v36 }
  0xd8   : > { %901 = vrot.lane.b32.xlu2 %v6313_v29, %s5477_s11  ;;  %13312 = vst [vmem:[#allocation144_spill] sm:$0xff] %v6387_v4 }
  0xd9   : > { %899 = vrot.lane.b32.xlu1 %v6316_v16, %s5477_s11  ;;  %903 = vrot.lane.b32.xlu0 %v6319_v13, %s5477_s11 }
  0xda   : > { %v6329_v24 = vpop.permute.xlu2 %623 }
  0xdb   : > { %13300 = vst [vmem:[#allocation132_spill] sm:$0xff] %v6329_v24  ;;  %v6333_v17 = vpop.permute.xlu1 %603  ;;  %v6335_v6 = vpop.permute.xlu0 %607  ;;  %v6366_v24 = vsel %vm742_vm1, %v766_v3, %v768_v25  ;;  %v779_v3 = vrot.slane %v5728_v57, 2 }
  0xdc   : > { %13301 = vst [vmem:[#allocation133_spill] sm:$0xff] %v6333_v17  ;;  %v6363_v17 = vsel %vm742_vm1, %v768_v25, %v770_v27 }
  0xdd   : > { %13302 = vst [vmem:[#allocation134_spill] sm:$0xff] %v6335_v6 }
  0xde   : > { %13307 = vst [vmem:[#allocation139_spill] sm:$0xff] %v6363_v17 }
  0xe0   : > { %907 = vrot.lane.b32.xlu2 %v6338_v9, %s5477_s11 }
  0xe1   : > { %905 = vrot.lane.b32.xlu1 %v6341_v7, %s5477_s11  ;;  %909 = vrot.lane.b32.xlu0 %v6344_v26, %s5477_s11 }
  0xe2   : > { %v6354_v35 = vpop.permute.xlu2 %629 }
  0xe3   : > { %13304 = vst [vmem:[#allocation136_spill] sm:$0xff] %v6354_v35  ;;  %v6358_v15 = vpop.permute.xlu1 %609  ;;  %v6360_v2 = vpop.permute.xlu0 %613  ;;  %v6393_v35 = vsel %vm742_vm1, %v777_v44, %v779_v3 }
  0xe4   : > { %13305 = vst [vmem:[#allocation137_spill] sm:$0xff] %v6358_v15 }
  0xe5   : > { %13306 = vst [vmem:[#allocation138_spill] sm:$0xff] %v6360_v2  ;;  %v6390_v2 = vsel %vm742_vm1, %v773_v12, %v775_v37  ;;  %v781_v12 = vrot.slane %v5722_v55, 2  ;;  %v786_v37 = vrot.slane %v5753_v8, 2  ;;  %v790_v55 = vrot.slane %v5759_v11, 2 }
  0xe6   : > { %13313 = vst [vmem:[#allocation145_spill] sm:$0xff] %v6390_v2 }
  0xe7   : > { %13314 = vst [vmem:[#allocation146_spill] sm:$0xff] %v6393_v35  ;;  %v6418_v56 = vsel %vm742_vm1, %v784_v47, %v786_v37 }
  0xe8   : > { %913 = vrot.lane.b32.xlu2 %v6363_v17, %s5477_s11 }
  0xe9   : > { %911 = vrot.lane.b32.xlu1 %v6366_v24, %s5477_s11  ;;  %915 = vrot.lane.b32.xlu0 %v6369_v36, %s5477_s11 }
  0xea   : > { %v6379_v46 = vpop.permute.xlu2 %635 }
  0xeb   : > { %13309 = vst [vmem:[#allocation141_spill] sm:$0xff] %v6379_v46  ;;  %v6382_v25 = vpop.permute.xlu1 %615  ;;  %v6384_v27 = vpop.permute.xlu0 %619 }
  0xec   : > { %13310 = vst [vmem:[#allocation142_spill] sm:$0xff] %v6382_v25  ;;  %v6415_v25 = vsel %vm742_vm1, %v781_v12, %v782_v45 }
  0xed   : > { %13311 = vst [vmem:[#allocation143_spill] sm:$0xff] %v6384_v27  ;;  %v6412_v27 = vsel %vm742_vm1, %v782_v45, %v784_v47  ;;  %v788_v45 = vrot.slane %v5756_v10, 2  ;;  %v793_v47 = vrot.slane %v5784_v39, 2  ;;  %v795_v10 = vrot.slane %v5787_v40, 2 }
  0xef   : > { %v6440_v46 = vsel %vm742_vm1, %v786_v37, %v788_v45  ;;  %v6443_v11 = vsel %vm742_vm1, %v791_v58, %v793_v47  ;;  %v799_v37 = vrot.slane %v5817_v20, 2 }
  0xf0   : > { %919 = vrot.lane.b32.xlu2 %v6387_v4, %s5477_s11  ;;  %13322 = vst [vmem:[#allocation154_spill] sm:$0xff] %v6440_v46 }
  0xf1   : > { %917 = vrot.lane.b32.xlu1 %v6390_v2, %s5477_s11  ;;  %921 = vrot.lane.b32.xlu0 %v6393_v35, %s5477_s11  ;;  %13323 = vst [vmem:[#allocation155_spill] sm:$0xff] %v6443_v11 }
  0xf2   : > { %v6403_v57 = vpop.permute.xlu2 %641 }
  0xf3   : > { %13315 = vst [vmem:[#allocation147_spill] sm:$0xff] %v6403_v57  ;;  %v6407_v44 = vpop.permute.xlu1 %621  ;;  %v6409_v3 = vpop.permute.xlu0 %625  ;;  %v13365_v57 = vld [vmem:[#allocation58_spill] sm:$0xff] }
  0xf4   : > { %13316 = vst [vmem:[#allocation148_spill] sm:$0xff] %v6407_v44  ;;  %v6437_v44 = vsel %vm742_vm1, %v790_v55, %v791_v58  ;;  %v800_v55 = vrot.slane %v5811_v62, 2  ;;  %v804_v62 = vrot.slane %v5820_v28, 2 }
  0xf5   : > { %13317 = vst [vmem:[#allocation149_spill] sm:$0xff] %v6409_v3 }
  0xf6   : > { %13321 = vst [vmem:[#allocation153_spill] sm:$0xff] %v6437_v44  ;;  %v6468_v40 = vsel %vm742_vm1, %v799_v37, %v800_v55  ;;  %v6486_v37 = vsel %vm742_vm1, %v802_v48, %v804_v62 }
  0xf7   : > { %13329 = vst [vmem:[#allocation161_spill] sm:$0xff] %v6468_v40 }
  0xf8   : > { %925 = vrot.lane.b32.xlu2 %v6412_v27, %s5477_s11  ;;  %13333 = vst [vmem:[#allocation165_spill] sm:$0xff] %v6486_v37 }
  0xf9   : > { %923 = vrot.lane.b32.xlu1 %v6415_v25, %s5477_s11  ;;  %927 = vrot.lane.b32.xlu0 %v6418_v56, %s5477_s11 }
  0xfa   : > { %v6428_v8 = vpop.permute.xlu2 %647 }
  0xfb   : > { %13318 = vst [vmem:[#allocation150_spill] sm:$0xff] %v6428_v8  ;;  %v6432_v12 = vpop.permute.xlu1 %627  ;;  %v6434_v3 = vpop.permute.xlu0 %631  ;;  %v6462_v8 = vsel %vm742_vm1, %v795_v10, %v797_v18 }
  0xfc   : > { %13319 = vst [vmem:[#allocation151_spill] sm:$0xff] %v6432_v12 }
  0xfd   : > { %13320 = vst [vmem:[#allocation152_spill] sm:$0xff] %v6434_v3  ;;  %v6465_v3 = vsel %vm742_vm1, %v793_v47, %v795_v10  ;;  %v806_v47 = vrot.slane %v5848_v60, 2  ;;  %v809_v60 = vrot.slane %v5845_v38, 2 }
  0xfe   : > { %13327 = vst [vmem:[#allocation159_spill] sm:$0xff] %v6462_v8 }
  0xff   : > { %13328 = vst [vmem:[#allocation160_spill] sm:$0xff] %v6465_v3 }
 0x100   : > { %931 = vrot.lane.b32.xlu2 %v6437_v44, %s5477_s11 }
 0x101   : > { %929 = vrot.lane.b32.xlu1 %v6440_v46, %s5477_s11  ;;  %933 = vrot.lane.b32.xlu0 %v6443_v11, %s5477_s11 }
 0x102   : > { %v6453_v39 = vpop.permute.xlu2 %653 }
 0x103   : > { %13324 = vst [vmem:[#allocation156_spill] sm:$0xff] %v6453_v39  ;;  %v6457_v58 = vpop.permute.xlu1 %633  ;;  %v6459_v45 = vpop.permute.xlu0 %637  ;;  %v6489_v39 = vsel %vm742_vm1, %v800_v55, %v802_v48  ;;  %v808_v55 = vrot.slane %v5842_v61, 2  ;;  %v813_v48 = vrot.slane %v5873_v59, 2  ;;  %v818_v59 = vrot.slane %v5882_v5, 2 }
 0x104   : > { %13325 = vst [vmem:[#allocation157_spill] sm:$0xff] %v6457_v58  ;;  %v824_v5 = vrot.slane %v5910_v53, 2  ;;  %v829_v53 = vrot.slane %v5934_v63, 2 }
 0x105   : > { %13326 = vst [vmem:[#allocation158_spill] sm:$0xff] %v6459_v45  ;;  %v6492_v45 = vsel %vm742_vm1, %v804_v62, %v806_v47  ;;  %v6517_v38 = vsel %vm742_vm1, %v811_v19, %v813_v48 }
 0x106   : > { %13334 = vst [vmem:[#allocation166_spill] sm:$0xff] %v6489_v39 }
 0x107   : > { %13335 = vst [vmem:[#allocation167_spill] sm:$0xff] %v6492_v45 }
 0x108   : > { %937 = vrot.lane.b32.xlu2 %v6462_v8, %s5477_s11  ;;  %13341 = vst [vmem:[#allocation173_spill] sm:$0xff] %v6517_v38 }
 0x109   : > { %935 = vrot.lane.b32.xlu1 %v6465_v3, %s5477_s11  ;;  %939 = vrot.lane.b32.xlu0 %v6468_v40, %s5477_s11 }
 0x10a   : > { %v6478_v20 = vpop.permute.xlu2 %659 }
 0x10b   : > { %13330 = vst [vmem:[#allocation162_spill] sm:$0xff] %v6478_v20  ;;  %v6481_v10 = vpop.permute.xlu1 %639  ;;  %v6483_v18 = vpop.permute.xlu0 %643 }
 0x10c   : > { %13331 = vst [vmem:[#allocation163_spill] sm:$0xff] %v6481_v10  ;;  %v6514_v10 = vsel %vm742_vm1, %v808_v55, %v809_v60 }
 0x10d   : > { %13332 = vst [vmem:[#allocation164_spill] sm:$0xff] %v6483_v18  ;;  %v6511_v18 = vsel %vm742_vm1, %v809_v60, %v811_v19  ;;  %v815_v60 = vrot.slane %v5876_v1, 2  ;;  %v820_v19 = vrot.slane %v5904_v0, 2  ;;  %v822_v1 = vrot.slane %v5907_v43, 2 }
 0x10e   : > { %13339 = vst [vmem:[#allocation171_spill] sm:$0xff] %v6511_v18 }
 0x10f   : > { %13340 = vst [vmem:[#allocation172_spill] sm:$0xff] %v6514_v10  ;;  %v6539_v20 = vsel %vm742_vm1, %v813_v48, %v815_v60  ;;  %v6542_v54 = vsel %vm742_vm1, %v818_v59, %v820_v19  ;;  %v826_v48 = vrot.slane %v5937_v34, 2 }
 0x110   : > { %943 = vrot.lane.b32.xlu2 %v6486_v37, %s5477_s11  ;;  %13346 = vst [vmem:[#allocation178_spill] sm:$0xff] %v6539_v20 }
 0x111   : > { %941 = vrot.lane.b32.xlu1 %v6489_v39, %s5477_s11  ;;  %945 = vrot.lane.b32.xlu0 %v6492_v45, %s5477_s11  ;;  %13347 = vst [vmem:[#allocation179_spill] sm:$0xff] %v6542_v54  ;;  %v13413_v39 = vld [vmem:[#allocation105_spill] sm:$0xff] }
 0x112   : > { %v6502_v28 = vpop.permute.xlu2 %665 }
 0x113   : > { %13336 = vst [vmem:[#allocation168_spill] sm:$0xff] %v6502_v28  ;;  %v6506_v62 = vpop.permute.xlu1 %645  ;;  %v6508_v47 = vpop.permute.xlu0 %649  ;;  %v6536_v28 = vsel %vm742_vm1, %v817_v30, %v818_v59  ;;  %v827_v59 = vrot.slane %v5931_v31, 2 }
 0x114   : > { %13337 = vst [vmem:[#allocation169_spill] sm:$0xff] %v6506_v62 }
 0x115   : > { %13338 = vst [vmem:[#allocation170_spill] sm:$0xff] %v6508_v47  ;;  %v6567_v43 = vsel %vm742_vm1, %v826_v48, %v827_v59  ;;  %v6588_v47 = vsel %vm742_vm1, %v827_v59, %v829_v53  ;;  %v13364_v59 = vld [vmem:[#allocation50_spill] sm:$0xff] }
 0x116   : > { %13345 = vst [vmem:[#allocation177_spill] sm:$0xff] %v6536_v28 }
 0x117   : > { %13353 = vst [vmem:[#allocation185_spill] sm:$0xff] %v6567_v43 }
 0x118   : > { %949 = vrot.lane.b32.xlu2 %v6511_v18, %s5477_s11  ;;  %13359 = vst [vmem:[#allocation189_spill] sm:$0xff] %v6588_v47 }
 0x119   : > { %947 = vrot.lane.b32.xlu1 %v6514_v10, %s5477_s11  ;;  %951 = vrot.lane.b32.xlu0 %v6517_v38, %s5477_s11 }
 0x11a   : > { %v6527_v61 = vpop.permute.xlu2 %671 }
 0x11b   : > { %13342 = vst [vmem:[#allocation174_spill] sm:$0xff] %v6527_v61  ;;  %v6531_v55 = vpop.permute.xlu1 %651  ;;  %v6533_v62 = vpop.permute.xlu0 %655  ;;  %v6564_v61 = vsel %vm742_vm1, %v820_v19, %v822_v1  ;;  %v13355_v19 = vld [vmem:[#allocation52_spill] sm:$0xff] }
 0x11c   : > { %13343 = vst [vmem:[#allocation175_spill] sm:$0xff] %v6531_v55 }
 0x11d   : > { %13344 = vst [vmem:[#allocation176_spill] sm:$0xff] %v6533_v62  ;;  %v6561_v62 = vsel %vm742_vm1, %v822_v1, %v824_v5  ;;  %v831_v5 = vrot.slane %v5940_v42, 2  ;;  %v833_v1 = vrot.slane %v13355_v19, 2  ;;  %v13361_v19 = vld [vmem:[#allocation51_spill] sm:$0xff] }
 0x11e   : > { %13351 = vst [vmem:[#allocation183_spill] sm:$0xff] %v6561_v62 }
 0x11f   : > { %13352 = vst [vmem:[#allocation184_spill] sm:$0xff] %v6564_v61  ;;  %v6585_v58 = vsel %vm742_vm1, %v829_v53, %v831_v5  ;;  %v6591_v12 = vsel %vm742_vm1, %v831_v5, %v833_v1  ;;  %v835_v53 = vrot.slane %v13364_v59, 2  ;;  %v840_v5 = vrot.slane %v13365_v57, 2 }
 0x120   : > { %955 = vrot.lane.b32.xlu2 %v6536_v28, %s5477_s11  ;;  %13358 = vst [vmem:[#allocation188_spill] sm:$0xff] %v6585_v58 }
 0x121   : > { %953 = vrot.lane.b32.xlu1 %v6539_v20, %s5477_s11  ;;  %957 = vrot.lane.b32.xlu0 %v6542_v54, %s5477_s11  ;;  %13360 = vst [vmem:[#allocation190_spill] sm:$0xff] %v6591_v12 }
 0x122   : > { %v6552_v30 = vpop.permute.xlu2 %889 }
 0x123   : > { %13348 = vst [vmem:[#allocation180_spill] sm:$0xff] %v6552_v30  ;;  %v6556_v60 = vpop.permute.xlu1 %657  ;;  %v6558_v55 = vpop.permute.xlu0 %661 }
 0x124   : > { %13349 = vst [vmem:[#allocation181_spill] sm:$0xff] %v6556_v60 }
 0x125   : > { %13350 = vst [vmem:[#allocation182_spill] sm:$0xff] %v6558_v55 }
 0x128   : > { %961 = vrot.lane.b32.xlu2 %v6561_v62, %s5477_s11  ;;  %v13385_v62 = vld [vmem:[#allocation76_spill] sm:$0xff] }
 0x129   : > { %959 = vrot.lane.b32.xlu1 %v6564_v61, %s5477_s11  ;;  %963 = vrot.lane.b32.xlu0 %v6567_v43, %s5477_s11 }
 0x12a   : > { %v6577_v55 = vpop.permute.xlu2 %895 }
 0x12b   : > { %13354 = vst [vmem:[#allocation186_spill] sm:$0xff] %v6577_v55  ;;  %v6580_v60 = vpop.permute.xlu1 %663  ;;  %v6582_v48 = vpop.permute.xlu0 %667 }
 0x12c   : > { %13356 = vst [vmem:[#allocation52_spill] sm:$0xff] %v6580_v60  ;;  %v13362_v60 = vld [vmem:[#allocation53_spill] sm:$0xff] }
 0x12d   : > { %13357 = vst [vmem:[#allocation187_spill] sm:$0xff] %v6582_v48  ;;  %v836_v48 = vrot.slane %v13361_v19, 2  ;;  %v838_v55 = vrot.slane %v13362_v60, 2 }
 0x12f   : > { %v6610_v6 = vsel %vm742_vm1, %v836_v48, %v838_v55  ;;  %v6613_v41 = vsel %vm742_vm1, %v835_v53, %v836_v48  ;;  %v6616_v51 = vsel %vm742_vm1, %v838_v55, %v840_v5  ;;  %v13374_v48 = vld [vmem:[#allocation59_spill] sm:$0xff] }
 0x130   : > { %967 = vrot.lane.b32.xlu2 %v6585_v58, %s5477_s11  ;;  %13368 = vst [vmem:[#allocation58_spill] sm:$0xff] %v6610_v6  ;;  %v842_v53 = vrot.slane %v13374_v48, 2  ;;  %v13375_v58 = vld [vmem:[#allocation67_spill] sm:$0xff]  ;;  %v13381_v48 = vld [vmem:[#allocation68_spill] sm:$0xff] }
 0x131   : > { %965 = vrot.lane.b32.xlu1 %v6588_v47, %s5477_s11  ;;  %969 = vrot.lane.b32.xlu0 %v6591_v12, %s5477_s11  ;;  %13369 = vst [vmem:[#allocation191_spill] sm:$0xff] %v6613_v41  ;;  %v847_v55 = vrot.slane %v13375_v58, 2 }
 0x132   : > { %v6601_v30 = vpop.permute.xlu2 %901  ;;  %13370 = vst [vmem:[#allocation192_spill] sm:$0xff] %v6616_v51 }
 0x133   : > { %13363 = vst [vmem:[#allocation51_spill] sm:$0xff] %v6601_v30  ;;  %v6605_v1 = vpop.permute.xlu1 %669  ;;  %v6607_v15 = vpop.permute.xlu0 %673  ;;  %v13372_v30 = vld [vmem:[#allocation61_spill] sm:$0xff] }
 0x134   : > { %13366 = vst [vmem:[#allocation53_spill] sm:$0xff] %v6605_v1  ;;  %v13371_v1 = vld [vmem:[#allocation60_spill] sm:$0xff]  ;;  %v845_v12 = vrot.slane %v13372_v30, 2 }
 0x135   : > { %13367 = vst [vmem:[#allocation50_spill] sm:$0xff] %v6607_v15  ;;  %v844_v15 = vrot.slane %v13371_v1, 2 }
 0x138   : > { %973 = vrot.lane.b32.xlu2 %v6610_v6, %s5477_s11  ;;  %v6635_v6 = vsel %vm742_vm1, %v844_v15, %v845_v12 }
 0x139   : > { %971 = vrot.lane.b32.xlu1 %v6613_v41, %s5477_s11  ;;  %975 = vrot.lane.b32.xlu0 %v6616_v51, %s5477_s11  ;;  %13378 = vst [vmem:[#allocation67_spill] sm:$0xff] %v6635_v6  ;;  %v6638_v41 = vsel %vm742_vm1, %v840_v5, %v842_v53  ;;  %v6641_v51 = vsel %vm742_vm1, %v845_v12, %v847_v55  ;;  %v13384_v5 = vld [vmem:[#allocation78_spill] sm:$0xff]  ;;  %v854_v12 = vrot.slane %v13385_v62, 2 }
 0x13a   : > { %v6626_v47 = vpop.permute.xlu2 %907  ;;  %13379 = vst [vmem:[#allocation193_spill] sm:$0xff] %v6638_v41  ;;  %v853_v53 = vrot.slane %v13384_v5, 2 }
 0x13b   : > { %13373 = vst [vmem:[#allocation60_spill] sm:$0xff] %v6626_v47  ;;  %v6630_v43 = vpop.permute.xlu1 %675  ;;  %v6632_v61 = vpop.permute.xlu0 %891 }
 0x13c   : > { %13376 = vst [vmem:[#allocation61_spill] sm:$0xff] %v6630_v43  ;;  %v13382_v43 = vld [vmem:[#allocation69_spill] sm:$0xff] }
 0x13d   : > { %13377 = vst [vmem:[#allocation59_spill] sm:$0xff] %v6632_v61  ;;  %v849_v61 = vrot.slane %v13381_v48, 2  ;;  %v851_v15 = vrot.slane %v13382_v43, 2  ;;  %v13391_v43 = vld [vmem:[#allocation77_spill] sm:$0xff] }
 0x13e   : > { %13380 = vst [vmem:[#allocation194_spill] sm:$0xff] %v6641_v51 }
 0x140   : > { %979 = vrot.lane.b32.xlu2 %v6635_v6, %s5477_s11  ;;  %v6660_v6 = vsel %vm742_vm1, %v849_v61, %v851_v15 }
 0x141   : > { %977 = vrot.lane.b32.xlu1 %v6638_v41, %s5477_s11  ;;  %981 = vrot.lane.b32.xlu0 %v6641_v51, %s5477_s11  ;;  %13388 = vst [vmem:[#allocation76_spill] sm:$0xff] %v6660_v6  ;;  %v6663_v41 = vsel %vm742_vm1, %v847_v55, %v849_v61  ;;  %v6666_v51 = vsel %vm742_vm1, %v853_v53, %v854_v12  ;;  %v13394_v61 = vld [vmem:[#allocation88_spill] sm:$0xff] }
 0x142   : > { %v6651_v47 = vpop.permute.xlu2 %913  ;;  %13389 = vst [vmem:[#allocation195_spill] sm:$0xff] %v6663_v41  ;;  %v860_v55 = vrot.slane %v13394_v61, 2  ;;  %v13400_v61 = vld [vmem:[#allocation87_spill] sm:$0xff] }
 0x143   : > { %13383 = vst [vmem:[#allocation68_spill] sm:$0xff] %v6651_v47  ;;  %v6655_v54 = vpop.permute.xlu1 %893  ;;  %v6657_v20 = vpop.permute.xlu0 %897 }
 0x144   : > { %13386 = vst [vmem:[#allocation69_spill] sm:$0xff] %v6655_v54  ;;  %v13392_v54 = vld [vmem:[#allocation79_spill] sm:$0xff] }
 0x145   : > { %13387 = vst [vmem:[#allocation78_spill] sm:$0xff] %v6657_v20  ;;  %v856_v20 = vrot.slane %v13391_v43, 2  ;;  %v858_v15 = vrot.slane %v13392_v54, 2 }
 0x146   : > { %13390 = vst [vmem:[#allocation196_spill] sm:$0xff] %v6666_v51 }
 0x148   : > { %985 = vrot.lane.b32.xlu2 %v6660_v6, %s5477_s11  ;;  %v6684_v6 = vsel %vm742_vm1, %v856_v20, %v858_v15 }
 0x149   : > { %983 = vrot.lane.b32.xlu1 %v6663_v41, %s5477_s11  ;;  %987 = vrot.lane.b32.xlu0 %v6666_v51, %s5477_s11  ;;  %13397 = vst [vmem:[#allocation197_spill] sm:$0xff] %v6684_v6  ;;  %v6687_v41 = vsel %vm742_vm1, %v854_v12, %v856_v20  ;;  %v6690_v51 = vsel %vm742_vm1, %v858_v15, %v860_v55  ;;  %v13403_v20 = vld [vmem:[#allocation86_spill] sm:$0xff]  ;;  %v867_v15 = vrot.slane %v6139_v50, 2 }
 0x14a   : > { %v6676_v47 = vpop.permute.xlu2 %919  ;;  %13398 = vst [vmem:[#allocation198_spill] sm:$0xff] %v6687_v41  ;;  %v862_v12 = vrot.slane %v13403_v20, 2 }
 0x14b   : > { %13393 = vst [vmem:[#allocation77_spill] sm:$0xff] %v6676_v47  ;;  %v6679_v28 = vpop.permute.xlu1 %899  ;;  %v6681_v53 = vpop.permute.xlu0 %903 }
 0x14c   : > { %13395 = vst [vmem:[#allocation79_spill] sm:$0xff] %v6679_v28  ;;  %v13401_v28 = vld [vmem:[#allocation89_spill] sm:$0xff] }
 0x14d   : > { %13396 = vst [vmem:[#allocation88_spill] sm:$0xff] %v6681_v53  ;;  %v863_v53 = vrot.slane %v13400_v61, 2  ;;  %v865_v47 = vrot.slane %v13401_v28, 2 }
 0x14e   : > { %13399 = vst [vmem:[#allocation199_spill] sm:$0xff] %v6690_v51 }
 0x150   : > { %991 = vrot.lane.b32.xlu2 %v6684_v6, %s5477_s11  ;;  %v6709_v6 = vsel %vm742_vm1, %v863_v53, %v865_v47 }
 0x151   : > { %989 = vrot.lane.b32.xlu1 %v6687_v41, %s5477_s11  ;;  %993 = vrot.lane.b32.xlu0 %v6690_v51, %s5477_s11  ;;  %13406 = vst [vmem:[#allocation200_spill] sm:$0xff] %v6709_v6  ;;  %v6712_v41 = vsel %vm742_vm1, %v862_v12, %v863_v53  ;;  %v6715_v51 = vsel %vm742_vm1, %v865_v47, %v867_v15  ;;  %v13412_v53 = vld [vmem:[#allocation96_spill] sm:$0xff]  ;;  %v874_v47 = vrot.slane %v13413_v39, 2 }
 0x152   : > { %v6700_v38 = vpop.permute.xlu2 %925  ;;  %13407 = vst [vmem:[#allocation201_spill] sm:$0xff] %v6712_v41  ;;  %v869_v12 = vrot.slane %v13412_v53, 2  ;;  %v13419_v53 = vld [vmem:[#allocation106_spill] sm:$0xff] }
 0x153   : > { %13402 = vst [vmem:[#allocation87_spill] sm:$0xff] %v6700_v38  ;;  %v6704_v55 = vpop.permute.xlu1 %905  ;;  %v6706_v10 = vpop.permute.xlu0 %909  ;;  %v13410_v38 = vld [vmem:[#allocation98_spill] sm:$0xff] }
 0x154   : > { %13404 = vst [vmem:[#allocation89_spill] sm:$0xff] %v6704_v55  ;;  %v13409_v55 = vld [vmem:[#allocation97_spill] sm:$0xff]  ;;  %v872_v18 = vrot.slane %v13410_v38, 2 }
 0x155   : > { %13405 = vst [vmem:[#allocation86_spill] sm:$0xff] %v6706_v10  ;;  %v871_v10 = vrot.slane %v13409_v55, 2 }
 0x156   : > { %13408 = vst [vmem:[#allocation202_spill] sm:$0xff] %v6715_v51 }
 0x158   : > { %997 = vrot.lane.b32.xlu2 %v6709_v6, %s5477_s11  ;;  %v6734_v6 = vsel %vm742_vm1, %v871_v10, %v872_v18 }
 0x159   : > { %995 = vrot.lane.b32.xlu1 %v6712_v41, %s5477_s11  ;;  %999 = vrot.lane.b32.xlu0 %v6715_v51, %s5477_s11  ;;  %13416 = vst [vmem:[#allocation105_spill] sm:$0xff] %v6734_v6  ;;  %v6737_v41 = vsel %vm742_vm1, %v867_v15, %v869_v12  ;;  %v6740_v51 = vsel %vm742_vm1, %v872_v18, %v874_v47  ;;  %v880_v15 = vrot.slane %v6215_v52, 2  ;;  %v881_v18 = vrot.slane %v6209_v32, 2 }
 0x15a   : > { %v6725_v45 = vpop.permute.xlu2 %931  ;;  %13417 = vst [vmem:[#allocation203_spill] sm:$0xff] %v6737_v41 }
 0x15b   : > { %13411 = vst [vmem:[#allocation97_spill] sm:$0xff] %v6725_v45  ;;  %v6729_v37 = vpop.permute.xlu1 %911  ;;  %v6731_v40 = vpop.permute.xlu0 %915  ;;  %v13420_v45 = vld [vmem:[#allocation107_spill] sm:$0xff] }
 0x15c   : > { %13414 = vst [vmem:[#allocation98_spill] sm:$0xff] %v6729_v37  ;;  %v876_v37 = vrot.slane %v13419_v53, 2  ;;  %v878_v10 = vrot.slane %v13420_v45, 2  ;;  %v13427_v45 = vld [vmem:[#allocation114_spill] sm:$0xff] }
 0x15d   : > { %13415 = vst [vmem:[#allocation96_spill] sm:$0xff] %v6731_v40 }
 0x15e   : > { %13418 = vst [vmem:[#allocation204_spill] sm:$0xff] %v6740_v51 }
 0x160   : > { %1003 = vrot.lane.b32.xlu2 %v6734_v6, %s5477_s11  ;;  %v6759_v6 = vsel %vm742_vm1, %v876_v37, %v878_v10  ;;  %v13428_v10 = vld [vmem:[#allocation115_spill] sm:$0xff] }
 0x161   : > { %1001 = vrot.lane.b32.xlu1 %v6737_v41, %s5477_s11  ;;  %1005 = vrot.lane.b32.xlu0 %v6740_v51, %s5477_s11  ;;  %13424 = vst [vmem:[#allocation206_spill] sm:$0xff] %v6759_v6  ;;  %v6762_v41 = vsel %vm742_vm1, %v874_v47, %v876_v37  ;;  %v6765_v51 = vsel %vm742_vm1, %v880_v15, %v881_v18  ;;  %v887_v37 = vrot.slane %v6246_v33, 2 }
 0x162   : > { %v6750_v40 = vpop.permute.xlu2 %937  ;;  %13425 = vst [vmem:[#allocation207_spill] sm:$0xff] %v6762_v41 }
 0x163   : > { %13421 = vst [vmem:[#allocation106_spill] sm:$0xff] %v6750_v40  ;;  %v6754_v12 = vpop.permute.xlu1 %917  ;;  %v6756_v3 = vpop.permute.xlu0 %921  ;;  %v883_v40 = vrot.slane %v13427_v45, 2 }
 0x164   : > { %13422 = vst [vmem:[#allocation107_spill] sm:$0xff] %v6754_v12 }
 0x165   : > { %13423 = vst [vmem:[#allocation205_spill] sm:$0xff] %v6756_v3  ;;  %v885_v3 = vrot.slane %v13428_v10, 2 }
 0x166   : > { %13426 = vst [vmem:[#allocation208_spill] sm:$0xff] %v6765_v51 }
 0x168   : > { %1009 = vrot.lane.b32.xlu2 %v6759_v6, %s5477_s11  ;;  %v6789_v6 = vsel %vm742_vm1, %v885_v3, %v887_v37  ;;  %v6814_v37 = vld [vmem:[%s5574_s10 + $0x10] sm:$0xff] }
 0x169   : > { %1007 = vrot.lane.b32.xlu1 %v6762_v41, %s5477_s11  ;;  %1011 = vrot.lane.b32.xlu0 %v6765_v51, %s5477_s11  ;;  %v6783_v41 = vsel %vm742_vm1, %v883_v40, %v885_v3  ;;  %v6786_v51 = vsel %vm742_vm1, %v881_v18, %v883_v40  ;;  %13434 = vst [vmem:[#allocation212_spill] sm:$0xff] %v6789_v6  ;;  %v6804_v3 = vld [vmem:[%s5574_s10 + $0x8] sm:$0xff]  ;;  %v6809_v18 = vld [vmem:[%s5574_s10] sm:$0xff] }
 0x16a   : > { %v6775_v12 = vpop.permute.xlu2 %943  ;;  %13432 = vst [vmem:[#allocation210_spill] sm:$0xff] %v6783_v41 }
 0x16b   : > { %13429 = vst [vmem:[#allocation114_spill] sm:$0xff] %v6775_v12  ;;  %v6778_v47 = vpop.permute.xlu1 %923  ;;  %v6780_v15 = vpop.permute.xlu0 %927  ;;  %v6825_v12 = vld [vmem:[%s5574_s10 + $0x28] sm:$0xff] }
 0x16c   : > { %13430 = vst [vmem:[#allocation115_spill] sm:$0xff] %v6778_v47 }
 0x16d   : > { %13431 = vst [vmem:[#allocation209_spill] sm:$0xff] %v6780_v15 }
 0x16e   : > { %13433 = vst [vmem:[#allocation211_spill] sm:$0xff] %v6786_v51 }
 0x16f   : > { %13438 = vst [vmem:[#allocation216_spill] sm:$0xff] %v6809_v18 }
 0x170   : > { %1015 = vrot.lane.b32.xlu2 %v6783_v41, %s5477_s11  ;;  %13439 = vst [vmem:[#allocation217_spill] sm:$0xff] %v6814_v37 }
 0x171   : > { %1013 = vrot.lane.b32.xlu1 %v6786_v51, %s5477_s11  ;;  %1017 = vrot.lane.b32.xlu0 %v6789_v6, %s5477_s11  ;;  %13443 = vst [vmem:[#allocation221_spill] sm:$0xff] %v6825_v12  ;;  %s5371_s11 = scalar_lea.hbm %s12503_s4, 2 }
 0x172   : > { %v6797_v33 = vpop.permute.xlu2 %949 }
 0x173   : > { %13435 = vst [vmem:[#allocation213_spill] sm:$0xff] %v6797_v33  ;;  %v6799_v15 = vpop.permute.xlu1 %929  ;;  %v6801_v40 = vpop.permute.xlu0 %933  ;;  %v6830_v33 = vld [vmem:[%s5574_s10 + $0x18] sm:$0xff] }
 0x174   : > { %13436 = vst [vmem:[#allocation214_spill] sm:$0xff] %v6799_v15 }
 0x175   : > { %13437 = vst [vmem:[#allocation215_spill] sm:$0xff] %v6801_v40 }
 0x176   : > { %13444 = vst [vmem:[#allocation222_spill] sm:$0xff] %v6830_v33 }
 0x178   : > { %1086 = vrot.lane.b32.xlu2 %v6804_v3, %s5478_s12 }
 0x179   : > { %1084 = vrot.lane.b32.xlu1 %v6809_v18, %s5478_s12  ;;  %1088 = vrot.lane.b32.xlu0 %v6814_v37, %s5478_s12  ;;  %v6835_v18 = vld [vmem:[%s5574_s10 + $0x30] sm:$0xff]  ;;  %v6851_v37 = vld [vmem:[%s5574_s10 + $0x38] sm:$0xff] }
 0x17a   : > { %v6818_v15 = vpop.permute.xlu2 %955  ;;  %13445 = vst [vmem:[#allocation223_spill] sm:$0xff] %v6835_v18 }
 0x17b   : > { %13440 = vst [vmem:[#allocation218_spill] sm:$0xff] %v6818_v15  ;;  %v6820_v40 = vpop.permute.xlu1 %935  ;;  %v6822_v47 = vpop.permute.xlu0 %939 }
 0x17c   : > { %13441 = vst [vmem:[#allocation219_spill] sm:$0xff] %v6820_v40 }
 0x17d   : > { %13442 = vst [vmem:[#allocation220_spill] sm:$0xff] %v6822_v47 }
 0x17e   : > { %13450 = vst [vmem:[#allocation228_spill] sm:$0xff] %v6851_v37 }
 0x180   : > { %1092 = vrot.lane.b32.xlu2 %v6825_v12, %s5478_s12  ;;  %v6846_v12 = vld [vmem:[%s5574_s10 + $0x40] sm:$0xff] }
 0x181   : > { %1090 = vrot.lane.b32.xlu1 %v6830_v33, %s5478_s12  ;;  %1094 = vrot.lane.b32.xlu0 %v6835_v18, %s5478_s12  ;;  %13449 = vst [vmem:[#allocation227_spill] sm:$0xff] %v6846_v12  ;;  %v6856_v33 = vld [vmem:[%s5574_s10 + $0x50] sm:$0xff]  ;;  %v6872_v18 = vld [vmem:[%s5574_s10 + $0x58] sm:$0xff] }
 0x182   : > { %v6839_v40 = vpop.permute.xlu2 %961  ;;  %13451 = vst [vmem:[#allocation229_spill] sm:$0xff] %v6856_v33 }
 0x183   : > { %13446 = vst [vmem:[#allocation224_spill] sm:$0xff] %v6839_v40  ;;  %v6841_v47 = vpop.permute.xlu1 %941  ;;  %v6843_v15 = vpop.permute.xlu0 %945 }
 0x184   : > { %13447 = vst [vmem:[#allocation225_spill] sm:$0xff] %v6841_v47 }
 0x185   : > { %13448 = vst [vmem:[#allocation226_spill] sm:$0xff] %v6843_v15 }
 0x186   : > { %13456 = vst [vmem:[#allocation234_spill] sm:$0xff] %v6872_v18 }
 0x188   : > { %1098 = vrot.lane.b32.xlu2 %v6846_v12, %s5478_s12  ;;  %v6867_v12 = vld [vmem:[%s5574_s10 + $0x60] sm:$0xff] }
 0x189   : > { %1096 = vrot.lane.b32.xlu1 %v6851_v37, %s5478_s12  ;;  %1100 = vrot.lane.b32.xlu0 %v6856_v33, %s5478_s12  ;;  %13455 = vst [vmem:[#allocation233_spill] sm:$0xff] %v6867_v12  ;;  %v6877_v37 = vld [vmem:[%s5574_s10 + $0x68] sm:$0xff]  ;;  %v6893_v33 = vld [vmem:[%s5574_s10 + $0x78] sm:$0xff] }
 0x18a   : > { %v6860_v47 = vpop.permute.xlu2 %967  ;;  %13457 = vst [vmem:[#allocation235_spill] sm:$0xff] %v6877_v37 }
 0x18b   : > { %13452 = vst [vmem:[#allocation230_spill] sm:$0xff] %v6860_v47  ;;  %v6862_v15 = vpop.permute.xlu1 %947  ;;  %v6864_v40 = vpop.permute.xlu0 %951 }
 0x18c   : > { %13453 = vst [vmem:[#allocation231_spill] sm:$0xff] %v6862_v15 }
 0x18d   : > { %13454 = vst [vmem:[#allocation232_spill] sm:$0xff] %v6864_v40 }
 0x18e   : > { %13462 = vst [vmem:[#allocation240_spill] sm:$0xff] %v6893_v33 }
 0x190   : > { %1104 = vrot.lane.b32.xlu2 %v6867_v12, %s5478_s12  ;;  %v6888_v12 = vld [vmem:[%s5574_s10 + $0x80] sm:$0xff] }
 0x191   : > { %1102 = vrot.lane.b32.xlu1 %v6872_v18, %s5478_s12  ;;  %1106 = vrot.lane.b32.xlu0 %v6877_v37, %s5478_s12  ;;  %13461 = vst [vmem:[#allocation239_spill] sm:$0xff] %v6888_v12  ;;  %v6898_v18 = vld [vmem:[%s5574_s10 + $0x88] sm:$0xff]  ;;  %v6914_v37 = vld [vmem:[%s5574_s10 + $0x90] sm:$0xff] }
 0x192   : > { %v6881_v47 = vpop.permute.xlu2 %973  ;;  %13463 = vst [vmem:[#allocation241_spill] sm:$0xff] %v6898_v18 }
 0x193   : > { %13458 = vst [vmem:[#allocation236_spill] sm:$0xff] %v6881_v47  ;;  %v6883_v40 = vpop.permute.xlu1 %953  ;;  %v6885_v15 = vpop.permute.xlu0 %957 }
 0x194   : > { %13459 = vst [vmem:[#allocation237_spill] sm:$0xff] %v6883_v40 }
 0x195   : > { %13460 = vst [vmem:[#allocation238_spill] sm:$0xff] %v6885_v15 }
 0x196   : > { %13468 = vst [vmem:[#allocation246_spill] sm:$0xff] %v6914_v37 }
 0x198   : > { %1110 = vrot.lane.b32.xlu2 %v6888_v12, %s5478_s12  ;;  %v6909_v12 = vld [vmem:[%s5574_s10 + $0xa0] sm:$0xff] }
 0x199   : > { %1108 = vrot.lane.b32.xlu1 %v6893_v33, %s5478_s12  ;;  %1112 = vrot.lane.b32.xlu0 %v6898_v18, %s5478_s12  ;;  %13467 = vst [vmem:[#allocation245_spill] sm:$0xff] %v6909_v12  ;;  %v6919_v33 = vld [vmem:[%s5574_s10 + $0xa8] sm:$0xff]  ;;  %v6935_v18 = vld [vmem:[%s5574_s10 + $0xb0] sm:$0xff] }
 0x19a   : > { %v6902_v47 = vpop.permute.xlu2 %979  ;;  %13469 = vst [vmem:[#allocation247_spill] sm:$0xff] %v6919_v33 }
 0x19b   : > { %13464 = vst [vmem:[#allocation242_spill] sm:$0xff] %v6902_v47  ;;  %v6904_v15 = vpop.permute.xlu1 %959  ;;  %v6906_v40 = vpop.permute.xlu0 %963 }
 0x19c   : > { %13465 = vst [vmem:[#allocation243_spill] sm:$0xff] %v6904_v15 }
 0x19d   : > { %13466 = vst [vmem:[#allocation244_spill] sm:$0xff] %v6906_v40 }
 0x19e   : > { %13474 = vst [vmem:[#allocation252_spill] sm:$0xff] %v6935_v18 }
 0x1a0   : > { %1116 = vrot.lane.b32.xlu2 %v6909_v12, %s5478_s12  ;;  %v6930_v12 = vld [vmem:[%s5574_s10 + $0xb8] sm:$0xff] }
 0x1a1   : > { %1114 = vrot.lane.b32.xlu1 %v6914_v37, %s5478_s12  ;;  %1118 = vrot.lane.b32.xlu0 %v6919_v33, %s5478_s12  ;;  %13473 = vst [vmem:[#allocation251_spill] sm:$0xff] %v6930_v12  ;;  %v6940_v37 = vld [vmem:[%s5574_s10 + $0xc8] sm:$0xff]  ;;  %v6956_v33 = vld [vmem:[%s5574_s10 + $0xd0] sm:$0xff] }
 0x1a2   : > { %v6923_v15 = vpop.permute.xlu2 %985  ;;  %13475 = vst [vmem:[#allocation253_spill] sm:$0xff] %v6940_v37 }
 0x1a3   : > { %13470 = vst [vmem:[#allocation248_spill] sm:$0xff] %v6923_v15  ;;  %v6925_v40 = vpop.permute.xlu1 %965  ;;  %v6927_v47 = vpop.permute.xlu0 %969 }
 0x1a4   : > { %13471 = vst [vmem:[#allocation249_spill] sm:$0xff] %v6925_v40 }
 0x1a5   : > { %13472 = vst [vmem:[#allocation250_spill] sm:$0xff] %v6927_v47 }
 0x1a6   : > { %13480 = vst [vmem:[#allocation258_spill] sm:$0xff] %v6956_v33 }
 0x1a8   : > { %1122 = vrot.lane.b32.xlu2 %v6930_v12, %s5478_s12  ;;  %v6951_v12 = vld [vmem:[%s5574_s10 + $0xd8] sm:$0xff] }
 0x1a9   : > { %1120 = vrot.lane.b32.xlu1 %v6935_v18, %s5478_s12  ;;  %1124 = vrot.lane.b32.xlu0 %v6940_v37, %s5478_s12  ;;  %13479 = vst [vmem:[#allocation257_spill] sm:$0xff] %v6951_v12  ;;  %v6961_v18 = vld [vmem:[%s5574_s10 + $0xe0] sm:$0xff]  ;;  %v6977_v37 = vld [vmem:[%s5574_s10 + $0xf0] sm:$0xff] }
 0x1aa   : > { %v6944_v40 = vpop.permute.xlu2 %991  ;;  %13481 = vst [vmem:[#allocation259_spill] sm:$0xff] %v6961_v18 }
 0x1ab   : > { %13476 = vst [vmem:[#allocation254_spill] sm:$0xff] %v6944_v40  ;;  %v6946_v47 = vpop.permute.xlu1 %971  ;;  %v6948_v15 = vpop.permute.xlu0 %975 }
 0x1ac   : > { %13477 = vst [vmem:[#allocation255_spill] sm:$0xff] %v6946_v47 }
 0x1ad   : > { %13478 = vst [vmem:[#allocation256_spill] sm:$0xff] %v6948_v15 }
 0x1ae   : > { %13486 = vst [vmem:[#allocation264_spill] sm:$0xff] %v6977_v37 }
 0x1b0   : > { %1128 = vrot.lane.b32.xlu2 %v6951_v12, %s5478_s12  ;;  %v6972_v12 = vld [vmem:[%s5574_s10 + $0xf8] sm:$0xff] }
 0x1b1   : > { %1126 = vrot.lane.b32.xlu1 %v6956_v33, %s5478_s12  ;;  %1130 = vrot.lane.b32.xlu0 %v6961_v18, %s5478_s12  ;;  %13485 = vst [vmem:[#allocation263_spill] sm:$0xff] %v6972_v12  ;;  %v6982_v33 = vld [vmem:[%s5574_s10 + $0x100] sm:$0xff]  ;;  %v6998_v18 = vld [vmem:[%s5574_s10 + $0x108] sm:$0xff] }
 0x1b2   : > { %v6965_v47 = vpop.permute.xlu2 %997  ;;  %13487 = vst [vmem:[#allocation265_spill] sm:$0xff] %v6982_v33 }
 0x1b3   : > { %13482 = vst [vmem:[#allocation260_spill] sm:$0xff] %v6965_v47  ;;  %v6967_v15 = vpop.permute.xlu1 %977  ;;  %v6969_v40 = vpop.permute.xlu0 %981 }
 0x1b4   : > { %13483 = vst [vmem:[#allocation261_spill] sm:$0xff] %v6967_v15 }
 0x1b5   : > { %13484 = vst [vmem:[#allocation262_spill] sm:$0xff] %v6969_v40 }
 0x1b6   : > { %13492 = vst [vmem:[#allocation270_spill] sm:$0xff] %v6998_v18 }
 0x1b8   : > { %1134 = vrot.lane.b32.xlu2 %v6972_v12, %s5478_s12  ;;  %v6993_v12 = vld [vmem:[%s5574_s10 + $0x118] sm:$0xff] }
 0x1b9   : > { %1132 = vrot.lane.b32.xlu1 %v6977_v37, %s5478_s12  ;;  %1136 = vrot.lane.b32.xlu0 %v6982_v33, %s5478_s12  ;;  %13491 = vst [vmem:[#allocation269_spill] sm:$0xff] %v6993_v12  ;;  %v7003_v37 = vld [vmem:[%s5574_s10 + $0x120] sm:$0xff]  ;;  %v7014_v33 = vld [vmem:[%s5574_s10 + $0x130] sm:$0xff] }
 0x1ba   : > { %v6986_v15 = vpop.permute.xlu2 %1003  ;;  %13496 = vst [vmem:[#allocation274_spill] sm:$0xff] %v7014_v33 }
 0x1bb   : > { %13488 = vst [vmem:[#allocation266_spill] sm:$0xff] %v6986_v15  ;;  %v6988_v47 = vpop.permute.xlu1 %983  ;;  %v6990_v40 = vpop.permute.xlu0 %987 }
 0x1bc   : > { %13489 = vst [vmem:[#allocation267_spill] sm:$0xff] %v6988_v47 }
 0x1bd   : > { %13490 = vst [vmem:[#allocation268_spill] sm:$0xff] %v6990_v40 }
 0x1c0   : > { %1140 = vrot.lane.b32.xlu2 %v6993_v12, %s5478_s12  ;;  %v7019_v12 = vld [vmem:[%s5574_s10 + $0x128] sm:$0xff] }
 0x1c1   : > { %1138 = vrot.lane.b32.xlu1 %v6998_v18, %s5478_s12  ;;  %1142 = vrot.lane.b32.xlu0 %v7003_v37, %s5478_s12  ;;  %13497 = vst [vmem:[#allocation275_spill] sm:$0xff] %v7019_v12  ;;  %v7024_v18 = vld [vmem:[%s5574_s10 + $0x140] sm:$0xff] }
 0x1c2   : > { %v7007_v15 = vpop.permute.xlu2 %1009  ;;  %13498 = vst [vmem:[#allocation276_spill] sm:$0xff] %v7024_v18 }
 0x1c3   : > { %13493 = vst [vmem:[#allocation271_spill] sm:$0xff] %v7007_v15  ;;  %v7009_v40 = vpop.permute.xlu1 %989  ;;  %v7011_v47 = vpop.permute.xlu0 %993 }
 0x1c4   : > { %13494 = vst [vmem:[#allocation272_spill] sm:$0xff] %v7009_v40 }
 0x1c5   : > { %13495 = vst [vmem:[#allocation273_spill] sm:$0xff] %v7011_v47 }
 0x1c8   : > { %1146 = vrot.lane.b32.xlu2 %v7014_v33, %s5478_s12  ;;  %v7037_v33 = vld [vmem:[%s5574_s10 + $0x148] sm:$0xff] }
 0x1c9   : > { %1144 = vrot.lane.b32.xlu1 %v7019_v12, %s5478_s12  ;;  %1148 = vrot.lane.b32.xlu0 %v7024_v18, %s5478_s12  ;;  %v7042_v12 = vld [vmem:[%s5574_s10 + $0x158] sm:$0xff] }
 0x1ca   : > { %v7028_v15 = vpop.permute.xlu2 %1015  ;;  %13502 = vst [vmem:[#allocation280_spill] sm:$0xff] %v7042_v12 }
 0x1cb   : > { %13499 = vst [vmem:[#allocation277_spill] sm:$0xff] %v7028_v15  ;;  %v7030_v40 = vpop.permute.xlu1 %995  ;;  %v7032_v47 = vpop.permute.xlu0 %999 }
 0x1cc   : > { %13500 = vst [vmem:[#allocation278_spill] sm:$0xff] %v7030_v40 }
 0x1cd   : > { %13501 = vst [vmem:[#allocation279_spill] sm:$0xff] %v7032_v47 }
 0x1d0   : > { %1152 = vrot.lane.b32.xlu2 %v5904_v0, %s5478_s12 }
 0x1d1   : > { %1150 = vrot.lane.b32.xlu1 %v7037_v33, %s5478_s12  ;;  %1154 = vrot.lane.b32.xlu0 %v7042_v12, %s5478_s12 }
 0x1d2   : > { %v7046_v18 = vpop.permute.xlu2 %1086 }
 0x1d3   : > { %13503 = vst [vmem:[#allocation281_spill] sm:$0xff] %v7046_v18  ;;  %v7048_v15 = vpop.permute.xlu1 %1001  ;;  %v7050_v40 = vpop.permute.xlu0 %1005 }
 0x1d4   : > { %13504 = vst [vmem:[#allocation282_spill] sm:$0xff] %v7048_v15 }
 0x1d5   : > { %13505 = vst [vmem:[#allocation283_spill] sm:$0xff] %v7050_v40 }
 0x1d8   : > { %1158 = vrot.lane.b32.xlu2 %v5931_v31, %s5478_s12 }
 0x1d9   : > { %1156 = vrot.lane.b32.xlu1 %v5937_v34, %s5478_s12  ;;  %1160 = vrot.lane.b32.xlu0 %v5934_v63, %s5478_s12 }
 0x1da   : > { %v7058_v0 = vpop.permute.xlu2 %1092 }
 0x1db   : > { %13506 = vst [vmem:[#allocation284_spill] sm:$0xff] %v7058_v0  ;;  %v7060_v47 = vpop.permute.xlu1 %1007  ;;  %v7062_v12 = vpop.permute.xlu0 %1011 }
 0x1dc   : > { %13507 = vst [vmem:[#allocation285_spill] sm:$0xff] %v7060_v47 }
 0x1dd   : > { %13508 = vst [vmem:[#allocation286_spill] sm:$0xff] %v7062_v12  ;;  %v13564_v12 = vld [vmem:[#allocation25_spill] sm:$0xff] }
 0x1e0   : > { %1164 = vrot.lane.b32.xlu2 %v13364_v59, %s5478_s12 }
 0x1e1   : > { %1162 = vrot.lane.b32.xlu1 %v5940_v42, %s5478_s12  ;;  %1166 = vrot.lane.b32.xlu0 %v13361_v19, %s5478_s12 }
 0x1e2   : > { %v7070_v31 = vpop.permute.xlu2 %1098 }
 0x1e3   : > { %13509 = vst [vmem:[#allocation287_spill] sm:$0xff] %v7070_v31  ;;  %v7072_v34 = vpop.permute.xlu1 %1013  ;;  %v7074_v63 = vpop.permute.xlu0 %1017 }
 0x1e4   : > { %13510 = vst [vmem:[#allocation288_spill] sm:$0xff] %v7072_v34 }
 0x1e5   : > { %13511 = vst [vmem:[#allocation289_spill] sm:$0xff] %v7074_v63 }
 0x1e8   : > { %1170 = vrot.lane.b32.xlu2 %v13365_v57, %s5478_s12 }
 0x1e9   : > { %1168 = vrot.lane.b32.xlu1 %v13362_v60, %s5478_s12  ;;  %1172 = vrot.lane.b32.xlu0 %v13371_v1, %s5478_s12 }
 0x1ea   : > { %v7082_v59 = vpop.permute.xlu2 %1104 }
 0x1eb   : > { %13512 = vst [vmem:[#allocation290_spill] sm:$0xff] %v7082_v59  ;;  %v7084_v42 = vpop.permute.xlu1 %1084  ;;  %v7086_v19 = vpop.permute.xlu0 %1088  ;;  %v13558_v59 = vld [vmem:[#allocation22_spill] sm:$0xff] }
 0x1ec   : > { %13513 = vst [vmem:[#allocation291_spill] sm:$0xff] %v7084_v42 }
 0x1ed   : > { %13514 = vst [vmem:[#allocation292_spill] sm:$0xff] %v7086_v19 }
 0x1f0   : > { %1176 = vrot.lane.b32.xlu2 %v13375_v58, %s5478_s12 }
 0x1f1   : > { %1174 = vrot.lane.b32.xlu1 %v13372_v30, %s5478_s12  ;;  %1178 = vrot.lane.b32.xlu0 %v13381_v48, %s5478_s12 }
 0x1f2   : > { %v7094_v57 = vpop.permute.xlu2 %1110 }
 0x1f3   : > { %13515 = vst [vmem:[#allocation293_spill] sm:$0xff] %v7094_v57  ;;  %v7096_v60 = vpop.permute.xlu1 %1090  ;;  %v7098_v1 = vpop.permute.xlu0 %1094 }
 0x1f4   : > { %13516 = vst [vmem:[#allocation294_spill] sm:$0xff] %v7096_v60 }
 0x1f5   : > { %13517 = vst [vmem:[#allocation295_spill] sm:$0xff] %v7098_v1 }
 0x1f8   : > { %1182 = vrot.lane.b32.xlu2 %v13385_v62, %s5478_s12 }
 0x1f9   : > { %1180 = vrot.lane.b32.xlu1 %v13384_v5, %s5478_s12  ;;  %1184 = vrot.lane.b32.xlu0 %v13391_v43, %s5478_s12 }
 0x1fa   : > { %v7106_v58 = vpop.permute.xlu2 %1116 }
 0x1fb   : > { %13518 = vst [vmem:[#allocation296_spill] sm:$0xff] %v7106_v58  ;;  %v7108_v30 = vpop.permute.xlu1 %1096  ;;  %v7110_v48 = vpop.permute.xlu0 %1100 }
 0x1fc   : > { %13519 = vst [vmem:[#allocation297_spill] sm:$0xff] %v7108_v30 }
 0x1fd   : > { %13520 = vst [vmem:[#allocation298_spill] sm:$0xff] %v7110_v48 }
 0x200   : > { %1188 = vrot.lane.b32.xlu2 %v13403_v20, %s5478_s12 }
 0x201   : > { %1186 = vrot.lane.b32.xlu1 %v13392_v54, %s5478_s12  ;;  %1190 = vrot.lane.b32.xlu0 %v13400_v61, %s5478_s12 }
 0x202   : > { %v7118_v62 = vpop.permute.xlu2 %1122 }
 0x203   : > { %13521 = vst [vmem:[#allocation299_spill] sm:$0xff] %v7118_v62  ;;  %v7120_v5 = vpop.permute.xlu1 %1102  ;;  %v7122_v43 = vpop.permute.xlu0 %1106  ;;  %v13544_v62 = vld [vmem:[#allocation17_spill] sm:$0xff] }
 0x204   : > { %13522 = vst [vmem:[#allocation300_spill] sm:$0xff] %v7120_v5 }
 0x205   : > { %13523 = vst [vmem:[#allocation301_spill] sm:$0xff] %v7122_v43 }
 0x208   : > { %1194 = vrot.lane.b32.xlu2 %v6139_v50, %s5478_s12 }
 0x209   : > { %1192 = vrot.lane.b32.xlu1 %v13401_v28, %s5478_s12  ;;  %1196 = vrot.lane.b32.xlu0 %v13409_v55, %s5478_s12 }
 0x20a   : > { %v7130_v20 = vpop.permute.xlu2 %1128 }
 0x20b   : > { %13524 = vst [vmem:[#allocation302_spill] sm:$0xff] %v7130_v20  ;;  %v7132_v54 = vpop.permute.xlu1 %1108  ;;  %v7134_v61 = vpop.permute.xlu0 %1112  ;;  %v13540_v20 = vld [vmem:[#allocation13_spill] sm:$0xff] }
 0x20c   : > { %13525 = vst [vmem:[#allocation303_spill] sm:$0xff] %v7132_v54 }
 0x20d   : > { %13526 = vst [vmem:[#allocation304_spill] sm:$0xff] %v7134_v61 }
 0x210   : > { %1200 = vrot.lane.b32.xlu2 %v13413_v39, %s5478_s12 }
 0x211   : > { %1198 = vrot.lane.b32.xlu1 %v13410_v38, %s5478_s12  ;;  %1202 = vrot.lane.b32.xlu0 %v13419_v53, %s5478_s12 }
 0x212   : > { %v7142_v50 = vpop.permute.xlu2 %1134 }
 0x213   : > { %13527 = vst [vmem:[#allocation305_spill] sm:$0xff] %v7142_v50  ;;  %v7144_v28 = vpop.permute.xlu1 %1114  ;;  %v7146_v55 = vpop.permute.xlu0 %1118  ;;  %v13533_v50 = vld [vmem:[#allocation12_spill] sm:$0xff] }
 0x214   : > { %13528 = vst [vmem:[#allocation306_spill] sm:$0xff] %v7144_v28 }
 0x215   : > { %13529 = vst [vmem:[#allocation307_spill] sm:$0xff] %v7146_v55 }
 0x218   : > { %1206 = vrot.lane.b32.xlu2 %v6209_v32, %s5478_s12  ;;  %v13534_v32 = vld [vmem:[#allocation11_spill] sm:$0xff] }
 0x219   : > { %1204 = vrot.lane.b32.xlu1 %v6215_v52, %s5478_s12  ;;  %1208 = vrot.lane.b32.xlu0 %v13427_v45, %s5478_s12 }
 0x21a   : > { %v7154_v39 = vpop.permute.xlu2 %1140 }
 0x21b   : > { %13530 = vst [vmem:[#allocation308_spill] sm:$0xff] %v7154_v39  ;;  %v7156_v38 = vpop.permute.xlu1 %1120  ;;  %v7158_v53 = vpop.permute.xlu0 %1124 }
 0x21c   : > { %13531 = vst [vmem:[#allocation309_spill] sm:$0xff] %v7156_v38  ;;  %v13538_v38 = vld [vmem:[#allocation10_spill] sm:$0xff] }
 0x21d   : > { %13532 = vst [vmem:[#allocation310_spill] sm:$0xff] %v7158_v53  ;;  %v13539_v53 = vld [vmem:[#allocation14_spill] sm:$0xff] }
 0x220   : > { %1276 = vrot.lane.b32.xlu2 %v13533_v50, %s5479_s13 }
 0x221   : > { %1210 = vrot.lane.b32.xlu1 %v13428_v10, %s5478_s12  ;;  %1278 = vrot.lane.b32.xlu0 %v13534_v32, %s5479_s13  ;;  %s4913_s12 = scalar_lea.hbm %s12504_s5, %s5535_s22 }
 0x222   : > { %v7166_v52 = vpop.permute.xlu2 %1146 }
 0x223   : > { %13535 = vst [vmem:[#allocation12_spill] sm:$0xff] %v7166_v52  ;;  %v7168_v55 = vpop.permute.xlu1 %1126  ;;  %v7170_v45 = vpop.permute.xlu0 %1130 }
 0x224   : > { %13536 = vst [vmem:[#allocation11_spill] sm:$0xff] %v7168_v55  ;;  %v13546_v55 = vld [vmem:[#allocation16_spill] sm:$0xff] }
 0x225   : > { %13537 = vst [vmem:[#allocation311_spill] sm:$0xff] %v7170_v45  ;;  %v13545_v45 = vld [vmem:[#allocation15_spill] sm:$0xff] }
 0x228   : > { %1282 = vrot.lane.b32.xlu2 %v13538_v38, %s5479_s13 }
 0x229   : > { %1280 = vrot.lane.b32.xlu1 %v13539_v53, %s5479_s13  ;;  %1284 = vrot.lane.b32.xlu0 %v13540_v20, %s5479_s13 }
 0x22a   : > { %v7178_v43 = vpop.permute.xlu2 %1152 }
 0x22b   : > { %13541 = vst [vmem:[#allocation10_spill] sm:$0xff] %v7178_v43  ;;  %v7180_v10 = vpop.permute.xlu1 %1132  ;;  %v7182_v5 = vpop.permute.xlu0 %1136  ;;  %v13550_v43 = vld [vmem:[#allocation20_spill] sm:$0xff] }
 0x22c   : > { %13542 = vst [vmem:[#allocation14_spill] sm:$0xff] %v7180_v10  ;;  %v13552_v10 = vld [vmem:[#allocation19_spill] sm:$0xff] }
 0x22d   : > { %13543 = vst [vmem:[#allocation13_spill] sm:$0xff] %v7182_v5  ;;  %v13551_v5 = vld [vmem:[#allocation18_spill] sm:$0xff] }
 0x230   : > { %1288 = vrot.lane.b32.xlu2 %v13544_v62, %s5479_s13 }
 0x231   : > { %1286 = vrot.lane.b32.xlu1 %v13545_v45, %s5479_s13  ;;  %1290 = vrot.lane.b32.xlu0 %v13546_v55, %s5479_s13 }
 0x232   : > { %v7190_v48 = vpop.permute.xlu2 %1158 }
 0x233   : > { %13547 = vst [vmem:[#allocation17_spill] sm:$0xff] %v7190_v48  ;;  %v7192_v30 = vpop.permute.xlu1 %1138  ;;  %v7194_v58 = vpop.permute.xlu0 %1142  ;;  %v13556_v48 = vld [vmem:[#allocation23_spill] sm:$0xff] }
 0x234   : > { %13548 = vst [vmem:[#allocation15_spill] sm:$0xff] %v7192_v30  ;;  %v13557_v30 = vld [vmem:[#allocation21_spill] sm:$0xff] }
 0x235   : > { %13549 = vst [vmem:[#allocation16_spill] sm:$0xff] %v7194_v58 }
 0x238   : > { %1294 = vrot.lane.b32.xlu2 %v13550_v43, %s5479_s13 }
 0x239   : > { %1292 = vrot.lane.b32.xlu1 %v13551_v5, %s5479_s13  ;;  %1296 = vrot.lane.b32.xlu0 %v13552_v10, %s5479_s13 }
 0x23a   : > { %v7202_v1 = vpop.permute.xlu2 %1164 }
 0x23b   : > { %13553 = vst [vmem:[#allocation20_spill] sm:$0xff] %v7202_v1  ;;  %v7204_v60 = vpop.permute.xlu1 %1144  ;;  %v7206_v19 = vpop.permute.xlu0 %1148  ;;  %v13562_v1 = vld [vmem:[#allocation26_spill] sm:$0xff] }
 0x23c   : > { %13554 = vst [vmem:[#allocation18_spill] sm:$0xff] %v7204_v60 }
 0x23d   : > { %13555 = vst [vmem:[#allocation19_spill] sm:$0xff] %v7206_v19  ;;  %v13563_v19 = vld [vmem:[#allocation24_spill] sm:$0xff] }
 0x240   : > { %1300 = vrot.lane.b32.xlu2 %v13556_v48, %s5479_s13 }
 0x241   : > { %1298 = vrot.lane.b32.xlu1 %v13557_v30, %s5479_s13  ;;  %1302 = vrot.lane.b32.xlu0 %v13558_v59, %s5479_s13 }
 0x242   : > { %v7214_v63 = vpop.permute.xlu2 %1170 }
 0x243   : > { %13559 = vst [vmem:[#allocation23_spill] sm:$0xff] %v7214_v63  ;;  %v7216_v34 = vpop.permute.xlu1 %1150  ;;  %v7218_v31 = vpop.permute.xlu0 %1154  ;;  %v13568_v63 = vld [vmem:[#allocation29_spill] sm:$0xff] }
 0x244   : > { %13560 = vst [vmem:[#allocation21_spill] sm:$0xff] %v7216_v34  ;;  %v13570_v34 = vld [vmem:[#allocation28_spill] sm:$0xff] }
 0x245   : > { %13561 = vst [vmem:[#allocation22_spill] sm:$0xff] %v7218_v31  ;;  %v13569_v31 = vld [vmem:[#allocation27_spill] sm:$0xff] }
 0x248   : > { %1306 = vrot.lane.b32.xlu2 %v13562_v1, %s5479_s13 }
 0x249   : > { %1304 = vrot.lane.b32.xlu1 %v13563_v19, %s5479_s13  ;;  %1308 = vrot.lane.b32.xlu0 %v13564_v12, %s5479_s13 }
 0x24a   : > { %v7226_v47 = vpop.permute.xlu2 %1176 }
 0x24b   : > { %13565 = vst [vmem:[#allocation26_spill] sm:$0xff] %v7226_v47  ;;  %v7228_v0 = vpop.permute.xlu1 %1156  ;;  %v7230_v40 = vpop.permute.xlu0 %1160  ;;  %v13574_v47 = vld [vmem:[#allocation32_spill] sm:$0xff] }
 0x24c   : > { %13566 = vst [vmem:[#allocation24_spill] sm:$0xff] %v7228_v0  ;;  %v13576_v0 = vld [vmem:[#allocation31_spill] sm:$0xff] }
 0x24d   : > { %13567 = vst [vmem:[#allocation25_spill] sm:$0xff] %v7230_v40  ;;  %v13575_v40 = vld [vmem:[#allocation30_spill] sm:$0xff] }
 0x250   : > { %1312 = vrot.lane.b32.xlu2 %v13568_v63, %s5479_s13 }
 0x251   : > { %1310 = vrot.lane.b32.xlu1 %v13569_v31, %s5479_s13  ;;  %1314 = vrot.lane.b32.xlu0 %v13570_v34, %s5479_s13 }
 0x252   : > { %v7238_v15 = vpop.permute.xlu2 %1182 }
 0x253   : > { %13571 = vst [vmem:[#allocation29_spill] sm:$0xff] %v7238_v15  ;;  %v7240_v18 = vpop.permute.xlu1 %1162  ;;  %v7242_v42 = vpop.permute.xlu0 %1166  ;;  %v13580_v15 = vld [vmem:[#allocation35_spill] sm:$0xff] }
 0x254   : > { %13572 = vst [vmem:[#allocation27_spill] sm:$0xff] %v7240_v18  ;;  %v13582_v18 = vld [vmem:[#allocation34_spill] sm:$0xff] }
 0x255   : > { %13573 = vst [vmem:[#allocation28_spill] sm:$0xff] %v7242_v42  ;;  %v13581_v42 = vld [vmem:[#allocation33_spill] sm:$0xff] }
 0x258   : > { %1318 = vrot.lane.b32.xlu2 %v13574_v47, %s5479_s13 }
 0x259   : > { %1316 = vrot.lane.b32.xlu1 %v13575_v40, %s5479_s13  ;;  %1320 = vrot.lane.b32.xlu0 %v13576_v0, %s5479_s13 }
 0x25a   : > { %v7250_v60 = vpop.permute.xlu2 %1188 }
 0x25b   : > { %13577 = vst [vmem:[#allocation32_spill] sm:$0xff] %v7250_v60  ;;  %v7252_v58 = vpop.permute.xlu1 %1168  ;;  %v7254_v52 = vpop.permute.xlu0 %1172  ;;  %v13586_v60 = vld [vmem:[#allocation38_spill] sm:$0xff] }
 0x25c   : > { %13578 = vst [vmem:[#allocation30_spill] sm:$0xff] %v7252_v58  ;;  %v13587_v58 = vld [vmem:[#allocation36_spill] sm:$0xff] }
 0x25d   : > { %13579 = vst [vmem:[#allocation31_spill] sm:$0xff] %v7254_v52  ;;  %v13588_v52 = vld [vmem:[#allocation37_spill] sm:$0xff] }
 0x260   : > { %1324 = vrot.lane.b32.xlu2 %v13580_v15, %s5479_s13 }
 0x261   : > { %1322 = vrot.lane.b32.xlu1 %v13581_v42, %s5479_s13  ;;  %1326 = vrot.lane.b32.xlu0 %v13582_v18, %s5479_s13 }
 0x262   : > { %v7262_v39 = vpop.permute.xlu2 %1194 }
 0x263   : > { %13583 = vst [vmem:[#allocation35_spill] sm:$0xff] %v7262_v39  ;;  %v7264_v28 = vpop.permute.xlu1 %1174  ;;  %v7266_v61 = vpop.permute.xlu0 %1178  ;;  %v13592_v39 = vld [vmem:[#allocation41_spill] sm:$0xff] }
 0x264   : > { %13584 = vst [vmem:[#allocation33_spill] sm:$0xff] %v7264_v28  ;;  %v13594_v28 = vld [vmem:[#allocation40_spill] sm:$0xff] }
 0x265   : > { %13585 = vst [vmem:[#allocation312_spill] sm:$0xff] %v7266_v61  ;;  %v13593_v61 = vld [vmem:[#allocation39_spill] sm:$0xff] }
 0x268   : > { %1330 = vrot.lane.b32.xlu2 %v13586_v60, %s5479_s13 }
 0x269   : > { %1328 = vrot.lane.b32.xlu1 %v13587_v58, %s5479_s13  ;;  %1332 = vrot.lane.b32.xlu0 %v13588_v52, %s5479_s13 }
 0x26a   : > { %v7274_v54 = vpop.permute.xlu2 %1200 }
 0x26b   : > { %13589 = vst [vmem:[#allocation313_spill] sm:$0xff] %v7274_v54  ;;  %v7276_v57 = vpop.permute.xlu1 %1180  ;;  %v7278_v18 = vpop.permute.xlu0 %1184  ;;  %v13598_v54 = vld [vmem:[#allocation44_spill] sm:$0xff] }
 0x26c   : > { %13590 = vst [vmem:[#allocation314_spill] sm:$0xff] %v7276_v57  ;;  %v13599_v57 = vld [vmem:[#allocation42_spill] sm:$0xff] }
 0x26d   : > { %13591 = vst [vmem:[#allocation315_spill] sm:$0xff] %v7278_v18  ;;  %v13600_v18 = vld [vmem:[#allocation43_spill] sm:$0xff] }
 0x270   : > { %1336 = vrot.lane.b32.xlu2 %v13592_v39, %s5479_s13 }
 0x271   : > { %1334 = vrot.lane.b32.xlu1 %v13593_v61, %s5479_s13  ;;  %1338 = vrot.lane.b32.xlu0 %v13594_v28, %s5479_s13 }
 0x272   : > { %v7286_v60 = vpop.permute.xlu2 %1206 }
 0x273   : > { %13595 = vst [vmem:[#allocation316_spill] sm:$0xff] %v7286_v60  ;;  %v7288_v58 = vpop.permute.xlu1 %1186  ;;  %v7290_v52 = vpop.permute.xlu0 %1190  ;;  %v13604_v60 = vld [vmem:[#allocation48_spill] sm:$0xff] }
 0x274   : > { %13596 = vst [vmem:[#allocation317_spill] sm:$0xff] %v7288_v58  ;;  %v13605_v58 = vld [vmem:[#allocation45_spill] sm:$0xff] }
 0x275   : > { %13597 = vst [vmem:[#allocation318_spill] sm:$0xff] %v7290_v52  ;;  %v13606_v52 = vld [vmem:[#allocation47_spill] sm:$0xff] }
 0x278   : > { %1342 = vrot.lane.b32.xlu2 %v13598_v54, %s5479_s13 }
 0x279   : > { %1340 = vrot.lane.b32.xlu1 %v13599_v57, %s5479_s13  ;;  %1344 = vrot.lane.b32.xlu0 %v13600_v18, %s5479_s13 }
 0x27a   : > { %v7298_v39 = vpop.permute.xlu2 %1276 }
 0x27b   : > { %13601 = vst [vmem:[#allocation319_spill] sm:$0xff] %v7298_v39  ;;  %v7300_v61 = vpop.permute.xlu1 %1192  ;;  %v7302_v28 = vpop.permute.xlu0 %1196  ;;  %v13610_v39 = vld [vmem:[#allocation56_spill] sm:$0xff] }
 0x27c   : > { %13602 = vst [vmem:[#allocation320_spill] sm:$0xff] %v7300_v61  ;;  %v13612_v61 = vld [vmem:[#allocation55_spill] sm:$0xff] }
 0x27d   : > { %13603 = vst [vmem:[#allocation321_spill] sm:$0xff] %v7302_v28  ;;  %v13611_v28 = vld [vmem:[#allocation49_spill] sm:$0xff] }
 0x280   : > { %1348 = vrot.lane.b32.xlu2 %v13604_v60, %s5479_s13 }
 0x281   : > { %1346 = vrot.lane.b32.xlu1 %v13605_v58, %s5479_s13  ;;  %1350 = vrot.lane.b32.xlu0 %v13606_v52, %s5479_s13 }
 0x282   : > { %v7310_v54 = vpop.permute.xlu2 %1282 }
 0x283   : > { %13607 = vst [vmem:[#allocation322_spill] sm:$0xff] %v7310_v54  ;;  %v7312_v57 = vpop.permute.xlu1 %1198  ;;  %v7314_v18 = vpop.permute.xlu0 %1202  ;;  %v13616_v54 = vld [vmem:[#allocation65_spill] sm:$0xff] }
 0x284   : > { %13608 = vst [vmem:[#allocation323_spill] sm:$0xff] %v7312_v57  ;;  %v13618_v57 = vld [vmem:[#allocation64_spill] sm:$0xff] }
 0x285   : > { %13609 = vst [vmem:[#allocation324_spill] sm:$0xff] %v7314_v18  ;;  %v13617_v18 = vld [vmem:[#allocation57_spill] sm:$0xff] }
 0x288   : > { %1354 = vrot.lane.b32.xlu2 %v13610_v39, %s5479_s13 }
 0x289   : > { %1352 = vrot.lane.b32.xlu1 %v13611_v28, %s5479_s13  ;;  %1356 = vrot.lane.b32.xlu0 %v13612_v61, %s5479_s13 }
 0x28a   : > { %v7322_v60 = vpop.permute.xlu2 %1288 }
 0x28b   : > { %13613 = vst [vmem:[#allocation325_spill] sm:$0xff] %v7322_v60  ;;  %v7324_v58 = vpop.permute.xlu1 %1204  ;;  %v7326_v52 = vpop.permute.xlu0 %1208  ;;  %v13622_v60 = vld [vmem:[#allocation74_spill] sm:$0xff] }
 0x28c   : > { %13614 = vst [vmem:[#allocation326_spill] sm:$0xff] %v7324_v58  ;;  %v13624_v58 = vld [vmem:[#allocation73_spill] sm:$0xff] }
 0x28d   : > { %13615 = vst [vmem:[#allocation327_spill] sm:$0xff] %v7326_v52  ;;  %v13623_v52 = vld [vmem:[#allocation66_spill] sm:$0xff] }
 0x290   : > { %1360 = vrot.lane.b32.xlu2 %v13616_v54, %s5479_s13 }
 0x291   : > { %1358 = vrot.lane.b32.xlu1 %v13617_v18, %s5479_s13  ;;  %1362 = vrot.lane.b32.xlu0 %v13618_v57, %s5479_s13 }
 0x292   : > { %v7334_v39 = vpop.permute.xlu2 %1294 }
 0x293   : > { %13619 = vst [vmem:[#allocation328_spill] sm:$0xff] %v7334_v39  ;;  %v7336_v28 = vpop.permute.xlu1 %1210  ;;  %v7338_v61 = vpop.permute.xlu0 %1278  ;;  %v13628_v39 = vld [vmem:[#allocation84_spill] sm:$0xff] }
 0x294   : > { %13620 = vst [vmem:[#allocation329_spill] sm:$0xff] %v7336_v28  ;;  %v13629_v28 = vld [vmem:[#allocation75_spill] sm:$0xff] }
 0x295   : > { %13621 = vst [vmem:[#allocation330_spill] sm:$0xff] %v7338_v61  ;;  %v13630_v61 = vld [vmem:[#allocation83_spill] sm:$0xff] }
 0x298   : > { %1366 = vrot.lane.b32.xlu2 %v13622_v60, %s5479_s13 }
 0x299   : > { %1364 = vrot.lane.b32.xlu1 %v13623_v52, %s5479_s13  ;;  %1368 = vrot.lane.b32.xlu0 %v13624_v58, %s5479_s13 }
 0x29a   : > { %v7346_v54 = vpop.permute.xlu2 %1300 }
 0x29b   : > { %13625 = vst [vmem:[#allocation331_spill] sm:$0xff] %v7346_v54  ;;  %v7348_v18 = vpop.permute.xlu1 %1280  ;;  %v7350_v57 = vpop.permute.xlu0 %1284  ;;  %v13634_v54 = vld [vmem:[#allocation94_spill] sm:$0xff] }
 0x29c   : > { %13626 = vst [vmem:[#allocation332_spill] sm:$0xff] %v7348_v18  ;;  %v13636_v18 = vld [vmem:[#allocation93_spill] sm:$0xff] }
 0x29d   : > { %13627 = vst [vmem:[#allocation333_spill] sm:$0xff] %v7350_v57  ;;  %v13635_v57 = vld [vmem:[#allocation85_spill] sm:$0xff] }
 0x2a0   : > { %1372 = vrot.lane.b32.xlu2 %v13628_v39, %s5479_s13 }
 0x2a1   : > { %1370 = vrot.lane.b32.xlu1 %v13629_v28, %s5479_s13  ;;  %1374 = vrot.lane.b32.xlu0 %v13630_v61, %s5479_s13 }
 0x2a2   : > { %v7358_v60 = vpop.permute.xlu2 %1306 }
 0x2a3   : > { %13631 = vst [vmem:[#allocation334_spill] sm:$0xff] %v7358_v60  ;;  %v7360_v52 = vpop.permute.xlu1 %1286  ;;  %v7362_v58 = vpop.permute.xlu0 %1290  ;;  %v13640_v60 = vld [vmem:[#allocation103_spill] sm:$0xff] }
 0x2a4   : > { %13632 = vst [vmem:[#allocation335_spill] sm:$0xff] %v7360_v52  ;;  %v13641_v52 = vld [vmem:[#allocation95_spill] sm:$0xff] }
 0x2a5   : > { %13633 = vst [vmem:[#allocation336_spill] sm:$0xff] %v7362_v58  ;;  %v13642_v58 = vld [vmem:[#allocation102_spill] sm:$0xff] }
 0x2a8   : > { %1378 = vrot.lane.b32.xlu2 %v13634_v54, %s5479_s13 }
 0x2a9   : > { %1376 = vrot.lane.b32.xlu1 %v13635_v57, %s5479_s13  ;;  %1380 = vrot.lane.b32.xlu0 %v13636_v18, %s5479_s13 }
 0x2aa   : > { %v7370_v39 = vpop.permute.xlu2 %1312 }
 0x2ab   : > { %13637 = vst [vmem:[#allocation337_spill] sm:$0xff] %v7370_v39  ;;  %v7372_v28 = vpop.permute.xlu1 %1292  ;;  %v7374_v61 = vpop.permute.xlu0 %1296  ;;  %v13646_v39 = vld [vmem:[#allocation112_spill] sm:$0xff] }
 0x2ac   : > { %13638 = vst [vmem:[#allocation338_spill] sm:$0xff] %v7372_v28  ;;  %v13648_v28 = vld [vmem:[#allocation111_spill] sm:$0xff] }
 0x2ad   : > { %13639 = vst [vmem:[#allocation339_spill] sm:$0xff] %v7374_v61  ;;  %v13647_v61 = vld [vmem:[#allocation104_spill] sm:$0xff] }
 0x2b0   : > { %1384 = vrot.lane.b32.xlu2 %v13640_v60, %s5479_s13 }
 0x2b1   : > { %1382 = vrot.lane.b32.xlu1 %v13641_v52, %s5479_s13  ;;  %1386 = vrot.lane.b32.xlu0 %v13642_v58, %s5479_s13 }
 0x2b2   : > { %v7382_v54 = vpop.permute.xlu2 %1318 }
 0x2b3   : > { %13643 = vst [vmem:[#allocation340_spill] sm:$0xff] %v7382_v54  ;;  %v7384_v57 = vpop.permute.xlu1 %1298  ;;  %v7386_v18 = vpop.permute.xlu0 %1302  ;;  %v13652_v54 = vld [vmem:[#allocation120_spill] sm:$0xff] }
 0x2b4   : > { %13644 = vst [vmem:[#allocation341_spill] sm:$0xff] %v7384_v57  ;;  %v13653_v57 = vld [vmem:[#allocation113_spill] sm:$0xff] }
 0x2b5   : > { %13645 = vst [vmem:[#allocation342_spill] sm:$0xff] %v7386_v18 }
 0x2b8   : > { %1390 = vrot.lane.b32.xlu2 %v13646_v39, %s5479_s13  ;;  %v13654_v39 = vld [vmem:[#allocation119_spill] sm:$0xff] }
 0x2b9   : > { %1388 = vrot.lane.b32.xlu1 %v13647_v61, %s5479_s13  ;;  %1392 = vrot.lane.b32.xlu0 %v13648_v28, %s5479_s13 }
 0x2ba   : > { %v7394_v60 = vpop.permute.xlu2 %1324 }
 0x2bb   : > { %13649 = vst [vmem:[#allocation343_spill] sm:$0xff] %v7394_v60  ;;  %v7396_v52 = vpop.permute.xlu1 %1304  ;;  %v7398_v58 = vpop.permute.xlu0 %1308  ;;  %v13658_v60 = vld [vmem:[#allocation121_spill] sm:$0xff] }
 0x2bc   : > { %13650 = vst [vmem:[#allocation344_spill] sm:$0xff] %v7396_v52 }
 0x2bd   : > { %13651 = vst [vmem:[#allocation345_spill] sm:$0xff] %v7398_v58 }
 0x2c0   : > { %1396 = vrot.lane.b32.xlu2 %v13652_v54, %s5479_s13 }
 0x2c1   : > { %1394 = vrot.lane.b32.xlu1 %v13653_v57, %s5479_s13  ;;  %1398 = vrot.lane.b32.xlu0 %v13654_v39, %s5479_s13 }
 0x2c2   : > { %v7406_v18 = vpop.permute.xlu2 %1330 }
 0x2c3   : > { %13655 = vst [vmem:[#allocation120_spill] sm:$0xff] %v7406_v18  ;;  %v7408_v61 = vpop.permute.xlu1 %1310  ;;  %v7410_v28 = vpop.permute.xlu0 %1314 }
 0x2c4   : > { %13656 = vst [vmem:[#allocation346_spill] sm:$0xff] %v7408_v61 }
 0x2c5   : > { %13657 = vst [vmem:[#allocation347_spill] sm:$0xff] %v7410_v28 }
 0x2c8   : > { %1402 = vrot.lane.b32.xlu2 %v6267_v23, %s5479_s13 }
 0x2c9   : > { %1400 = vrot.lane.b32.xlu1 %v13658_v60, %s5479_s13  ;;  %1468 = vrot.lane.b32.xlu0 %v6270_v49, %s5480_s14  ;;  %s227_s13 = scalar_lea.vmem [#allocation4], %s12403_s26 }
 0x2ca   : > { %v7418_v58 = vpop.permute.xlu2 %1336 }
 0x2cb   : > { %13659 = vst [vmem:[#allocation121_spill] sm:$0xff] %v7418_v58  ;;  %v7420_v57 = vpop.permute.xlu1 %1316  ;;  %v7422_v39 = vpop.permute.xlu0 %1320 }
 0x2cc   : > { %13660 = vst [vmem:[#allocation348_spill] sm:$0xff] %v7420_v57 }
 0x2cd   : > { %13661 = vst [vmem:[#allocation349_spill] sm:$0xff] %v7422_v39 }
 0x2d0   : > { %1472 = vrot.lane.b32.xlu2 %v6288_v22, %s5480_s14 }
 0x2d1   : > { %1470 = vrot.lane.b32.xlu1 %v6291_v14, %s5480_s14  ;;  %1474 = vrot.lane.b32.xlu0 %v6294_v21, %s5480_s14 }
 0x2d2   : > { %v7430_v28 = vpop.permute.xlu2 %1342 }
 0x2d3   : > { %13662 = vst [vmem:[#allocation350_spill] sm:$0xff] %v7430_v28  ;;  %v7432_v18 = vpop.permute.xlu1 %1322  ;;  %v7434_v61 = vpop.permute.xlu0 %1326 }
 0x2d4   : > { %13663 = vst [vmem:[#allocation351_spill] sm:$0xff] %v7432_v18 }
 0x2d5   : > { %13664 = vst [vmem:[#allocation352_spill] sm:$0xff] %v7434_v61 }
 0x2d8   : > { %1478 = vrot.lane.b32.xlu2 %v6313_v29, %s5480_s14 }
 0x2d9   : > { %1476 = vrot.lane.b32.xlu1 %v6316_v16, %s5480_s14  ;;  %1480 = vrot.lane.b32.xlu0 %v6319_v13, %s5480_s14 }
 0x2da   : > { %v7442_v39 = vpop.permute.xlu2 %1348 }
 0x2db   : > { %13665 = vst [vmem:[#allocation353_spill] sm:$0xff] %v7442_v39  ;;  %v7444_v57 = vpop.permute.xlu1 %1328  ;;  %v7446_v58 = vpop.permute.xlu0 %1332 }
 0x2dc   : > { %13666 = vst [vmem:[#allocation354_spill] sm:$0xff] %v7444_v57 }
 0x2dd   : > { %13667 = vst [vmem:[#allocation355_spill] sm:$0xff] %v7446_v58 }
 0x2e0   : > { %1484 = vrot.lane.b32.xlu2 %v6338_v9, %s5480_s14 }
 0x2e1   : > { %1482 = vrot.lane.b32.xlu1 %v6341_v7, %s5480_s14  ;;  %1486 = vrot.lane.b32.xlu0 %v6344_v26, %s5480_s14 }
 0x2e2   : > { %v7454_v28 = vpop.permute.xlu2 %1354 }
 0x2e3   : > { %13668 = vst [vmem:[#allocation356_spill] sm:$0xff] %v7454_v28  ;;  %v7456_v61 = vpop.permute.xlu1 %1334  ;;  %v7458_v18 = vpop.permute.xlu0 %1338 }
 0x2e4   : > { %13669 = vst [vmem:[#allocation357_spill] sm:$0xff] %v7456_v61 }
 0x2e5   : > { %13670 = vst [vmem:[#allocation358_spill] sm:$0xff] %v7458_v18 }
 0x2e8   : > { %1490 = vrot.lane.b32.xlu2 %v6363_v17, %s5480_s14 }
 0x2e9   : > { %1488 = vrot.lane.b32.xlu1 %v6366_v24, %s5480_s14  ;;  %1492 = vrot.lane.b32.xlu0 %v6369_v36, %s5480_s14 }
 0x2ea   : > { %v7466_v39 = vpop.permute.xlu2 %1360 }
 0x2eb   : > { %13671 = vst [vmem:[#allocation359_spill] sm:$0xff] %v7466_v39  ;;  %v7468_v57 = vpop.permute.xlu1 %1340  ;;  %v7470_v26 = vpop.permute.xlu0 %1344 }
 0x2ec   : > { %13672 = vst [vmem:[#allocation360_spill] sm:$0xff] %v7468_v57 }
 0x2ed   : > { %13673 = vst [vmem:[#allocation361_spill] sm:$0xff] %v7470_v26 }
 0x2f0   : > { %1496 = vrot.lane.b32.xlu2 %v6387_v4, %s5480_s14 }
 0x2f1   : > { %1494 = vrot.lane.b32.xlu1 %v6390_v2, %s5480_s14  ;;  %1498 = vrot.lane.b32.xlu0 %v6393_v35, %s5480_s14 }
 0x2f2   : > { %v7478_v28 = vpop.permute.xlu2 %1366 }
 0x2f3   : > { %13674 = vst [vmem:[#allocation362_spill] sm:$0xff] %v7478_v28  ;;  %v7480_v17 = vpop.permute.xlu1 %1346  ;;  %v7482_v36 = vpop.permute.xlu0 %1350 }
 0x2f4   : > { %13675 = vst [vmem:[#allocation363_spill] sm:$0xff] %v7480_v17 }
 0x2f5   : > { %13676 = vst [vmem:[#allocation364_spill] sm:$0xff] %v7482_v36 }
 0x2f8   : > { %1502 = vrot.lane.b32.xlu2 %v6412_v27, %s5480_s14 }
 0x2f9   : > { %1500 = vrot.lane.b32.xlu1 %v6415_v25, %s5480_s14  ;;  %1504 = vrot.lane.b32.xlu0 %v6418_v56, %s5480_s14 }
 0x2fa   : > { %v7490_v26 = vpop.permute.xlu2 %1372 }
 0x2fb   : > { %13677 = vst [vmem:[#allocation365_spill] sm:$0xff] %v7490_v26  ;;  %v7492_v39 = vpop.permute.xlu1 %1352  ;;  %v7494_v57 = vpop.permute.xlu0 %1356  ;;  %v13684_v26 = vld [vmem:[#allocation161_spill] sm:$0xff] }
 0x2fc   : > { %13678 = vst [vmem:[#allocation366_spill] sm:$0xff] %v7492_v39 }
 0x2fd   : > { %13679 = vst [vmem:[#allocation367_spill] sm:$0xff] %v7494_v57  ;;  %v13683_v57 = vld [vmem:[#allocation160_spill] sm:$0xff] }
 0x300   : > { %1508 = vrot.lane.b32.xlu2 %v6437_v44, %s5480_s14 }
 0x301   : > { %1506 = vrot.lane.b32.xlu1 %v6440_v46, %s5480_s14  ;;  %1510 = vrot.lane.b32.xlu0 %v6443_v11, %s5480_s14  ;;  %v13742_v46 = vld [vmem:[#allocation200_spill] sm:$0xff] }
 0x302   : > { %v7502_v36 = vpop.permute.xlu2 %1378 }
 0x303   : > { %13680 = vst [vmem:[#allocation368_spill] sm:$0xff] %v7502_v36  ;;  %v7504_v17 = vpop.permute.xlu1 %1358  ;;  %v7506_v28 = vpop.permute.xlu0 %1362  ;;  %v13688_v36 = vld [vmem:[#allocation165_spill] sm:$0xff] }
 0x304   : > { %13681 = vst [vmem:[#allocation369_spill] sm:$0xff] %v7504_v17  ;;  %v13690_v17 = vld [vmem:[#allocation167_spill] sm:$0xff] }
 0x305   : > { %13682 = vst [vmem:[#allocation370_spill] sm:$0xff] %v7506_v28  ;;  %v13689_v28 = vld [vmem:[#allocation166_spill] sm:$0xff] }
 0x308   : > { %1514 = vrot.lane.b32.xlu2 %v6462_v8, %s5480_s14 }
 0x309   : > { %1512 = vrot.lane.b32.xlu1 %v13683_v57, %s5480_s14  ;;  %1516 = vrot.lane.b32.xlu0 %v13684_v26, %s5480_s14 }
 0x30a   : > { %v7514_v39 = vpop.permute.xlu2 %1384 }
 0x30b   : > { %13685 = vst [vmem:[#allocation371_spill] sm:$0xff] %v7514_v39  ;;  %v7516_v44 = vpop.permute.xlu1 %1364  ;;  %v7518_v11 = vpop.permute.xlu0 %1368  ;;  %v13694_v39 = vld [vmem:[#allocation171_spill] sm:$0xff] }
 0x30c   : > { %13686 = vst [vmem:[#allocation372_spill] sm:$0xff] %v7516_v44  ;;  %v13695_v44 = vld [vmem:[#allocation172_spill] sm:$0xff] }
 0x30d   : > { %13687 = vst [vmem:[#allocation373_spill] sm:$0xff] %v7518_v11 }
 0x310   : > { %1520 = vrot.lane.b32.xlu2 %v13688_v36, %s5480_s14  ;;  %v13696_v36 = vld [vmem:[#allocation173_spill] sm:$0xff] }
 0x311   : > { %1518 = vrot.lane.b32.xlu1 %v13689_v28, %s5480_s14  ;;  %1522 = vrot.lane.b32.xlu0 %v13690_v17, %s5480_s14 }
 0x312   : > { %v7526_v8 = vpop.permute.xlu2 %1390 }
 0x313   : > { %13691 = vst [vmem:[#allocation374_spill] sm:$0xff] %v7526_v8  ;;  %v7528_v57 = vpop.permute.xlu1 %1370  ;;  %v7530_v26 = vpop.permute.xlu0 %1374  ;;  %v13700_v8 = vld [vmem:[#allocation177_spill] sm:$0xff] }
 0x314   : > { %13692 = vst [vmem:[#allocation375_spill] sm:$0xff] %v7528_v57 }
 0x315   : > { %13693 = vst [vmem:[#allocation376_spill] sm:$0xff] %v7530_v26  ;;  %v13701_v26 = vld [vmem:[#allocation178_spill] sm:$0xff] }
 0x318   : > { %1526 = vrot.lane.b32.xlu2 %v13694_v39, %s5480_s14  ;;  %v13702_v39 = vld [vmem:[#allocation179_spill] sm:$0xff] }
 0x319   : > { %1524 = vrot.lane.b32.xlu1 %v13695_v44, %s5480_s14  ;;  %1528 = vrot.lane.b32.xlu0 %v13696_v36, %s5480_s14 }
 0x31a   : > { %v7538_v35 = vpop.permute.xlu2 %1396 }
 0x31b   : > { %13697 = vst [vmem:[#allocation377_spill] sm:$0xff] %v7538_v35  ;;  %v7540_v28 = vpop.permute.xlu1 %1376  ;;  %v7542_v17 = vpop.permute.xlu0 %1380  ;;  %v13706_v35 = vld [vmem:[#allocation183_spill] sm:$0xff] }
 0x31c   : > { %13698 = vst [vmem:[#allocation378_spill] sm:$0xff] %v7540_v28 }
 0x31d   : > { %13699 = vst [vmem:[#allocation379_spill] sm:$0xff] %v7542_v17  ;;  %v13707_v17 = vld [vmem:[#allocation184_spill] sm:$0xff] }
 0x320   : > { %1532 = vrot.lane.b32.xlu2 %v13700_v8, %s5480_s14  ;;  %v13708_v8 = vld [vmem:[#allocation185_spill] sm:$0xff] }
 0x321   : > { %1530 = vrot.lane.b32.xlu1 %v13701_v26, %s5480_s14  ;;  %1534 = vrot.lane.b32.xlu0 %v13702_v39, %s5480_s14 }
 0x322   : > { %v7550_v57 = vpop.permute.xlu2 %1402 }
 0x323   : > { %13703 = vst [vmem:[#allocation380_spill] sm:$0xff] %v7550_v57  ;;  %v7552_v44 = vpop.permute.xlu1 %1382  ;;  %v7554_v36 = vpop.permute.xlu0 %1386  ;;  %v13712_v57 = vld [vmem:[#allocation188_spill] sm:$0xff] }
 0x324   : > { %13704 = vst [vmem:[#allocation381_spill] sm:$0xff] %v7552_v44 }
 0x325   : > { %13705 = vst [vmem:[#allocation382_spill] sm:$0xff] %v7554_v36  ;;  %v13713_v36 = vld [vmem:[#allocation189_spill] sm:$0xff] }
 0x328   : > { %1538 = vrot.lane.b32.xlu2 %v13706_v35, %s5480_s14  ;;  %v13714_v35 = vld [vmem:[#allocation190_spill] sm:$0xff] }
 0x329   : > { %1536 = vrot.lane.b32.xlu1 %v13707_v17, %s5480_s14  ;;  %1540 = vrot.lane.b32.xlu0 %v13708_v8, %s5480_s14 }
 0x32a   : > { %v7562_v28 = vpop.permute.xlu2 %1472 }
 0x32b   : > { %13709 = vst [vmem:[#allocation383_spill] sm:$0xff] %v7562_v28  ;;  %v7564_v26 = vpop.permute.xlu1 %1388  ;;  %v7566_v39 = vpop.permute.xlu0 %1392  ;;  %v13718_v28 = vld [vmem:[#allocation58_spill] sm:$0xff] }
 0x32c   : > { %13710 = vst [vmem:[#allocation384_spill] sm:$0xff] %v7564_v26  ;;  %v13719_v26 = vld [vmem:[#allocation191_spill] sm:$0xff] }
 0x32d   : > { %13711 = vst [vmem:[#allocation385_spill] sm:$0xff] %v7566_v39 }
 0x330   : > { %1544 = vrot.lane.b32.xlu2 %v13712_v57, %s5480_s14  ;;  %v13720_v57 = vld [vmem:[#allocation192_spill] sm:$0xff] }
 0x331   : > { %1542 = vrot.lane.b32.xlu1 %v13713_v36, %s5480_s14  ;;  %1546 = vrot.lane.b32.xlu0 %v13714_v35, %s5480_s14 }
 0x332   : > { %v7574_v44 = vpop.permute.xlu2 %1478 }
 0x333   : > { %13715 = vst [vmem:[#allocation386_spill] sm:$0xff] %v7574_v44  ;;  %v7576_v17 = vpop.permute.xlu1 %1394  ;;  %v7578_v8 = vpop.permute.xlu0 %1398  ;;  %v13724_v44 = vld [vmem:[#allocation67_spill] sm:$0xff] }
 0x334   : > { %13716 = vst [vmem:[#allocation387_spill] sm:$0xff] %v7576_v17 }
 0x335   : > { %13717 = vst [vmem:[#allocation388_spill] sm:$0xff] %v7578_v8  ;;  %v13725_v8 = vld [vmem:[#allocation193_spill] sm:$0xff] }
 0x338   : > { %1550 = vrot.lane.b32.xlu2 %v13718_v28, %s5480_s14  ;;  %v13726_v28 = vld [vmem:[#allocation194_spill] sm:$0xff] }
 0x339   : > { %1548 = vrot.lane.b32.xlu1 %v13719_v26, %s5480_s14  ;;  %1552 = vrot.lane.b32.xlu0 %v13720_v57, %s5480_s14 }
 0x33a   : > { %v7586_v39 = vpop.permute.xlu2 %1484 }
 0x33b   : > { %13721 = vst [vmem:[#allocation389_spill] sm:$0xff] %v7586_v39  ;;  %v7588_v36 = vpop.permute.xlu1 %1400  ;;  %v7590_v35 = vpop.permute.xlu0 %1468  ;;  %v13730_v39 = vld [vmem:[#allocation76_spill] sm:$0xff] }
 0x33c   : > { %13722 = vst [vmem:[#allocation390_spill] sm:$0xff] %v7588_v36  ;;  %v13731_v36 = vld [vmem:[#allocation195_spill] sm:$0xff] }
 0x33d   : > { %13723 = vst [vmem:[#allocation391_spill] sm:$0xff] %v7590_v35 }
 0x340   : > { %1556 = vrot.lane.b32.xlu2 %v13724_v44, %s5480_s14  ;;  %v13732_v44 = vld [vmem:[#allocation196_spill] sm:$0xff] }
 0x341   : > { %1554 = vrot.lane.b32.xlu1 %v13725_v8, %s5480_s14  ;;  %1558 = vrot.lane.b32.xlu0 %v13726_v28, %s5480_s14 }
 0x342   : > { %v7598_v17 = vpop.permute.xlu2 %1490 }
 0x343   : > { %13727 = vst [vmem:[#allocation392_spill] sm:$0xff] %v7598_v17  ;;  %v7600_v26 = vpop.permute.xlu1 %1470  ;;  %v7602_v57 = vpop.permute.xlu0 %1474  ;;  %v13736_v17 = vld [vmem:[#allocation197_spill] sm:$0xff] }
 0x344   : > { %13728 = vst [vmem:[#allocation393_spill] sm:$0xff] %v7600_v26 }
 0x345   : > { %13729 = vst [vmem:[#allocation394_spill] sm:$0xff] %v7602_v57  ;;  %v13737_v57 = vld [vmem:[#allocation198_spill] sm:$0xff] }
 0x348   : > { %1562 = vrot.lane.b32.xlu2 %v13730_v39, %s5480_s14  ;;  %v13738_v39 = vld [vmem:[#allocation199_spill] sm:$0xff] }
 0x349   : > { %1560 = vrot.lane.b32.xlu1 %v13731_v36, %s5480_s14  ;;  %1564 = vrot.lane.b32.xlu0 %v13732_v44, %s5480_s14 }
 0x34a   : > { %v7610_v35 = vpop.permute.xlu2 %1496 }
 0x34b   : > { %13733 = vst [vmem:[#allocation395_spill] sm:$0xff] %v7610_v35  ;;  %v7612_v8 = vpop.permute.xlu1 %1476  ;;  %v7614_v28 = vpop.permute.xlu0 %1480 }
 0x34c   : > { %13734 = vst [vmem:[#allocation396_spill] sm:$0xff] %v7612_v8  ;;  %v13744_v8 = vld [vmem:[#allocation202_spill] sm:$0xff] }
 0x34d   : > { %13735 = vst [vmem:[#allocation397_spill] sm:$0xff] %v7614_v28  ;;  %v13743_v28 = vld [vmem:[#allocation201_spill] sm:$0xff] }
 0x350   : > { %1568 = vrot.lane.b32.xlu2 %v13736_v17, %s5480_s14 }
 0x351   : > { %1566 = vrot.lane.b32.xlu1 %v13737_v57, %s5480_s14  ;;  %1570 = vrot.lane.b32.xlu0 %v13738_v39, %s5480_s14 }
 0x352   : > { %v7622_v26 = vpop.permute.xlu2 %1502 }
 0x353   : > { %13739 = vst [vmem:[#allocation398_spill] sm:$0xff] %v7622_v26  ;;  %v7624_v36 = vpop.permute.xlu1 %1482  ;;  %v7626_v44 = vpop.permute.xlu0 %1486  ;;  %v13748_v26 = vld [vmem:[#allocation105_spill] sm:$0xff] }
 0x354   : > { %13740 = vst [vmem:[#allocation399_spill] sm:$0xff] %v7624_v36 }
 0x355   : > { %13741 = vst [vmem:[#allocation400_spill] sm:$0xff] %v7626_v44  ;;  %v13749_v44 = vld [vmem:[#allocation203_spill] sm:$0xff] }
 0x358   : > { %1574 = vrot.lane.b32.xlu2 %v13742_v46, %s5480_s14  ;;  %v13750_v46 = vld [vmem:[#allocation204_spill] sm:$0xff] }
 0x359   : > { %1572 = vrot.lane.b32.xlu1 %v13743_v28, %s5480_s14  ;;  %1576 = vrot.lane.b32.xlu0 %v13744_v8, %s5480_s14 }
 0x35a   : > { %v7634_v17 = vpop.permute.xlu2 %1508 }
 0x35b   : > { %13745 = vst [vmem:[#allocation401_spill] sm:$0xff] %v7634_v17  ;;  %v7636_v57 = vpop.permute.xlu1 %1488  ;;  %v7638_v39 = vpop.permute.xlu0 %1492  ;;  %v13754_v17 = vld [vmem:[#allocation206_spill] sm:$0xff] }
 0x35c   : > { %13746 = vst [vmem:[#allocation402_spill] sm:$0xff] %v7636_v57  ;;  %v13755_v57 = vld [vmem:[#allocation207_spill] sm:$0xff] }
 0x35d   : > { %13747 = vst [vmem:[#allocation403_spill] sm:$0xff] %v7638_v39 }
 0x360   : > { %1580 = vrot.lane.b32.xlu2 %v13748_v26, %s5480_s14  ;;  %v13756_v26 = vld [vmem:[#allocation208_spill] sm:$0xff] }
 0x361   : > { %1578 = vrot.lane.b32.xlu1 %v13749_v44, %s5480_s14  ;;  %1582 = vrot.lane.b32.xlu0 %v13750_v46, %s5480_s14 }
 0x362   : > { %v7646_v36 = vpop.permute.xlu2 %1514 }
 0x363   : > { %13751 = vst [vmem:[#allocation404_spill] sm:$0xff] %v7646_v36  ;;  %v7648_v28 = vpop.permute.xlu1 %1494  ;;  %v7650_v8 = vpop.permute.xlu0 %1498 }
 0x364   : > { %13752 = vst [vmem:[#allocation405_spill] sm:$0xff] %v7648_v28 }
 0x365   : > { %13753 = vst [vmem:[#allocation406_spill] sm:$0xff] %v7650_v8 }
 0x368   : > { %1586 = vrot.lane.b32.xlu2 %v13754_v17, %s5480_s14 }
 0x369   : > { %1584 = vrot.lane.b32.xlu1 %v13755_v57, %s5480_s14  ;;  %1588 = vrot.lane.b32.xlu0 %v13756_v26, %s5480_s14 }
 0x36a   : > { %v7658_v4 = vpop.permute.xlu2 %1520 }
 0x36b   : > { %13757 = vst [vmem:[#allocation407_spill] sm:$0xff] %v7658_v4  ;;  %v7660_v44 = vpop.permute.xlu1 %1500  ;;  %v7662_v46 = vpop.permute.xlu0 %1504  ;;  %v13763_v4 = vld [vmem:[#allocation216_spill] sm:$0xff] }
 0x36c   : > { %13758 = vst [vmem:[#allocation408_spill] sm:$0xff] %v7660_v44  ;;  %v13787_v44 = vld [vmem:[#allocation240_spill] sm:$0xff] }
 0x36d   : > { %13759 = vst [vmem:[#allocation409_spill] sm:$0xff] %v7662_v46  ;;  %v13769_v46 = vld [vmem:[#allocation222_spill] sm:$0xff] }
 0x370   : > { %1592 = vrot.lane.b32.xlu2 %v6783_v41, %s5480_s14  ;;  %v13764_v41 = vld [vmem:[#allocation217_spill] sm:$0xff] }
 0x371   : > { %1590 = vrot.lane.b32.xlu1 %v6786_v51, %s5480_s14  ;;  %1594 = vrot.lane.b32.xlu0 %v6789_v6, %s5480_s14  ;;  %s12416_s14 = sshll.u32 %s227_s13, 4  ;;  %s4903_s14 = int_to_ptr.vmem [resolvable:$true] %s12416_s14 }
 0x372   : > { %v7670_v17 = vpop.permute.xlu2 %1526 }
 0x373   : > { %13760 = vst [vmem:[#allocation410_spill] sm:$0xff] %v7670_v17  ;;  %v7672_v36 = vpop.permute.xlu1 %1506  ;;  %v7674_v26 = vpop.permute.xlu0 %1510 }
 0x374   : > { %13761 = vst [vmem:[#allocation411_spill] sm:$0xff] %v7672_v36  ;;  %v13768_v36 = vld [vmem:[#allocation221_spill] sm:$0xff] }
 0x375   : > { %13762 = vst [vmem:[#allocation412_spill] sm:$0xff] %v7674_v26 }
 0x378   : > { %1662 = vrot.lane.b32.xlu2 %v6804_v3, %s5481_s15  ;;  %v13770_v3 = vld [vmem:[#allocation223_spill] sm:$0xff] }
 0x379   : > { %1660 = vrot.lane.b32.xlu1 %v13763_v4, %s5481_s15  ;;  %1664 = vrot.lane.b32.xlu0 %v13764_v41, %s5481_s15 }
 0x37a   : > { %v7682_v51 = vpop.permute.xlu2 %1532 }
 0x37b   : > { %13765 = vst [vmem:[#allocation216_spill] sm:$0xff] %v7682_v51  ;;  %v7684_v57 = vpop.permute.xlu1 %1512  ;;  %v7686_v6 = vpop.permute.xlu0 %1516  ;;  %v13774_v51 = vld [vmem:[#allocation227_spill] sm:$0xff] }
 0x37c   : > { %13766 = vst [vmem:[#allocation217_spill] sm:$0xff] %v7684_v57  ;;  %v13775_v57 = vld [vmem:[#allocation228_spill] sm:$0xff] }
 0x37d   : > { %13767 = vst [vmem:[#allocation413_spill] sm:$0xff] %v7686_v6 }
 0x380   : > { %1668 = vrot.lane.b32.xlu2 %v13768_v36, %s5481_s15  ;;  %v13776_v36 = vld [vmem:[#allocation229_spill] sm:$0xff] }
 0x381   : > { %1666 = vrot.lane.b32.xlu1 %v13769_v46, %s5481_s15  ;;  %1670 = vrot.lane.b32.xlu0 %v13770_v3, %s5481_s15 }
 0x382   : > { %v7694_v26 = vpop.permute.xlu2 %1538 }
 0x383   : > { %13771 = vst [vmem:[#allocation221_spill] sm:$0xff] %v7694_v26  ;;  %v7696_v4 = vpop.permute.xlu1 %1518  ;;  %v7698_v41 = vpop.permute.xlu0 %1522  ;;  %v13780_v26 = vld [vmem:[#allocation233_spill] sm:$0xff] }
 0x384   : > { %13772 = vst [vmem:[#allocation222_spill] sm:$0xff] %v7696_v4  ;;  %v13781_v4 = vld [vmem:[#allocation234_spill] sm:$0xff] }
 0x385   : > { %13773 = vst [vmem:[#allocation223_spill] sm:$0xff] %v7698_v41 }
 0x388   : > { %1674 = vrot.lane.b32.xlu2 %v13774_v51, %s5481_s15  ;;  %v13782_v51 = vld [vmem:[#allocation235_spill] sm:$0xff] }
 0x389   : > { %1672 = vrot.lane.b32.xlu1 %v13775_v57, %s5481_s15  ;;  %1676 = vrot.lane.b32.xlu0 %v13776_v36, %s5481_s15 }
 0x38a   : > { %v7706_v6 = vpop.permute.xlu2 %1544 }
 0x38b   : > { %13777 = vst [vmem:[#allocation227_spill] sm:$0xff] %v7706_v6  ;;  %v7708_v46 = vpop.permute.xlu1 %1524  ;;  %v7710_v3 = vpop.permute.xlu0 %1528  ;;  %v13786_v6 = vld [vmem:[#allocation239_spill] sm:$0xff] }
 0x38c   : > { %13778 = vst [vmem:[#allocation228_spill] sm:$0xff] %v7708_v46 }
 0x38d   : > { %13779 = vst [vmem:[#allocation229_spill] sm:$0xff] %v7710_v3 }
 0x390   : > { %1680 = vrot.lane.b32.xlu2 %v13780_v26, %s5481_s15  ;;  %v13788_v26 = vld [vmem:[#allocation241_spill] sm:$0xff] }
 0x391   : > { %1678 = vrot.lane.b32.xlu1 %v13781_v4, %s5481_s15  ;;  %1682 = vrot.lane.b32.xlu0 %v13782_v51, %s5481_s15 }
 0x392   : > { %v7718_v41 = vpop.permute.xlu2 %1550 }
 0x393   : > { %13783 = vst [vmem:[#allocation233_spill] sm:$0xff] %v7718_v41  ;;  %v7720_v57 = vpop.permute.xlu1 %1530  ;;  %v7722_v36 = vpop.permute.xlu0 %1534  ;;  %v13792_v41 = vld [vmem:[#allocation245_spill] sm:$0xff] }
 0x394   : > { %13784 = vst [vmem:[#allocation234_spill] sm:$0xff] %v7720_v57 }
 0x395   : > { %13785 = vst [vmem:[#allocation235_spill] sm:$0xff] %v7722_v36  ;;  %v13793_v36 = vld [vmem:[#allocation246_spill] sm:$0xff] }
 0x398   : > { %1686 = vrot.lane.b32.xlu2 %v13786_v6, %s5481_s15  ;;  %v13794_v6 = vld [vmem:[#allocation247_spill] sm:$0xff] }
 0x399   : > { %1684 = vrot.lane.b32.xlu1 %v13787_v44, %s5481_s15  ;;  %1688 = vrot.lane.b32.xlu0 %v13788_v26, %s5481_s15 }
 0x39a   : > { %v7730_v11 = vpop.permute.xlu2 %1556 }
 0x39b   : > { %13789 = vst [vmem:[#allocation239_spill] sm:$0xff] %v7730_v11  ;;  %v7732_v4 = vpop.permute.xlu1 %1536  ;;  %v7734_v51 = vpop.permute.xlu0 %1540  ;;  %v13798_v11 = vld [vmem:[#allocation251_spill] sm:$0xff] }
 0x39c   : > { %13790 = vst [vmem:[#allocation240_spill] sm:$0xff] %v7732_v4  ;;  %v13799_v4 = vld [vmem:[#allocation252_spill] sm:$0xff] }
 0x39d   : > { %13791 = vst [vmem:[#allocation241_spill] sm:$0xff] %v7734_v51 }
 0x3a0   : > { %1692 = vrot.lane.b32.xlu2 %v13792_v41, %s5481_s15  ;;  %v13800_v41 = vld [vmem:[#allocation253_spill] sm:$0xff] }
 0x3a1   : > { %1690 = vrot.lane.b32.xlu1 %v13793_v36, %s5481_s15  ;;  %1694 = vrot.lane.b32.xlu0 %v13794_v6, %s5481_s15 }
 0x3a2   : > { %v7742_v2 = vpop.permute.xlu2 %1562 }
 0x3a3   : > { %13795 = vst [vmem:[#allocation245_spill] sm:$0xff] %v7742_v2  ;;  %v7744_v44 = vpop.permute.xlu1 %1542  ;;  %v7746_v26 = vpop.permute.xlu0 %1546  ;;  %v13804_v2 = vld [vmem:[#allocation257_spill] sm:$0xff] }
 0x3a4   : > { %13796 = vst [vmem:[#allocation246_spill] sm:$0xff] %v7744_v44  ;;  %v13805_v44 = vld [vmem:[#allocation258_spill] sm:$0xff] }
 0x3a5   : > { %13797 = vst [vmem:[#allocation247_spill] sm:$0xff] %v7746_v26 }
 0x3a8   : > { %1698 = vrot.lane.b32.xlu2 %v13798_v11, %s5481_s15  ;;  %v13806_v11 = vld [vmem:[#allocation259_spill] sm:$0xff] }
 0x3a9   : > { %1696 = vrot.lane.b32.xlu1 %v13799_v4, %s5481_s15  ;;  %1700 = vrot.lane.b32.xlu0 %v13800_v41, %s5481_s15 }
 0x3aa   : > { %v7754_v51 = vpop.permute.xlu2 %1568 }
 0x3ab   : > { %13801 = vst [vmem:[#allocation251_spill] sm:$0xff] %v7754_v51  ;;  %v7756_v36 = vpop.permute.xlu1 %1548  ;;  %v7758_v6 = vpop.permute.xlu0 %1552  ;;  %v13810_v51 = vld [vmem:[#allocation263_spill] sm:$0xff] }
 0x3ac   : > { %13802 = vst [vmem:[#allocation252_spill] sm:$0xff] %v7756_v36  ;;  %v13811_v36 = vld [vmem:[#allocation264_spill] sm:$0xff] }
 0x3ad   : > { %13803 = vst [vmem:[#allocation253_spill] sm:$0xff] %v7758_v6 }
 0x3b0   : > { %1704 = vrot.lane.b32.xlu2 %v13804_v2, %s5481_s15  ;;  %v13812_v2 = vld [vmem:[#allocation265_spill] sm:$0xff] }
 0x3b1   : > { %1702 = vrot.lane.b32.xlu1 %v13805_v44, %s5481_s15  ;;  %1706 = vrot.lane.b32.xlu0 %v13806_v11, %s5481_s15 }
 0x3b2   : > { %v7766_v26 = vpop.permute.xlu2 %1574 }
 0x3b3   : > { %13807 = vst [vmem:[#allocation257_spill] sm:$0xff] %v7766_v26  ;;  %v7768_v4 = vpop.permute.xlu1 %1554  ;;  %v7770_v41 = vpop.permute.xlu0 %1558  ;;  %v13817_v26 = vld [vmem:[#allocation270_spill] sm:$0xff] }
 0x3b4   : > { %13808 = vst [vmem:[#allocation258_spill] sm:$0xff] %v7768_v4  ;;  %v13816_v4 = vld [vmem:[#allocation269_spill] sm:$0xff] }
 0x3b5   : > { %13809 = vst [vmem:[#allocation259_spill] sm:$0xff] %v7770_v41  ;;  %v7850_v41 = vld [vmem:[%s5574_s10 + $0x180] sm:$0xff] }
 0x3b6   : > { %13839 = vst [vmem:[#allocation425_spill] sm:$0xff] %v7850_v41 }
 0x3b8   : > { %1710 = vrot.lane.b32.xlu2 %v13810_v51, %s5481_s15 }
 0x3b9   : > { %1708 = vrot.lane.b32.xlu1 %v13811_v36, %s5481_s15  ;;  %1712 = vrot.lane.b32.xlu0 %v13812_v2, %s5481_s15 }
 0x3ba   : > { %v7778_v44 = vpop.permute.xlu2 %1580 }
 0x3bb   : > { %13813 = vst [vmem:[#allocation263_spill] sm:$0xff] %v7778_v44  ;;  %v7780_v6 = vpop.permute.xlu1 %1560  ;;  %v7782_v11 = vpop.permute.xlu0 %1564  ;;  %v13821_v44 = vld [vmem:[#allocation274_spill] sm:$0xff] }
 0x3bc   : > { %13814 = vst [vmem:[#allocation264_spill] sm:$0xff] %v7780_v6  ;;  %v13881_v6 = vmov 0.0  }
 0x3bd   : > { %13815 = vst [vmem:[#allocation265_spill] sm:$0xff] %v7782_v11  ;;  %v13822_v11 = vld [vmem:[#allocation275_spill] sm:$0xff] }
 0x3c0   : > { %1716 = vrot.lane.b32.xlu2 %v13816_v4, %s5481_s15  ;;  %v13823_v4 = vld [vmem:[#allocation276_spill] sm:$0xff] }
 0x3c1   : > { %1714 = vrot.lane.b32.xlu1 %v13817_v26, %s5481_s15  ;;  %1718 = vrot.lane.b32.xlu0 %v7003_v37, %s5481_s15 }
 0x3c2   : > { %v7790_v51 = vpop.permute.xlu2 %1586 }
 0x3c3   : > { %13818 = vst [vmem:[#allocation269_spill] sm:$0xff] %v7790_v51  ;;  %v7792_v36 = vpop.permute.xlu1 %1566  ;;  %v7794_v2 = vpop.permute.xlu0 %1570 }
 0x3c4   : > { %13819 = vst [vmem:[#allocation270_spill] sm:$0xff] %v7792_v36  ;;  %v7809_v36 = vld [vmem:[%s5574_s10 + $0x150] sm:$0xff] }
 0x3c5   : > { %13820 = vst [vmem:[#allocation414_spill] sm:$0xff] %v7794_v2  ;;  %v7824_v2 = vld [vmem:[%s5574_s10 + $0x170] sm:$0xff] }
 0x3c6   : > { %13827 = vst [vmem:[#allocation415_spill] sm:$0xff] %v7809_v36 }
 0x3c7   : > { %13832 = vst [vmem:[#allocation418_spill] sm:$0xff] %v7824_v2 }
 0x3c8   : > { %1722 = vrot.lane.b32.xlu2 %v13821_v44, %s5481_s15  ;;  %v13828_v44 = vld [vmem:[#allocation280_spill] sm:$0xff] }
 0x3c9   : > { %1720 = vrot.lane.b32.xlu1 %v13822_v11, %s5481_s15  ;;  %1724 = vrot.lane.b32.xlu0 %v13823_v4, %s5481_s15 }
 0x3ca   : > { %v7802_v26 = vpop.permute.xlu2 %1592 }
 0x3cb   : > { %13824 = vst [vmem:[#allocation274_spill] sm:$0xff] %v7802_v26  ;;  %v7804_v37 = vpop.permute.xlu1 %1572  ;;  %v7806_v51 = vpop.permute.xlu0 %1576  ;;  %v7829_v26 = vld [vmem:[%s5574_s10 + $0x168] sm:$0xff] }
 0x3cc   : > { %13825 = vst [vmem:[#allocation275_spill] sm:$0xff] %v7804_v37 }
 0x3cd   : > { %13826 = vst [vmem:[#allocation276_spill] sm:$0xff] %v7806_v51  ;;  %v7855_v51 = vld [vmem:[%s5574_s10 + $0x198] sm:$0xff] }
 0x3ce   : > { %13833 = vst [vmem:[#allocation419_spill] sm:$0xff] %v7829_v26 }
 0x3cf   : > { %13840 = vst [vmem:[#allocation426_spill] sm:$0xff] %v7855_v51 }
 0x3d0   : > { %1728 = vrot.lane.b32.xlu2 %v7809_v36, %s5481_s15 }
 0x3d1   : > { %1726 = vrot.lane.b32.xlu1 %v7037_v33, %s5481_s15  ;;  %1730 = vrot.lane.b32.xlu0 %v13828_v44, %s5481_s15  ;;  %v7834_v33 = vld [vmem:[%s5574_s10 + $0x178] sm:$0xff] }
 0x3d2   : > { %v7817_v11 = vpop.permute.xlu2 %1662  ;;  %13834 = vst [vmem:[#allocation420_spill] sm:$0xff] %v7834_v33 }
 0x3d3   : > { %13829 = vst [vmem:[#allocation280_spill] sm:$0xff] %v7817_v11  ;;  %v7819_v4 = vpop.permute.xlu1 %1578  ;;  %v7821_v37 = vpop.permute.xlu0 %1582  ;;  %v7845_v11 = vld [vmem:[%s5574_s10 + $0x190] sm:$0xff] }
 0x3d4   : > { %13830 = vst [vmem:[#allocation416_spill] sm:$0xff] %v7819_v4 }
 0x3d5   : > { %13831 = vst [vmem:[#allocation417_spill] sm:$0xff] %v7821_v37 }
 0x3d6   : > { %13838 = vst [vmem:[#allocation424_spill] sm:$0xff] %v7845_v11 }
 0x3d8   : > { %1734 = vrot.lane.b32.xlu2 %v7824_v2, %s5481_s15  ;;  %v5295_v2 = vld [vmem:[%s5574_s10 + $0x1e0] sm:$0xff] }
 0x3d9   : > { %1732 = vrot.lane.b32.xlu1 %v7829_v26, %s5481_s15  ;;  %1736 = vrot.lane.b32.xlu0 %v7834_v33, %s5481_s15  ;;  %v7866_v33 = vld [vmem:[%s5574_s10 + $0x1a8] sm:$0xff]  ;;  %v7871_v26 = vld [vmem:[%s5574_s10 + $0x1a0] sm:$0xff] }
 0x3da   : > { %v7838_v44 = vpop.permute.xlu2 %1668  ;;  %13844 = vst [vmem:[#allocation430_spill] sm:$0xff] %v7866_v33 }
 0x3db   : > { %13835 = vst [vmem:[#allocation421_spill] sm:$0xff] %v7838_v44  ;;  %v7840_v4 = vpop.permute.xlu1 %1584  ;;  %v7842_v37 = vpop.permute.xlu0 %1588 }
 0x3dc   : > { %13836 = vst [vmem:[#allocation422_spill] sm:$0xff] %v7840_v4 }
 0x3dd   : > { %13837 = vst [vmem:[#allocation423_spill] sm:$0xff] %v7842_v37 }
 0x3de   : > { %13845 = vst [vmem:[#allocation431_spill] sm:$0xff] %v7871_v26 }
 0x3e0   : > { %1740 = vrot.lane.b32.xlu2 %v7845_v11, %s5481_s15  ;;  %v5294_v11 = vld [vmem:[%s5574_s10 + $0x1e8] sm:$0xff] }
 0x3e1   : > { %1738 = vrot.lane.b32.xlu1 %v7850_v41, %s5481_s15  ;;  %1742 = vrot.lane.b32.xlu0 %v7855_v51, %s5481_s15  ;;  %v7876_v41 = vld [vmem:[%s5574_s10 + $0x1b8] sm:$0xff]  ;;  %v7887_v51 = vld [vmem:[%s5574_s10 + $0x1c8] sm:$0xff] }
 0x3e2   : > { %v7859_v44 = vpop.permute.xlu2 %1674  ;;  %13846 = vst [vmem:[#allocation432_spill] sm:$0xff] %v7876_v41 }
 0x3e3   : > { %13841 = vst [vmem:[#allocation427_spill] sm:$0xff] %v7859_v44  ;;  %v7861_v37 = vpop.permute.xlu1 %1590  ;;  %v7863_v4 = vpop.permute.xlu0 %1594 }
 0x3e4   : > { %13842 = vst [vmem:[#allocation428_spill] sm:$0xff] %v7861_v37 }
 0x3e5   : > { %13843 = vst [vmem:[#allocation429_spill] sm:$0xff] %v7863_v4 }
 0x3e8   : > { %1746 = vrot.lane.b32.xlu2 %v7866_v33, %s5481_s15  ;;  %v7892_v33 = vld [vmem:[%s5574_s10 + $0x1c0] sm:$0xff] }
 0x3e9   : > { %1744 = vrot.lane.b32.xlu1 %v7871_v26, %s5481_s15  ;;  %1748 = vrot.lane.b32.xlu0 %v7876_v41, %s5481_s15  ;;  %13850 = vst [vmem:[#allocation436_spill] sm:$0xff] %v7892_v33  ;;  %v7897_v26 = vld [vmem:[%s5574_s10 + $0x1d0] sm:$0xff] }
 0x3ea   : > { %v7880_v37 = vpop.permute.xlu2 %1680  ;;  %13851 = vst [vmem:[#allocation437_spill] sm:$0xff] %v7897_v26 }
 0x3eb   : > { %13847 = vst [vmem:[#allocation433_spill] sm:$0xff] %v7880_v37  ;;  %v7882_v4 = vpop.permute.xlu1 %1660  ;;  %v7884_v44 = vpop.permute.xlu0 %1664 }
 0x3ec   : > { %13848 = vst [vmem:[#allocation434_spill] sm:$0xff] %v7882_v4  ;;  %v7964_v4 = vld [vmem:[%s5574_s10 + $0x238] sm:$0xff] }
 0x3ed   : > { %13849 = vst [vmem:[#allocation435_spill] sm:$0xff] %v7884_v44 }
 0x3ee   : > { %13870 = vst [vmem:[#allocation456_spill] sm:$0xff] %v7964_v4 }
 0x3f0   : > { %1752 = vrot.lane.b32.xlu2 %v7887_v51, %s5481_s15 }
 0x3f1   : > { %1750 = vrot.lane.b32.xlu1 %v7892_v33, %s5481_s15  ;;  %1754 = vrot.lane.b32.xlu0 %v7897_v26, %s5481_s15  ;;  %v7912_v33 = vld [vmem:[%s5574_s10 + $0x1f0] sm:$0xff] }
 0x3f2   : > { %v7901_v37 = vpop.permute.xlu2 %1686  ;;  %13855 = vst [vmem:[#allocation441_spill] sm:$0xff] %v7912_v33 }
 0x3f3   : > { %13852 = vst [vmem:[#allocation438_spill] sm:$0xff] %v7901_v37  ;;  %v7903_v44 = vpop.permute.xlu1 %1666  ;;  %v7905_v41 = vpop.permute.xlu0 %1670 }
 0x3f4   : > { %13853 = vst [vmem:[#allocation439_spill] sm:$0xff] %v7903_v44 }
 0x3f5   : > { %13854 = vst [vmem:[#allocation440_spill] sm:$0xff] %v7905_v41  ;;  %v5297_v41 = vld [vmem:[%s5574_s10 + $0x208] sm:$0xff] }
 0x3f8   : > { %1758 = vrot.lane.b32.xlu2 %v5294_v11, %s5481_s15  ;;  %v5298_v11 = vld [vmem:[%s5574_s10 + $0x1f8] sm:$0xff] }
 0x3f9   : > { %1756 = vrot.lane.b32.xlu1 %v5295_v2, %s5481_s15  ;;  %1760 = vrot.lane.b32.xlu0 %v7912_v33, %s5481_s15  ;;  %v7927_v2 = vld [vmem:[%s5574_s10 + $0x210] sm:$0xff] }
 0x3fa   : > { %v7916_v26 = vpop.permute.xlu2 %1692  ;;  %13859 = vst [vmem:[#allocation445_spill] sm:$0xff] %v7927_v2 }
 0x3fb   : > { %13856 = vst [vmem:[#allocation442_spill] sm:$0xff] %v7916_v26  ;;  %v7918_v37 = vpop.permute.xlu1 %1672  ;;  %v7920_v44 = vpop.permute.xlu0 %1676 }
 0x3fc   : > { %13857 = vst [vmem:[#allocation443_spill] sm:$0xff] %v7918_v37 }
 0x3fd   : > { %13858 = vst [vmem:[#allocation444_spill] sm:$0xff] %v7920_v44  ;;  %v7938_v44 = vld [vmem:[%s5574_s10 + $0x220] sm:$0xff] }
 0x3fe   : > { %13863 = vst [vmem:[#allocation449_spill] sm:$0xff] %v7938_v44 }
 0x400   : > { %1764 = vrot.lane.b32.xlu2 %v5297_v41, %s5481_s15  ;;  %v7943_v41 = vld [vmem:[%s5574_s10 + $0x218] sm:$0xff] }
 0x401   : > { %1762 = vrot.lane.b32.xlu1 %v5298_v11, %s5481_s15  ;;  %1766 = vrot.lane.b32.xlu0 %v7927_v2, %s5481_s15  ;;  %13864 = vst [vmem:[#allocation450_spill] sm:$0xff] %v7943_v41  ;;  %v7948_v11 = vld [vmem:[%s5574_s10 + $0x230] sm:$0xff] }
 0x402   : > { %v7931_v33 = vpop.permute.xlu2 %1698  ;;  %13865 = vst [vmem:[#allocation451_spill] sm:$0xff] %v7948_v11 }
 0x403   : > { %13860 = vst [vmem:[#allocation446_spill] sm:$0xff] %v7931_v33  ;;  %v7933_v36 = vpop.permute.xlu1 %1678  ;;  %v7935_v37 = vpop.permute.xlu0 %1682 }
 0x404   : > { %13861 = vst [vmem:[#allocation447_spill] sm:$0xff] %v7933_v36 }
 0x405   : > { %13862 = vst [vmem:[#allocation448_spill] sm:$0xff] %v7935_v37 }
 0x408   : > { %1770 = vrot.lane.b32.xlu2 %v7938_v44, %s5481_s15  ;;  %v7959_v44 = vld [vmem:[%s5574_s10 + $0x240] sm:$0xff] }
 0x409   : > { %1768 = vrot.lane.b32.xlu1 %v7943_v41, %s5481_s15  ;;  %1772 = vrot.lane.b32.xlu0 %v7948_v11, %s5481_s15  ;;  %13869 = vst [vmem:[#allocation455_spill] sm:$0xff] %v7959_v44  ;;  %v7969_v41 = vld [vmem:[%s5574_s10 + $0x248] sm:$0xff]  ;;  %v7980_v11 = vld [vmem:[%s5574_s10 + $0x260] sm:$0xff] }
 0x40a   : > { %v7952_v36 = vpop.permute.xlu2 %1704  ;;  %13871 = vst [vmem:[#allocation457_spill] sm:$0xff] %v7969_v41 }
 0x40b   : > { %13866 = vst [vmem:[#allocation452_spill] sm:$0xff] %v7952_v36  ;;  %v7954_v37 = vpop.permute.xlu1 %1684  ;;  %v7956_v2 = vpop.permute.xlu0 %1688 }
 0x40c   : > { %13867 = vst [vmem:[#allocation453_spill] sm:$0xff] %v7954_v37 }
 0x40d   : > { %13868 = vst [vmem:[#allocation454_spill] sm:$0xff] %v7956_v2 }
 0x40e   : > { %13875 = vst [vmem:[#allocation461_spill] sm:$0xff] %v7980_v11 }
 0x410   : > { %1776 = vrot.lane.b32.xlu2 %v7959_v44, %s5481_s15  ;;  %v7985_v44 = vld [vmem:[%s5574_s10 + $0x258] sm:$0xff] }
 0x411   : > { %1774 = vrot.lane.b32.xlu1 %v7964_v4, %s5481_s15  ;;  %1778 = vrot.lane.b32.xlu0 %v7969_v41, %s5481_s15  ;;  %13876 = vst [vmem:[#allocation462_spill] sm:$0xff] %v7985_v44  ;;  %v7990_v4 = vld [vmem:[%s5574_s10 + $0x268] sm:$0xff] }
 0x412   : > { %v7973_v36 = vpop.permute.xlu2 %1710  ;;  %13877 = vst [vmem:[#allocation463_spill] sm:$0xff] %v7990_v4 }
 0x413   : > { %13872 = vst [vmem:[#allocation458_spill] sm:$0xff] %v7973_v36  ;;  %v7975_v37 = vpop.permute.xlu1 %1690  ;;  %v7977_v2 = vpop.permute.xlu0 %1694 }
 0x414   : > { %13873 = vst [vmem:[#allocation459_spill] sm:$0xff] %v7975_v37 }
 0x415   : > { %13874 = vst [vmem:[#allocation460_spill] sm:$0xff] %v7977_v2 }
 0x418   : > { %1782 = vrot.lane.b32.xlu2 %v7980_v11, %s5481_s15  ;;  %v8003_v11 = vld [vmem:[%s5574_s10 + $0x270] sm:$0xff] }
 0x419   : > { %1780 = vrot.lane.b32.xlu1 %v7985_v44, %s5481_s15  ;;  %1784 = vrot.lane.b32.xlu0 %v7990_v4, %s5481_s15 }
 0x41a   : > { %v7994_v36 = vpop.permute.xlu2 %1716 }
 0x41b   : > { %13878 = vst [vmem:[#allocation464_spill] sm:$0xff] %v7994_v36  ;;  %v7996_v37 = vpop.permute.xlu1 %1696  ;;  %v7998_v41 = vpop.permute.xlu0 %1700 }
 0x41c   : > { %13879 = vst [vmem:[#allocation465_spill] sm:$0xff] %v7996_v37 }
 0x41d   : > { %13880 = vst [vmem:[#allocation466_spill] sm:$0xff] %v7998_v41 }
 0x420   : > { %1788 = vrot.lane.b32.xlu2 %v13881_v6, %s5481_s15 }
 0x421   : > { %1786 = vrot.lane.b32.xlu1 %v8003_v11, %s5481_s15  ;;  %1855 = vrot.lane.b32.xlu0 %v13533_v50, %s5482_s16  ;;  %s12418_s15 = sshll.u32 %s4900_s7, 4  ;;  %s4905_s15 = int_to_ptr.hbm [resolvable:$true] %s12418_s15 }
 0x422   : > { %v8009_v44 = vpop.permute.xlu2 %1722  ;;  %s5365_s30 = sshra.s32 %s4905_s15, 4  ;;  %s5366_s30 = int_to_ptr.hbm [resolvable:$true] %s5365_s30 }
 0x423   : > { %13882 = vst [vmem:[#allocation467_spill] sm:$0xff] %v8009_v44  ;;  %v8011_v4 = vpop.permute.xlu1 %1702  ;;  %v8013_v36 = vpop.permute.xlu0 %1706  ;;  %v13943_v44 = vld [vmem:[#allocation64_spill] sm:$0xff]  ;;  %s5367_s6 = scalar_lea.hbm %s5366_s30, 1  ;;  %p5372_p0 = scmp.lt.s32.totalorder %s5366_s30, %s12503_s4 }
 0x424   : > { %13883 = vst [vmem:[#allocation468_spill] sm:$0xff] %v8011_v4  ;;  %p5368_p11 = scmp.ne.s32.totalorder %s5366_s30, %s5367_s6  ;;  %p5373_p1 = scmp.lt.s32.totalorder %s5371_s11, %s5367_s6 }
 0x425   : > { %13884 = vst [vmem:[#allocation469_spill] sm:$0xff] %v8013_v36  ;;  %v13938_v36 = vld [vmem:[#allocation55_spill] sm:$0xff] }
 0x426   : > { %p5369_p12 = pnand %p5368_p11, %p5554_p5  ;;  %p5374_p2 = por %p5373_p1, %p5372_p0 }
 0x428   : > { %1859 = vrot.lane.b32.xlu2 %v13539_v53, %s5482_s16  ;;  %p5370_p13 = pneg %p5369_p12 }
 0x429   : > { %1857 = vrot.lane.b32.xlu1 %v13534_v32, %s5482_s16  ;;  %1861 = vrot.lane.b32.xlu0 %v13538_v38, %s5482_s16 }
 0x42a   : > { %v8021_v6 = vpop.permute.xlu2 %1728  ;;  %p5375_p3 = pnand %p5374_p2, %p5370_p13 }
 0x42b   : > { %13885 = vst [vmem:[#allocation470_spill] sm:$0xff] %v8021_v6  ;;  %v8023_v41 = vpop.permute.xlu1 %1708  ;;  %v8025_v50 = vpop.permute.xlu0 %1712 }
 0x42c   : > { %13886 = vst [vmem:[#allocation471_spill] sm:$0xff] %v8023_v41  ;;  %v13949_v41 = vld [vmem:[#allocation73_spill] sm:$0xff] }
 0x42d   : > { %13887 = vst [vmem:[#allocation472_spill] sm:$0xff] %v8025_v50 }
 0x430   : > { %1865 = vrot.lane.b32.xlu2 %v13545_v45, %s5482_s16 }
 0x431   : > { %1863 = vrot.lane.b32.xlu1 %v13540_v20, %s5482_s16  ;;  %1867 = vrot.lane.b32.xlu0 %v13544_v62, %s5482_s16 }
 0x432   : > { %v8033_v53 = vpop.permute.xlu2 %1734 }
 0x433   : > { %13888 = vst [vmem:[#allocation473_spill] sm:$0xff] %v8033_v53  ;;  %v8035_v32 = vpop.permute.xlu1 %1714  ;;  %v8037_v38 = vpop.permute.xlu0 %1718 }
 0x434   : > { %13889 = vst [vmem:[#allocation474_spill] sm:$0xff] %v8035_v32  ;;  %v13948_v32 = vld [vmem:[#allocation75_spill] sm:$0xff] }
 0x435   : > { %13890 = vst [vmem:[#allocation475_spill] sm:$0xff] %v8037_v38 }
 0x438   : > { %1871 = vrot.lane.b32.xlu2 %v13551_v5, %s5482_s16 }
 0x439   : > { %1869 = vrot.lane.b32.xlu1 %v13546_v55, %s5482_s16  ;;  %1873 = vrot.lane.b32.xlu0 %v13550_v43, %s5482_s16 }
 0x43a   : > { %v8045_v45 = vpop.permute.xlu2 %1740 }
 0x43b   : > { %13891 = vst [vmem:[#allocation476_spill] sm:$0xff] %v8045_v45  ;;  %v8047_v20 = vpop.permute.xlu1 %1720  ;;  %v8049_v62 = vpop.permute.xlu0 %1724  ;;  %v13925_v45 = vld [vmem:[#allocation45_spill] sm:$0xff] }
 0x43c   : > { %13892 = vst [vmem:[#allocation477_spill] sm:$0xff] %v8047_v20 }
 0x43d   : > { %13893 = vst [vmem:[#allocation478_spill] sm:$0xff] %v8049_v62 }
 0x440   : > { %1877 = vrot.lane.b32.xlu2 %v13557_v30, %s5482_s16 }
 0x441   : > { %1875 = vrot.lane.b32.xlu1 %v13552_v10, %s5482_s16  ;;  %1879 = vrot.lane.b32.xlu0 %v13556_v48, %s5482_s16 }
 0x442   : > { %v8057_v5 = vpop.permute.xlu2 %1746 }
 0x443   : > { %13894 = vst [vmem:[#allocation479_spill] sm:$0xff] %v8057_v5  ;;  %v8059_v55 = vpop.permute.xlu1 %1726  ;;  %v8061_v43 = vpop.permute.xlu0 %1730  ;;  %v13921_v5 = vld [vmem:[#allocation40_spill] sm:$0xff] }
 0x444   : > { %13895 = vst [vmem:[#allocation480_spill] sm:$0xff] %v8059_v55 }
 0x445   : > { %13896 = vst [vmem:[#allocation481_spill] sm:$0xff] %v8061_v43 }
 0x448   : > { %1883 = vrot.lane.b32.xlu2 %v13563_v19, %s5482_s16 }
 0x449   : > { %1881 = vrot.lane.b32.xlu1 %v13558_v59, %s5482_s16  ;;  %1885 = vrot.lane.b32.xlu0 %v13562_v1, %s5482_s16 }
 0x44a   : > { %v8069_v30 = vpop.permute.xlu2 %1752 }
 0x44b   : > { %13897 = vst [vmem:[#allocation482_spill] sm:$0xff] %v8069_v30  ;;  %v8071_v10 = vpop.permute.xlu1 %1732  ;;  %v8073_v48 = vpop.permute.xlu0 %1736 }
 0x44c   : > { %13898 = vst [vmem:[#allocation483_spill] sm:$0xff] %v8071_v10  ;;  %v13942_v10 = vld [vmem:[#allocation66_spill] sm:$0xff] }
 0x44d   : > { %13899 = vst [vmem:[#allocation484_spill] sm:$0xff] %v8073_v48 }
 0x450   : > { %1889 = vrot.lane.b32.xlu2 %v13569_v31, %s5482_s16 }
 0x451   : > { %1887 = vrot.lane.b32.xlu1 %v13564_v12, %s5482_s16  ;;  %1891 = vrot.lane.b32.xlu0 %v13568_v63, %s5482_s16 }
 0x452   : > { %v8081_v19 = vpop.permute.xlu2 %1758 }
 0x453   : > { %13900 = vst [vmem:[#allocation485_spill] sm:$0xff] %v8081_v19  ;;  %v8083_v59 = vpop.permute.xlu1 %1738  ;;  %v8085_v1 = vpop.permute.xlu0 %1742 }
 0x454   : > { %13901 = vst [vmem:[#allocation486_spill] sm:$0xff] %v8083_v59  ;;  %v13937_v59 = vld [vmem:[#allocation57_spill] sm:$0xff] }
 0x455   : > { %13902 = vst [vmem:[#allocation487_spill] sm:$0xff] %v8085_v1  ;;  %v13920_v1 = vld [vmem:[#allocation42_spill] sm:$0xff] }
 0x458   : > { %1895 = vrot.lane.b32.xlu2 %v13575_v40, %s5482_s16 }
 0x459   : > { %1893 = vrot.lane.b32.xlu1 %v13570_v34, %s5482_s16  ;;  %1897 = vrot.lane.b32.xlu0 %v13574_v47, %s5482_s16 }
 0x45a   : > { %v8093_v31 = vpop.permute.xlu2 %1764 }
 0x45b   : > { %13903 = vst [vmem:[#allocation488_spill] sm:$0xff] %v8093_v31  ;;  %v8095_v12 = vpop.permute.xlu1 %1744  ;;  %v8097_v63 = vpop.permute.xlu0 %1748  ;;  %v13909_v31 = vld [vmem:[#allocation36_spill] sm:$0xff] }
 0x45c   : > { %13904 = vst [vmem:[#allocation489_spill] sm:$0xff] %v8095_v12  ;;  %v13931_v12 = vld [vmem:[#allocation49_spill] sm:$0xff] }
 0x45d   : > { %13905 = vst [vmem:[#allocation490_spill] sm:$0xff] %v8097_v63  ;;  %v13910_v63 = vld [vmem:[#allocation34_spill] sm:$0xff] }
 0x460   : > { %1901 = vrot.lane.b32.xlu2 %v13581_v42, %s5482_s16  ;;  %v13911_v42 = vld [vmem:[#allocation38_spill] sm:$0xff] }
 0x461   : > { %1899 = vrot.lane.b32.xlu1 %v13576_v0, %s5482_s16  ;;  %1903 = vrot.lane.b32.xlu0 %v13580_v15, %s5482_s16 }
 0x462   : > { %v8105_v40 = vpop.permute.xlu2 %1770 }
 0x463   : > { %13906 = vst [vmem:[#allocation491_spill] sm:$0xff] %v8105_v40  ;;  %v8107_v34 = vpop.permute.xlu1 %1750  ;;  %v8109_v47 = vpop.permute.xlu0 %1754  ;;  %v13914_v40 = vld [vmem:[#allocation39_spill] sm:$0xff] }
 0x464   : > { %13907 = vst [vmem:[#allocation492_spill] sm:$0xff] %v8107_v34 }
 0x465   : > { %13908 = vst [vmem:[#allocation493_spill] sm:$0xff] %v8109_v47  ;;  %v13915_v47 = vld [vmem:[#allocation37_spill] sm:$0xff] }
 0x468   : > { %1907 = vrot.lane.b32.xlu2 %v13909_v31, %s5482_s16  ;;  %v13916_v31 = vld [vmem:[#allocation41_spill] sm:$0xff] }
 0x469   : > { %1905 = vrot.lane.b32.xlu1 %v13910_v63, %s5482_s16  ;;  %1909 = vrot.lane.b32.xlu0 %v13911_v42, %s5482_s16 }
 0x46a   : > { %v8117_v48 = vpop.permute.xlu2 %1776 }
 0x46b   : > { %v8119_v0 = vpop.permute.xlu1 %1756  ;;  %v8121_v15 = vpop.permute.xlu0 %1760 }
 0x46c   : > { %13912 = vst [vmem:[#allocation36_spill] sm:$0xff] %v8119_v0 }
 0x46d   : > { %13913 = vst [vmem:[#allocation34_spill] sm:$0xff] %v8121_v15 }
 0x470   : > { %1913 = vrot.lane.b32.xlu2 %v13914_v40, %s5482_s16  ;;  %v13922_v40 = vld [vmem:[#allocation44_spill] sm:$0xff] }
 0x471   : > { %1911 = vrot.lane.b32.xlu1 %v13915_v47, %s5482_s16  ;;  %1915 = vrot.lane.b32.xlu0 %v13916_v31, %s5482_s16 }
 0x472   : > { %v8129_v30 = vpop.permute.xlu2 %1782 }
 0x473   : > { %13917 = vst [vmem:[#allocation38_spill] sm:$0xff] %v8129_v30  ;;  %v8131_v63 = vpop.permute.xlu1 %1762  ;;  %v8133_v42 = vpop.permute.xlu0 %1766 }
 0x474   : > { %13918 = vst [vmem:[#allocation39_spill] sm:$0xff] %v8131_v63 }
 0x475   : > { %13919 = vst [vmem:[#allocation37_spill] sm:$0xff] %v8133_v42  ;;  %v13926_v42 = vld [vmem:[#allocation43_spill] sm:$0xff] }
 0x478   : > { %1919 = vrot.lane.b32.xlu2 %v13920_v1, %s5482_s16  ;;  %v13927_v1 = vld [vmem:[#allocation48_spill] sm:$0xff] }
 0x479   : > { %1917 = vrot.lane.b32.xlu1 %v13921_v5, %s5482_s16  ;;  %1921 = vrot.lane.b32.xlu0 %v13922_v40, %s5482_s16 }
 0x47a   : > { %v8141_v53 = vpop.permute.xlu2 %1788 }
 0x47b   : > { %13923 = vst [vmem:[#allocation41_spill] sm:$0xff] %v8141_v53  ;;  %v8143_v47 = vpop.permute.xlu1 %1768  ;;  %v8145_v31 = vpop.permute.xlu0 %1772  ;;  %v13955_v53 = vld [vmem:[#allocation107_spill] sm:$0xff] }
 0x47c   : > { %13924 = vst [vmem:[#allocation42_spill] sm:$0xff] %v8145_v31  ;;  %v13932_v31 = vld [vmem:[#allocation47_spill] sm:$0xff] }
 0x480   : > { %1925 = vrot.lane.b32.xlu2 %v13925_v45, %s5482_s16  ;;  %v13933_v45 = vld [vmem:[#allocation56_spill] sm:$0xff] }
 0x481   : > { %1923 = vrot.lane.b32.xlu1 %v13926_v42, %s5482_s16  ;;  %1927 = vrot.lane.b32.xlu0 %v13927_v1, %s5482_s16 }
 0x482   : > { %v8153_v34 = vpop.permute.xlu2 %1859 }
 0x483   : > { %13928 = vst [vmem:[#allocation40_spill] sm:$0xff] %v8153_v34  ;;  %v8155_v5 = vpop.permute.xlu1 %1774  ;;  %v8157_v40 = vpop.permute.xlu0 %1778 }
 0x484   : > { %13929 = vst [vmem:[#allocation44_spill] sm:$0xff] %v8155_v5  ;;  %v14132_v5 = vld [vmem:[#allocation378_spill] sm:$0xff] }
 0x485   : > { %13930 = vst [vmem:[#allocation45_spill] sm:$0xff] %v8157_v40 }
 0x488   : > { %1931 = vrot.lane.b32.xlu2 %v13931_v12, %s5482_s16  ;;  %v13939_v12 = vld [vmem:[#allocation65_spill] sm:$0xff] }
 0x489   : > { %1929 = vrot.lane.b32.xlu1 %v13932_v31, %s5482_s16  ;;  %1933 = vrot.lane.b32.xlu0 %v13933_v45, %s5482_s16 }
 0x48a   : > { %v8165_v20 = vpop.permute.xlu2 %1865 }
 0x48b   : > { %13934 = vst [vmem:[#allocation43_spill] sm:$0xff] %v8165_v20  ;;  %v8167_v42 = vpop.permute.xlu1 %1780  ;;  %v8169_v1 = vpop.permute.xlu0 %1784 }
 0x48c   : > { %13935 = vst [vmem:[#allocation48_spill] sm:$0xff] %v8167_v42 }
 0x48d   : > { %13936 = vst [vmem:[#allocation49_spill] sm:$0xff] %v8169_v1  ;;  %v14135_v1 = vld [vmem:[#allocation251_spill] sm:$0xff] }
 0x490   : > { %1937 = vrot.lane.b32.xlu2 %v13937_v59, %s5482_s16  ;;  %v13944_v59 = vld [vmem:[#allocation74_spill] sm:$0xff] }
 0x491   : > { %1935 = vrot.lane.b32.xlu1 %v13938_v36, %s5482_s16  ;;  %1939 = vrot.lane.b32.xlu0 %v13939_v12, %s5482_s16 }
 0x492   : > { %v8177_v50 = vpop.permute.xlu2 %1871 }
 0x493   : > { %13940 = vst [vmem:[#allocation47_spill] sm:$0xff] %v8177_v50  ;;  %v8179_v31 = vpop.permute.xlu1 %1786  ;;  %v8181_v45 = vpop.permute.xlu0 %1855  ;;  %v13954_v50 = vld [vmem:[#allocation80_spill] sm:$0xff] }
 0x494   : > { %13941 = vst [vmem:[#allocation56_spill] sm:$0xff] %v8179_v31 }
 0x498   : > { %1943 = vrot.lane.b32.xlu2 %v13942_v10, %s5482_s16  ;;  %v13950_v10 = vld [vmem:[#allocation84_spill] sm:$0xff] }
 0x499   : > { %1941 = vrot.lane.b32.xlu1 %v13943_v44, %s5482_s16  ;;  %1945 = vrot.lane.b32.xlu0 %v13944_v59, %s5482_s16 }
 0x49a   : > { %v8189_v36 = vpop.permute.xlu2 %1877 }
 0x49b   : > { %13945 = vst [vmem:[#allocation57_spill] sm:$0xff] %v8189_v36  ;;  %v8191_v38 = vpop.permute.xlu1 %1857  ;;  %v8193_v12 = vpop.permute.xlu0 %1861  ;;  %v5310_v36 = vld [vmem:[%s5574_s10 + $0x80] sm:$0xff] }
 0x49c   : > { %13946 = vst [vmem:[#allocation55_spill] sm:$0xff] %v8191_v38  ;;  %v2260_v31 = vsel %vm2245_vm2, %v5310_v36, %v13954_v50 }
 0x49d   : > { %13947 = vst [vmem:[#allocation65_spill] sm:$0xff] %v8193_v12 }
 0x4a0   : > { %1949 = vrot.lane.b32.xlu2 %v13948_v32, %s5482_s16  ;;  %v8212_v32 = vsel %vm2311_vm3, %v2260_v31, %v13955_v53  ;;  %v13960_v53 = vld [vmem:[#allocation83_spill] sm:$0xff]  ;;  %v13961_v31 = vld [vmem:[#allocation94_spill] sm:$0xff] }
 0x4a1   : > { %1947 = vrot.lane.b32.xlu1 %v13949_v41, %s5482_s16  ;;  %1951 = vrot.lane.b32.xlu0 %v13950_v10, %s5482_s16  ;;  %13956 = vst [vmem:[#allocation75_spill] sm:$0xff] %v8212_v32  ;;  %v13957_v41 = vld [vmem:[#allocation293_spill] sm:$0xff] }
 0x4a2   : > { %v8201_v4 = vpop.permute.xlu2 %1883  ;;  %v2407_v10 = vsel %vm2377_vm4, %v8212_v32, %v13957_v41  ;;  %v14111_v32 = vld [vmem:[#allocation151_spill] sm:$0xff] }
 0x4a3   : > { %13951 = vst [vmem:[#allocation66_spill] sm:$0xff] %v8201_v4  ;;  %v8203_v44 = vpop.permute.xlu1 %1863  ;;  %v8205_v59 = vpop.permute.xlu0 %1867  ;;  %v13958_v4 = vld [vmem:[#allocation342_spill] sm:$0xff] }
 0x4a4   : > { %13952 = vst [vmem:[#allocation64_spill] sm:$0xff] %v8203_v44  ;;  %v2536_v20 = vsel %vm2506_vm5, %v2407_v10, %v13958_v4  ;;  %v13980_v44 = vld [vmem:[#allocation96_spill] sm:$0xff] }
 0x4a5   : > { %13953 = vst [vmem:[#allocation74_spill] sm:$0xff] %v8205_v59  ;;  %v13959_v59 = vld [vmem:[#allocation85_spill] sm:$0xff]  ;;  %v2665_v50 = vsel %vm2635_vm6, %v2536_v20, %v7648_v28 }
 0x4a6   : > { %v2794_v36 = vsel %vm2764_vm7, %v2665_v50, %v7977_v2  ;;  %v13967_v50 = vld [vmem:[#allocation95_spill] sm:$0xff]  ;;  %v13978_v2 = vld [vmem:[#allocation77_spill] sm:$0xff] }
 0x4a8   : > { %1955 = vrot.lane.b32.xlu2 %v13959_v59, %s5482_s16 }
 0x4a9   : > { %1953 = vrot.lane.b32.xlu1 %v13960_v53, %s5482_s16  ;;  %1957 = vrot.lane.b32.xlu0 %v13961_v31, %s5482_s16  ;;  %v13966_v53 = vld [vmem:[#allocation93_spill] sm:$0xff] }
 0x4aa   : > { %v8229_v30 = vpop.permute.xlu2 %1889 }
 0x4ab   : > { %13962 = vst [vmem:[#allocation73_spill] sm:$0xff] %v8229_v30  ;;  %v8231_v10 = vpop.permute.xlu1 %1869  ;;  %v8235_v59 = vsel %vm2893_vm8, %v2794_v36, %v8229_v30  ;;  %v8237_v20 = vpop.permute.xlu0 %1873  ;;  %v13971_v36 = vld [vmem:[#allocation103_spill] sm:$0xff]  ;;  %v13977_v30 = vld [vmem:[#allocation110_spill] sm:$0xff] }
 0x4ac   : > { %13963 = vst [vmem:[#allocation84_spill] sm:$0xff] %v8231_v10 }
 0x4ad   : > { %13964 = vst [vmem:[#allocation80_spill] sm:$0xff] %v8235_v59  ;;  %v13976_v59 = vld [vmem:[#allocation109_spill] sm:$0xff] }
 0x4ae   : > { %13965 = vst [vmem:[#allocation107_spill] sm:$0xff] %v8237_v20 }
 0x4b0   : > { %2050 = vrot.lane.b32.xlu2 %v6270_v49, %s5483_s17  ;;  %v13972_v49 = vld [vmem:[#allocation102_spill] sm:$0xff] }
 0x4b1   : > { %1959 = vrot.lane.b32.xlu1 %v13966_v53, %s5482_s16  ;;  %1961 = vrot.lane.b32.xlu0 %v13967_v50, %s5482_s16 }
 0x4b2   : > { %v8245_v31 = vpop.permute.xlu2 %1895 }
 0x4b3   : > { %13968 = vst [vmem:[#allocation85_spill] sm:$0xff] %v8245_v31  ;;  %v8247_v28 = vpop.permute.xlu1 %1875  ;;  %v8249_v4 = vpop.permute.xlu0 %1879  ;;  %v5311_v31 = vld [vmem:[%s5574_s10 + $0x78] sm:$0xff] }
 0x4b4   : > { %13969 = vst [vmem:[#allocation83_spill] sm:$0xff] %v8247_v28  ;;  %v2259_v28 = vsel %vm2245_vm2, %v5311_v31, %v13976_v59  ;;  %v13984_v31 = vld [vmem:[#allocation104_spill] sm:$0xff] }
 0x4b5   : > { %13970 = vst [vmem:[#allocation94_spill] sm:$0xff] %v8249_v4  ;;  %v5312_v4 = vld [vmem:[%s5574_s10 + $0x88] sm:$0xff] }
 0x4b8   : > { %1963 = vrot.lane.b32.xlu2 %v13971_v36, %s5482_s16  ;;  %v2261_v36 = vsel %vm2245_vm2, %v5312_v4, %v13977_v30  ;;  %v13985_v4 = vld [vmem:[#allocation331_spill] sm:$0xff] }
 0x4b9   : > { %2052 = vrot.lane.b32.xlu1 %v6291_v14, %s5483_s17  ;;  %1965 = vrot.lane.b32.xlu0 %v13972_v49, %s5482_s16  ;;  %v8271_v14 = vsel %vm2311_vm3, %v2261_v36, %v13978_v2  ;;  %v8275_v49 = vsel %vm2311_vm3, %v2259_v28, %v13980_v44  ;;  %v13986_v28 = vld [vmem:[#allocation112_spill] sm:$0xff] }
 0x4ba   : > { %v8257_v20 = vpop.permute.xlu2 %1901  ;;  %13979 = vst [vmem:[#allocation102_spill] sm:$0xff] %v8271_v14 }
 0x4bb   : > { %13973 = vst [vmem:[#allocation93_spill] sm:$0xff] %v8257_v20  ;;  %v8259_v53 = vpop.permute.xlu1 %1881  ;;  %v8261_v50 = vpop.permute.xlu0 %1885  ;;  %v13982_v20 = vld [vmem:[#allocation303_spill] sm:$0xff] }
 0x4bc   : > { %13974 = vst [vmem:[#allocation95_spill] sm:$0xff] %v8259_v53  ;;  %v13983_v53 = vld [vmem:[#allocation304_spill] sm:$0xff] }
 0x4bd   : > { %13975 = vst [vmem:[#allocation103_spill] sm:$0xff] %v8261_v50  ;;  %v2406_v50 = vsel %vm2377_vm4, %v8275_v49, %v13982_v20  ;;  %v2408_v59 = vsel %vm2377_vm4, %v8271_v14, %v13983_v53  ;;  %v14104_v14 = vld [vmem:[#allocation430_spill] sm:$0xff] }
 0x4be   : > { %13981 = vst [vmem:[#allocation109_spill] sm:$0xff] %v8275_v49  ;;  %v2535_v2 = vsel %vm2506_vm5, %v2406_v50, %v13985_v4  ;;  %v2537_v30 = vsel %vm2506_vm5, %v2408_v59, %v7396_v52  ;;  %v14116_v53 = vld [vmem:[#allocation426_spill] sm:$0xff]  ;;  %v14123_v49 = vld [vmem:[#allocation449_spill] sm:$0xff] }
 0x4bf   : > { %v2666_v44 = vsel %vm2635_vm6, %v2537_v30, %v7610_v35  ;;  %v2664_v36 = vsel %vm2635_vm6, %v2535_v2, %v7638_v39  ;;  %v5313_v30 = vld [vmem:[%s5574_s10 + $0x90] sm:$0xff]  ;;  %v13993_v35 = vld [vmem:[#allocation205_spill] sm:$0xff] }
 0x4c0   : > { %1967 = vrot.lane.b32.xlu2 %v13984_v31, %s5482_s16  ;;  %v2793_v50 = vsel %vm2764_vm7, %v2664_v36, %v7916_v26  ;;  %v2795_v59 = vsel %vm2764_vm7, %v2666_v44, %v7996_v37  ;;  %v13995_v37 = vld [vmem:[#allocation306_spill] sm:$0xff]  ;;  %v14099_v26 = vld [vmem:[#allocation424_spill] sm:$0xff] }
 0x4c1   : > { %2054 = vrot.lane.b32.xlu1 %v6288_v22, %s5483_s17  ;;  %1969 = vrot.lane.b32.xlu0 %v13986_v28, %s5482_s16  ;;  %v13997_v39 = vld [vmem:[#allocation334_spill] sm:$0xff] }
 0x4c2   : > { %v8297_v40 = vpop.permute.xlu2 %1907 }
 0x4c3   : > { %13987 = vst [vmem:[#allocation110_spill] sm:$0xff] %v8297_v40  ;;  %v8303_v31 = vpop.permute.xlu1 %1887  ;;  %v8305_v22 = vpop.permute.xlu0 %1891  ;;  %v13992_v40 = vld [vmem:[#allocation117_spill] sm:$0xff] }
 0x4c4   : > { %13988 = vst [vmem:[#allocation77_spill] sm:$0xff] %v8303_v31  ;;  %v8309_v28 = vsel %vm2893_vm8, %v2793_v50, %v8303_v31  ;;  %v8313_v2 = vsel %vm2893_vm8, %v2795_v59, %v8305_v22  ;;  %v2262_v36 = vsel %vm2245_vm2, %v5313_v30, %v13992_v40  ;;  %v13996_v50 = vld [vmem:[#allocation111_spill] sm:$0xff]  ;;  %v14097_v31 = vld [vmem:[#allocation133_spill] sm:$0xff] }
 0x4c5   : > { %13989 = vst [vmem:[#allocation96_spill] sm:$0xff] %v8305_v22  ;;  %v8320_v44 = vsel %vm2311_vm3, %v2262_v36, %v13993_v35 }
 0x4c6   : > { %13990 = vst [vmem:[#allocation104_spill] sm:$0xff] %v8309_v28  ;;  %v2409_v52 = vsel %vm2377_vm4, %v8320_v44, %v13995_v37  ;;  %v14096_v28 = vld [vmem:[#allocation418_spill] sm:$0xff] }
 0x4c7   : > { %13991 = vst [vmem:[#allocation112_spill] sm:$0xff] %v8313_v2  ;;  %v2538_v4 = vsel %vm2506_vm5, %v2409_v52, %v13997_v39  ;;  %v14003_v39 = vld [vmem:[#allocation231_spill] sm:$0xff]  ;;  %v14113_v37 = vld [vmem:[#allocation170_spill] sm:$0xff] }
 0x4c8   : > { %13994 = vst [vmem:[#allocation117_spill] sm:$0xff] %v8320_v44  ;;  %1971 = vrot.lane.b32.xlu2 %v13996_v50, %s5482_s16  ;;  %v2667_v35 = vsel %vm2635_vm6, %v2538_v4, %v7650_v8  ;;  %v14002_v50 = vld [vmem:[#allocation122_spill] sm:$0xff] }
 0x4c9   : > { %2056 = vrot.lane.b32.xlu1 %v6294_v21, %s5483_s17  ;;  %2058 = vrot.lane.b32.xlu0 %v6316_v16, %s5483_s17  ;;  %v2796_v59 = vsel %vm2764_vm7, %v2667_v35, %v7931_v33  ;;  %v5314_v21 = vld [vmem:[%s5574_s10 + $0x118] sm:$0xff]  ;;  %v14122_v44 = vld [vmem:[#allocation162_spill] sm:$0xff] }
 0x4ca   : > { %v8335_v40 = vpop.permute.xlu2 %1913  ;;  %v2275_v16 = vsel %vm2245_vm2, %v5314_v21, %v14002_v50 }
 0x4cb   : > { %13998 = vst [vmem:[#allocation205_spill] sm:$0xff] %v8335_v40  ;;  %v8339_v30 = vpop.permute.xlu1 %1893  ;;  %v8341_v36 = vpop.permute.xlu0 %1897  ;;  %v8352_v4 = vsel %vm2311_vm3, %v2275_v16, %v14003_v39  ;;  %v14005_v40 = vld [vmem:[#allocation308_spill] sm:$0xff] }
 0x4cc   : > { %13999 = vst [vmem:[#allocation111_spill] sm:$0xff] %v8339_v30  ;;  %v8345_v52 = vsel %vm2893_vm8, %v2796_v59, %v8339_v30  ;;  %v2438_v35 = vsel %vm2377_vm4, %v8352_v4, %v14005_v40  ;;  %v14082_v30 = vld [vmem:[#allocation123_spill] sm:$0xff]  ;;  %v14105_v40 = vld [vmem:[#allocation142_spill] sm:$0xff] }
 0x4cd   : > { %14000 = vst [vmem:[#allocation494_spill] sm:$0xff] %v8341_v36  ;;  %v2567_v33 = vsel %vm2506_vm5, %v2438_v35, %v7446_v58  ;;  %v14011_v35 = vld [vmem:[#allocation126_spill] sm:$0xff]  ;;  %v14014_v58 = vld [vmem:[#allocation12_spill] sm:$0xff]  ;;  %v14092_v36 = vld [vmem:[#allocation415_spill] sm:$0xff] }
 0x4ce   : > { %14001 = vst [vmem:[#allocation495_spill] sm:$0xff] %v8345_v52  ;;  %v2696_v59 = vsel %vm2635_vm6, %v2567_v33, %v7708_v46  ;;  %v14006_v52 = vld [vmem:[#allocation113_spill] sm:$0xff]  ;;  %v5315_v33 = vld [vmem:[%s5574_s10 + $0x130] sm:$0xff] }
 0x4cf   : > { %14004 = vst [vmem:[#allocation122_spill] sm:$0xff] %v8352_v4  ;;  %v2825_v39 = vsel %vm2764_vm7, %v2696_v59, %v8049_v62  ;;  %v14012_v46 = vld [vmem:[#allocation237_spill] sm:$0xff]  ;;  %v14036_v62 = vld [vmem:[#allocation18_spill] sm:$0xff] }
 0x4d0   : > { %1975 = vrot.lane.b32.xlu2 %v13652_v54, %s5482_s16  ;;  %v14080_v4 = vld [vmem:[#allocation118_spill] sm:$0xff] }
 0x4d1   : > { %1973 = vrot.lane.b32.xlu1 %v14006_v52, %s5482_s16  ;;  %2060 = vrot.lane.b32.xlu0 %v6313_v29, %s5483_s17  ;;  %v2278_v52 = vsel %vm2245_vm2, %v5315_v33, %v14011_v35 }
 0x4d2   : > { %v8369_v21 = vpop.permute.xlu2 %1919  ;;  %v8384_v29 = vsel %vm2311_vm3, %v2278_v52, %v14012_v46 }
 0x4d3   : > { %14007 = vst [vmem:[#allocation231_spill] sm:$0xff] %v8369_v21  ;;  %v8371_v50 = vpop.permute.xlu1 %1899  ;;  %v8375_v16 = vsel %vm2893_vm8, %v2825_v39, %v8369_v21  ;;  %v8377_v54 = vpop.permute.xlu0 %1903  ;;  %v2441_v59 = vsel %vm2377_vm4, %v8384_v29, %v14014_v58  ;;  %v14095_v58 = vld [vmem:[#allocation132_spill] sm:$0xff] }
 0x4d4   : > { %14008 = vst [vmem:[#allocation113_spill] sm:$0xff] %v8371_v50  ;;  %v2570_v50 = vsel %vm2506_vm5, %v2441_v59, %v7458_v18  ;;  %v14073_v18 = vld [vmem:[#allocation180_spill] sm:$0xff] }
 0x4d5   : > { %14009 = vst [vmem:[#allocation496_spill] sm:$0xff] %v8375_v16  ;;  %v2699_v39 = vsel %vm2635_vm6, %v2570_v50, %v7720_v57  ;;  %v14015_v16 = vld [vmem:[#allocation119_spill] sm:$0xff] }
 0x4d6   : > { %14010 = vst [vmem:[#allocation497_spill] sm:$0xff] %v8377_v54  ;;  %v2828_v46 = vsel %vm2764_vm7, %v2699_v39, %v8061_v43  ;;  %v3155_v39 = vld [vmem:[%s12500_s1 + $0x20] sm:$0xf]  ;;  %v14091_v54 = vld [vmem:[#allocation129_spill] sm:$0xff] }
 0x4d7   : > { %14013 = vst [vmem:[#allocation126_spill] sm:$0xff] %v8384_v29  ;;  %5036 = vmatpush.msk.msra.mxu0 %vm3545_vm9, %v3155_v39  ;;  %5171 = vmatpush.msk.msra.mxu1 %vm3545_vm9, %v3155_v39  ;;  %v14027_v43 = vld [vmem:[#allocation16_spill] sm:$0xff] }
 0x4d8   : > { %1979 = vrot.lane.b32.xlu2 %v13658_v60, %s5482_s16  ;;  %5172 = vmatpush.msk.msra.mxu2 %vm3545_vm9, %v3155_v39  ;;  %v14075_v29 = vld [vmem:[#allocation100_spill] sm:$0xff] }
 0x4d9   : > { %1977 = vrot.lane.b32.xlu1 %v14015_v16, %s5482_s16  ;;  %2062 = vrot.lane.b32.xlu0 %v6319_v13, %s5483_s17  ;;  %v14020_v13 = vld [vmem:[#allocation9_spill] sm:$0xff] }
 0x4da   : > { %v8401_v33 = vpop.permute.xlu2 %1925  ;;  %5173 = vmatpush.msk.msra.mxu3 %vm3545_vm9, %v3155_v39  ;;  %v14028_v39 = vld [vmem:[#allocation135_spill] sm:$0xff] }
 0x4db   : > { %14016 = vst [vmem:[#allocation237_spill] sm:$0xff] %v8401_v33  ;;  %v8403_v35 = vpop.permute.xlu1 %1905  ;;  %v8407_v60 = vsel %vm2893_vm8, %v2828_v46, %v8401_v33  ;;  %v8409_v52 = vpop.permute.xlu0 %1909  ;;  %v5316_v46 = vld [vmem:[%s5574_s10 + $0x120] sm:$0xff] }
 0x4dc   : > { %14017 = vst [vmem:[#allocation119_spill] sm:$0xff] %v8403_v35 }
 0x4dd   : > { %14018 = vst [vmem:[#allocation498_spill] sm:$0xff] %v8407_v60  ;;  %v14025_v60 = vld [vmem:[#allocation213_spill] sm:$0xff] }
 0x4de   : > { %14019 = vst [vmem:[#allocation499_spill] sm:$0xff] %v8409_v52 }
 0x4e0   : > { %2064 = vrot.lane.b32.xlu2 %v6341_v7, %s5483_s17  ;;  %v3154_v7 = vld [vmem:[%s12500_s1 + $0x18] sm:$0xff] }
 0x4e1   : > { %1981 = vrot.lane.b32.xlu1 %v6267_v23, %s5482_s16  ;;  %1983 = vrot.lane.b32.xlu0 %v14020_v13, %s5482_s16  ;;  %v3153_v23 = vld [vmem:[%s12500_s1 + $0x10] sm:$0xff] }
 0x4e2   : > { %v8417_v50 = vpop.permute.xlu2 %1931  ;;  %v14024_v13 = vld [vmem:[#allocation134_spill] sm:$0xff]  ;;  %3561 = vmatpush.msra.mxu0 %v3154_v7  ;;  %5174 = vmatpush.msra.mxu1 %v3154_v7 }
 0x4e3   : > { %14021 = vst [vmem:[#allocation9_spill] sm:$0xff] %v8417_v50  ;;  %v8419_v16 = vpop.permute.xlu1 %1911  ;;  %v8421_v59 = vpop.permute.xlu0 %1915  ;;  %v2276_v50 = vsel %vm2245_vm2, %v5316_v46, %v14024_v13  ;;  %5175 = vmatpush.msra.mxu2 %v3154_v7  ;;  %v3151_v13 = vld [vmem:[%s12500_s1] sm:$0xff]  ;;  %5176 = vmatpush.msra.mxu3 %v3154_v7 }
 0x4e4   : > { %14022 = vst [vmem:[#allocation500_spill] sm:$0xff] %v8419_v16  ;;  %v8437_v33 = vsel %vm2311_vm3, %v2276_v50, %v14025_v60  ;;  %3562 = vmatpush.msra.mxu0 %v3153_v23  ;;  %v3152_v60 = vld [vmem:[%s12500_s1 + $0x8] sm:$0xff]  ;;  %5177 = vmatpush.msra.mxu1 %v3153_v23 }
 0x4e5   : > { %14023 = vst [vmem:[#allocation501_spill] sm:$0xff] %v8421_v59  ;;  %v2439_v59 = vsel %vm2377_vm4, %v8437_v33, %v14027_v43  ;;  %5178 = vmatpush.msra.mxu2 %v3153_v23  ;;  %5179 = vmatpush.msra.mxu3 %v3153_v23  ;;  %v14038_v23 = vld [vmem:[#allocation139_spill] sm:$0xff] }
 0x4e6   : > { %14026 = vst [vmem:[#allocation134_spill] sm:$0xff] %v8437_v33  ;;  %v2568_v16 = vsel %vm2506_vm5, %v2439_v59, %v7456_v61  ;;  %3563 = vmatpush.msra.mxu0 %v3152_v60  ;;  %5180 = vmatpush.msra.mxu1 %v3152_v60  ;;  %v14076_v33 = vld [vmem:[#allocation101_spill] sm:$0xff]  ;;  %v14079_v61 = vld [vmem:[#allocation116_spill] sm:$0xff]  ;;  %v5335_v43 = vld [vmem:[%s5574_s10 + $0xb0] sm:$0xff] }
 0x4e7   : > { %v2697_v50 = vsel %vm2635_vm6, %v2568_v16, %v7670_v17  ;;  %5181 = vmatpush.msra.mxu2 %v3152_v60  ;;  %5182 = vmatpush.msra.mxu3 %v3152_v60  ;;  %v14078_v17 = vld [vmem:[#allocation108_spill] sm:$0xff]  ;;  %v8645_v52 = vsel %vm2245_vm2, %v5335_v43, %v14082_v30 }
 0x4e8   : > { %2082 = vrot.lane.b32.xlu2 %v6415_v25, %s5483_s17  ;;  %v2826_v25 = vsel %vm2764_vm7, %v2697_v50, %v8059_v55  ;;  %3564 = vmatpush.msra.mxu0 %v3151_v13  ;;  %v14034_v55 = vld [vmem:[#allocation232_spill] sm:$0xff] }
 0x4e9   : > { %2066 = vrot.lane.b32.xlu1 %v6338_v9, %s5483_s17  ;;  %2068 = vrot.lane.b32.xlu0 %v14028_v39, %s5483_s17  ;;  %v5317_v39 = vld [vmem:[%s5574_s10 + $0x128] sm:$0xff]  ;;  %v5338_v43 = vld [vmem:[%s5574_s10 + $0xe0] sm:$0xff] }
 0x4ea   : > { %v8455_v46 = vpop.permute.xlu2 %1937  ;;  %5183 = vmatpush.msra.mxu1 %v3151_v13  ;;  %5184 = vmatpush.msra.mxu2 %v3151_v13  ;;  %v14087_v30 = vld [vmem:[#allocation128_spill] sm:$0xff] }
 0x4eb   : > { %14029 = vst [vmem:[#allocation213_spill] sm:$0xff] %v8455_v46  ;;  %v8459_v59 = vpop.permute.xlu1 %1917  ;;  %v8461_v9 = vpop.permute.xlu0 %1921  ;;  %v14033_v46 = vld [vmem:[#allocation137_spill] sm:$0xff]  ;;  %5185 = vmatpush.msra.mxu3 %v3151_v13  ;;  %v8664_v22 = vsel %vm2245_vm2, %v5338_v43, %v14087_v30  ;;  %v14094_v30 = vld [vmem:[#allocation131_spill] sm:$0xff] }
 0x4ec   : > { %14030 = vst [vmem:[#allocation135_spill] sm:$0xff] %v8459_v59  ;;  %v8468_v16 = vsel %vm2893_vm8, %v2826_v25, %v8461_v9  ;;  %v2277_v50 = vsel %vm2245_vm2, %v5317_v39, %v14033_v46  ;;  %v14037_v25 = vld [vmem:[#allocation121_spill] sm:$0xff] }
 0x4ed   : > { %14031 = vst [vmem:[#allocation502_spill] sm:$0xff] %v8461_v9  ;;  %v8475_v21 = vsel %vm2311_vm3, %v2277_v50, %v14034_v55  ;;  %v14043_v50 = vld [vmem:[#allocation140_spill] sm:$0xff]  ;;  %v14044_v13 = vld [vmem:[#allocation145_spill] sm:$0xff]  ;;  %v14061_v9 = vld [vmem:[#allocation63_spill] sm:$0xff] }
 0x4ee   : > { %14032 = vst [vmem:[#allocation503_spill] sm:$0xff] %v8468_v16  ;;  %v2440_v7 = vsel %vm2377_vm4, %v8475_v21, %v14036_v62 }
 0x4ef   : > { %14035 = vst [vmem:[#allocation137_spill] sm:$0xff] %v8475_v21  ;;  %v2569_v16 = vsel %vm2506_vm5, %v2440_v7, %v14037_v25  ;;  %v14067_v25 = vld [vmem:[#allocation72_spill] sm:$0xff]  ;;  %v14093_v21 = vld [vmem:[#allocation130_spill] sm:$0xff] }
 0x4f0   : > { %2084 = vrot.lane.b32.xlu2 %v6412_v27, %s5483_s17  ;;  %v2698_v55 = vsel %vm2635_vm6, %v2569_v16, %v7710_v3  ;;  %v5320_v3 = vld [vmem:[%s5574_s10 + $0x40] sm:$0xff] }
 0x4f1   : > { %2070 = vrot.lane.b32.xlu1 %v6366_v24, %s5483_s17  ;;  %2072 = vrot.lane.b32.xlu0 %v14038_v23, %s5483_s17  ;;  %v2827_v39 = vsel %vm2764_vm7, %v2698_v55, %v8021_v6  ;;  %v14048_v55 = vld [vmem:[#allocation147_spill] sm:$0xff] }
 0x4f2   : > { %v8490_v46 = vpop.permute.xlu2 %1943 }
 0x4f3   : > { %14039 = vst [vmem:[#allocation232_spill] sm:$0xff] %v8490_v46  ;;  %v8494_v27 = vpop.permute.xlu1 %1923  ;;  %v8496_v60 = vpop.permute.xlu0 %1927  ;;  %v14049_v46 = vld [vmem:[#allocation267_spill] sm:$0xff] }
 0x4f4   : > { %14040 = vst [vmem:[#allocation139_spill] sm:$0xff] %v8494_v27  ;;  %v8500_v24 = vsel %vm2893_vm8, %v2827_v39, %v8494_v27  ;;  %v2293_v39 = vsel %vm2245_vm2, %v7887_v51, %v14048_v55  ;;  %v14054_v27 = vld [vmem:[#allocation264_spill] sm:$0xff]  ;;  %v14055_v51 = vld [vmem:[#allocation154_spill] sm:$0xff] }
 0x4f5   : > { %14041 = vst [vmem:[#allocation504_spill] sm:$0xff] %v8496_v60  ;;  %v5318_v55 = vld [vmem:[%s5574_s10 + $0x18] sm:$0xff] }
 0x4f6   : > { %14042 = vst [vmem:[#allocation505_spill] sm:$0xff] %v8500_v24  ;;  %v14051_v24 = vld [vmem:[#allocation26_spill] sm:$0xff]  ;;  %v14066_v60 = vld [vmem:[#allocation71_spill] sm:$0xff] }
 0x4f8   : > { %2074 = vrot.lane.b32.xlu2 %v14043_v50, %s5483_s17  ;;  %v8519_v50 = vsel %vm2311_vm3, %v2293_v39, %v14049_v46  ;;  %v14056_v46 = vld [vmem:[#allocation146_spill] sm:$0xff] }
 0x4f9   : > { %2086 = vrot.lane.b32.xlu1 %v6418_v56, %s5483_s17  ;;  %2076 = vrot.lane.b32.xlu0 %v14044_v13, %s5483_s17  ;;  %14050 = vst [vmem:[#allocation147_spill] sm:$0xff] %v8519_v50  ;;  %v2472_v56 = vsel %vm2377_vm4, %v8519_v50, %v14051_v24  ;;  %v14052_v13 = vld [vmem:[#allocation373_spill] sm:$0xff]  ;;  %v14057_v39 = vld [vmem:[#allocation46_spill] sm:$0xff]  ;;  %v14074_v24 = vld [vmem:[#allocation99_spill] sm:$0xff] }
 0x4fa   : > { %v8508_v16 = vpop.permute.xlu2 %1949  ;;  %v8537_v50 = vsel %vm2245_vm2, %v5318_v55, %v14057_v39  ;;  %v8553_v55 = vsel %vm2245_vm2, %v5320_v3, %v14061_v9  ;;  %v5321_v39 = vld [vmem:[%s5574_s10 + $0x60] sm:$0xff] }
 0x4fb   : > { %14045 = vst [vmem:[#allocation140_spill] sm:$0xff] %v8508_v16  ;;  %v8510_v7 = vpop.permute.xlu1 %1929  ;;  %v8512_v23 = vpop.permute.xlu0 %1933  ;;  %v2601_v16 = vsel %vm2506_vm5, %v2472_v56, %v14052_v13  ;;  %v5319_v56 = vld [vmem:[%s5574_s10 + $0x28] sm:$0xff]  ;;  %v5323_v9 = vld [vmem:[%s5574_s10] sm:$0xff] }
 0x4fc   : > { %14046 = vst [vmem:[#allocation145_spill] sm:$0xff] %v8510_v7  ;;  %v14053_v7 = vld [vmem:[#allocation144_spill] sm:$0xff]  ;;  %v2730_v6 = vsel %vm2635_vm6, %v2601_v16, %v14054_v27  ;;  %v14058_v13 = vld [vmem:[#allocation54_spill] sm:$0xff] }
 0x4fd   : > { %14047 = vst [vmem:[#allocation506_spill] sm:$0xff] %v8512_v23  ;;  %v2859_v16 = vsel %vm2764_vm7, %v2730_v6, %v8121_v15  ;;  %v14060_v27 = vld [vmem:[#allocation62_spill] sm:$0xff] }
 0x4fe   : > { %v14062_v23 = vld [vmem:[#allocation70_spill] sm:$0xff] }
 0x4ff   : > { %v5322_v15 = vld [vmem:[%s5574_s10 + $0x8] sm:$0xff] }
 0x500   : > { %2078 = vrot.lane.b32.xlu2 %v14053_v7, %s5483_s17  ;;  %v8542_v7 = vsel %vm2245_vm2, %v5319_v56, %v14058_v13  ;;  %v8558_v13 = vsel %vm2245_vm2, %v5321_v39, %v14062_v23  ;;  %v8571_v3 = vsel %vm2245_vm2, %v5322_v15, %v14066_v60  ;;  %v8576_v23 = vsel %vm2245_vm2, %v5323_v9, %v14067_v25  ;;  %v5324_v39 = vld [vmem:[%s5574_s10 + $0x10] sm:$0xff]  ;;  %v5326_v15 = vld [vmem:[%s5574_s10 + $0xa0] sm:$0xff]  ;;  %v5327_v25 = vld [vmem:[%s5574_s10 + $0x38] sm:$0xff] }
 0x501   : > { %2088 = vrot.lane.b32.xlu1 %v14055_v51, %s5483_s17  ;;  %2080 = vrot.lane.b32.xlu0 %v14056_v46, %s5483_s17  ;;  %v2246_v46 = vsel %vm2245_vm2, 0.0, %v14060_v27  ;;  %v14070_v60 = vld [vmem:[#allocation90_spill] sm:$0xff]  ;;  %v14071_v9 = vld [vmem:[#allocation91_spill] sm:$0xff] }
 0x502   : > { %v8546_v51 = vpop.permute.xlu2 %1955  ;;  %v8591_v35 = vsel %vm2245_vm2, %v5326_v15, %v14070_v60  ;;  %v8596_v59 = vsel %vm2245_vm2, %v5327_v25, %v14071_v9  ;;  %v5330_v60 = vld [vmem:[%s5574_s10 + $0x58] sm:$0xff]  ;;  %v5331_v9 = vld [vmem:[%s5574_s10 + $0x68] sm:$0xff] }
 0x503   : > { %14059 = vst [vmem:[#allocation267_spill] sm:$0xff] %v8546_v51  ;;  %v8560_v6 = vpop.permute.xlu1 %1935  ;;  %v8564_v56 = vsel %vm2893_vm8, %v2859_v16, %v8546_v51  ;;  %v8566_v27 = vpop.permute.xlu0 %1939  ;;  %v14069_v51 = vld [vmem:[#allocation82_spill] sm:$0xff]  ;;  %v8615_v25 = vsel %vm2245_vm2, %v5330_v60, %v14075_v29 }
 0x504   : > { %14063 = vst [vmem:[#allocation144_spill] sm:$0xff] %v8560_v6  ;;  %v14068_v6 = vld [vmem:[#allocation81_spill] sm:$0xff] }
 0x505   : > { %14064 = vst [vmem:[#allocation154_spill] sm:$0xff] %v8564_v56  ;;  %v8581_v16 = vsel %vm2245_vm2, %v5324_v39, %v14068_v6  ;;  %v5325_v56 = vld [vmem:[%s5574_s10 + $0x30] sm:$0xff]  ;;  %v14072_v39 = vld [vmem:[#allocation92_spill] sm:$0xff]  ;;  %v5334_v60 = vld [vmem:[%s5574_s10 + $0xa8] sm:$0xff] }
 0x506   : > { %14065 = vst [vmem:[#allocation146_spill] sm:$0xff] %v8566_v27  ;;  %v8586_v27 = vsel %vm2245_vm2, %v5325_v56, %v14069_v51  ;;  %v5328_v6 = vld [vmem:[%s5574_s10 + $0x50] sm:$0xff]  ;;  %v8605_v51 = vsel %vm2311_vm3, %v2246_v46, %v14073_v18  ;;  %v5329_v56 = vld [vmem:[%s5574_s10 + $0xb8] sm:$0xff] }
 0x507   : > { %v8601_v57 = vsel %vm2245_vm2, %v5328_v6, %v14072_v39  ;;  %v8610_v15 = vsel %vm2245_vm2, %v5329_v56, %v14074_v24  ;;  %v8620_v6 = vsel %vm2245_vm2, %v5331_v9, %v14076_v33  ;;  %v14077_v39 = vld [vmem:[#allocation291_spill] sm:$0xff]  ;;  %v8638_v33 = vsel %vm2245_vm2, %v5334_v60, %v14080_v4 }
 0x508   : > { %v2378_v18 = vsel %vm2377_vm4, %v8605_v51, %v14077_v39  ;;  %v5332_v46 = vld [vmem:[%s5574_s10 + $0xd8] sm:$0xff] }
 0x509   : > { %v8628_v24 = vsel %vm2245_vm2, %v5332_v46, %v14078_v17  ;;  %v5333_v56 = vld [vmem:[%s5574_s10 + $0xf8] sm:$0xff]  ;;  %v5336_v17 = vld [vmem:[%s5574_s10 + $0xc8] sm:$0xff] }
 0x50a   : > { %v8633_v29 = vsel %vm2245_vm2, %v5333_v56, %v14079_v61  ;;  %v14081_v9 = vld [vmem:[#allocation319_spill] sm:$0xff]  ;;  %v14083_v46 = vld [vmem:[#allocation124_spill] sm:$0xff] }
 0x50b   : > { %v2507_v62 = vsel %vm2506_vm5, %v2378_v18, %v14081_v9  ;;  %v8650_v61 = vsel %vm2245_vm2, %v5336_v17, %v14083_v46  ;;  %v14084_v56 = vld [vmem:[#allocation391_spill] sm:$0xff]  ;;  %v14088_v17 = vld [vmem:[#allocation434_spill] sm:$0xff] }
 0x50c   : > { %v2636_v8 = vsel %vm2635_vm6, %v2507_v62, %v14084_v56  ;;  %v14085_v4 = vld [vmem:[#allocation155_spill] sm:$0xff]  ;;  %v14089_v62 = vld [vmem:[#allocation153_spill] sm:$0xff]  ;;  %v14102_v9 = vld [vmem:[#allocation138_spill] sm:$0xff] }
 0x50d   : > { %2092 = vrot.lane.b32.xlu2 %v14085_v4, %s5483_s17  ;;  %v5337_v18 = vld [vmem:[%s5574_s10 + $0xd0] sm:$0xff]  ;;  %v2765_v46 = vsel %vm2764_vm7, %v2636_v8, %v14088_v17  ;;  %2090 = vrot.lane.b32.xlu1 %v14089_v62, %s5483_s17  ;;  %v14090_v4 = vld [vmem:[#allocation160_spill] sm:$0xff] }
 0x50e   : > { %v14086_v60 = vld [vmem:[#allocation127_spill] sm:$0xff]  ;;  %2094 = vrot.lane.b32.xlu0 %v14090_v4, %s5483_s17  ;;  %v5340_v8 = vld [vmem:[%s5574_s10 + $0x100] sm:$0xff]  ;;  %v2894_v62 = vsel %vm2893_vm8, %v2765_v46, %v8181_v45  ;;  %v2051_v4 = vpop.permute.xlu2 %2050 }
 0x50f   : > { %v8659_v2 = vsel %vm2245_vm2, %v5337_v18, %v14086_v60  ;;  %v8675_v18 = vsel %vm2245_vm2, %v14092_v36, %v14091_v54  ;;  %v5339_v60 = vld [vmem:[%s5574_s10 + $0xf0] sm:$0xff]  ;;  %v8685_v17 = vsel %vm2245_vm2, %v5340_v8, %v14094_v30  ;;  %v8692_v36 = vsel %vm2245_vm2, %v14096_v28, %v14095_v58  ;;  %v5341_v54 = vld [vmem:[%s5574_s10 + $0x108] sm:$0xff]  ;;  %v8704_v8 = vpop.permute.xlu1 %1941  ;;  %v8706_v30 = vpop.permute.xlu0 %1945  ;;  %v5342_v46 = vld [vmem:[%s5574_s10 + $0x140] sm:$0xff] }
 0x510   : > { %v8680_v43 = vsel %vm2245_vm2, %v5339_v60, %v14093_v21  ;;  %v8697_v21 = vsel %vm2245_vm2, %v5341_v54, %v14097_v31  ;;  %v14098_v60 = vld [vmem:[#allocation136_spill] sm:$0xff]  ;;  %14100 = vst [vmem:[#allocation46_spill] sm:$0xff] %v8704_v8  ;;  %v3023_v45 = vsel %vm3022_vm10, %v2894_v62, %v2051_v4  ;;  %v8712_v58 = vsel %vm2245_vm2, %v5342_v46, %v14102_v9  ;;  %v14103_v28 = vld [vmem:[#allocation141_spill] sm:$0xff]  ;;  %v14106_v8 = vld [vmem:[#allocation143_spill] sm:$0xff] }
 0x511   : > { %v8702_v56 = vsel %vm2245_vm2, %v14099_v26, %v14098_v60  ;;  %14101 = vst [vmem:[#allocation54_spill] sm:$0xff] %v8706_v30  ;;  %v8717_v31 = vsel %vm2245_vm2, %v14104_v14, %v14103_v28  ;;  %v5343_v54 = vld [vmem:[%s5574_s10 + $0x148] sm:$0xff]  ;;  %v5344_v60 = vld [vmem:[%s5574_s10 + $0x158] sm:$0xff]  ;;  %5037 = vmatmul.msk.f32.vlgmr.msra.gmra.mxu0 %vm3160_vm11, %v3023_v45 }
 0x512   : > { %v8722_v26 = vsel %vm2245_vm2, %v5343_v54, %v14105_v40  ;;  %v8727_v30 = vsel %vm2245_vm2, %v5344_v60, %v14106_v8  ;;  %v14107_v62 = vld [vmem:[#allocation148_spill] sm:$0xff]  ;;  %v14108_v9 = vld [vmem:[#allocation419_spill] sm:$0xff]  ;;  %v14109_v46 = vld [vmem:[#allocation149_spill] sm:$0xff] }
 0x513   : > { %v8733_v4 = vsel %vm2245_vm2, %v14108_v9, %v14107_v62  ;;  %v14110_v14 = vld [vmem:[#allocation420_spill] sm:$0xff]  ;;  %v14112_v40 = vld [vmem:[#allocation425_spill] sm:$0xff]  ;;  %v14118_v9 = vld [vmem:[#allocation431_spill] sm:$0xff] }
 0x514   : > { %v8738_v28 = vsel %vm2245_vm2, %v14110_v14, %v14109_v46  ;;  %v8743_v54 = vsel %vm2245_vm2, %v14112_v40, %v14111_v32  ;;  %v14114_v8 = vld [vmem:[#allocation441_spill] sm:$0xff]  ;;  %v14115_v45 = vld [vmem:[#allocation152_spill] sm:$0xff]  ;;  %v14119_v46 = vld [vmem:[#allocation158_spill] sm:$0xff] }
 0x515   : > { %v2297_v60 = vsel %vm2245_vm2, %v14114_v8, %v14113_v37  ;;  %v8751_v20 = vsel %vm2245_vm2, %v14116_v53, %v14115_v45  ;;  %v14117_v62 = vld [vmem:[#allocation157_spill] sm:$0xff]  ;;  %v14120_v14 = vld [vmem:[#allocation432_spill] sm:$0xff]  ;;  %v14121_v32 = vld [vmem:[#allocation254_spill] sm:$0xff]  ;;  %v8766_v37 = vsel %vm2245_vm2, %v14123_v49, %v14122_v44 }
 0x516   : > { %v8756_v12 = vsel %vm2245_vm2, %v14118_v9, %v14117_v62  ;;  %v2291_v10 = vsel %vm2245_vm2, %v14120_v14, %v14119_v46  ;;  %v2363_v40 = vsel %vm2311_vm3, %v2297_v60, %v14121_v32  ;;  %v14124_v8 = vld [vmem:[#allocation242_spill] sm:$0xff]  ;;  %v14126_v45 = vld [vmem:[#allocation315_spill] sm:$0xff]  ;;  %v14127_v9 = vld [vmem:[#allocation320_spill] sm:$0xff] }
 0x517   : > { %v8770_v53 = vsel %vm2311_vm3, %v2291_v10, %v14124_v8  ;;  %v2480_v62 = vsel %vm2377_vm4, %v2363_v40, %v14126_v45  ;;  %v2484_v41 = vsel %vm2377_vm4, %v2363_v40, %v14127_v9  ;;  %v14128_v39 = vld [vmem:[#allocation163_spill] sm:$0xff]  ;;  %v14129_v46 = vld [vmem:[#allocation436_spill] sm:$0xff]  ;;  %v14133_v8 = vld [vmem:[#allocation161_spill] sm:$0xff]  ;;  %v8814_v42 = vpop.permute.xlu1 %1947 }
 0x518   : > { %14125 = vst [vmem:[#allocation62_spill] sm:$0xff] %v8770_v53  ;;  %v2292_v14 = vsel %vm2245_vm2, %v14129_v46, %v14128_v39  ;;  %v14130_v60 = vld [vmem:[#allocation31_spill] sm:$0xff]  ;;  %v2609_v10 = vsel %vm2506_vm5, %v2480_v62, %v14132_v5  ;;  %2098 = vrot.lane.b32.xlu2 %v14133_v8, %s5483_s17  ;;  %v14134_v45 = vld [vmem:[#allocation372_spill] sm:$0xff]  ;;  %v14140_v62 = vld [vmem:[#allocation437_spill] sm:$0xff] }
 0x519   : > { %v2470_v32 = vsel %vm2377_vm4, %v8770_v53, %v14130_v60  ;;  %v14131_v49 = vld [vmem:[#allocation371_spill] sm:$0xff]  ;;  %v2738_v34 = vsel %vm2635_vm6, %v2609_v10, %v14135_v1  ;;  %v14136_v39 = vld [vmem:[#allocation276_spill] sm:$0xff]  ;;  %14144 = vst [vmem:[#allocation63_spill] sm:$0xff] %v8814_v42  ;;  %v14153_v42 = vld [vmem:[#allocation450_spill] sm:$0xff] }
 0x51a   : > { %v2613_v44 = vsel %vm2506_vm5, %v2484_v41, %v14131_v49  ;;  %v2599_v40 = vsel %vm2506_vm5, %v2470_v32, %v14134_v45  ;;  %v14137_v53 = vld [vmem:[#allocation159_spill] sm:$0xff]  ;;  %v14138_v41 = vld [vmem:[#allocation166_spill] sm:$0xff]  ;;  %v14139_v60 = vld [vmem:[#allocation164_spill] sm:$0xff]  ;;  %v2867_v32 = vsel %vm2764_vm7, %v2738_v34, %v8143_v47  ;;  %v8822_v34 = vpop.permute.xlu0 %1951 }
 0x51b   : > { %v2742_v46 = vsel %vm2635_vm6, %v2613_v44, %v14136_v39  ;;  %2096 = vrot.lane.b32.xlu1 %v14137_v53, %s5483_s17  ;;  %2100 = vrot.lane.b32.xlu0 %v14138_v41, %s5483_s17  ;;  %v2294_v5 = vsel %vm2245_vm2, %v14140_v62, %v14139_v60  ;;  %v14141_v8 = vld [vmem:[#allocation239_spill] sm:$0xff]  ;;  %v1964_v44 = vpop.permute.xlu2 %1963  ;;  %v14142_v1 = vld [vmem:[#allocation168_spill] sm:$0xff]  ;;  %14147 = vst [vmem:[#allocation72_spill] sm:$0xff] %v8822_v34 }
 0x51c   : > { %v2728_v38 = vsel %vm2635_vm6, %v2599_v40, %v14141_v8  ;;  %v2871_v10 = vsel %vm2764_vm7, %v2742_v46, %v8143_v47  ;;  %v14143_v45 = vld [vmem:[#allocation455_spill] sm:$0xff]  ;;  %v8817_v60 = vsel %vm2893_vm8, %v2867_v32, %v1964_v44  ;;  %v14148_v47 = vld [vmem:[#allocation174_spill] sm:$0xff]  ;;  %v14149_v46 = vld [vmem:[#allocation461_spill] sm:$0xff] }
 0x51d   : > { %v8810_v53 = vsel %vm2245_vm2, %v14143_v45, %v14142_v1  ;;  %v2857_v41 = vsel %vm2764_vm7, %v2728_v38, %v8119_v0  ;;  %14145 = vst [vmem:[#allocation70_spill] sm:$0xff] %v8817_v60  ;;  %v8820_v40 = vsel %vm2893_vm8, %v2871_v10, %v1964_v44  ;;  %v8827_v62 = vsel %vm2245_vm2, %v14149_v46, %v14148_v47  ;;  %v14150_v1 = vld [vmem:[#allocation176_spill] sm:$0xff]  ;;  %v14151_v45 = vld [vmem:[#allocation445_spill] sm:$0xff]  ;;  %v14155_v44 = vld [vmem:[#allocation182_spill] sm:$0xff] }
 0x51e   : > { %14146 = vst [vmem:[#allocation71_spill] sm:$0xff] %v8820_v40  ;;  %v8832_v8 = vsel %vm2245_vm2, %v14151_v45, %v14150_v1  ;;  %v14152_v38 = vld [vmem:[#allocation181_spill] sm:$0xff]  ;;  %v8839_v10 = vsel %vm2893_vm8, %v2857_v41, %v8822_v34  ;;  %v14156_v40 = vld [vmem:[#allocation451_spill] sm:$0xff]  ;;  %v14157_v47 = vld [vmem:[#allocation186_spill] sm:$0xff] }
 0x51f   : > { %v2301_v32 = vsel %vm2245_vm2, %v14153_v42, %v14152_v38  ;;  %14154 = vst [vmem:[#allocation81_spill] sm:$0xff] %v8839_v10  ;;  %v8844_v60 = vsel %vm2245_vm2, %v14156_v40, %v14155_v44  ;;  %v8849_v46 = vsel %vm2311_vm3, %v8581_v16, %v14157_v47  ;;  %v14159_v1 = vld [vmem:[#allocation52_spill] sm:$0xff]  ;;  %v14161_v42 = vld [vmem:[#allocation187_spill] sm:$0xff]  ;;  %v14162_v38 = vld [vmem:[#allocation457_spill] sm:$0xff] }
 0x520   : > { %14158 = vst [vmem:[#allocation82_spill] sm:$0xff] %v8849_v46  ;;  %v14160_v45 = vld [vmem:[#allocation456_spill] sm:$0xff]  ;;  %v8859_v41 = vsel %vm2245_vm2, %v14162_v38, %v14161_v42  ;;  %v14163_v10 = vld [vmem:[#allocation51_spill] sm:$0xff]  ;;  %v14165_v44 = vld [vmem:[#allocation53_spill] sm:$0xff] }
 0x521   : > { %v8854_v0 = vsel %vm2245_vm2, %v14160_v45, %v14159_v1  ;;  %v8864_v40 = vsel %vm2311_vm3, %v8586_v27, %v14163_v10  ;;  %v14166_v34 = vld [vmem:[#allocation462_spill] sm:$0xff]  ;;  %v14168_v46 = vld [vmem:[#allocation463_spill] sm:$0xff]  ;;  %v14169_v45 = vld [vmem:[#allocation60_spill] sm:$0xff] }
 0x522   : > { %14164 = vst [vmem:[#allocation90_spill] sm:$0xff] %v8864_v40  ;;  %v8869_v16 = vsel %vm2245_vm2, %v14166_v34, %v14165_v44  ;;  %v14167_v47 = vld [vmem:[#allocation50_spill] sm:$0xff]  ;;  %v8879_v42 = vsel %vm2311_vm3, %v8601_v57, %v14169_v45  ;;  %v14170_v38 = vld [vmem:[#allocation61_spill] sm:$0xff]  ;;  %v14171_v10 = vld [vmem:[#allocation59_spill] sm:$0xff] }
 0x523   : > { %v8874_v1 = vsel %vm2245_vm2, %v14168_v46, %v14167_v47  ;;  %v8884_v27 = vsel %vm2245_vm2, %v8003_v11, %v14170_v38  ;;  %v8889_v34 = vsel %vm2311_vm3, %v8576_v23, %v14171_v10  ;;  %v14172_v44 = vld [vmem:[#allocation248_spill] sm:$0xff]  ;;  %v14174_v46 = vld [vmem:[#allocation262_spill] sm:$0xff]  ;;  %v14178_v11 = vld [vmem:[#allocation69_spill] sm:$0xff] }
 0x524   : > { %v8893_v40 = vsel %vm2311_vm3, %v2294_v5, %v14172_v44  ;;  %v8897_v47 = vsel %vm2311_vm3, %v2292_v14, %v14174_v46  ;;  %v14176_v57 = vld [vmem:[#allocation68_spill] sm:$0xff]  ;;  %v8907_v38 = vsel %vm2311_vm3, %v8571_v3, %v14178_v11  ;;  %v14179_v23 = vld [vmem:[#allocation33_spill] sm:$0xff]  ;;  %v14181_v14 = vld [vmem:[#allocation167_spill] sm:$0xff] }
 0x525   : > { %14173 = vst [vmem:[#allocation91_spill] sm:$0xff] %v8893_v40  ;;  %v8902_v45 = vsel %vm2311_vm3, %v8620_v6, %v14176_v57  ;;  %v2471_v10 = vsel %vm2377_vm4, %v8897_v47, %v14179_v23  ;;  %v14180_v5 = vld [vmem:[#allocation312_spill] sm:$0xff]  ;;  %2104 = vrot.lane.b32.xlu2 %v14181_v14, %s5483_s17  ;;  %v14182_v46 = vld [vmem:[#allocation78_spill] sm:$0xff]  ;;  %v14184_v11 = vld [vmem:[#allocation375_spill] sm:$0xff] }
 0x526   : > { %14175 = vst [vmem:[#allocation92_spill] sm:$0xff] %v8897_v47  ;;  %v2473_v44 = vsel %vm2377_vm4, %v8893_v40, %v14180_v5  ;;  %v8920_v6 = vsel %vm2311_vm3, %v8537_v50, %v14182_v46  ;;  %v14183_v57 = vld [vmem:[#allocation362_spill] sm:$0xff]  ;;  %v14185_v23 = vld [vmem:[#allocation165_spill] sm:$0xff]  ;;  %v14187_v40 = vld [vmem:[#allocation79_spill] sm:$0xff] }
 0x527   : > { %14177 = vst [vmem:[#allocation180_spill] sm:$0xff] %v8902_v45  ;;  %v2600_v3 = vsel %vm2506_vm5, %v2471_v10, %v14183_v57  ;;  %v2602_v45 = vsel %vm2506_vm5, %v2473_v44, %v14184_v11  ;;  %2102 = vrot.lane.b32.xlu1 %v14185_v23, %s5483_s17  ;;  %v14186_v47 = vld [vmem:[#allocation177_spill] sm:$0xff]  ;;  %v8933_v14 = vsel %vm2311_vm3, %v8542_v7, %v14187_v40  ;;  %v14188_v5 = vld [vmem:[#allocation88_spill] sm:$0xff]  ;;  %v14190_v44 = vld [vmem:[#allocation259_spill] sm:$0xff]  ;;  %v8944_v23 = vpop.permute.xlu2 %1967 }
 0x528   : > { %2114 = vrot.lane.b32.xlu0 %v14186_v47, %s5483_s17  ;;  %v8938_v50 = vsel %vm2311_vm3, %v8596_v59, %v14188_v5  ;;  %v14189_v10 = vld [vmem:[#allocation245_spill] sm:$0xff]  ;;  %v2729_v11 = vsel %vm2635_vm6, %v2600_v3, %v14190_v44  ;;  %14191 = vst [vmem:[#allocation99_spill] sm:$0xff] %v8944_v23  ;;  %v14192_v57 = vld [vmem:[#allocation87_spill] sm:$0xff]  ;;  %v8960_v5 = vpop.permute.xlu1 %1953  ;;  %v8962_v3 = vpop.permute.xlu0 %1957  ;;  %v14196_v23 = vld [vmem:[#allocation86_spill] sm:$0xff] }
 0x529   : > { %v2731_v46 = vsel %vm2635_vm6, %v2602_v45, %v14189_v10  ;;  %v8949_v47 = vsel %vm2311_vm3, %v8638_v33, %v14192_v57  ;;  %v14193_v7 = vld [vmem:[#allocation89_spill] sm:$0xff]  ;;  %v2858_v59 = vsel %vm2764_vm7, %v2729_v11, %v8081_v19  ;;  %14194 = vst [vmem:[#allocation100_spill] sm:$0xff] %v8960_v5  ;;  %v8967_v33 = vsel %vm2311_vm3, %v8615_v25, %v14196_v23  ;;  %v14201_v25 = vld [vmem:[#allocation106_spill] sm:$0xff]  ;;  %v14264_v10 = vld [vmem:[#allocation384_spill] sm:$0xff] }
 0x52a   : > { %v8954_v40 = vsel %vm2311_vm3, %v8553_v55, %v14193_v7  ;;  %v2860_v45 = vsel %vm2764_vm7, %v2731_v46, %v8131_v63  ;;  %14195 = vst [vmem:[#allocation101_spill] sm:$0xff] %v8962_v3  ;;  %v14197_v57 = vld [vmem:[#allocation97_spill] sm:$0xff]  ;;  %v8976_v11 = vsel %vm2893_vm8, %v2858_v59, %v8960_v5  ;;  %v14200_v7 = vld [vmem:[#allocation98_spill] sm:$0xff]  ;;  %v8990_v23 = vsel %vm2311_vm3, %v8664_v22, %v14201_v25  ;;  %v14205_v59 = vld [vmem:[#allocation115_spill] sm:$0xff] }
 0x52b   : > { %v8972_v55 = vsel %vm2311_vm3, %v8650_v61, %v14197_v57  ;;  %14198 = vst [vmem:[#allocation108_spill] sm:$0xff] %v8976_v11  ;;  %v8980_v46 = vsel %vm2893_vm8, %v2860_v45, %v8962_v3  ;;  %v8985_v63 = vsel %vm2311_vm3, %v8558_v13, %v14200_v7  ;;  %v14203_v61 = vld [vmem:[#allocation114_spill] sm:$0xff]  ;;  %v9000_v45 = vsel %vm2311_vm3, %v8591_v35, %v14205_v59  ;;  %v14206_v3 = vld [vmem:[#allocation209_spill] sm:$0xff]  ;;  %v14209_v25 = vld [vmem:[#allocation215_spill] sm:$0xff] }
 0x52c   : > { %14199 = vst [vmem:[#allocation116_spill] sm:$0xff] %v8980_v46  ;;  %v8995_v57 = vsel %vm2311_vm3, %v8685_v17, %v14203_v61  ;;  %v9005_v13 = vsel %vm2311_vm3, %v8645_v52, %v14206_v3  ;;  %v14207_v7 = vld [vmem:[#allocation214_spill] sm:$0xff]  ;;  %v9015_v17 = vsel %vm2311_vm3, %v8659_v2, %v14209_v25  ;;  %v14211_v61 = vld [vmem:[#allocation279_spill] sm:$0xff]  ;;  %v14217_v25 = vld [vmem:[#allocation220_spill] sm:$0xff] }
 0x52d   : > { %14202 = vst [vmem:[#allocation118_spill] sm:$0xff] %v8990_v23  ;;  %v9010_v22 = vsel %vm2311_vm3, %v8610_v15, %v14207_v7  ;;  %v2367_v11 = vsel %vm2311_vm3, %v2301_v32, %v14211_v61  ;;  %v14212_v35 = vld [vmem:[#allocation218_spill] sm:$0xff]  ;;  %v14214_v52 = vld [vmem:[#allocation219_spill] sm:$0xff]  ;;  %v14216_v15 = vld [vmem:[#allocation313_spill] sm:$0xff]  ;;  %v9036_v32 = vsel %vm2311_vm3, %v8680_v43, %v14217_v25 }
 0x52e   : > { %14204 = vst [vmem:[#allocation123_spill] sm:$0xff] %v8995_v57  ;;  %v9022_v59 = vsel %vm2311_vm3, %v8712_v58, %v14212_v35  ;;  %v9027_v3 = vsel %vm2311_vm3, %v8628_v24, %v14214_v52  ;;  %v2492_v7 = vsel %vm2377_vm4, %v2367_v11, %v14216_v15  ;;  %v2488_v2 = vsel %vm2377_vm4, %v2367_v11, %v14127_v9  ;;  %v14219_v61 = vld [vmem:[#allocation224_spill] sm:$0xff]  ;;  %v14221_v35 = vld [vmem:[#allocation385_spill] sm:$0xff]  ;;  %v14222_v5 = vld [vmem:[#allocation171_spill] sm:$0xff] }
 0x52f   : > { %14208 = vst [vmem:[#allocation124_spill] sm:$0xff] %v9010_v22  ;;  %v9041_v58 = vsel %vm2311_vm3, %v8727_v30, %v14219_v61  ;;  %v2617_v24 = vsel %vm2506_vm5, %v2488_v2, %v14131_v49  ;;  %v2621_v52 = vsel %vm2506_vm5, %v2492_v7, %v14221_v35  ;;  %2108 = vrot.lane.b32.xlu2 %v14222_v5, %s5483_s17  ;;  %v14223_v9 = vld [vmem:[#allocation225_spill] sm:$0xff]  ;;  %v14225_v25 = vld [vmem:[#allocation422_spill] sm:$0xff]  ;;  %v14226_v61 = vld [vmem:[#allocation172_spill] sm:$0xff] }
 0x530   : > { %14210 = vst [vmem:[#allocation155_spill] sm:$0xff] %v9015_v17  ;;  %v9052_v11 = vsel %vm2311_vm3, %v8633_v29, %v14223_v9  ;;  %v2746_v43 = vsel %vm2635_vm6, %v2617_v24, %v14136_v39  ;;  %v2750_v30 = vsel %vm2635_vm6, %v2621_v52, %v14225_v25  ;;  %2106 = vrot.lane.b32.xlu1 %v14226_v61, %s5483_s17  ;;  %v14227_v49 = vld [vmem:[#allocation179_spill] sm:$0xff]  ;;  %v14228_v7 = vld [vmem:[#allocation226_spill] sm:$0xff]  ;;  %v1972_v52 = vpop.permute.xlu2 %1971  ;;  %v14231_v9 = vld [vmem:[#allocation236_spill] sm:$0xff] }
 0x531   : > { %14213 = vst [vmem:[#allocation127_spill] sm:$0xff] %v9022_v59  ;;  %2116 = vrot.lane.b32.xlu0 %v14227_v49, %s5483_s17  ;;  %v9065_v5 = vsel %vm2311_vm3, %v8697_v21, %v14228_v7  ;;  %v14229_v2 = vld [vmem:[#allocation230_spill] sm:$0xff]  ;;  %v2875_v39 = vsel %vm2764_vm7, %v2746_v43, %v8117_v48  ;;  %v2879_v24 = vsel %vm2764_vm7, %v2750_v30, %v8117_v48  ;;  %v9086_v7 = vpop.permute.xlu1 %1959  ;;  %v9094_v48 = vpop.permute.xlu0 %1961  ;;  %v14239_v30 = vld [vmem:[#allocation243_spill] sm:$0xff]  ;;  %v14305_v57 = vld [vmem:[#allocation49_spill] sm:$0xff] }
 0x532   : > { %14215 = vst [vmem:[#allocation128_spill] sm:$0xff] %v9027_v3  ;;  %v9070_v29 = vsel %vm2311_vm3, %v8738_v28, %v14229_v2  ;;  %v9079_v61 = vsel %vm2311_vm3, %v8751_v20, %v14231_v9  ;;  %v14233_v49 = vld [vmem:[#allocation238_spill] sm:$0xff]  ;;  %v9089_v28 = vsel %vm2893_vm8, %v2875_v39, %v1972_v52  ;;  %v9092_v43 = vsel %vm2893_vm8, %v2879_v24, %v1972_v52  ;;  %v14241_v2 = vld [vmem:[#allocation244_spill] sm:$0xff]  ;;  %v14243_v9 = vld [vmem:[#allocation249_spill] sm:$0xff] }
 0x533   : > { %14218 = vst [vmem:[#allocation434_spill] sm:$0xff] %v9036_v32  ;;  %v9084_v21 = vsel %vm2311_vm3, %v8722_v26, %v14233_v49  ;;  %v9099_v20 = vsel %vm2311_vm3, %v8675_v18, %v14239_v30  ;;  %v9104_v26 = vsel %vm2311_vm3, %v8733_v4, %v14241_v2  ;;  %v9109_v39 = vsel %vm2311_vm3, %v8692_v36, %v14243_v9  ;;  %v14245_v49 = vld [vmem:[#allocation250_spill] sm:$0xff]  ;;  %v14247_v52 = vld [vmem:[#allocation255_spill] sm:$0xff]  ;;  %v14249_v30 = vld [vmem:[#allocation256_spill] sm:$0xff] }
 0x534   : > { %14220 = vst [vmem:[#allocation153_spill] sm:$0xff] %v9041_v58  ;;  %v9114_v24 = vsel %vm2311_vm3, %v8743_v54, %v14245_v49  ;;  %v9119_v18 = vsel %vm2311_vm3, %v8702_v56, %v14247_v52  ;;  %v9124_v4 = vsel %vm2311_vm3, %v8756_v12, %v14249_v30  ;;  %v14251_v2 = vld [vmem:[#allocation260_spill] sm:$0xff]  ;;  %v14252_v9 = vld [vmem:[#allocation261_spill] sm:$0xff]  ;;  %v14254_v54 = vld [vmem:[#allocation266_spill] sm:$0xff] }
 0x535   : > { %14224 = vst [vmem:[#allocation160_spill] sm:$0xff] %v9052_v11  ;;  %v2366_v36 = vsel %vm2311_vm3, %v8832_v8, %v14251_v2  ;;  %v2369_v49 = vsel %vm2311_vm3, %v8844_v60, %v14254_v54  ;;  %v14255_v56 = vld [vmem:[#allocation271_spill] sm:$0xff]  ;;  %v14256_v12 = vld [vmem:[#allocation277_spill] sm:$0xff]  ;;  %v14258_v60 = vld [vmem:[#allocation282_spill] sm:$0xff] }
 0x536   : > { %14230 = vst [vmem:[#allocation129_spill] sm:$0xff] %v9070_v29  ;;  %v9140_v52 = vsel %vm2311_vm3, %v8859_v41, %v14255_v56  ;;  %v9145_v30 = vsel %vm2311_vm3, %v8874_v1, %v14256_v12  ;;  %v14257_v8 = vld [vmem:[#allocation281_spill] sm:$0xff]  ;;  %v14260_v56 = vld [vmem:[#allocation326_spill] sm:$0xff]  ;;  %v14261_v12 = vld [vmem:[#allocation283_spill] sm:$0xff] }
 0x537   : > { %14232 = vst [vmem:[#allocation415_spill] sm:$0xff] %v9079_v61  ;;  %v2379_v2 = vsel %vm2377_vm4, %v8605_v51, %v14257_v8  ;;  %v14259_v41 = vld [vmem:[#allocation321_spill] sm:$0xff]  ;;  %v2498_v1 = vsel %vm2377_vm4, %v2369_v49, %v14260_v56  ;;  %v14267_v46 = vld [vmem:[#allocation263_spill] sm:$0xff]  ;;  %v14271_v61 = vld [vmem:[#allocation284_spill] sm:$0xff] }
 0x538   : > { %14234 = vst [vmem:[#allocation130_spill] sm:$0xff] %v9084_v21  ;;  %v2494_v54 = vsel %vm2377_vm4, %v2369_v49, %v14259_v41  ;;  %v14266_v41 = vld [vmem:[#allocation393_spill] sm:$0xff]  ;;  %v14295_v59 = vld [vmem:[#allocation383_spill] sm:$0xff]  ;;  %v14376_v23 = vld [vmem:[#allocation416_spill] sm:$0xff] }
 0x539   : > { %14235 = vst [vmem:[#allocation131_spill] sm:$0xff] %v9086_v7  ;;  %v14263_v7 = vld [vmem:[#allocation377_spill] sm:$0xff] }
 0x53a   : > { %14236 = vst [vmem:[#allocation132_spill] sm:$0xff] %v9089_v28  ;;  %v9167_v28 = vsel %vm2311_vm3, %v8854_v0, %v14261_v12  ;;  %v2627_v19 = vsel %vm2506_vm5, %v2498_v1, %v14263_v7  ;;  %v14268_v0 = vld [vmem:[#allocation423_spill] sm:$0xff]  ;;  %v14270_v1 = vld [vmem:[#allocation184_spill] sm:$0xff] }
 0x53b   : > { %14237 = vst [vmem:[#allocation418_spill] sm:$0xff] %v9092_v43  ;;  %v9132_v43 = vsel %vm2311_vm3, %v8717_v31, %v14252_v9  ;;  %v9153_v31 = vsel %vm2377_vm4, %v8907_v38, %v14257_v8  ;;  %v9158_v9 = vsel %vm2311_vm3, %v8766_v37, %v14258_v60  ;;  %v2623_v37 = vsel %vm2506_vm5, %v2494_v54, %v14264_v10  ;;  %v14265_v60 = vld [vmem:[#allocation178_spill] sm:$0xff]  ;;  %v14274_v10 = vld [vmem:[#allocation48_spill] sm:$0xff] }
 0x53c   : > { %14238 = vst [vmem:[#allocation133_spill] sm:$0xff] %v9094_v48  ;;  %v14262_v48 = vld [vmem:[#allocation330_spill] sm:$0xff]  ;;  %2112 = vrot.lane.b32.xlu2 %v14265_v60, %s5483_s17  ;;  %v2752_v44 = vsel %vm2635_vm6, %v2623_v37, %v14267_v46  ;;  %v2756_v12 = vsel %vm2635_vm6, %v2627_v19, %v14268_v0  ;;  %2118 = vrot.lane.b32.xlu0 %v14270_v1, %s5483_s17  ;;  %v14273_v60 = vld [vmem:[#allocation280_spill] sm:$0xff]  ;;  %v1976_v46 = vpop.permute.xlu2 %1975  ;;  %v14276_v1 = vld [vmem:[#allocation55_spill] sm:$0xff] }
 0x53d   : > { %14240 = vst [vmem:[#allocation136_spill] sm:$0xff] %v9099_v20  ;;  %v2508_v8 = vsel %vm2506_vm5, %v2379_v2, %v14262_v48  ;;  %v14269_v2 = vld [vmem:[#allocation173_spill] sm:$0xff]  ;;  %v9190_v54 = vsel %vm2377_vm4, %v8889_v34, %v14271_v61  ;;  %v2881_v37 = vsel %vm2764_vm7, %v2752_v44, %v14274_v10  ;;  %v2885_v19 = vsel %vm2764_vm7, %v2756_v12, %v14274_v10  ;;  %v9211_v44 = vpop.permute.xlu0 %1965  ;;  %v14281_v12 = vld [vmem:[#allocation286_spill] sm:$0xff]  ;;  %v14375_v20 = vld [vmem:[#allocation391_spill] sm:$0xff] }
 0x53e   : > { %14242 = vst [vmem:[#allocation424_spill] sm:$0xff] %v9104_v26  ;;  %v2637_v49 = vsel %vm2635_vm6, %v2508_v8, %v14266_v41  ;;  %2110 = vrot.lane.b32.xlu1 %v14269_v2, %s5483_s17  ;;  %v9201_v2 = vsel %vm2377_vm4, %v8933_v14, %v14271_v61  ;;  %v9206_v58 = vsel %vm2893_vm8, %v2881_v37, %v1976_v46  ;;  %v14297_v26 = vld [vmem:[#allocation257_spill] sm:$0xff] }
 0x53f   : > { %14244 = vst [vmem:[#allocation138_spill] sm:$0xff] %v9109_v39  ;;  %v2766_v8 = vsel %vm2764_vm7, %v2637_v49, %v14273_v60  ;;  %v9209_v49 = vsel %vm2893_vm8, %v2885_v19, %v1976_v46  ;;  %v14280_v60 = vld [vmem:[#allocation285_spill] sm:$0xff]  ;;  %v9219_v61 = vsel %vm2311_vm3, %v8869_v16, %v14281_v12  ;;  %v14284_v19 = vld [vmem:[#allocation288_spill] sm:$0xff]  ;;  %v14299_v39 = vld [vmem:[#allocation274_spill] sm:$0xff] }
 0x540   : > { %14246 = vst [vmem:[#allocation141_spill] sm:$0xff] %v9114_v24  ;;  %v2895_v29 = vsel %vm2893_vm8, %v2766_v8, %v14276_v1  ;;  %v2371_v10 = vsel %vm2311_vm3, %v8810_v53, %v14280_v60  ;;  %v9233_v53 = vsel %vm2311_vm3, %v8827_v62, %v14284_v19  ;;  %v14285_v1 = vld [vmem:[#allocation289_spill] sm:$0xff]  ;;  %v14286_v60 = vld [vmem:[#allocation290_spill] sm:$0xff] }
 0x541   : > { %14248 = vst [vmem:[#allocation430_spill] sm:$0xff] %v9119_v18  ;;  %v9238_v16 = vsel %vm2311_vm3, %v8884_v27, %v14285_v1  ;;  %v9243_v12 = vsel %vm2377_vm4, %v8938_v50, %v14286_v60  ;;  %v2496_v62 = vsel %vm2377_vm4, %v2371_v10, %v14216_v15  ;;  %v14291_v1 = vld [vmem:[#allocation327_spill] sm:$0xff]  ;;  %v14296_v18 = vld [vmem:[#allocation390_spill] sm:$0xff] }
 0x542   : > { %14250 = vst [vmem:[#allocation142_spill] sm:$0xff] %v9124_v4  ;;  %v2053_v4 = vpop.permute.xlu1 %2052 }
 0x543   : > { %14253 = vst [vmem:[#allocation143_spill] sm:$0xff] %v9132_v43  ;;  %v3024_v37 = vsel %vm3022_vm10, %v2895_v29, %v2053_v4  ;;  %v14288_v29 = vld [vmem:[#allocation292_spill] sm:$0xff]  ;;  %v14294_v43 = vld [vmem:[#allocation381_spill] sm:$0xff] }
 0x544   : > { %14272 = vst [vmem:[#allocation148_spill] sm:$0xff] %v9190_v54  ;;  %5038 = vmatmul.msk.f32.gmra.mxu0 %vm3160_vm11, %v3024_v37  ;;  %v2380_v4 = vsel %vm2377_vm4, %v8605_v51, %v14288_v29  ;;  %v14293_v37 = vld [vmem:[#allocation374_spill] sm:$0xff]  ;;  %v14372_v54 = vld [vmem:[#allocation387_spill] sm:$0xff] }
 0x545   : > { %14275 = vst [vmem:[#allocation419_spill] sm:$0xff] %v9201_v2  ;;  %v14282_v2 = vld [vmem:[#allocation287_spill] sm:$0xff] }
 0x546   : > { %14277 = vst [vmem:[#allocation149_spill] sm:$0xff] %v9206_v58  ;;  %v2389_v8 = vsel %vm2377_vm4, %v8920_v6, %v14282_v2  ;;  %v9228_v46 = vsel %vm2377_vm4, %v8954_v40, %v14282_v2  ;;  %v14289_v2 = vld [vmem:[#allocation318_spill] sm:$0xff]  ;;  %v2500_v58 = vsel %vm2377_vm4, %v2371_v10, %v14291_v1 }
 0x547   : > { %14278 = vst [vmem:[#allocation420_spill] sm:$0xff] %v9209_v49  ;;  %v2487_v19 = vsel %vm2377_vm4, %v2366_v36, %v14289_v2  ;;  %v14290_v49 = vld [vmem:[#allocation323_spill] sm:$0xff]  ;;  %v2625_v2 = vsel %vm2506_vm5, %v2496_v62, %v14221_v35  ;;  %v14303_v62 = vld [vmem:[#allocation417_spill] sm:$0xff] }
 0x548   : > { %14279 = vst [vmem:[#allocation151_spill] sm:$0xff] %v9211_v44  ;;  %v2491_v27 = vsel %vm2377_vm4, %v2366_v36, %v14290_v49  ;;  %v14292_v44 = vld [vmem:[#allocation332_spill] sm:$0xff]  ;;  %v2616_v24 = vsel %vm2506_vm5, %v2487_v19, %v14294_v43  ;;  %v2629_v36 = vsel %vm2506_vm5, %v2500_v58, %v14296_v18  ;;  %v2754_v19 = vsel %vm2635_vm6, %v2625_v2, %v14225_v25  ;;  %v14300_v43 = vld [vmem:[#allocation435_spill] sm:$0xff]  ;;  %v14302_v58 = vld [vmem:[#allocation189_spill] sm:$0xff]  ;;  %v1980_v2 = vpop.permute.xlu2 %1979 }
 0x549   : > { %14283 = vst [vmem:[#allocation425_spill] sm:$0xff] %v9228_v46  ;;  %v2509_v46 = vsel %vm2506_vm5, %v2380_v4, %v14292_v44  ;;  %v2620_v21 = vsel %vm2506_vm5, %v2491_v27, %v14293_v37  ;;  %v2745_v10 = vsel %vm2635_vm6, %v2616_v24, %v14297_v26  ;;  %v14298_v4 = vld [vmem:[#allocation185_spill] sm:$0xff]  ;;  %v2758_v27 = vsel %vm2635_vm6, %v2629_v36, %v14299_v39  ;;  %v14301_v35 = vld [vmem:[#allocation183_spill] sm:$0xff]  ;;  %v14304_v26 = vld [vmem:[#allocation40_spill] sm:$0xff] }
 0x54a   : > { %14287 = vst [vmem:[#allocation170_spill] sm:$0xff] %v9243_v12  ;;  %v2638_v15 = vsel %vm2635_vm6, %v2509_v46, %v14295_v59  ;;  %2122 = vrot.lane.b32.xlu2 %v14298_v4, %s5483_s17  ;;  %2120 = vrot.lane.b32.xlu1 %v14301_v35, %s5483_s17  ;;  %v2749_v24 = vsel %vm2635_vm6, %v2620_v21, %v14303_v62 }
 0x54b   : > { %v2767_v46 = vsel %vm2764_vm7, %v2638_v15, %v14300_v43  ;;  %2124 = vrot.lane.b32.xlu0 %v14302_v58, %s5483_s17  ;;  %v2883_v36 = vsel %vm2764_vm7, %v2754_v19, %v14305_v57  ;;  %v2887_v25 = vsel %vm2764_vm7, %v2758_v27, %v14305_v57  ;;  %v14306_v43 = vld [vmem:[#allocation44_spill] sm:$0xff]  ;;  %v2055_v58 = vpop.permute.xlu1 %2054  ;;  %v9304_v19 = vsel %vm2377_vm4, %v8985_v63, %v14286_v60 }
 0x54c   : > { %v2896_v4 = vsel %vm2893_vm8, %v2767_v46, %v14304_v26  ;;  %v2874_v15 = vsel %vm2764_vm7, %v2745_v10, %v14306_v43  ;;  %v2878_v35 = vsel %vm2764_vm7, %v2749_v24, %v14306_v43  ;;  %v9296_v12 = vsel %vm2893_vm8, %v2883_v36, %v1980_v2  ;;  %v1970_v26 = vpop.permute.xlu0 %1969  ;;  %v14311_v46 = vld [vmem:[#allocation291_spill] sm:$0xff]  ;;  %v14312_v36 = vld [vmem:[#allocation82_spill] sm:$0xff] }
 0x54d   : > { %14307 = vst [vmem:[#allocation441_spill] sm:$0xff] %v9296_v12  ;;  %v9299_v21 = vsel %vm2893_vm8, %v2887_v25, %v1980_v2  ;;  %v9307_v57 = vsel %vm2893_vm8, %v2874_v15, %v1970_v26  ;;  %v9310_v10 = vsel %vm2893_vm8, %v2878_v35, %v1970_v26  ;;  %v3025_v27 = vsel %vm3022_vm10, %v2896_v4, %v2055_v58  ;;  %v14313_v2 = vld [vmem:[#allocation293_spill] sm:$0xff]  ;;  %v14315_v43 = vld [vmem:[#allocation294_spill] sm:$0xff]  ;;  %v14316_v4 = vld [vmem:[#allocation295_spill] sm:$0xff] }
 0x54e   : > { %14308 = vst [vmem:[#allocation152_spill] sm:$0xff] %v9299_v21  ;;  %v2382_v24 = vsel %vm2377_vm4, %v8889_v34, %v14311_v46  ;;  %v9319_v25 = vsel %vm2377_vm4, %v14312_v36, %v14288_v29  ;;  %v9324_v60 = vsel %vm2377_vm4, %v8967_v33, %v14313_v2  ;;  %v2381_v15 = vsel %vm2377_vm4, %v8605_v51, %v14315_v43  ;;  %v14318_v35 = vld [vmem:[#allocation90_spill] sm:$0xff]  ;;  %v14320_v26 = vld [vmem:[#allocation296_spill] sm:$0xff]  ;;  %v14321_v46 = vld [vmem:[#allocation109_spill] sm:$0xff] }
 0x54f   : > { %14309 = vst [vmem:[#allocation426_spill] sm:$0xff] %v9307_v57  ;;  %5039 = vmatmul.msk.f32.gmra.mxu0 %vm3160_vm11, %v3025_v27  ;;  %v9333_v34 = vsel %vm2377_vm4, %v8920_v6, %v14315_v43  ;;  %v9338_v29 = vsel %vm2377_vm4, %v8907_v38, %v14316_v4  ;;  %v9343_v58 = vsel %vm2377_vm4, %v14318_v35, %v14316_v4  ;;  %v14323_v6 = vld [vmem:[#allocation297_spill] sm:$0xff]  ;;  %v14326_v43 = vld [vmem:[#allocation336_spill] sm:$0xff]  ;;  %v14327_v21 = vld [vmem:[#allocation298_spill] sm:$0xff] }
 0x550   : > { %14310 = vst [vmem:[#allocation157_spill] sm:$0xff] %v9310_v10  ;;  %v2410_v51 = vsel %vm2377_vm4, %v14321_v46, %v14320_v26  ;;  %v9351_v27 = vsel %vm2377_vm4, %v9000_v45, %v14320_v26  ;;  %v9356_v2 = vsel %vm2377_vm4, %v14312_v36, %v14323_v6  ;;  %v9361_v38 = vsel %vm2377_vm4, %v8938_v50, %v14323_v6  ;;  %v14328_v36 = vld [vmem:[#allocation322_spill] sm:$0xff]  ;;  %v14329_v10 = vld [vmem:[#allocation399_spill] sm:$0xff]  ;;  %v14332_v57 = vld [vmem:[#allocation117_spill] sm:$0xff] }
 0x551   : > { %14314 = vst [vmem:[#allocation431_spill] sm:$0xff] %v9324_v60  ;;  %v2518_v4 = vsel %vm2506_vm5, %v2389_v8, %v14326_v43  ;;  %v9368_v46 = vsel %vm2377_vm4, %v8933_v14, %v14327_v21  ;;  %v9373_v26 = vsel %vm2377_vm4, %v8879_v42, %v14327_v21  ;;  %v2510_v12 = vsel %vm2506_vm5, %v2381_v15, %v14328_v36  ;;  %v14330_v6 = vld [vmem:[#allocation190_spill] sm:$0xff]  ;;  %v14331_v8 = vld [vmem:[#allocation299_spill] sm:$0xff] }
 0x552   : > { %14317 = vst [vmem:[#allocation158_spill] sm:$0xff] %v9338_v29  ;;  %v2647_v50 = vsel %vm2635_vm6, %v2518_v4, %v14329_v10  ;;  %2128 = vrot.lane.b32.xlu2 %v14330_v6, %s5483_s17  ;;  %v9384_v43 = vsel %vm2377_vm4, %v14332_v57, %v14331_v8  ;;  %v14334_v14 = vld [vmem:[#allocation394_spill] sm:$0xff]  ;;  %v14337_v15 = vld [vmem:[#allocation191_spill] sm:$0xff]  ;;  %v9397_v4 = vsel %vm2377_vm4, %v9010_v22, %v14331_v8  ;;  %v14339_v6 = vld [vmem:[#allocation300_spill] sm:$0xff] }
 0x553   : > { %14319 = vst [vmem:[#allocation432_spill] sm:$0xff] %v9343_v58  ;;  %v2639_v58 = vsel %vm2635_vm6, %v2510_v12, %v14334_v14  ;;  %2130 = vrot.lane.b32.xlu0 %v14337_v15, %s5483_s17  ;;  %v9402_v57 = vsel %vm2377_vm4, %v14318_v35, %v14339_v6  ;;  %v14340_v12 = vld [vmem:[#allocation439_spill] sm:$0xff]  ;;  %v9413_v15 = vsel %vm2377_vm4, %v8967_v33, %v14339_v6  ;;  %v14343_v8 = vld [vmem:[#allocation301_spill] sm:$0xff]  ;;  %v2057_v29 = vpop.permute.xlu1 %2056  ;;  %v14349_v6 = vld [vmem:[#allocation302_spill] sm:$0xff] }
 0x554   : > { %14322 = vst [vmem:[#allocation254_spill] sm:$0xff] %v9351_v27  ;;  %v14336_v27 = vld [vmem:[#allocation188_spill] sm:$0xff]  ;;  %v2768_v10 = vsel %vm2764_vm7, %v2639_v58, %v14340_v12  ;;  %v14345_v35 = vld [vmem:[#allocation65_spill] sm:$0xff]  ;;  %v9422_v58 = vpop.permute.xlu0 %2058 }
 0x555   : > { %14324 = vst [vmem:[#allocation162_spill] sm:$0xff] %v9356_v2  ;;  %2126 = vrot.lane.b32.xlu1 %v14336_v27, %s5483_s17  ;;  %v9408_v27 = vpop.permute.xlu2 %2064  ;;  %v2897_v60 = vsel %vm2893_vm8, %v2768_v10, %v14345_v35  ;;  %v14347_v12 = vld [vmem:[#allocation180_spill] sm:$0xff] }
 0x556   : > { %14325 = vst [vmem:[#allocation449_spill] sm:$0xff] %v9361_v38  ;;  %v14335_v38 = vld [vmem:[#allocation427_spill] sm:$0xff]  ;;  %v9431_v33 = vsel %vm2377_vm4, %v14347_v12, %v14343_v8  ;;  %v3026_v35 = vsel %vm3022_vm10, %v2897_v60, %v2057_v29  ;;  %v14352_v2 = vld [vmem:[#allocation304_spill] sm:$0xff] }
 0x557   : > { %14333 = vst [vmem:[#allocation242_spill] sm:$0xff] %v9384_v43  ;;  %v2776_v21 = vsel %vm2764_vm7, %v2647_v50, %v14335_v38  ;;  %v14341_v50 = vld [vmem:[#allocation84_spill] sm:$0xff]  ;;  %5040 = vmatmul.msk.f32.gmra.mxu0 %vm3160_vm11, %v3026_v35  ;;  %v14358_v60 = vld [vmem:[#allocation307_spill] sm:$0xff] }
 0x558   : > { %14338 = vst [vmem:[#allocation320_spill] sm:$0xff] %v9397_v4  ;;  %v2905_v43 = vsel %vm2893_vm8, %v2776_v21, %v14341_v50  ;;  %v9418_v4 = vsel %vm2377_vm4, %v8954_v40, %v14343_v8  ;;  %v9436_v40 = vsel %vm2377_vm4, %v9005_v13, %v14349_v6  ;;  %v14385_v22 = vld [vmem:[#allocation104_spill] sm:$0xff] }
 0x559   : > { %14342 = vst [vmem:[#allocation163_spill] sm:$0xff] %v9413_v15  ;;  %v9426_v21 = vsel %vm3022_vm10, %v2905_v43, %v9408_v27  ;;  %v14351_v15 = vld [vmem:[#allocation303_spill] sm:$0xff]  ;;  %v9445_v43 = vsel %vm2377_vm4, %v8985_v63, %v14352_v2  ;;  %v9469_v2 = vsel %vm2377_vm4, %v8949_v47, %v14358_v60 }
 0x55a   : > { %14344 = vst [vmem:[#allocation436_spill] sm:$0xff] %v9418_v4  ;;  %v2402_v10 = vsel %vm2377_vm4, %v8879_v42, %v14351_v15  ;;  %v14359_v63 = vld [vmem:[#allocation75_spill] sm:$0xff]  ;;  %v14361_v15 = vld [vmem:[#allocation308_spill] sm:$0xff] }
 0x55b   : > { %14346 = vst [vmem:[#allocation371_spill] sm:$0xff] %v9426_v21  ;;  %v14353_v21 = vld [vmem:[#allocation305_spill] sm:$0xff]  ;;  %v2411_v29 = vsel %vm2377_vm4, %v14359_v63, %v14358_v60  ;;  %v14367_v63 = vld [vmem:[#allocation316_spill] sm:$0xff] }
 0x55c   : > { %14348 = vst [vmem:[#allocation161_spill] sm:$0xff] %v9431_v33  ;;  %v9450_v8 = vsel %vm2377_vm4, %v9015_v17, %v14353_v21  ;;  %v9455_v6 = vsel %vm2377_vm4, %v9052_v11, %v14353_v21  ;;  %v9474_v21 = vsel %vm2377_vm4, %v9036_v32, %v14361_v15  ;;  %v2499_v11 = vsel %vm2377_vm4, %v9167_v28, %v14367_v63  ;;  %v14368_v60 = vld [vmem:[#allocation324_spill] sm:$0xff]  ;;  %v14369_v33 = vld [vmem:[#allocation345_spill] sm:$0xff]  ;;  %v9528_v17 = vpop.permute.xlu0 %2060 }
 0x55d   : > { %14350 = vst [vmem:[#allocation276_spill] sm:$0xff] %v9436_v40  ;;  %v14356_v40 = vld [vmem:[#allocation306_spill] sm:$0xff]  ;;  %v2539_v15 = vsel %vm2506_vm5, %v2410_v51, %v14369_v33  ;;  %v14373_v4 = vld [vmem:[#allocation408_spill] sm:$0xff] }
 0x55e   : > { %14354 = vst [vmem:[#allocation159_spill] sm:$0xff] %v9450_v8  ;;  %v9460_v42 = vsel %vm2377_vm4, %v14347_v12, %v14356_v40  ;;  %v14363_v8 = vld [vmem:[#allocation309_spill] sm:$0xff]  ;;  %v14366_v40 = vld [vmem:[#allocation35_spill] sm:$0xff]  ;;  %v2668_v3 = vsel %vm2635_vm6, %v2539_v15, %v14373_v4  ;;  %v14374_v32 = vld [vmem:[#allocation192_spill] sm:$0xff] }
 0x55f   : > { %14355 = vst [vmem:[#allocation166_spill] sm:$0xff] %v9455_v6  ;;  %v14364_v6 = vld [vmem:[#allocation102_spill] sm:$0xff]  ;;  %v2489_v35 = vsel %vm2377_vm4, %v9158_v9, %v14366_v40  ;;  %2134 = vrot.lane.b32.xlu2 %v14374_v32, %s5483_s17  ;;  %v14382_v4 = vld [vmem:[#allocation45_spill] sm:$0xff] }
 0x560   : > { %14357 = vst [vmem:[#allocation164_spill] sm:$0xff] %v9460_v42  ;;  %v9479_v12 = vsel %vm2377_vm4, %v14364_v6, %v14363_v8  ;;  %v14371_v6 = vld [vmem:[#allocation382_spill] sm:$0xff] }
 0x561   : > { %14360 = vst [vmem:[#allocation437_spill] sm:$0xff] %v9469_v2  ;;  %v2493_v2 = vsel %vm2377_vm4, %v9158_v9, %v14368_v60  ;;  %v14377_v33 = vld [vmem:[#allocation442_spill] sm:$0xff] }
 0x562   : > { %14362 = vst [vmem:[#allocation168_spill] sm:$0xff] %v9474_v21  ;;  %v14370_v21 = vld [vmem:[#allocation319_spill] sm:$0xff]  ;;  %v2622_v40 = vsel %vm2506_vm5, %v2493_v2, %v14372_v54  ;;  %v14379_v2 = vld [vmem:[#allocation193_spill] sm:$0xff] }
 0x563   : > { %14365 = vst [vmem:[#allocation455_spill] sm:$0xff] %v9479_v12  ;;  %v2511_v42 = vsel %vm2506_vm5, %v2382_v24, %v14370_v21  ;;  %v2618_v12 = vsel %vm2506_vm5, %v2489_v35, %v14371_v6  ;;  %v2797_v24 = vsel %vm2764_vm7, %v2668_v3, %v14377_v33  ;;  %v14378_v21 = vld [vmem:[#allocation58_spill] sm:$0xff]  ;;  %2136 = vrot.lane.b32.xlu0 %v14379_v2, %s5483_s17  ;;  %v14380_v35 = vld [vmem:[#allocation269_spill] sm:$0xff]  ;;  %v14384_v33 = vld [vmem:[#allocation64_spill] sm:$0xff]  ;;  %v1974_v2 = vpop.permute.xlu1 %1973 }
 0x564   : > { %v2640_v9 = vsel %vm2635_vm6, %v2511_v42, %v14375_v20  ;;  %v2747_v51 = vsel %vm2635_vm6, %v2618_v12, %v14376_v23  ;;  %2132 = vrot.lane.b32.xlu1 %v14378_v21, %s5483_s17  ;;  %v2751_v15 = vsel %vm2635_vm6, %v2622_v40, %v14380_v35  ;;  %v14381_v6 = vld [vmem:[#allocation421_spill] sm:$0xff]  ;;  %v2083_v23 = vpop.permute.xlu2 %2082 }
 0x565   : > { %v2769_v32 = vsel %vm2764_vm7, %v2640_v9, %v14381_v6  ;;  %v2876_v20 = vsel %vm2764_vm7, %v2747_v51, %v14382_v4  ;;  %v14383_v42 = vld [vmem:[#allocation77_spill] sm:$0xff]  ;;  %v2880_v3 = vsel %vm2764_vm7, %v2751_v15, %v14382_v4  ;;  %v9526_v40 = vsel %vm3022_vm10, %v14385_v22, %v2083_v23 }
 0x566   : > { %v2926_v12 = vsel %vm2893_vm8, %v2797_v24, %v14383_v42  ;;  %v2898_v21 = vsel %vm2893_vm8, %v2769_v32, %v14384_v33  ;;  %14386 = vst [vmem:[#allocation174_spill] sm:$0xff] %v9526_v40  ;;  %v2503_v51 = vsel %vm2377_vm4, %v9233_v53, %v14367_v63  ;;  %v9535_v24 = vsel %vm2893_vm8, %v2876_v20, %v1974_v2  ;;  %v14389_v32 = vld [vmem:[#allocation329_spill] sm:$0xff]  ;;  %v14480_v40 = vld [vmem:[#allocation448_spill] sm:$0xff] }
 0x567   : > { %v3055_v9 = vsel %vm3022_vm10, %v2926_v12, %v2083_v23  ;;  %14387 = vst [vmem:[#allocation461_spill] sm:$0xff] %v9535_v24  ;;  %v9538_v4 = vsel %vm2893_vm8, %v2880_v3, %v1974_v2  ;;  %v3027_v15 = vsel %vm3022_vm10, %v2898_v21, %v9422_v58  ;;  %v2495_v22 = vsel %vm2377_vm4, %v9167_v28, %v14290_v49  ;;  %v14394_v12 = vld [vmem:[#allocation388_spill] sm:$0xff]  ;;  %v14398_v2 = vld [vmem:[#allocation67_spill] sm:$0xff] }
 0x568   : > { %14388 = vst [vmem:[#allocation176_spill] sm:$0xff] %v9538_v4  ;;  %5069 = vmatmul.msk.f32.vlgmr.msra.gmra.mxu1 %vm3160_vm11, %v3055_v9  ;;  %v2497_v23 = vsel %vm2377_vm4, %v9140_v52, %v14368_v60  ;;  %v2502_v53 = vsel %vm2377_vm4, %v9219_v61, %v14260_v56  ;;  %v2504_v63 = vsel %vm2377_vm4, %v9145_v30, %v14291_v1  ;;  %v14390_v60 = vld [vmem:[#allocation331_spill] sm:$0xff]  ;;  %v14391_v61 = vld [vmem:[#allocation338_spill] sm:$0xff]  ;;  %v14397_v21 = vld [vmem:[#allocation460_spill] sm:$0xff] }
 0x569   : > { %5041 = vmatmul.msk.f32.gmra.mxu0 %vm3160_vm11, %v3027_v15  ;;  %v2501_v20 = vsel %vm2377_vm4, %v9140_v52, %v14389_v32  ;;  %v2505_v28 = vsel %vm2377_vm4, %v9238_v16, %v14389_v32  ;;  %v2512_v49 = vsel %vm2506_vm5, %v9153_v31, %v14262_v48  ;;  %v2531_v56 = vsel %vm2506_vm5, %v2402_v10, %v14390_v60  ;;  %v14392_v52 = vld [vmem:[#allocation346_spill] sm:$0xff]  ;;  %v14393_v31 = vld [vmem:[#allocation380_spill] sm:$0xff] }
 0x56a   : > { %v2513_v30 = vsel %vm2506_vm5, %v9319_v25, %v14292_v44  ;;  %v2527_v1 = vsel %vm2506_vm5, %v9373_v26, %v14391_v61  ;;  %v2540_v42 = vsel %vm2506_vm5, %v2411_v29, %v14392_v52  ;;  %v2624_v16 = vsel %vm2506_vm5, %v2495_v22, %v14293_v37  ;;  %v14395_v44 = vld [vmem:[#allocation398_spill] sm:$0xff]  ;;  %v14400_v9 = vld [vmem:[#allocation428_spill] sm:$0xff] }
 0x56b   : > { %v2631_v48 = vsel %vm2506_vm5, %v2502_v53, %v14263_v7  ;;  %v2630_v10 = vsel %vm2506_vm5, %v2501_v20, %v14393_v31  ;;  %v2628_v3 = vsel %vm2506_vm5, %v2499_v11, %v14394_v12  ;;  %v2669_v25 = vsel %vm2635_vm6, %v2540_v42, %v14395_v44  ;;  %v14396_v26 = vld [vmem:[#allocation194_spill] sm:$0xff]  ;;  %v14399_v11 = vld [vmem:[#allocation195_spill] sm:$0xff]  ;;  %v14401_v22 = vld [vmem:[#allocation440_spill] sm:$0xff] }
 0x56c   : > { %2140 = vrot.lane.b32.xlu2 %v14396_v26, %s5483_s17  ;;  %v2641_v29 = vsel %vm2635_vm6, %v2512_v49, %v14266_v41  ;;  %v2753_v37 = vsel %vm2635_vm6, %v2624_v16, %v14303_v62  ;;  %v2798_v7 = vsel %vm2764_vm7, %v2669_v25, %v14397_v21  ;;  %2138 = vrot.lane.b32.xlu1 %v14398_v2, %s5483_s17  ;;  %v14402_v32 = vld [vmem:[#allocation38_spill] sm:$0xff]  ;;  %v14403_v20 = vld [vmem:[#allocation73_spill] sm:$0xff]  ;;  %v2085_v49 = vpop.permute.xlu2 %2084  ;;  %v14404_v42 = vld [vmem:[#allocation43_spill] sm:$0xff]  ;;  %v1978_v25 = vpop.permute.xlu1 %1977 }
 0x56d   : > { %2142 = vrot.lane.b32.xlu0 %v14399_v11, %s5483_s17  ;;  %v2757_v15 = vsel %vm2635_vm6, %v2628_v3, %v14400_v9  ;;  %v2770_v53 = vsel %vm2764_vm7, %v2641_v29, %v14401_v22  ;;  %v2882_v41 = vsel %vm2764_vm7, %v2753_v37, %v14402_v32  ;;  %v2927_v62 = vsel %vm2893_vm8, %v2798_v7, %v14403_v20  ;;  %v14405_v26 = vld [vmem:[#allocation80_spill] sm:$0xff]  ;;  %v9613_v21 = vpop.permute.xlu0 %2062  ;;  %v14410_v20 = vld [vmem:[#allocation403_spill] sm:$0xff]  ;;  %v14474_v4 = vld [vmem:[#allocation202_spill] sm:$0xff] }
 0x56e   : > { %v2886_v60 = vsel %vm2764_vm7, %v2757_v15, %v14402_v32  ;;  %v2899_v16 = vsel %vm2893_vm8, %v2770_v53, %v14404_v42  ;;  %v9611_v3 = vsel %vm3022_vm10, %v14405_v26, %v2085_v49  ;;  %v3056_v29 = vsel %vm3022_vm10, %v2927_v62, %v2085_v49  ;;  %v14409_v32 = vld [vmem:[#allocation389_spill] sm:$0xff]  ;;  %v14418_v26 = vld [vmem:[#allocation56_spill] sm:$0xff] }
 0x56f   : > { %14406 = vst [vmem:[#allocation445_spill] sm:$0xff] %v9611_v3  ;;  %v2634_v37 = vsel %vm2506_vm5, %v2505_v28, %v14393_v31  ;;  %v9619_v7 = vsel %vm2893_vm8, %v2882_v41, %v1978_v25  ;;  %v9622_v2 = vsel %vm2893_vm8, %v2886_v60, %v1978_v25  ;;  %v3028_v11 = vsel %vm3022_vm10, %v2899_v16, %v9528_v17  ;;  %v14414_v49 = vld [vmem:[#allocation41_spill] sm:$0xff]  ;;  %v14416_v16 = vld [vmem:[#allocation76_spill] sm:$0xff]  ;;  %v14417_v25 = vld [vmem:[#allocation198_spill] sm:$0xff] }
 0x570   : > { %14407 = vst [vmem:[#allocation181_spill] sm:$0xff] %v9619_v7  ;;  %5070 = vmatmul.msk.f32.gmra.mxu1 %vm3160_vm11, %v3056_v29  ;;  %v2642_v15 = vsel %vm2635_vm6, %v2513_v30, %v14295_v59  ;;  %v2626_v53 = vsel %vm2506_vm5, %v2497_v23, %v14372_v54  ;;  %v2632_v28 = vsel %vm2506_vm5, %v2503_v51, %v14394_v12  ;;  %v14411_v23 = vld [vmem:[#allocation429_spill] sm:$0xff] }
 0x571   : > { %14408 = vst [vmem:[#allocation450_spill] sm:$0xff] %v9622_v2  ;;  %v2633_v31 = vsel %vm2506_vm5, %v2504_v63, %v14296_v18  ;;  %5042 = vmatmul.msk.f32.gmra.mxu0 %vm3160_vm11, %v3028_v11  ;;  %v2656_v41 = vsel %vm2635_vm6, %v2527_v1, %v14409_v32  ;;  %v2660_v62 = vsel %vm2635_vm6, %v2531_v56, %v14410_v20  ;;  %v14412_v1 = vld [vmem:[#allocation443_spill] sm:$0xff]  ;;  %v14413_v12 = vld [vmem:[#allocation453_spill] sm:$0xff]  ;;  %v14472_v2 = vld [vmem:[#allocation392_spill] sm:$0xff] }
 0x572   : > { %v2755_v59 = vsel %vm2635_vm6, %v2626_v53, %v14380_v35  ;;  %v2762_v54 = vsel %vm2635_vm6, %v2633_v31, %v14299_v39  ;;  %v2760_v51 = vsel %vm2635_vm6, %v2631_v48, %v14268_v0  ;;  %v2761_v18 = vsel %vm2635_vm6, %v2632_v28, %v14400_v9  ;;  %v14415_v48 = vld [vmem:[#allocation196_spill] sm:$0xff] }
 0x573   : > { %v2759_v63 = vsel %vm2635_vm6, %v2630_v10, %v14411_v23  ;;  %v2763_v30 = vsel %vm2635_vm6, %v2634_v37, %v14411_v23  ;;  %v2771_v56 = vsel %vm2764_vm7, %v2642_v15, %v14412_v1  ;;  %v2785_v35 = vsel %vm2764_vm7, %v2656_v41, %v14413_v12  ;;  %v14419_v37 = vld [vmem:[#allocation74_spill] sm:$0xff] }
 0x574   : > { %v2789_v39 = vsel %vm2764_vm7, %v2660_v62, %v14413_v12  ;;  %v2889_v0 = vsel %vm2764_vm7, %v2760_v51, %v14414_v49  ;;  %2146 = vrot.lane.b32.xlu2 %v14415_v48, %s5483_s17  ;;  %v2890_v10 = vsel %vm2764_vm7, %v2761_v18, %v14414_v49  ;;  %v2891_v9 = vsel %vm2764_vm7, %v2762_v54, %v14414_v49  ;;  %v14420_v15 = vld [vmem:[#allocation94_spill] sm:$0xff]  ;;  %v2075_v31 = vpop.permute.xlu2 %2074  ;;  %v1982_v20 = vpop.permute.xlu1 %1981 }
 0x575   : > { %v2892_v60 = vsel %vm2764_vm7, %v2763_v30, %v14414_v49  ;;  %2144 = vrot.lane.b32.xlu1 %v14416_v16, %s5483_s17  ;;  %2148 = vrot.lane.b32.xlu0 %v14417_v25, %s5483_s17  ;;  %v2884_v29 = vsel %vm2764_vm7, %v2755_v59, %v14418_v26  ;;  %v2900_v11 = vsel %vm2893_vm8, %v2771_v56, %v14419_v37  ;;  %v1984_v54 = vpop.permute.xlu0 %1983  ;;  %v14427_v12 = vld [vmem:[#allocation310_spill] sm:$0xff] }
 0x576   : > { %v2914_v53 = vsel %vm2893_vm8, %v2785_v35, %v14420_v15  ;;  %v2918_v28 = vsel %vm2893_vm8, %v2789_v39, %v14420_v15  ;;  %v2888_v41 = vsel %vm2764_vm7, %v2759_v63, %v14418_v26  ;;  %v3029_v59 = vsel %vm3022_vm10, %v2900_v11, %v9613_v21  ;;  %v14434_v26 = vld [vmem:[#allocation400_spill] sm:$0xff]  ;;  %v14438_v15 = vld [vmem:[#allocation454_spill] sm:$0xff] }
 0x577   : > { %v9683_v62 = vsel %vm3022_vm10, %v2918_v28, %v2075_v31  ;;  %v9688_v51 = vsel %vm3022_vm10, %v2914_v53, %v2075_v31  ;;  %v9691_v18 = vsel %vm2893_vm8, %v2884_v29, %v1982_v20  ;;  %v9694_v23 = vsel %vm2893_vm8, %v2888_v41, %v1982_v20  ;;  %v14437_v11 = vld [vmem:[#allocation444_spill] sm:$0xff]  ;;  %v14439_v28 = vld [vmem:[#allocation197_spill] sm:$0xff]  ;;  %v14441_v41 = vld [vmem:[#allocation447_spill] sm:$0xff] }
 0x578   : > { %14421 = vst [vmem:[#allocation182_spill] sm:$0xff] %v9683_v62  ;;  %v9697_v30 = vsel %vm2893_vm8, %v2889_v0, %v1984_v54  ;;  %v9700_v63 = vsel %vm2893_vm8, %v2890_v10, %v1984_v54  ;;  %v9705_v56 = vsel %vm2377_vm4, %v9005_v13, %v14363_v8  ;;  %v9710_v35 = vsel %vm2377_vm4, %v9000_v45, %v14427_v12  ;;  %v14430_v8 = vld [vmem:[#allocation328_spill] sm:$0xff]  ;;  %v14431_v10 = vld [vmem:[#allocation339_spill] sm:$0xff]  ;;  %v14440_v31 = vld [vmem:[#allocation201_spill] sm:$0xff] }
 0x579   : > { %14422 = vst [vmem:[#allocation451_spill] sm:$0xff] %v9688_v51  ;;  %5043 = vmatmul.msk.f32.gmra.mxu0 %vm3160_vm11, %v3029_v59  ;;  %v9714_v39 = vsel %vm2893_vm8, %v2891_v9, %v1984_v54  ;;  %v9717_v49 = vsel %vm2893_vm8, %v2892_v60, %v1984_v54  ;;  %v9722_v0 = vsel %vm2377_vm4, %v8972_v55, %v14427_v12  ;;  %v14432_v60 = vld [vmem:[#allocation344_spill] sm:$0xff]  ;;  %v14442_v20 = vld [vmem:[#allocation47_spill] sm:$0xff]  ;;  %v14443_v59 = vld [vmem:[#allocation66_spill] sm:$0xff] }
 0x57a   : > { %14423 = vst [vmem:[#allocation186_spill] sm:$0xff] %v9691_v18  ;;  %v2514_v13 = vsel %vm2506_vm5, %v9333_v34, %v14328_v36  ;;  %v2524_v45 = vsel %vm2506_vm5, %v9402_v57, %v14430_v8  ;;  %v2523_v48 = vsel %vm2506_vm5, %v9368_v46, %v14391_v61  ;;  %v2529_v9 = vsel %vm2506_vm5, %v9304_v19, %v14431_v10  ;;  %v14433_v36 = vld [vmem:[#allocation395_spill] sm:$0xff]  ;;  %v14435_v61 = vld [vmem:[#allocation402_spill] sm:$0xff] }
 0x57b   : > { %14424 = vst [vmem:[#allocation52_spill] sm:$0xff] %v9694_v23  ;;  %v2533_v16 = vsel %vm2506_vm5, %v9445_v43, %v14432_v60  ;;  %v2652_v25 = vsel %vm2635_vm6, %v2523_v48, %v14409_v32  ;;  %v2643_v34 = vsel %vm2635_vm6, %v2514_v13, %v14334_v14  ;;  %v2653_v46 = vsel %vm2635_vm6, %v2524_v45, %v14434_v26  ;;  %v14436_v43 = vld [vmem:[#allocation199_spill] sm:$0xff]  ;;  %v14492_v51 = vld [vmem:[#allocation158_spill] sm:$0xff] }
 0x57c   : > { %14425 = vst [vmem:[#allocation456_spill] sm:$0xff] %v9697_v30  ;;  %v2662_v57 = vsel %vm2635_vm6, %v2533_v16, %v14433_v36  ;;  %v2658_v29 = vsel %vm2635_vm6, %v2529_v9, %v14435_v61  ;;  %v2772_v19 = vsel %vm2764_vm7, %v2643_v34, %v14335_v38  ;;  %2152 = vrot.lane.b32.xlu2 %v14436_v43, %s5483_s17  ;;  %v2079_v45 = vpop.permute.xlu2 %2078  ;;  %v14444_v9 = vld [vmem:[#allocation107_spill] sm:$0xff]  ;;  %v9775_v16 = vpop.permute.xlu1 %2066  ;;  %v14471_v30 = vld [vmem:[#allocation170_spill] sm:$0xff] }
 0x57d   : > { %14426 = vst [vmem:[#allocation187_spill] sm:$0xff] %v9700_v63  ;;  %v2781_v32 = vsel %vm2764_vm7, %v2652_v25, %v14437_v11  ;;  %v2787_v14 = vsel %vm2764_vm7, %v2658_v29, %v14438_v15  ;;  %v2791_v53 = vsel %vm2764_vm7, %v2662_v57, %v14438_v15  ;;  %2150 = vrot.lane.b32.xlu1 %v14439_v28, %s5483_s17  ;;  %v9780_v34 = vpop.permute.xlu0 %2068  ;;  %v14447_v57 = vld [vmem:[#allocation12_spill] sm:$0xff]  ;;  %v14450_v43 = vld [vmem:[#allocation11_spill] sm:$0xff]  ;;  %v14469_v63 = vld [vmem:[#allocation333_spill] sm:$0xff] }
 0x57e   : > { %14428 = vst [vmem:[#allocation457_spill] sm:$0xff] %v9714_v39  ;;  %2154 = vrot.lane.b32.xlu0 %v14440_v31, %s5483_s17  ;;  %v2782_v38 = vsel %vm2764_vm7, %v2653_v46, %v14441_v41  ;;  %v2910_v54 = vsel %vm2893_vm8, %v2781_v32, %v14442_v20  ;;  %v2916_v12 = vsel %vm2893_vm8, %v2787_v14, %v14443_v59  ;;  %v14451_v15 = vld [vmem:[#allocation155_spill] sm:$0xff]  ;;  %v14454_v28 = vld [vmem:[#allocation124_spill] sm:$0xff]  ;;  %v14456_v31 = vld [vmem:[#allocation118_spill] sm:$0xff] }
 0x57f   : > { %14429 = vst [vmem:[#allocation51_spill] sm:$0xff] %v9717_v49  ;;  %v2920_v13 = vsel %vm2893_vm8, %v2791_v53, %v14443_v59  ;;  %v2901_v48 = vsel %vm2893_vm8, %v2772_v19, %v14341_v50  ;;  %v2911_v60 = vsel %vm2893_vm8, %v2782_v38, %v14444_v9  ;;  %v9783_v36 = vsel %vm3022_vm10, %v2916_v12, %v2079_v45  ;;  %v14453_v53 = vld [vmem:[#allocation311_spill] sm:$0xff]  ;;  %v14458_v59 = vld [vmem:[#allocation137_spill] sm:$0xff]  ;;  %v14459_v12 = vld [vmem:[#allocation136_spill] sm:$0xff] }
 0x580   : > { %v9778_v25 = vsel %vm3022_vm10, %v2920_v13, %v2079_v45  ;;  %14446 = vst [vmem:[#allocation462_spill] sm:$0xff] %v9783_v36  ;;  %v9788_v46 = vsel %vm2377_vm4, %v9065_v5, %v14447_v57  ;;  %v3030_v50 = vsel %vm3022_vm10, %v2901_v48, %v9408_v27  ;;  %v9794_v29 = vsel %vm3022_vm10, %v2910_v54, %v9775_v16  ;;  %v14457_v54 = vld [vmem:[#allocation10_spill] sm:$0xff]  ;;  %v14483_v62 = vld [vmem:[#allocation83_spill] sm:$0xff] }
 0x581   : > { %14445 = vst [vmem:[#allocation53_spill] sm:$0xff] %v9778_v25  ;;  %v9798_v19 = vsel %vm3022_vm10, %v2911_v60, %v9780_v34  ;;  %v2419_v32 = vsel %vm2377_vm4, %v8949_v47, %v14450_v43  ;;  %v9806_v14 = vsel %vm2377_vm4, %v14451_v15, %v14450_v43  ;;  %v9811_v27 = vsel %vm2377_vm4, %v14454_v28, %v14453_v53  ;;  %v14461_v45 = vld [vmem:[#allocation14_spill] sm:$0xff]  ;;  %v14464_v43 = vld [vmem:[#allocation128_spill] sm:$0xff] }
 0x582   : > { %14448 = vst [vmem:[#allocation50_spill] sm:$0xff] %v9794_v29  ;;  %v9816_v38 = vsel %vm2377_vm4, %v14456_v31, %v14453_v53  ;;  %5044 = vmatmul.msk.f32.gmra.mxu0 %vm3160_vm11, %v3030_v50  ;;  %v9822_v47 = vsel %vm2377_vm4, %v14458_v59, %v14457_v54  ;;  %v9827_v13 = vsel %vm2377_vm4, %v14459_v12, %v14457_v54  ;;  %v14462_v60 = vld [vmem:[#allocation434_spill] sm:$0xff]  ;;  %v14463_v50 = vld [vmem:[#allocation13_spill] sm:$0xff]  ;;  %v14465_v53 = vld [vmem:[#allocation15_spill] sm:$0xff] }
 0x583   : > { %14449 = vst [vmem:[#allocation463_spill] sm:$0xff] %v9798_v19  ;;  %v2426_v48 = vsel %vm2377_vm4, %v8972_v55, %v14461_v45  ;;  %v9835_v57 = vsel %vm2377_vm4, %v14462_v60, %v14461_v45  ;;  %v9840_v15 = vsel %vm2377_vm4, %v14464_v43, %v14463_v50  ;;  %v9845_v28 = vsel %vm2377_vm4, %v14456_v31, %v14465_v53  ;;  %v14466_v54 = vld [vmem:[#allocation341_spill] sm:$0xff]  ;;  %v14467_v59 = vld [vmem:[#allocation436_spill] sm:$0xff]  ;;  %v14481_v25 = vld [vmem:[#allocation494_spill] sm:$0xff] }
 0x584   : > { %14452 = vst [vmem:[#allocation60_spill] sm:$0xff] %v9806_v14  ;;  %v2526_v49 = vsel %vm2506_vm5, %v14467_v59, %v14466_v54  ;;  %v14468_v55 = vld [vmem:[#allocation340_spill] sm:$0xff]  ;;  %v2525_v23 = vsel %vm2506_vm5, %v14471_v30, %v14431_v10  ;;  %2158 = vrot.lane.b32.xlu2 %v14474_v4, %s5483_s17  ;;  %v14479_v10 = vld [vmem:[#allocation433_spill] sm:$0xff]  ;;  %v14487_v12 = vld [vmem:[#allocation162_spill] sm:$0xff] }
 0x585   : > { %14455 = vst [vmem:[#allocation61_spill] sm:$0xff] %v9811_v27  ;;  %v2548_v39 = vsel %vm2506_vm5, %v2419_v32, %v14468_v55  ;;  %v14470_v45 = vld [vmem:[#allocation148_spill] sm:$0xff]  ;;  %v2655_v18 = vsel %vm2635_vm6, %v2526_v49, %v14472_v2  ;;  %v2654_v24 = vsel %vm2635_vm6, %v2525_v23, %v14435_v61  ;;  %v14478_v49 = vld [vmem:[#allocation203_spill] sm:$0xff]  ;;  %v9882_v61 = vpop.permute.xlu2 %2092  ;;  %v14501_v27 = vld [vmem:[#allocation405_spill] sm:$0xff] }
 0x586   : > { %14460 = vst [vmem:[#allocation59_spill] sm:$0xff] %v9827_v13  ;;  %v2515_v60 = vsel %vm2506_vm5, %v14470_v45, %v14469_v63  ;;  %v14473_v31 = vld [vmem:[#allocation412_spill] sm:$0xff]  ;;  %2160 = vrot.lane.b32.xlu0 %v14478_v49, %s5483_s17  ;;  %v2783_v4 = vsel %vm2764_vm7, %v2654_v24, %v14479_v10  ;;  %v9892_v24 = vpop.permute.xlu0 %2072  ;;  %v14491_v43 = vld [vmem:[#allocation335_spill] sm:$0xff]  ;;  %v14504_v55 = vld [vmem:[#allocation438_spill] sm:$0xff] }
 0x587   : > { %v2677_v7 = vsel %vm2635_vm6, %v2548_v39, %v14473_v31  ;;  %v14475_v59 = vld [vmem:[#allocation396_spill] sm:$0xff]  ;;  %14484 = vst [vmem:[#allocation248_spill] sm:$0xff] %v9892_v24  ;;  %v2516_v31 = vsel %vm2506_vm5, %v14492_v51, %v14491_v43  ;;  %v14494_v13 = vld [vmem:[#allocation455_spill] sm:$0xff] }
 0x588   : > { %v2644_v32 = vsel %vm2635_vm6, %v2515_v60, %v14475_v59  ;;  %v14476_v45 = vld [vmem:[#allocation468_spill] sm:$0xff]  ;;  %v2784_v60 = vsel %vm2764_vm7, %v2655_v18, %v14480_v40  ;;  %v14496_v19 = vld [vmem:[#allocation431_spill] sm:$0xff] }
 0x589   : > { %v2806_v3 = vsel %vm2764_vm7, %v2677_v7, %v14476_v45  ;;  %v14477_v30 = vld [vmem:[#allocation200_spill] sm:$0xff]  ;;  %v2773_v39 = vsel %vm2764_vm7, %v2644_v32, %v14381_v6  ;;  %v14482_v7 = vld [vmem:[#allocation57_spill] sm:$0xff]  ;;  %v2912_v6 = vsel %vm2893_vm8, %v2783_v4, %v14483_v62  ;;  %v9890_v32 = vpop.permute.xlu1 %2070  ;;  %v14490_v4 = vld [vmem:[#allocation163_spill] sm:$0xff] }
 0x58a   : > { %2156 = vrot.lane.b32.xlu1 %v14477_v30, %s5483_s17  ;;  %v2935_v23 = vsel %vm2893_vm8, %v2806_v3, %v14481_v25  ;;  %v2913_v30 = vsel %vm2893_vm8, %v2784_v60, %v14482_v7  ;;  %v2902_v49 = vsel %vm2893_vm8, %v2773_v39, %v14384_v33  ;;  %v14486_v3 = vld [vmem:[#allocation325_spill] sm:$0xff]  ;;  %v9905_v33 = vsel %vm3022_vm10, %v2912_v6, %v9890_v32 }
 0x58b   : > { %v9896_v18 = vsel %vm3022_vm10, %v2935_v23, %v9882_v61  ;;  %v2517_v36 = vsel %vm2506_vm5, %v14487_v12, %v14486_v3  ;;  %v3031_v60 = vsel %vm3022_vm10, %v2902_v49, %v9422_v58  ;;  %14488 = vst [vmem:[#allocation68_spill] sm:$0xff] %v9905_v33  ;;  %v9909_v39 = vsel %vm3022_vm10, %v2913_v30, %v9892_v24  ;;  %v14493_v12 = vld [vmem:[#allocation337_spill] sm:$0xff]  ;;  %v14495_v49 = vld [vmem:[#allocation342_spill] sm:$0xff]  ;;  %v14497_v30 = vld [vmem:[#allocation343_spill] sm:$0xff] }
 0x58c   : > { %14485 = vst [vmem:[#allocation262_spill] sm:$0xff] %v9896_v18  ;;  %v2528_v23 = vsel %vm2506_vm5, %v14490_v4, %v14430_v8  ;;  %v2541_v58 = vsel %vm2506_vm5, %v14494_v13, %v14493_v12  ;;  %v2532_v6 = vsel %vm2506_vm5, %v14496_v19, %v14495_v49  ;;  %5045 = vmatmul.msk.f32.gmra.mxu0 %vm3160_vm11, %v3031_v60  ;;  %v14498_v33 = vld [vmem:[#allocation348_spill] sm:$0xff]  ;;  %v14499_v4 = vld [vmem:[#allocation386_spill] sm:$0xff]  ;;  %v14500_v13 = vld [vmem:[#allocation401_spill] sm:$0xff] }
 0x58d   : > { %14489 = vst [vmem:[#allocation69_spill] sm:$0xff] %v9909_v39  ;;  %v2555_v39 = vsel %vm2506_vm5, %v2426_v48, %v14497_v30  ;;  %v2551_v8 = vsel %vm2506_vm5, %v9722_v0, %v14498_v33  ;;  %v2645_v51 = vsel %vm2635_vm6, %v2516_v31, %v14499_v4  ;;  %v2657_v18 = vsel %vm2635_vm6, %v2528_v23, %v14434_v26  ;;  %v14502_v60 = vld [vmem:[#allocation409_spill] sm:$0xff] }
 0x58e   : > { %v2680_v29 = vsel %vm2635_vm6, %v2551_v8, %v14500_v13  ;;  %v2661_v19 = vsel %vm2635_vm6, %v2532_v6, %v14501_v27  ;;  %v2670_v49 = vsel %vm2635_vm6, %v2541_v58, %v14502_v60  ;;  %v14503_v48 = vld [vmem:[#allocation413_spill] sm:$0xff]  ;;  %v2786_v0 = vsel %vm2764_vm7, %v2657_v18, %v14504_v55  ;;  %v14506_v27 = vld [vmem:[#allocation204_spill] sm:$0xff]  ;;  %v14507_v6 = vld [vmem:[#allocation471_spill] sm:$0xff] }
 0x58f   : > { %v2684_v14 = vsel %vm2635_vm6, %v2555_v39, %v14503_v48  ;;  %v2790_v31 = vsel %vm2764_vm7, %v2661_v19, %v14504_v55  ;;  %v2774_v26 = vsel %vm2764_vm7, %v2645_v51, %v14401_v22  ;;  %v14505_v23 = vld [vmem:[#allocation465_spill] sm:$0xff]  ;;  %2164 = vrot.lane.b32.xlu2 %v14506_v27, %s5483_s17  ;;  %v2809_v58 = vsel %vm2764_vm7, %v2680_v29, %v14507_v6  ;;  %v14509_v22 = vld [vmem:[#allocation207_spill] sm:$0xff]  ;;  %v2099_v27 = vpop.permute.xlu2 %2098 }
 0x590   : > { %v2799_v8 = vsel %vm2764_vm7, %v2670_v49, %v14505_v23  ;;  %v2813_v39 = vsel %vm2764_vm7, %v2684_v14, %v14507_v6  ;;  %v2903_v18 = vsel %vm2893_vm8, %v2774_v26, %v14404_v42  ;;  %v14508_v55 = vld [vmem:[#allocation105_spill] sm:$0xff]  ;;  %2166 = vrot.lane.b32.xlu0 %v14509_v22, %s5483_s17  ;;  %v14510_v51 = vld [vmem:[#allocation95_spill] sm:$0xff]  ;;  %v14512_v42 = vld [vmem:[#allocation96_spill] sm:$0xff] }
 0x591   : > { %v2915_v19 = vsel %vm2893_vm8, %v2786_v0, %v14510_v51  ;;  %v2919_v49 = vsel %vm2893_vm8, %v2790_v31, %v14510_v51  ;;  %v14511_v23 = vld [vmem:[#allocation497_spill] sm:$0xff]  ;;  %v2928_v26 = vsel %vm2893_vm8, %v2799_v8, %v14512_v42  ;;  %v2087_v6 = vpop.permute.xlu1 %2086  ;;  %v3032_v22 = vsel %vm3022_vm10, %v2903_v18, %v9528_v17  ;;  %v14515_v51 = vld [vmem:[#allocation112_spill] sm:$0xff]  ;;  %v14519_v42 = vld [vmem:[#allocation334_spill] sm:$0xff] }
 0x592   : > { %2162 = vrot.lane.b32.xlu1 %v14508_v55, %s5483_s17  ;;  %v2938_v29 = vsel %vm2893_vm8, %v2809_v58, %v14511_v23  ;;  %v2942_v14 = vsel %vm2893_vm8, %v2813_v39, %v14511_v23  ;;  %v2077_v55 = vpop.permute.xlu0 %2076  ;;  %v9981_v58 = vsel %vm3022_vm10, %v14515_v51, %v2087_v6  ;;  %v3057_v8 = vsel %vm3022_vm10, %v2928_v26, %v2087_v6  ;;  %v14520_v17 = vld [vmem:[#allocation164_spill] sm:$0xff]  ;;  %v14524_v26 = vld [vmem:[#allocation242_spill] sm:$0xff]  ;;  %v14525_v6 = vld [vmem:[#allocation351_spill] sm:$0xff] }
 0x593   : > { %v9974_v0 = vsel %vm3022_vm10, %v2938_v29, %v2099_v27  ;;  %v9977_v31 = vsel %vm3022_vm10, %v2942_v14, %v2099_v27  ;;  %14516 = vst [vmem:[#allocation165_spill] sm:$0xff] %v9981_v58  ;;  %v9984_v39 = vsel %vm3022_vm10, %v2919_v49, %v2077_v55  ;;  %v9988_v23 = vsel %vm3022_vm10, %v2915_v19, %v2077_v55  ;;  %v14521_v29 = vld [vmem:[#allocation161_spill] sm:$0xff]  ;;  %v14522_v27 = vld [vmem:[#allocation120_spill] sm:$0xff]  ;;  %v14523_v49 = vld [vmem:[#allocation347_spill] sm:$0xff] }
 0x594   : > { %14513 = vst [vmem:[#allocation167_spill] sm:$0xff] %v9974_v0  ;;  %v2534_v18 = vsel %vm2506_vm5, %v14520_v17, %v14519_v42  ;;  %v2530_v14 = vsel %vm2506_vm5, %v14521_v29, %v14466_v54  ;;  %v2558_v51 = vsel %vm2506_vm5, %v9845_v28, %v14522_v27  ;;  %5046 = vmatmul.msk.f32.gmra.mxu0 %vm3160_vm11, %v3032_v22  ;;  %v14526_v54 = vld [vmem:[#allocation397_spill] sm:$0xff]  ;;  %v14527_v29 = vld [vmem:[#allocation404_spill] sm:$0xff]  ;;  %v14528_v22 = vld [vmem:[#allocation406_spill] sm:$0xff] }
 0x595   : > { %14514 = vst [vmem:[#allocation78_spill] sm:$0xff] %v9977_v31  ;;  %5071 = vmatmul.msk.f32.gmra.mxu1 %vm3160_vm11, %v3057_v8  ;;  %v2542_v19 = vsel %vm2506_vm5, %v14524_v26, %v14523_v49  ;;  %v2554_v55 = vsel %vm2506_vm5, %v9816_v38, %v14525_v6  ;;  %v2659_v42 = vsel %vm2635_vm6, %v2530_v14, %v14472_v2  ;;  %v14529_v58 = vld [vmem:[#allocation411_spill] sm:$0xff]  ;;  %v14573_v6 = vld [vmem:[#allocation408_spill] sm:$0xff] }
 0x596   : > { %14517 = vst [vmem:[#allocation177_spill] sm:$0xff] %v9984_v39  ;;  %v2646_v17 = vsel %vm2635_vm6, %v2517_v36, %v14526_v54  ;;  %v2683_v28 = vsel %vm2635_vm6, %v2554_v55, %v14527_v29  ;;  %v2663_v8 = vsel %vm2635_vm6, %v2534_v18, %v14528_v22  ;;  %v2671_v39 = vsel %vm2635_vm6, %v2542_v19, %v14529_v58  ;;  %v14530_v26 = vld [vmem:[#allocation223_spill] sm:$0xff]  ;;  %v14533_v18 = vld [vmem:[#allocation208_spill] sm:$0xff]  ;;  %v14534_v22 = vld [vmem:[#allocation474_spill] sm:$0xff] }
 0x597   : > { %14518 = vst [vmem:[#allocation79_spill] sm:$0xff] %v9988_v23  ;;  %v2687_v31 = vsel %vm2635_vm6, %v2558_v51, %v14530_v26  ;;  %v2775_v38 = vsel %vm2764_vm7, %v2646_v17, %v14412_v1  ;;  %v14531_v23 = vld [vmem:[#allocation446_spill] sm:$0xff]  ;;  %v14532_v14 = vld [vmem:[#allocation459_spill] sm:$0xff]  ;;  %2170 = vrot.lane.b32.xlu2 %v14533_v18, %s5483_s17  ;;  %v2812_v19 = vsel %vm2764_vm7, %v2683_v28, %v14534_v22  ;;  %v2105_v18 = vpop.permute.xlu2 %2104 }
 0x598   : > { %v2800_v2 = vsel %vm2764_vm7, %v2671_v39, %v14531_v23  ;;  %v2788_v36 = vsel %vm2764_vm7, %v2659_v42, %v14532_v14  ;;  %v2792_v55 = vsel %vm2764_vm7, %v2663_v8, %v14532_v14  ;;  %v2816_v51 = vsel %vm2764_vm7, %v2687_v31, %v14534_v22  ;;  %v14535_v39 = vld [vmem:[#allocation206_spill] sm:$0xff]  ;;  %v14536_v23 = vld [vmem:[#allocation211_spill] sm:$0xff] }
 0x599   : > { %v2904_v1 = vsel %vm2893_vm8, %v2775_v38, %v14419_v37  ;;  %2172 = vrot.lane.b32.xlu0 %v14536_v23, %s5483_s17  ;;  %v14537_v42 = vld [vmem:[#allocation103_spill] sm:$0xff]  ;;  %v2089_v22 = vpop.permute.xlu1 %2088 }
 0x59a   : > { %2168 = vrot.lane.b32.xlu1 %v14535_v39, %s5483_s17  ;;  %v2917_v17 = vsel %vm2893_vm8, %v2788_v36, %v14537_v42  ;;  %v2921_v8 = vsel %vm2893_vm8, %v2792_v55, %v14537_v42  ;;  %v14538_v14 = vld [vmem:[#allocation499_spill] sm:$0xff]  ;;  %v2081_v39 = vpop.permute.xlu0 %2080  ;;  %v3033_v23 = vsel %vm3022_vm10, %v2904_v1, %v9613_v21 }
 0x59b   : > { %v2941_v28 = vsel %vm2893_vm8, %v2812_v19, %v14538_v14  ;;  %v2945_v31 = vsel %vm2893_vm8, %v2816_v51, %v14538_v14  ;;  %v14539_v37 = vld [vmem:[#allocation111_spill] sm:$0xff]  ;;  %v10062_v51 = vsel %vm3022_vm10, %v2921_v8, %v2081_v39  ;;  %v10066_v14 = vsel %vm3022_vm10, %v2917_v17, %v2081_v39  ;;  %v14550_v17 = vld [vmem:[#allocation16_spill] sm:$0xff] }
 0x59c   : > { %v2929_v38 = vsel %vm2893_vm8, %v2800_v2, %v14539_v37  ;;  %v10052_v36 = vsel %vm3022_vm10, %v2941_v28, %v2105_v18  ;;  %v10055_v55 = vsel %vm3022_vm10, %v2945_v31, %v2105_v18  ;;  %v14542_v42 = vld [vmem:[#allocation495_spill] sm:$0xff]  ;;  %14544 = vst [vmem:[#allocation86_spill] sm:$0xff] %v10062_v51  ;;  %v14547_v28 = vld [vmem:[#allocation17_spill] sm:$0xff]  ;;  %v14548_v31 = vld [vmem:[#allocation138_spill] sm:$0xff]  ;;  %v2433_v8 = vsel %vm2377_vm4, %v9065_v5, %v14465_v53 }
 0x59d   : > { %14540 = vst [vmem:[#allocation88_spill] sm:$0xff] %v10052_v36  ;;  %v10059_v19 = vsel %vm3022_vm10, %v14542_v42, %v2089_v22  ;;  %v3058_v2 = vsel %vm3022_vm10, %v2929_v38, %v2089_v22  ;;  %v14546_v21 = vld [vmem:[#allocation123_spill] sm:$0xff]  ;;  %v10076_v18 = vsel %vm2377_vm4, %v14548_v31, %v14547_v28  ;;  %5047 = vmatmul.msk.f32.gmra.mxu0 %vm3160_vm11, %v3033_v23  ;;  %v14551_v37 = vld [vmem:[#allocation160_spill] sm:$0xff]  ;;  %v14555_v42 = vld [vmem:[#allocation430_spill] sm:$0xff] }
 0x59e   : > { %14541 = vst [vmem:[#allocation87_spill] sm:$0xff] %v10055_v55  ;;  %v10071_v1 = vsel %vm2377_vm4, %v14546_v21, %v14463_v50  ;;  %5072 = vmatmul.msk.f32.gmra.mxu1 %vm3160_vm11, %v3058_v2  ;;  %v2435_v38 = vsel %vm2377_vm4, %v14551_v37, %v14550_v17  ;;  %v14552_v22 = vld [vmem:[#allocation20_spill] sm:$0xff]  ;;  %v14557_v51 = vld [vmem:[#allocation18_spill] sm:$0xff]  ;;  %v14558_v53 = vld [vmem:[#allocation19_spill] sm:$0xff] }
 0x59f   : > { %14543 = vst [vmem:[#allocation89_spill] sm:$0xff] %v10059_v19  ;;  %v14553_v50 = vld [vmem:[#allocation424_spill] sm:$0xff]  ;;  %v10094_v19 = vsel %vm2377_vm4, %v14555_v42, %v14552_v22  ;;  %v10099_v5 = vsel %vm2377_vm4, %v14546_v21, %v14557_v51  ;;  %v14559_v23 = vld [vmem:[#allocation122_spill] sm:$0xff]  ;;  %v14560_v17 = vld [vmem:[#allocation127_spill] sm:$0xff] }
 0x5a0   : > { %14545 = vst [vmem:[#allocation97_spill] sm:$0xff] %v10066_v14  ;;  %v10089_v39 = vsel %vm2377_vm4, %v14553_v50, %v14552_v22  ;;  %v10104_v2 = vsel %vm2377_vm4, %v14559_v23, %v14558_v53  ;;  %v10109_v37 = vsel %vm2377_vm4, %v14560_v17, %v14558_v53  ;;  %v14562_v55 = vld [vmem:[#allocation352_spill] sm:$0xff]  ;;  %v14563_v14 = vld [vmem:[#allocation166_spill] sm:$0xff]  ;;  %v14564_v36 = vld [vmem:[#allocation357_spill] sm:$0xff] }
 0x5a1   : > { %14549 = vst [vmem:[#allocation98_spill] sm:$0xff] %v10076_v18  ;;  %v2560_v22 = vsel %vm2506_vm5, %v14563_v14, %v14562_v55  ;;  %v2564_v28 = vsel %vm2506_vm5, %v2435_v38, %v14564_v36  ;;  %v14565_v0 = vld [vmem:[#allocation23_spill] sm:$0xff]  ;;  %v14566_v51 = vld [vmem:[#allocation141_spill] sm:$0xff]  ;;  %v14569_v23 = vld [vmem:[#allocation254_spill] sm:$0xff] }
 0x5a2   : > { %14554 = vst [vmem:[#allocation106_spill] sm:$0xff] %v10089_v39  ;;  %v10119_v21 = vsel %vm2377_vm4, %v14566_v51, %v14565_v0  ;;  %v14570_v39 = vld [vmem:[#allocation410_spill] sm:$0xff]  ;;  %v14572_v14 = vld [vmem:[#allocation212_spill] sm:$0xff]  ;;  %v14574_v38 = vld [vmem:[#allocation475_spill] sm:$0xff] }
 0x5a3   : > { %14556 = vst [vmem:[#allocation114_spill] sm:$0xff] %v10094_v19  ;;  %v14568_v19 = vld [vmem:[#allocation345_spill] sm:$0xff]  ;;  %v2693_v53 = vsel %vm2635_vm6, %v2564_v28, %v14570_v39  ;;  %v14571_v18 = vld [vmem:[#allocation222_spill] sm:$0xff]  ;;  %2176 = vrot.lane.b32.xlu2 %v14572_v14, %s5483_s17  ;;  %v14577_v39 = vld [vmem:[#allocation143_spill] sm:$0xff]  ;;  %v2109_v14 = vpop.permute.xlu2 %2108 }
 0x5a4   : > { %14561 = vst [vmem:[#allocation115_spill] sm:$0xff] %v10109_v37  ;;  %v2543_v29 = vsel %vm2506_vm5, %v14569_v23, %v14568_v19  ;;  %v2689_v37 = vsel %vm2635_vm6, %v2560_v22, %v14571_v18  ;;  %v14575_v19 = vld [vmem:[#allocation210_spill] sm:$0xff]  ;;  %v14576_v28 = vld [vmem:[#allocation125_spill] sm:$0xff]  ;;  %v10143_v22 = vsel %vm2377_vm4, %v14577_v39, %v14565_v0  ;;  %v10158_v0 = vpop.permute.xlu1 %2090 }
 0x5a5   : > { %14567 = vst [vmem:[#allocation209_spill] sm:$0xff] %v10119_v21  ;;  %v2672_v36 = vsel %vm2635_vm6, %v2543_v29, %v14573_v6  ;;  %v2818_v42 = vsel %vm2764_vm7, %v2689_v37, %v14574_v38  ;;  %v2822_v21 = vsel %vm2764_vm7, %v2693_v53, %v14574_v38  ;;  %2174 = vrot.lane.b32.xlu1 %v14575_v19, %s5483_s17  ;;  %v14579_v23 = vld [vmem:[#allocation466_spill] sm:$0xff]  ;;  %v14580_v29 = vld [vmem:[#allocation205_spill] sm:$0xff] }
 0x5a6   : > { %2178 = vrot.lane.b32.xlu0 %v14576_v28, %s5483_s17  ;;  %14578 = vst [vmem:[#allocation214_spill] sm:$0xff] %v10143_v22  ;;  %v2801_v6 = vsel %vm2764_vm7, %v2672_v36, %v14579_v23  ;;  %v2947_v37 = vsel %vm2893_vm8, %v2818_v42, %v14580_v29  ;;  %v2951_v53 = vsel %vm2893_vm8, %v2822_v21, %v14580_v29  ;;  %v14581_v38 = vld [vmem:[#allocation21_spill] sm:$0xff]  ;;  %v14582_v19 = vld [vmem:[#allocation134_spill] sm:$0xff]  ;;  %v10163_v36 = vpop.permute.xlu0 %2094  ;;  %s12423_s17 = sshll.u32 %s4913_s12, 4  ;;  %s4918_s17 = int_to_ptr.hbm [resolvable:$true] %s12423_s17 }
 0x5a7   : > { %v10154_v31 = vsel %vm2377_vm4, %v14582_v19, %v14581_v38  ;;  %v14583_v28 = vld [vmem:[#allocation85_spill] sm:$0xff]  ;;  %v10161_v22 = vsel %vm3022_vm10, %v2951_v53, %v2109_v14  ;;  %v10166_v42 = vsel %vm3022_vm10, %v2947_v37, %v2109_v14  ;;  %v14586_v21 = vld [vmem:[#allocation130_spill] sm:$0xff] }
 0x5a8   : > { %v2930_v51 = vsel %vm2893_vm8, %v2801_v6, %v14583_v28  ;;  %14584 = vst [vmem:[#allocation215_spill] sm:$0xff] %v10161_v22  ;;  %v10171_v29 = vsel %vm2377_vm4, %v14586_v21, %v14581_v38  ;;  %v14588_v19 = vld [vmem:[#allocation22_spill] sm:$0xff]  ;;  %v14591_v6 = vld [vmem:[#allocation153_spill] sm:$0xff]  ;;  %v14596_v38 = vld [vmem:[#allocation24_spill] sm:$0xff] }
 0x5a9   : > { %14585 = vst [vmem:[#allocation279_spill] sm:$0xff] %v10166_v42  ;;  %v14589_v39 = vld [vmem:[#allocation126_spill] sm:$0xff]  ;;  %v10181_v53 = vsel %vm2377_vm4, %v14591_v6, %v14588_v19  ;;  %v3059_v22 = vsel %vm3022_vm10, %v2930_v51, %v10158_v0  ;;  %v2450_v21 = vsel %vm2377_vm4, %v14560_v17, %v14596_v38  ;;  %v14599_v51 = vld [vmem:[#allocation25_spill] sm:$0xff]  ;;  %v14602_v17 = vld [vmem:[#allocation419_spill] sm:$0xff] }
 0x5aa   : > { %14587 = vst [vmem:[#allocation218_spill] sm:$0xff] %v10171_v29  ;;  %v10176_v24 = vsel %vm2377_vm4, %v14589_v39, %v14588_v19  ;;  %v14593_v37 = vld [vmem:[#allocation26_spill] sm:$0xff]  ;;  %v10196_v39 = vsel %vm2377_vm4, %v14553_v50, %v14596_v38  ;;  %v14598_v29 = vld [vmem:[#allocation371_spill] sm:$0xff]  ;;  %5073 = vmatmul.msk.f32.gmra.mxu1 %vm3160_vm11, %v3059_v22  ;;  %v14600_v19 = vld [vmem:[#allocation129_spill] sm:$0xff]  ;;  %v2519_v50 = vsel %vm2506_vm5, %v14602_v17, %v14469_v63 }
 0x5ab   : > { %14590 = vst [vmem:[#allocation219_spill] sm:$0xff] %v10176_v24  ;;  %v14594_v14 = vld [vmem:[#allocation142_spill] sm:$0xff]  ;;  %5048 = vmatmul.msk.f32.gmra.mxu0 %vm3160_vm11, %v14598_v29  ;;  %v2562_v38 = vsel %vm2506_vm5, %v2433_v8, %v14522_v27  ;;  %v14603_v29 = vld [vmem:[#allocation437_spill] sm:$0xff] }
 0x5ac   : > { %14592 = vst [vmem:[#allocation313_spill] sm:$0xff] %v10181_v53  ;;  %v10188_v42 = vsel %vm2377_vm4, %v14594_v14, %v14593_v37  ;;  %v10204_v53 = vsel %vm2377_vm4, %v14600_v19, %v14599_v51  ;;  %v14601_v37 = vld [vmem:[#allocation27_spill] sm:$0xff]  ;;  %v2544_v22 = vsel %vm2506_vm5, %v14603_v29, %v14392_v52  ;;  %v14605_v24 = vld [vmem:[#allocation358_spill] sm:$0xff]  ;;  %v2648_v14 = vsel %vm2635_vm6, %v2519_v50, %v14475_v59 }
 0x5ad   : > { %14595 = vst [vmem:[#allocation220_spill] sm:$0xff] %v10188_v42  ;;  %v10209_v42 = vsel %vm2377_vm4, %v14591_v6, %v14601_v37  ;;  %v2566_v6 = vsel %vm2506_vm5, %v9788_v46, %v14605_v24  ;;  %v2673_v63 = vsel %vm2635_vm6, %v2544_v22, %v14395_v44  ;;  %v2691_v52 = vsel %vm2635_vm6, %v2562_v38, %v14530_v26  ;;  %v14606_v8 = vld [vmem:[#allocation234_spill] sm:$0xff]  ;;  %v14608_v24 = vld [vmem:[#allocation467_spill] sm:$0xff] }
 0x5ae   : > { %14597 = vst [vmem:[#allocation224_spill] sm:$0xff] %v10196_v39  ;;  %v14604_v39 = vld [vmem:[#allocation159_spill] sm:$0xff]  ;;  %v2695_v17 = vsel %vm2635_vm6, %v2566_v6, %v14606_v8  ;;  %v2820_v59 = vsel %vm2764_vm7, %v2691_v52, %v14608_v24  ;;  %v10255_v6 = vpop.permute.xlu1 %2096 }
 0x5af   : > { %v2556_v51 = vsel %vm2506_vm5, %v14604_v39, %v14562_v55  ;;  %v2777_v55 = vsel %vm2764_vm7, %v2648_v14, %v14437_v11  ;;  %v14607_v39 = vld [vmem:[#allocation458_spill] sm:$0xff]  ;;  %v2824_v44 = vsel %vm2764_vm7, %v2695_v17, %v14608_v24  ;;  %v2113_v14 = vpop.permute.xlu2 %2112  ;;  %v14610_v29 = vld [vmem:[#allocation119_spill] sm:$0xff]  ;;  %v14616_v24 = vld [vmem:[#allocation432_spill] sm:$0xff] }
 0x5b0   : > { %v2685_v27 = vsel %vm2635_vm6, %v2556_v51, %v14571_v18  ;;  %v2802_v18 = vsel %vm2764_vm7, %v2673_v63, %v14476_v45  ;;  %v2906_v26 = vsel %vm2893_vm8, %v2777_v55, %v14442_v20  ;;  %v14609_v51 = vld [vmem:[#allocation135_spill] sm:$0xff]  ;;  %v10260_v63 = vpop.permute.xlu0 %2100  ;;  %v14615_v55 = vld [vmem:[#allocation449_spill] sm:$0xff] }
 0x5b1   : > { %v2814_v46 = vsel %vm2764_vm7, %v2685_v27, %v14607_v39  ;;  %v2949_v50 = vsel %vm2893_vm8, %v2820_v59, %v14609_v51  ;;  %v2953_v11 = vsel %vm2893_vm8, %v2824_v44, %v14609_v51  ;;  %v2931_v38 = vsel %vm2893_vm8, %v2802_v18, %v14481_v25  ;;  %v14613_v27 = vld [vmem:[#allocation30_spill] sm:$0xff]  ;;  %v14617_v44 = vld [vmem:[#allocation336_spill] sm:$0xff] }
 0x5b2   : > { %v2943_v22 = vsel %vm2893_vm8, %v2814_v46, %v14610_v29  ;;  %v10258_v45 = vsel %vm3022_vm10, %v2953_v11, %v2113_v14  ;;  %v10263_v20 = vsel %vm3022_vm10, %v2949_v50, %v2113_v14  ;;  %v2460_v52 = vsel %vm2377_vm4, %v14600_v19, %v14613_v27  ;;  %v14618_v19 = vld [vmem:[#allocation425_spill] sm:$0xff]  ;;  %v14621_v11 = vld [vmem:[#allocation354_spill] sm:$0xff]  ;;  %v14624_v14 = vld [vmem:[#allocation407_spill] sm:$0xff] }
 0x5b3   : > { %14611 = vst [vmem:[#allocation385_spill] sm:$0xff] %v10258_v45  ;;  %v3035_v25 = vsel %vm3022_vm10, %v2906_v26, %v9775_v16  ;;  %v3060_v8 = vsel %vm3022_vm10, %v2931_v38, %v9882_v61  ;;  %v10274_v17 = vsel %vm3022_vm10, %v2943_v22, %v10260_v63  ;;  %v2521_v46 = vsel %vm2506_vm5, %v14615_v55, %v14486_v3  ;;  %v14619_v3 = vld [vmem:[#allocation320_spill] sm:$0xff]  ;;  %v14620_v26 = vld [vmem:[#allocation121_spill] sm:$0xff]  ;;  %v14628_v55 = vld [vmem:[#allocation483_spill] sm:$0xff] }
 0x5b4   : > { %14612 = vst [vmem:[#allocation171_spill] sm:$0xff] %v10263_v20  ;;  %v2520_v59 = vsel %vm2506_vm5, %v14616_v24, %v14491_v43  ;;  %v10285_v18 = vsel %vm2506_vm5, %v14618_v19, %v14617_v44  ;;  %5049 = vmatmul.msk.f32.gmra.mxu0 %vm3160_vm11, %v3035_v25  ;;  %5074 = vmatmul.msk.f32.gmra.mxu1 %vm3160_vm11, %v3060_v8  ;;  %v14627_v8 = vld [vmem:[#allocation452_spill] sm:$0xff]  ;;  %v14630_v44 = vld [vmem:[#allocation478_spill] sm:$0xff] }
 0x5b5   : > { %14614 = vst [vmem:[#allocation225_spill] sm:$0xff] %v10274_v17  ;;  %v2545_v16 = vsel %vm2506_vm5, %v9705_v56, %v14493_v12  ;;  %v2559_v61 = vsel %vm2506_vm5, %v9835_v57, %v14497_v30  ;;  %v2546_v43 = vsel %vm2506_vm5, %v14619_v3, %v14523_v49  ;;  %v10301_v51 = vsel %vm2506_vm5, %v10099_v5, %v14620_v26  ;;  %v14622_v12 = vld [vmem:[#allocation353_spill] sm:$0xff]  ;;  %v14623_v30 = vld [vmem:[#allocation360_spill] sm:$0xff] }
 0x5b6   : > { %v10306_v50 = vsel %vm2506_vm5, %v9710_v35, %v14498_v33  ;;  %v2557_v56 = vsel %vm2506_vm5, %v9840_v15, %v14621_v11  ;;  %v2579_v57 = vsel %vm2506_vm5, %v2450_v21, %v14622_v12  ;;  %v2571_v49 = vsel %vm2506_vm5, %v10104_v2, %v14623_v30  ;;  %v14625_v33 = vld [vmem:[#allocation241_spill] sm:$0xff]  ;;  %v14626_v15 = vld [vmem:[#allocation216_spill] sm:$0xff] }
 0x5b7   : > { %v2649_v5 = vsel %vm2635_vm6, %v2520_v59, %v14499_v4  ;;  %v2686_v38 = vsel %vm2635_vm6, %v2557_v56, %v14624_v14  ;;  %v2674_v35 = vsel %vm2635_vm6, %v2545_v16, %v14502_v60  ;;  %v2708_v22 = vsel %vm2635_vm6, %v2579_v57, %v14625_v33  ;;  %v14629_v24 = vld [vmem:[#allocation472_spill] sm:$0xff]  ;;  %v10340_v26 = vpop.permute.xlu2 %2122  ;;  %v14633_v57 = vld [vmem:[#allocation113_spill] sm:$0xff] }
 0x5b8   : > { %v2700_v25 = vsel %vm2635_vm6, %v2571_v49, %v14626_v15  ;;  %v2778_v21 = vsel %vm2764_vm7, %v2649_v5, %v14441_v41  ;;  %v2803_v2 = vsel %vm2764_vm7, %v2674_v35, %v14627_v8  ;;  %v2837_v4 = vsel %vm2764_vm7, %v2708_v22, %v14628_v55  ;;  %v14631_v16 = vld [vmem:[#allocation504_spill] sm:$0xff]  ;;  %v14632_v41 = vld [vmem:[#allocation110_spill] sm:$0xff]  ;;  %v14634_v5 = vld [vmem:[#allocation231_spill] sm:$0xff]  ;;  %v10348_v35 = vpop.permute.xlu1 %2102  ;;  %v2115_v22 = vpop.permute.xlu0 %2114 }
 0x5b9   : > { %v2815_v59 = vsel %vm2764_vm7, %v2686_v38, %v14629_v24  ;;  %v2829_v60 = vsel %vm2764_vm7, %v2700_v25, %v14630_v44  ;;  %v2907_v19 = vsel %vm2893_vm8, %v2778_v21, %v14444_v9  ;;  %v2966_v3 = vsel %vm2893_vm8, %v2837_v4, %v14631_v16  ;;  %v14635_v25 = vld [vmem:[#allocation496_spill] sm:$0xff]  ;;  %v14637_v44 = vld [vmem:[#allocation350_spill] sm:$0xff] }
 0x5ba   : > { %v2944_v56 = vsel %vm2893_vm8, %v2815_v59, %v14632_v41  ;;  %v2932_v49 = vsel %vm2893_vm8, %v2803_v2, %v14633_v57  ;;  %v2958_v38 = vsel %vm2893_vm8, %v2829_v60, %v14634_v5  ;;  %v10352_v9 = vsel %vm3022_vm10, %v2966_v3, %v10340_v26 }
 0x5bb   : > { %v10356_v21 = vsel %vm3022_vm10, %v14635_v25, %v2115_v22  ;;  %v3036_v4 = vsel %vm3022_vm10, %v2907_v19, %v9780_v34  ;;  %v3061_v2 = vsel %vm3022_vm10, %v2932_v49, %v10163_v36  ;;  %v3087_v59 = vsel %vm3022_vm10, %v2958_v38, %v2115_v22  ;;  %v14639_v19 = vld [vmem:[#allocation355_spill] sm:$0xff]  ;;  %v14640_v49 = vld [vmem:[#allocation168_spill] sm:$0xff] }
 0x5bc   : > { %14636 = vst [vmem:[#allocation422_spill] sm:$0xff] %v10356_v21  ;;  %v2572_v60 = vsel %vm2506_vm5, %v10154_v31, %v14637_v44  ;;  %v2561_v3 = vsel %vm2506_vm5, %v10071_v1, %v14621_v11  ;;  %5050 = vmatmul.msk.f32.gmra.mxu0 %vm3160_vm11, %v3036_v4  ;;  %5075 = vmatmul.msk.f32.gmra.mxu1 %vm3160_vm11, %v3061_v2  ;;  %v14641_v38 = vld [vmem:[#allocation356_spill] sm:$0xff]  ;;  %v14642_v22 = vld [vmem:[#allocation359_spill] sm:$0xff]  ;;  %v14650_v21 = vld [vmem:[#allocation93_spill] sm:$0xff] }
 0x5bd   : > { %v10373_v34 = vsel %vm3022_vm10, %v2944_v56, %v10348_v35  ;;  %v2563_v5 = vsel %vm2506_vm5, %v14640_v49, %v14639_v19  ;;  %v2582_v31 = vsel %vm2506_vm5, %v10209_v42, %v14641_v38  ;;  %v2589_v25 = vsel %vm2506_vm5, %v2460_v52, %v14642_v22  ;;  %5101 = vmatmul.msk.f32.vlgmr.msra.gmra.mxu2 %vm3160_vm11, %v3087_v59  ;;  %v14643_v4 = vld [vmem:[#allocation228_spill] sm:$0xff]  ;;  %v14644_v19 = vld [vmem:[#allocation235_spill] sm:$0xff] }
 0x5be   : > { %14638 = vst [vmem:[#allocation172_spill] sm:$0xff] %v10373_v34  ;;  %v2650_v1 = vsel %vm2635_vm6, %v2521_v46, %v14526_v54  ;;  %v2675_v11 = vsel %vm2635_vm6, %v2546_v43, %v14529_v58  ;;  %v2688_v56 = vsel %vm2635_vm6, %v2559_v61, %v14503_v48  ;;  %v2692_v2 = vsel %vm2635_vm6, %v2563_v5, %v14643_v4  ;;  %v14645_v49 = vld [vmem:[#allocation247_spill] sm:$0xff]  ;;  %v14646_v46 = vld [vmem:[#allocation464_spill] sm:$0xff]  ;;  %v14647_v43 = vld [vmem:[#allocation469_spill] sm:$0xff] }
 0x5bf   : > { %v2701_v42 = vsel %vm2635_vm6, %v2572_v60, %v14644_v19  ;;  %v2711_v52 = vsel %vm2635_vm6, %v2582_v31, %v14645_v49  ;;  %v2779_v54 = vsel %vm2764_vm7, %v2650_v1, %v14479_v10  ;;  %v2817_v59 = vsel %vm2764_vm7, %v2688_v56, %v14646_v46  ;;  %v14648_v61 = vld [vmem:[#allocation480_spill] sm:$0xff]  ;;  %v14649_v4 = vld [vmem:[#allocation486_spill] sm:$0xff]  ;;  %v10418_v45 = vpop.permute.xlu2 %2128  ;;  %v14706_v34 = vld [vmem:[#allocation481_spill] sm:$0xff] }
 0x5c0   : > { %v2821_v58 = vsel %vm2764_vm7, %v2692_v2, %v14646_v46  ;;  %v2804_v48 = vsel %vm2764_vm7, %v2675_v11, %v14647_v43  ;;  %v2830_v5 = vsel %vm2764_vm7, %v2701_v42, %v14648_v61  ;;  %v2840_v60 = vsel %vm2764_vm7, %v2711_v52, %v14649_v4  ;;  %v14651_v1 = vld [vmem:[#allocation500_spill] sm:$0xff]  ;;  %v14652_v46 = vld [vmem:[#allocation506_spill] sm:$0xff]  ;;  %v2107_v61 = vpop.permute.xlu1 %2106  ;;  %v2117_v20 = vpop.permute.xlu0 %2116 }
 0x5c1   : > { %v2908_v31 = vsel %vm2893_vm8, %v2779_v54, %v14483_v62  ;;  %v2933_v10 = vsel %vm2893_vm8, %v2804_v48, %v14650_v21  ;;  %v2946_v56 = vsel %vm2893_vm8, %v2817_v59, %v14651_v1  ;;  %v2950_v2 = vsel %vm2893_vm8, %v2821_v58, %v14651_v1  ;;  %v14653_v42 = vld [vmem:[#allocation502_spill] sm:$0xff]  ;;  %v14656_v48 = vld [vmem:[#allocation503_spill] sm:$0xff] }
 0x5c2   : > { %v2969_v11 = vsel %vm2893_vm8, %v2840_v60, %v14652_v46  ;;  %v2959_v52 = vsel %vm2893_vm8, %v2830_v5, %v14653_v42  ;;  %v3037_v62 = vsel %vm3022_vm10, %v2908_v31, %v9890_v32  ;;  %v3062_v54 = vsel %vm3022_vm10, %v2933_v10, %v10255_v6  ;;  %v14659_v32 = vld [vmem:[#allocation361_spill] sm:$0xff]  ;;  %v14660_v10 = vld [vmem:[#allocation366_spill] sm:$0xff]  ;;  %v14661_v42 = vld [vmem:[#allocation399_spill] sm:$0xff] }
 0x5c3   : > { %v10428_v59 = vsel %vm3022_vm10, %v2969_v11, %v10418_v45  ;;  %v10431_v58 = vsel %vm3022_vm10, %v2950_v2, %v2107_v61  ;;  %v10435_v60 = vsel %vm3022_vm10, %v14656_v48, %v2117_v20  ;;  %v3088_v5 = vsel %vm3022_vm10, %v2959_v52, %v2117_v20 }
 0x5c4   : > { %14654 = vst [vmem:[#allocation179_spill] sm:$0xff] %v10428_v59  ;;  %v10439_v1 = vsel %vm3022_vm10, %v2946_v56, %v2107_v61  ;;  %v2573_v31 = vsel %vm2506_vm5, %v9822_v47, %v14659_v32  ;;  %v2585_v11 = vsel %vm2506_vm5, %v10204_v53, %v14660_v10  ;;  %v2651_v2 = vsel %vm2635_vm6, %v10285_v18, %v14661_v42  ;;  %v14662_v47 = vld [vmem:[#allocation227_spill] sm:$0xff]  ;;  %v14663_v61 = vld [vmem:[#allocation229_spill] sm:$0xff]  ;;  %v14664_v18 = vld [vmem:[#allocation240_spill] sm:$0xff]  ;;  %v3566_v59 = vpop.f32.mrf.mxu0 }
 0x5c5   : > { %14655 = vst [vmem:[#allocation226_spill] sm:$0xff] %v10431_v58  ;;  %5051 = vmatmul.msk.f32.gmra.mxu0 %vm3160_vm11, %v3037_v62  ;;  %5076 = vmatmul.msk.f32.gmra.mxu1 %vm3160_vm11, %v3062_v54  ;;  %v2676_v20 = vsel %vm2635_vm6, %v10306_v50, %v14500_v13  ;;  %v2690_v56 = vsel %vm2635_vm6, %v2561_v3, %v14624_v14  ;;  %v14665_v54 = vld [vmem:[#allocation253_spill] sm:$0xff]  ;;  %v14666_v14 = vld [vmem:[#allocation470_spill] sm:$0xff]  ;;  %v14700_v58 = vld [vmem:[#allocation259_spill] sm:$0xff] }
 0x5c6   : > { %14657 = vst [vmem:[#allocation230_spill] sm:$0xff] %v10435_v60  ;;  %v2714_v52 = vsel %vm2635_vm6, %v2585_v11, %v14662_v47  ;;  %v2694_v53 = vsel %vm2635_vm6, %v10301_v51, %v14663_v61  ;;  %5102 = vmatmul.msk.f32.gmra.mxu2 %vm3160_vm11, %v3088_v5  ;;  %v2702_v62 = vsel %vm2635_vm6, %v2573_v31, %v14664_v18  ;;  %v14667_v11 = vld [vmem:[#allocation477_spill] sm:$0xff]  ;;  %v14670_v61 = vld [vmem:[#allocation139_spill] sm:$0xff]  ;;  %v14695_v60 = vld [vmem:[#allocation340_spill] sm:$0xff] }
 0x5c7   : > { %14658 = vst [vmem:[#allocation236_spill] sm:$0xff] %v10439_v1  ;;  %v2718_v48 = vsel %vm2635_vm6, %v2589_v25, %v14665_v54  ;;  %v2780_v13 = vsel %vm2764_vm7, %v2651_v2, %v14480_v40  ;;  %v2805_v50 = vsel %vm2764_vm7, %v2676_v20, %v14579_v23  ;;  %v2831_v3 = vsel %vm2764_vm7, %v2702_v62, %v14666_v14  ;;  %v14668_v42 = vld [vmem:[#allocation489_spill] sm:$0xff]  ;;  %v14671_v62 = vld [vmem:[#allocation146_spill] sm:$0xff]  ;;  %v2135_v14 = vpop.permute.xlu2 %2134  ;;  %v14704_v1 = vld [vmem:[#allocation492_spill] sm:$0xff] }
 0x5c8   : > { %v2819_v51 = vsel %vm2764_vm7, %v2690_v56, %v14667_v11  ;;  %v2823_v5 = vsel %vm2764_vm7, %v2694_v53, %v14667_v11  ;;  %v2843_v31 = vsel %vm2764_vm7, %v2714_v52, %v14668_v42  ;;  %v2847_v25 = vsel %vm2764_vm7, %v2718_v48, %v14668_v42  ;;  %v14669_v2 = vld [vmem:[#allocation501_spill] sm:$0xff]  ;;  %v14672_v11 = vld [vmem:[#allocation248_spill] sm:$0xff] }
 0x5c9   : > { %v2909_v40 = vsel %vm2893_vm8, %v2780_v13, %v14482_v7  ;;  %v2934_v23 = vsel %vm2893_vm8, %v2805_v50, %v14583_v28  ;;  %v2948_v20 = vsel %vm2893_vm8, %v2819_v51, %v14669_v2  ;;  %v2952_v56 = vsel %vm2893_vm8, %v2823_v5, %v14669_v2  ;;  %v2111_v7 = vpop.permute.xlu1 %2110  ;;  %v2119_v13 = vpop.permute.xlu0 %2118  ;;  %v14676_v42 = vld [vmem:[#allocation505_spill] sm:$0xff]  ;;  %v14717_v10 = vld [vmem:[#allocation364_spill] sm:$0xff] }
 0x5ca   : > { %v2960_v53 = vsel %vm2893_vm8, %v2831_v3, %v14670_v61  ;;  %v2972_v52 = vsel %vm2893_vm8, %v2843_v31, %v14671_v62  ;;  %v2976_v48 = vsel %vm2893_vm8, %v2847_v25, %v14671_v62  ;;  %v3038_v28 = vsel %vm3022_vm10, %v2909_v40, %v14672_v11  ;;  %v14679_v2 = vld [vmem:[#allocation29_spill] sm:$0xff]  ;;  %v14687_v11 = vld [vmem:[#allocation430_spill] sm:$0xff] }
 0x5cb   : > { %v3063_v50 = vsel %vm3022_vm10, %v2934_v23, %v10158_v0  ;;  %v10500_v51 = vsel %vm3022_vm10, %v2972_v52, %v2135_v14  ;;  %v10503_v3 = vsel %vm3022_vm10, %v2976_v48, %v2135_v14  ;;  %v10506_v5 = vsel %vm3022_vm10, %v2952_v56, %v2111_v7  ;;  %v14680_v0 = vld [vmem:[#allocation92_spill] sm:$0xff]  ;;  %v14681_v61 = vld [vmem:[#allocation141_spill] sm:$0xff]  ;;  %v14683_v52 = vld [vmem:[#allocation138_spill] sm:$0xff] }
 0x5cc   : > { %14673 = vst [vmem:[#allocation238_spill] sm:$0xff] %v10500_v51  ;;  %v10510_v31 = vsel %vm3022_vm10, %v14676_v42, %v2119_v13  ;;  %v3089_v25 = vsel %vm3022_vm10, %v2960_v53, %v2119_v13  ;;  %v10514_v40 = vsel %vm3022_vm10, %v2948_v20, %v2111_v7  ;;  %v10519_v23 = vsel %vm2377_vm4, %v14680_v0, %v14679_v2  ;;  %v14682_v56 = vld [vmem:[#allocation28_spill] sm:$0xff]  ;;  %v14684_v20 = vld [vmem:[#allocation415_spill] sm:$0xff]  ;;  %v14685_v14 = vld [vmem:[#allocation142_spill] sm:$0xff] }
 0x5cd   : > { %14674 = vst [vmem:[#allocation243_spill] sm:$0xff] %v10503_v3  ;;  %v2457_v62 = vsel %vm2377_vm4, %v14681_v61, %v14601_v37  ;;  %v2459_v48 = vsel %vm2377_vm4, %v14683_v52, %v14682_v56  ;;  %5052 = vmatmul.msk.f32.gmra.mxu0 %vm3160_vm11, %v3038_v28  ;;  %5077 = vmatmul.msk.f32.gmra.mxu1 %vm3160_vm11, %v3063_v50  ;;  %v14686_v13 = vld [vmem:[#allocation31_spill] sm:$0xff]  ;;  %v14688_v42 = vld [vmem:[#allocation33_spill] sm:$0xff]  ;;  %v14689_v50 = vld [vmem:[#allocation312_spill] sm:$0xff] }
 0x5ce   : > { %14675 = vst [vmem:[#allocation244_spill] sm:$0xff] %v10506_v5  ;;  %v2463_v53 = vsel %vm2377_vm4, %v14684_v20, %v14682_v56  ;;  %v10535_v7 = vsel %vm2377_vm4, %v14685_v14, %v14613_v27  ;;  %v10540_v37 = vsel %vm2377_vm4, %v14687_v11, %v14686_v13  ;;  %v2467_v28 = vsel %vm2377_vm4, %v14684_v20, %v14688_v42  ;;  %v14690_v0 = vld [vmem:[#allocation143_spill] sm:$0xff]  ;;  %v14691_v56 = vld [vmem:[#allocation314_spill] sm:$0xff]  ;;  %v14694_v13 = vld [vmem:[#allocation369_spill] sm:$0xff] }
 0x5cf   : > { %14677 = vst [vmem:[#allocation249_spill] sm:$0xff] %v10510_v31  ;;  %5103 = vmatmul.msk.f32.gmra.mxu2 %vm3160_vm11, %v3089_v25  ;;  %v10549_v61 = vsel %vm2377_vm4, %v14690_v0, %v14689_v50  ;;  %v14692_v52 = vld [vmem:[#allocation62_spill] sm:$0xff]  ;;  %v2592_v11 = vsel %vm2506_vm5, %v2463_v53, %v14694_v13  ;;  %v14696_v5 = vld [vmem:[#allocation60_spill] sm:$0xff]  ;;  %v14697_v25 = vld [vmem:[#allocation363_spill] sm:$0xff]  ;;  %v2141_v17 = vpop.permute.xlu2 %2140 }
 0x5d0   : > { %14678 = vst [vmem:[#allocation250_spill] sm:$0xff] %v10514_v40  ;;  %v2474_v27 = vsel %vm2377_vm4, %v14692_v52, %v14691_v56  ;;  %v14693_v14 = vld [vmem:[#allocation362_spill] sm:$0xff]  ;;  %v10561_v20 = vsel %vm2506_vm5, %v14696_v5, %v14695_v60  ;;  %v14698_v42 = vld [vmem:[#allocation219_spill] sm:$0xff]  ;;  %v14699_v0 = vld [vmem:[#allocation233_spill] sm:$0xff] }
 0x5d1   : > { %v2596_v31 = vsel %vm2506_vm5, %v2467_v28, %v14693_v14  ;;  %v2574_v50 = vsel %vm2506_vm5, %v14698_v42, %v14697_v25  ;;  %v2721_v3 = vsel %vm2635_vm6, %v2592_v11, %v14699_v0  ;;  %v14701_v40 = vld [vmem:[#allocation349_spill] sm:$0xff]  ;;  %v14702_v28 = vld [vmem:[#allocation276_spill] sm:$0xff]  ;;  %v14705_v42 = vld [vmem:[#allocation218_spill] sm:$0xff] }
 0x5d2   : > { %v2725_v52 = vsel %vm2635_vm6, %v2596_v31, %v14700_v58  ;;  %v2549_v14 = vsel %vm2506_vm5, %v14702_v28, %v14701_v40  ;;  %v14703_v53 = vld [vmem:[#allocation221_spill] sm:$0xff]  ;;  %v2850_v60 = vsel %vm2764_vm7, %v2721_v3, %v14704_v1  ;;  %v10582_v11 = vsel %vm2506_vm5, %v14705_v42, %v14637_v44  ;;  %v14707_v31 = vld [vmem:[#allocation54_spill] sm:$0xff]  ;;  %v14708_v3 = vld [vmem:[#allocation351_spill] sm:$0xff] }
 0x5d3   : > { %v2703_v51 = vsel %vm2635_vm6, %v2574_v50, %v14703_v53  ;;  %v2854_v5 = vsel %vm2764_vm7, %v2725_v52, %v14704_v1  ;;  %v2979_v28 = vsel %vm2893_vm8, %v2850_v60, %v14707_v31  ;;  %v14709_v2 = vld [vmem:[#allocation61_spill] sm:$0xff]  ;;  %v10598_v44 = vld [vmem:[%s12501_s2] ss:$0 sm:$0xff]  ;;  %v10603_v60 = vpop.permute.xlu0 %2124 }
 0x5d4   : > { %v2832_v58 = vsel %vm2764_vm7, %v2703_v51, %v14706_v34  ;;  %v2983_v50 = vsel %vm2893_vm8, %v2854_v5, %v14707_v31  ;;  %v2550_v1 = vsel %vm2506_vm5, %v14709_v2, %v14708_v3  ;;  %v14710_v52 = vld [vmem:[#allocation237_spill] sm:$0xff]  ;;  %v2121_v34 = vpop.permute.xlu1 %2120  ;;  %v10606_v5 = vsel %vm3022_vm10, %v2979_v28, %v2141_v17  ;;  %v14713_v42 = vld [vmem:[#allocation224_spill] sm:$0xff]  ;;  %v14714_v31 = vld [vmem:[#allocation498_spill] sm:$0xff] }
 0x5d5   : > { %v2961_v47 = vsel %vm2893_vm8, %v2832_v58, %v14710_v52  ;;  %v10601_v51 = vsel %vm3022_vm10, %v2983_v50, %v2141_v17  ;;  %14712 = vst [vmem:[#allocation256_spill] sm:$0xff] %v10606_v5  ;;  %v2583_v2 = vsel %vm2506_vm5, %v14713_v42, %v14622_v12  ;;  %v2586_v58 = vsel %vm2506_vm5, %v2457_v62, %v14641_v38  ;;  %v14716_v50 = vld [vmem:[#allocation115_spill] sm:$0xff]  ;;  %v14718_v17 = vld [vmem:[#allocation98_spill] sm:$0xff]  ;;  %v14719_v5 = vld [vmem:[#allocation365_spill] sm:$0xff] }
 0x5d6   : > { %14711 = vst [vmem:[#allocation255_spill] sm:$0xff] %v10601_v51  ;;  %v10615_v3 = vsel %vm3022_vm10, %v14714_v31, %v2121_v34  ;;  %v3090_v52 = vsel %vm3022_vm10, %v2961_v47, %v2121_v34  ;;  %v2575_v51 = vsel %vm2506_vm5, %v14716_v50, %v14623_v30  ;;  %v2584_v28 = vsel %vm2506_vm5, %v14718_v17, %v14717_v10  ;;  %v14720_v42 = vld [vmem:[#allocation50_spill] sm:$0xff]  ;;  %v14722_v62 = vld [vmem:[#allocation367_spill] sm:$0xff]  ;;  %v14725_v50 = vld [vmem:[#allocation209_spill] sm:$0xff] }
 0x5d7   : > { %14715 = vst [vmem:[#allocation260_spill] sm:$0xff] %v10615_v3  ;;  %v2603_v12 = vsel %vm2506_vm5, %v2474_v27, %v14719_v5  ;;  %5053 = vmatmul.msk.f32.gmra.mxu0 %vm3160_vm11, %v14720_v42  ;;  %v14721_v38 = vld [vmem:[#allocation262_spill] sm:$0xff]  ;;  %v2588_v30 = vsel %vm2506_vm5, %v2459_v48, %v14694_v13  ;;  %v14726_v3 = vld [vmem:[#allocation404_spill] sm:$0xff]  ;;  %5104 = vmatmul.msk.f32.gmra.mxu2 %vm3160_vm11, %v3090_v52  ;;  %v14727_v42 = vld [vmem:[#allocation217_spill] sm:$0xff] }
 0x5d8   : > { %5078 = vmatmul.msk.f32.gmra.mxu1 %vm3160_vm11, %v14721_v38  ;;  %v14723_v31 = vld [vmem:[#allocation106_spill] sm:$0xff]  ;;  %v2679_v27 = vsel %vm2635_vm6, %v2550_v1, %v14726_v3  ;;  %v2678_v5 = vsel %vm2635_vm6, %v2549_v14, %v14727_v42  ;;  %v2704_v38 = vsel %vm2635_vm6, %v2575_v51, %v14626_v15  ;;  %v3567_v48 = vadd.f32 %v10598_v44, %v3566_v59  ;;  %v14729_v1 = vld [vmem:[#allocation265_spill] sm:$0xff]  ;;  %v14730_v52 = vld [vmem:[#allocation476_spill] sm:$0xff] }
 0x5d9   : > { %v2587_v47 = vsel %vm2506_vm5, %v14723_v31, %v14722_v62  ;;  %v14724_v34 = vld [vmem:[#allocation370_spill] sm:$0xff]  ;;  %v2717_v31 = vsel %vm2635_vm6, %v2588_v30, %v14699_v0  ;;  %v2712_v13 = vsel %vm2635_vm6, %v2583_v2, %v14625_v33  ;;  %v2732_v3 = vsel %vm2635_vm6, %v2603_v12, %v14729_v1  ;;  %v14731_v51 = vld [vmem:[#allocation36_spill] sm:$0xff] }
 0x5da   : > { %v2590_v17 = vsel %vm2506_vm5, %v14725_v50, %v14724_v34  ;;  %v14728_v50 = vld [vmem:[#allocation252_spill] sm:$0xff]  ;;  %v2807_v14 = vsel %vm2764_vm7, %v2678_v5, %v14627_v8  ;;  %v2841_v15 = vsel %vm2764_vm7, %v2712_v13, %v14730_v52  ;;  %v2833_v59 = vsel %vm2764_vm7, %v2704_v38, %v14628_v55  ;;  %v3569_v13 = vpop.f32.mrf.mxu0  ;;  %4603 = vxpose.xlu1.b32.start [1/16] (narrow) %v3567_v48, 8 }
 0x5db   : > { %v2716_v56 = vsel %vm2635_vm6, %v2587_v47, %v14728_v50  ;;  %v2861_v33 = vsel %vm2764_vm7, %v2732_v3, %v14731_v51  ;;  %v2936_v2 = vsel %vm2893_vm8, %v2807_v14, %v14633_v57  ;;  %v14732_v47 = vld [vmem:[#allocation144_spill] sm:$0xff]  ;;  %v3570_v55 = vadd.f32 %v10598_v44, %v3569_v13  ;;  %v14734_v3 = vld [vmem:[#allocation81_spill] sm:$0xff]  ;;  %v2131_v57 = vpop.permute.xlu0 %2130 }
 0x5dc   : > { %v2845_v0 = vsel %vm2764_vm7, %v2716_v56, %v14730_v52  ;;  %v2970_v12 = vsel %vm2893_vm8, %v2841_v15, %v14732_v47  ;;  %v14733_v5 = vld [vmem:[#allocation72_spill] sm:$0xff]  ;;  %v2147_v56 = vpop.permute.xlu2 %2146  ;;  %v4213_v52 = vmul.f32 %v3567_v48, %v3567_v48  ;;  %v10673_v38 = vpop.permute.xlu1 %2126  ;;  %v2962_v15 = vsel %vm2893_vm8, %v2833_v59, %v14631_v16  ;;  %v14736_v59 = vld [vmem:[#allocation246_spill] sm:$0xff] }
 0x5dd   : > { %v2974_v8 = vsel %vm2893_vm8, %v2845_v0, %v14732_v47  ;;  %v2990_v30 = vsel %vm2893_vm8, %v2861_v33, %v14733_v5  ;;  %v10677_v51 = vsel %vm3022_vm10, %v14734_v3, %v2147_v56  ;;  %v3065_v0 = vsel %vm3022_vm10, %v2936_v2, %v10163_v36 }
 0x5de   : > { %v3119_v14 = vsel %vm3022_vm10, %v2990_v30, %v2147_v56  ;;  %v10686_v33 = vsel %vm3022_vm10, %v2970_v12, %v2131_v57  ;;  %v10689_v47 = vsel %vm3022_vm10, %v2974_v8, %v2131_v57  ;;  %v3950_v5 = vsel %vm2311_vm3, %v3567_v48, 0.0  ;;  %v14735_v30 = vld [vmem:[#allocation463_spill] sm:$0xff]  ;;  %v14737_v56 = vld [vmem:[#allocation258_spill] sm:$0xff] }
 0x5df   : > { %5133 = vmatmul.msk.f32.vlgmr.msra.gmra.mxu3 %vm3160_vm11, %v3119_v14  ;;  %v3951_v13 = vsel %vm2311_vm3, %v3570_v55, 0.0  ;;  %v4214_v3 = vmul.f32 %v3570_v55, %v3570_v55  ;;  %5054 = vmatmul.msk.f32.gmra.mxu0 %vm3160_vm11, %v14735_v30  ;;  %v3091_v36 = vsel %vm3022_vm10, %v2962_v15, %v10340_v26  ;;  %v2705_v16 = vsel %vm2635_vm6, %v10582_v11, %v14644_v19  ;;  %v14738_v11 = vld [vmem:[#allocation473_spill] sm:$0xff]  ;;  %v14739_v15 = vld [vmem:[#allocation479_spill] sm:$0xff] }
 0x5e0   : > { %5079 = vmatmul.msk.f32.gmra.mxu1 %vm3160_vm11, %v3065_v0  ;;  %v2713_v2 = vsel %vm2635_vm6, %v2584_v28, %v14736_v59  ;;  %v3952_v12 = vadd.f32 %v3951_v13, %v3950_v5  ;;  %5105 = vmatmul.msk.f32.gmra.mxu2 %vm3160_vm11, %v3091_v36  ;;  %v2715_v8 = vsel %vm2635_vm6, %v2586_v58, %v14645_v49  ;;  %v4341_v14 = vsel %vm2311_vm3, %v4213_v52, 0.0  ;;  %v14740_v58 = vld [vmem:[#allocation487_spill] sm:$0xff]  ;;  %v14743_v36 = vld [vmem:[#allocation46_spill] sm:$0xff] }
 0x5e1   : > { %v2719_v57 = vsel %vm2635_vm6, %v2590_v17, %v14737_v56  ;;  %v4342_v26 = vsel %vm2311_vm3, %v4214_v3, 0.0  ;;  %v2808_v19 = vsel %vm2764_vm7, %v2679_v27, %v14647_v43  ;;  %v2834_v28 = vsel %vm2764_vm7, %v2705_v16, %v14738_v11  ;;  %v14741_v43 = vld [vmem:[#allocation213_spill] sm:$0xff] }
 0x5e2   : > { %v2844_v0 = vsel %vm2764_vm7, %v2715_v8, %v14739_v15  ;;  %v4343_v48 = vadd.f32 %v4342_v26, %v4341_v14  ;;  %v2848_v49 = vsel %vm2764_vm7, %v2719_v57, %v14739_v15  ;;  %v2842_v17 = vsel %vm2764_vm7, %v2713_v2, %v14740_v58  ;;  %v14742_v3 = vld [vmem:[#allocation145_spill] sm:$0xff]  ;;  %v3572_v8 = vpop.f32.mrf.mxu0  ;;  %v14744_v14 = vld [vmem:[#allocation116_spill] sm:$0xff]  ;;  %4604 = vxpose.xlu1.b32.cont [2/16] (narrow) %v3570_v55, 8 }
 0x5e3   : > { %v2846_v52 = vsel %vm2764_vm7, %v2717_v31, %v14740_v58  ;;  %v2937_v5 = vsel %vm2893_vm8, %v2808_v19, %v14650_v21  ;;  %v2971_v27 = vsel %vm2893_vm8, %v2842_v17, %v14741_v43  ;;  %v2963_v30 = vsel %vm2893_vm8, %v2834_v28, %v14742_v3  ;;  %v2137_v19 = vpop.permute.xlu0 %2136 }
 0x5e4   : > { %v2975_v13 = vsel %vm2893_vm8, %v2846_v52, %v14741_v43  ;;  %v2973_v16 = vsel %vm2893_vm8, %v2844_v0, %v14743_v36  ;;  %v10732_v2 = vpop.permute.xlu2 %2152  ;;  %v2977_v31 = vsel %vm2893_vm8, %v2848_v49, %v14743_v36  ;;  %v3573_v21 = vadd.f32 %v10598_v44, %v3572_v8  ;;  %v2133_v57 = vpop.permute.xlu1 %2132  ;;  %v14747_v36 = vld [vmem:[#allocation372_spill] sm:$0xff] }
 0x5e5   : > { %v10740_v26 = vsel %vm3022_vm10, %v14744_v14, %v10732_v2  ;;  %v3066_v28 = vsel %vm3022_vm10, %v2937_v5, %v10255_v6  ;;  %v10745_v15 = vsel %vm3022_vm10, %v2971_v27, %v2133_v57  ;;  %v10748_v0 = vsel %vm3022_vm10, %v2973_v16, %v2137_v19  ;;  %v14745_v6 = vld [vmem:[#allocation68_spill] sm:$0xff]  ;;  %v14746_v27 = vld [vmem:[#allocation59_spill] sm:$0xff] }
 0x5e6   : > { %v10751_v49 = vsel %vm3022_vm10, %v2975_v13, %v2133_v57  ;;  %v10754_v58 = vsel %vm3022_vm10, %v2977_v31, %v2137_v19  ;;  %v2593_v17 = vsel %vm2506_vm5, %v10535_v7, %v14642_v22  ;;  %v3953_v52 = vsel %vm2311_vm3, %v3573_v21, 0.0  ;;  %v14748_v7 = vld [vmem:[#allocation114_spill] sm:$0xff]  ;;  %v14749_v31 = vld [vmem:[#allocation373_spill] sm:$0xff]  ;;  %v14750_v57 = vld [vmem:[#allocation220_spill] sm:$0xff] }
 0x5e7   : > { %v4215_v43 = vmul.f32 %v3573_v21, %v3573_v21  ;;  %5055 = vmatmul.msk.f32.gmra.mxu0 %vm3160_vm11, %v14745_v6  ;;  %v3092_v5 = vsel %vm3022_vm10, %v2963_v30, %v10603_v60  ;;  %v2577_v13 = vsel %vm2506_vm5, %v14746_v27, %v14659_v32  ;;  %v2595_v16 = vsel %vm2506_vm5, %v10540_v37, %v14747_v36  ;;  %v14751_v14 = vld [vmem:[#allocation239_spill] sm:$0xff]  ;;  %v14753_v6 = vld [vmem:[#allocation482_spill] sm:$0xff]  ;;  %v14754_v27 = vld [vmem:[#allocation484_spill] sm:$0xff] }
 0x5e8   : > { %5080 = vmatmul.msk.f32.gmra.mxu1 %vm3160_vm11, %v3066_v28  ;;  %v3954_v22 = vadd.f32 %v3953_v52, %v3952_v12  ;;  %5106 = vmatmul.msk.f32.gmra.mxu2 %vm3160_vm11, %v3092_v5  ;;  %v2591_v8 = vsel %vm2506_vm5, %v14748_v7, %v14722_v62  ;;  %v2597_v30 = vsel %vm2506_vm5, %v14750_v57, %v14749_v31  ;;  %v14752_v62 = vld [vmem:[#allocation264_spill] sm:$0xff]  ;;  %v14758_v31 = vld [vmem:[#allocation63_spill] sm:$0xff] }
 0x5e9   : > { %v2724_v19 = vsel %vm2635_vm6, %v2595_v16, %v14751_v14  ;;  %v4344_v32 = vsel %vm2311_vm3, %v4215_v43, 0.0  ;;  %v2706_v37 = vsel %vm2635_vm6, %v2577_v13, %v14664_v18  ;;  %v2720_v12 = vsel %vm2635_vm6, %v2591_v8, %v14728_v50  ;;  %v14755_v43 = vld [vmem:[#allocation490_spill] sm:$0xff] }
 0x5ea   : > { %v2722_v55 = vsel %vm2635_vm6, %v2593_v17, %v14665_v54  ;;  %v4345_v28 = vadd.f32 %v4344_v32, %v4343_v48  ;;  %v2726_v52 = vsel %vm2635_vm6, %v2597_v30, %v14752_v62  ;;  %v2835_v36 = vsel %vm2764_vm7, %v2706_v37, %v14754_v27  ;;  %v14756_v54 = vld [vmem:[#allocation9_spill] sm:$0xff]  ;;  %v14757_v17 = vld [vmem:[#allocation232_spill] sm:$0xff]  ;;  %v3575_v7 = vpop.f32.mrf.mxu0  ;;  %4605 = vxpose.xlu1.b32.cont [3/16] (narrow) %v3573_v21, 8  ;;  %v14767_v21 = vld [vmem:[#allocation270_spill] sm:$0xff] }
 0x5eb   : > { %v2851_v5 = vsel %vm2764_vm7, %v2722_v55, %v14753_v6  ;;  %v2849_v16 = vsel %vm2764_vm7, %v2720_v12, %v14755_v43  ;;  %v2855_v18 = vsel %vm2764_vm7, %v2726_v52, %v14753_v6  ;;  %v2853_v50 = vsel %vm2764_vm7, %v2724_v19, %v14755_v43  ;;  %v2143_v19 = vpop.permute.xlu0 %2142  ;;  %v14759_v52 = vld [vmem:[#allocation313_spill] sm:$0xff] }
 0x5ec   : > { %v2964_v48 = vsel %vm2893_vm8, %v2835_v36, %v14756_v54  ;;  %v2978_v13 = vsel %vm2893_vm8, %v2849_v16, %v14757_v17  ;;  %v2982_v8 = vsel %vm2893_vm8, %v2853_v50, %v14757_v17  ;;  %v2980_v57 = vsel %vm2893_vm8, %v2851_v5, %v14758_v31  ;;  %v2139_v32 = vpop.permute.xlu1 %2138  ;;  %v14760_v43 = vld [vmem:[#allocation69_spill] sm:$0xff]  ;;  %v14761_v16 = vld [vmem:[#allocation167_spill] sm:$0xff]  ;;  %v14762_v50 = vld [vmem:[#allocation214_spill] sm:$0xff] }
 0x5ed   : > { %v2984_v30 = vsel %vm2893_vm8, %v2855_v18, %v14758_v31  ;;  %v3576_v14 = vadd.f32 %v10598_v44, %v3575_v7  ;;  %v10811_v37 = vsel %vm3022_vm10, %v2982_v8, %v2139_v32  ;;  %v10817_v55 = vsel %vm3022_vm10, %v2978_v13, %v2139_v32  ;;  %v14763_v13 = vld [vmem:[#allocation375_spill] sm:$0xff]  ;;  %v14764_v8 = vld [vmem:[#allocation376_spill] sm:$0xff]  ;;  %v14766_v32 = vld [vmem:[#allocation245_spill] sm:$0xff] }
 0x5ee   : > { %v10814_v12 = vsel %vm3022_vm10, %v2984_v30, %v2143_v19  ;;  %v10820_v62 = vsel %vm3022_vm10, %v2980_v57, %v2143_v19  ;;  %v2578_v6 = vsel %vm2506_vm5, %v14759_v52, %v14697_v25  ;;  %v3093_v18 = vsel %vm3022_vm10, %v2964_v48, %v10673_v38  ;;  %v14765_v57 = vld [vmem:[#allocation412_spill] sm:$0xff] }
 0x5ef   : > { %v3955_v5 = vsel %vm2311_vm3, %v3576_v14, 0.0  ;;  %v4216_v36 = vmul.f32 %v3576_v14, %v3576_v14  ;;  %5056 = vmatmul.msk.f32.gmra.mxu0 %vm3160_vm11, %v14760_v43  ;;  %v2594_v17 = vsel %vm2506_vm5, %v14762_v50, %v14724_v34  ;;  %v2598_v25 = vsel %vm2506_vm5, %v10549_v61, %v14763_v13  ;;  %v3662_v43 = vpop.f32.mrf.mxu1  ;;  %v14771_v13 = vld [vmem:[#allocation100_spill] sm:$0xff] }
 0x5f0   : > { %5081 = vmatmul.msk.f32.gmra.mxu1 %vm3160_vm11, %v14761_v16  ;;  %v3956_v7 = vadd.f32 %v3955_v5, %v3954_v22  ;;  %5107 = vmatmul.msk.f32.gmra.mxu2 %vm3160_vm11, %v3093_v18  ;;  %v2604_v31 = vsel %vm2506_vm5, %v10519_v23, %v14764_v8  ;;  %v2681_v48 = vsel %vm2635_vm6, %v10561_v20, %v14765_v57  ;;  %v14768_v5 = vld [vmem:[#allocation485_spill] sm:$0xff] }
 0x5f1   : > { %v2707_v30 = vsel %vm2635_vm6, %v2578_v6, %v14703_v53  ;;  %v4346_v34 = vsel %vm2311_vm3, %v4216_v36, 0.0  ;;  %v2727_v61 = vsel %vm2635_vm6, %v2598_v25, %v14766_v32  ;;  %v2723_v22 = vsel %vm2635_vm6, %v2594_v17, %v14737_v56  ;;  %v14769_v6 = vld [vmem:[#allocation493_spill] sm:$0xff] }
 0x5f2   : > { %v2733_v19 = vsel %vm2635_vm6, %v2604_v31, %v14767_v21  ;;  %v4347_v52 = vadd.f32 %v4346_v34, %v4345_v28  ;;  %v2810_v23 = vsel %vm2764_vm7, %v2681_v48, %v14607_v39  ;;  %v2836_v20 = vsel %vm2764_vm7, %v2707_v30, %v14649_v4  ;;  %v14770_v28 = vld [vmem:[#allocation140_spill] sm:$0xff]  ;;  %v3578_v39 = vpop.f32.mrf.mxu0  ;;  %4606 = vxpose.xlu1.b32.cont [4/16] (narrow) %v3576_v14, 8 }
 0x5f3   : > { %v2862_v53 = vsel %vm2764_vm7, %v2733_v19, %v14768_v5  ;;  %v2852_v36 = vsel %vm2764_vm7, %v2723_v22, %v14769_v6  ;;  %v2856_v56 = vsel %vm2764_vm7, %v2727_v61, %v14769_v6  ;;  %v2939_v16 = vsel %vm2893_vm8, %v2810_v23, %v14610_v29  ;;  %v2149_v29 = vpop.permute.xlu0 %2148  ;;  %v14772_v30 = vld [vmem:[#allocation108_spill] sm:$0xff]  ;;  %v14773_v19 = vld [vmem:[#allocation451_spill] sm:$0xff] }
 0x5f4   : > { %v2981_v18 = vsel %vm2893_vm8, %v2852_v36, %v14770_v28  ;;  %v10869_v50 = vadd.f32 %v10598_v44, %v3662_v43  ;;  %v2985_v4 = vsel %vm2893_vm8, %v2856_v56, %v14770_v28  ;;  %v2965_v17 = vsel %vm2893_vm8, %v2836_v20, %v14652_v46  ;;  %v2145_v57 = vpop.permute.xlu1 %2144  ;;  %v14776_v6 = vld [vmem:[#allocation315_spill] sm:$0xff]  ;;  %v14778_v28 = vld [vmem:[#allocation378_spill] sm:$0xff] }
 0x5f5   : > { %v2991_v25 = vsel %vm2893_vm8, %v2862_v53, %v14771_v13  ;;  %v3579_v31 = vadd.f32 %v10598_v44, %v3578_v39  ;;  %v10879_v48 = vsel %vm3022_vm10, %v2985_v4, %v2145_v57  ;;  %v10883_v34 = vsel %vm3022_vm10, %v14772_v30, %v2149_v29  ;;  %v14777_v36 = vld [vmem:[#allocation147_spill] sm:$0xff] }
 0x5f6   : > { %4667 = vxpose.xlu0.b32.start [1/16] (narrow) %v10869_v50, 8  ;;  %v3068_v32 = vsel %vm3022_vm10, %v2939_v16, %v10260_v63  ;;  %v3094_v46 = vsel %vm3022_vm10, %v2965_v17, %v10418_v45  ;;  %v3120_v23 = vsel %vm3022_vm10, %v2991_v25, %v2149_v29  ;;  %v10896_v20 = vsel %vm3022_vm10, %v2981_v18, %v2145_v57  ;;  %v14774_v63 = vld [vmem:[#allocation302_spill] sm:$0xff]  ;;  %v14775_v45 = vld [vmem:[#allocation128_spill] sm:$0xff]  ;;  %v14779_v4 = vld [vmem:[#allocation251_spill] sm:$0xff] }
 0x5f7   : > { %v3957_v61 = vsel %vm2311_vm3, %v3579_v31, 0.0  ;;  %v4217_v22 = vmul.f32 %v3579_v31, %v3579_v31  ;;  %5057 = vmatmul.msk.f32.gmra.mxu0 %vm3160_vm11, %v14773_v19  ;;  %5134 = vmatmul.msk.f32.gmra.mxu3 %vm3160_vm11, %v3120_v23  ;;  %v2424_v53 = vsel %vm2377_vm4, %v14775_v45, %v14774_v63  ;;  %v2476_v43 = vsel %vm2377_vm4, %v14777_v36, %v14776_v6  ;;  %v3665_v13 = vpop.f32.mrf.mxu1  ;;  %v14780_v57 = vld [vmem:[#allocation34_spill] sm:$0xff]  ;;  %v14781_v30 = vld [vmem:[#allocation267_spill] sm:$0xff] }
 0x5f8   : > { %5082 = vmatmul.msk.f32.gmra.mxu1 %vm3160_vm11, %v3068_v32  ;;  %v3958_v5 = vadd.f32 %v3957_v61, %v3956_v7  ;;  %5108 = vmatmul.msk.f32.gmra.mxu2 %vm3160_vm11, %v3094_v46  ;;  %v2553_v16 = vsel %vm2506_vm5, %v2424_v53, %v14701_v40  ;;  %v2605_v7 = vsel %vm2506_vm5, %v2476_v43, %v14778_v28  ;;  %v14782_v61 = vld [vmem:[#allocation154_spill] sm:$0xff]  ;;  %v14783_v63 = vld [vmem:[#allocation79_spill] sm:$0xff]  ;;  %v14786_v43 = vld [vmem:[#allocation317_spill] sm:$0xff] }
 0x5f9   : > { %v4348_v56 = vsel %vm2311_vm3, %v4217_v22, 0.0  ;;  %v2682_v39 = vsel %vm2635_vm6, %v2553_v16, %v14727_v42  ;;  %v2734_v17 = vsel %vm2635_vm6, %v2605_v7, %v14779_v4  ;;  %v10920_v40 = vadd.f32 %v10598_v44, %v3665_v13  ;;  %v14785_v6 = vld [vmem:[#allocation130_spill] sm:$0xff]  ;;  %v14788_v7 = vld [vmem:[#allocation368_spill] sm:$0xff] }
 0x5fa   : > { %v4349_v18 = vadd.f32 %v4348_v56, %v4347_v52  ;;  %v2811_v25 = vsel %vm2764_vm7, %v2682_v39, %v14629_v24  ;;  %v2863_v14 = vsel %vm2764_vm7, %v2734_v17, %v14780_v57  ;;  %v3581_v29 = vpop.f32.mrf.mxu0  ;;  %4607 = vxpose.xlu1.b32.cont [5/16] (narrow) %v3579_v31, 8  ;;  %v14787_v56 = vld [vmem:[#allocation91_spill] sm:$0xff]  ;;  %v14789_v31 = vld [vmem:[#allocation414_spill] sm:$0xff] }
 0x5fb   : > { %v2940_v52 = vsel %vm2893_vm8, %v2811_v25, %v14632_v41  ;;  %v2992_v42 = vsel %vm2893_vm8, %v2863_v14, %v14781_v30  ;;  %v3582_v32 = vadd.f32 %v10598_v44, %v3581_v29  ;;  %v2477_v16 = vsel %vm2377_vm4, %v14787_v56, %v14786_v43  ;;  %v14790_v25 = vld [vmem:[#allocation39_spill] sm:$0xff]  ;;  %v14791_v14 = vld [vmem:[#allocation101_spill] sm:$0xff]  ;;  %v14792_v30 = vld [vmem:[#allocation462_spill] sm:$0xff] }
 0x5fc   : > { %v2151_v46 = vpop.permute.xlu1 %2150  ;;  %v3069_v24 = vsel %vm3022_vm10, %v2940_v52, %v10348_v35  ;;  %v14784_v35 = vld [vmem:[#allocation17_spill] sm:$0xff] }
 0x5fd   : > { %v10929_v22 = vsel %vm3022_vm10, %v14782_v61, %v2151_v46  ;;  %v3121_v19 = vsel %vm3022_vm10, %v2992_v42, %v2151_v46  ;;  %v3959_v23 = vsel %vm2311_vm3, %v3582_v32, 0.0  ;;  %v4218_v41 = vmul.f32 %v3582_v32, %v3582_v32  ;;  %v14793_v42 = vld [vmem:[#allocation88_spill] sm:$0xff] }
 0x5fe   : > { %4668 = vxpose.xlu0.b32.cont [2/16] (narrow) %v10920_v40, 8  ;;  %v3960_v45 = vadd.f32 %v3959_v23, %v3958_v5  ;;  %v2451_v36 = vsel %vm2377_vm4, %v14785_v6, %v14784_v35  ;;  %v5345_v61 = vld [vmem:[%s5574_s10 + $0x1e0] sm:$0xff]  ;;  %v14798_v35 = vld [vmem:[#allocation314_spill] sm:$0xff] }
 0x5ff   : > { %5058 = vmatmul.msk.f32.gmra.mxu0 %vm3160_vm11, %v14783_v63  ;;  %5135 = vmatmul.msk.f32.gmra.mxu3 %vm3160_vm11, %v3121_v19  ;;  %v4350_v53 = vsel %vm2311_vm3, %v4218_v41, 0.0  ;;  %v2580_v5 = vsel %vm2506_vm5, %v2451_v36, %v14717_v10  ;;  %v14795_v23 = vld [vmem:[#allocation268_spill] sm:$0xff]  ;;  %v14799_v36 = vld [vmem:[#allocation366_spill] sm:$0xff] }
 0x600   : > { %5083 = vmatmul.msk.f32.gmra.mxu1 %vm3160_vm11, %v3069_v24  ;;  %5109 = vmatmul.msk.f32.gmra.mxu2 %vm3160_vm11, %v10352_v9  ;;  %v4351_v28 = vadd.f32 %v4350_v53, %v4349_v18  ;;  %v2606_v9 = vsel %vm2506_vm5, %v2477_v16, %v14788_v7  ;;  %v2709_v39 = vsel %vm2635_vm6, %v2580_v5, %v14736_v59  ;;  %v14797_v53 = vld [vmem:[#allocation136_spill] sm:$0xff]  ;;  %v14800_v16 = vld [vmem:[#allocation365_spill] sm:$0xff] }
 0x601   : > { %v2735_v4 = vsel %vm2635_vm6, %v2606_v9, %v14789_v31  ;;  %v2838_v13 = vsel %vm2764_vm7, %v2709_v39, %v14738_v11  ;;  %v14801_v9 = vld [vmem:[#allocation227_spill] sm:$0xff] }
 0x602   : > { %v3584_v17 = vpop.f32.mrf.mxu0  ;;  %v2864_v18 = vsel %vm2764_vm7, %v2735_v4, %v14790_v25  ;;  %v2967_v10 = vsel %vm2893_vm8, %v2838_v13, %v14742_v3  ;;  %v14794_v3 = vld [vmem:[#allocation169_spill] sm:$0xff]  ;;  %4608 = vxpose.xlu1.b32.cont [6/16] (narrow) %v3582_v32, 8  ;;  %v10999_v4 = vpop.permute.xlu0 %2154 }
 0x603   : > { %v3585_v57 = vadd.f32 %v10598_v44, %v3584_v17  ;;  %v2993_v29 = vsel %vm2893_vm8, %v2864_v18, %v14791_v14  ;;  %v3096_v11 = vsel %vm3022_vm10, %v2967_v10, %v10603_v60  ;;  %v2295_v24 = vsel %vm2245_vm2, %v5345_v61, %v14794_v3  ;;  %v14796_v60 = vld [vmem:[#allocation25_spill] sm:$0xff]  ;;  %v14803_v14 = vld [vmem:[#allocation131_spill] sm:$0xff]  ;;  %v14807_v3 = vld [vmem:[#allocation272_spill] sm:$0xff] }
 0x604   : > { %v3122_v46 = vsel %vm3022_vm10, %v2993_v29, %v10732_v2  ;;  %v10982_v41 = vsel %vm2311_vm3, %v2295_v24, %v14795_v23  ;;  %v2452_v2 = vsel %vm2377_vm4, %v14797_v53, %v14796_v60 }
 0x605   : > { %v3961_v59 = vsel %vm2311_vm3, %v3585_v57, 0.0  ;;  %v4219_v52 = vmul.f32 %v3585_v57, %v3585_v57  ;;  %v2478_v6 = vsel %vm2377_vm4, %v10982_v41, %v14798_v35  ;;  %v2581_v56 = vsel %vm2506_vm5, %v2452_v2, %v14799_v36  ;;  %v11036_v2 = vpop.permute.xlu1 %2156 }
 0x606   : > { %v3962_v19 = vadd.f32 %v3961_v59, %v3960_v45  ;;  %v2607_v5 = vsel %vm2506_vm5, %v2478_v6, %v14800_v16  ;;  %v2710_v39 = vsel %vm2635_vm6, %v2581_v56, %v14801_v9  ;;  %v14809_v6 = vld [vmem:[#allocation37_spill] sm:$0xff]  ;;  %v14811_v9 = vld [vmem:[#allocation182_spill] sm:$0xff] }
 0x607   : > { %5059 = vmatmul.msk.f32.gmra.mxu0 %vm3160_vm11, %v14792_v30  ;;  %5136 = vmatmul.msk.f32.gmra.mxu3 %vm3160_vm11, %v3122_v46  ;;  %v4352_v63 = vsel %vm2311_vm3, %v4219_v52, 0.0  ;;  %v2736_v32 = vsel %vm2635_vm6, %v2607_v5, %v14729_v1  ;;  %v2839_v13 = vsel %vm2764_vm7, %v2710_v39, %v14754_v27  ;;  %v14804_v52 = vld [vmem:[#allocation97_spill] sm:$0xff]  ;;  %v14805_v30 = vld [vmem:[#allocation78_spill] sm:$0xff] }
 0x608   : > { %5084 = vmatmul.msk.f32.gmra.mxu1 %vm3160_vm11, %v14793_v42  ;;  %5110 = vmatmul.msk.f32.gmra.mxu2 %vm3160_vm11, %v3096_v11  ;;  %v4353_v45 = vadd.f32 %v4352_v63, %v4351_v28  ;;  %v14802_v28 = vld [vmem:[#allocation488_spill] sm:$0xff]  ;;  %v2968_v10 = vsel %vm2893_vm8, %v2839_v13, %v14756_v54  ;;  %v5346_v11 = vld [vmem:[%s5574_s10 + $0x1e8] sm:$0xff] }
 0x609   : > { %v2865_v25 = vsel %vm2764_vm7, %v2736_v32, %v14802_v28  ;;  %v3097_v27 = vsel %vm3022_vm10, %v2968_v10, %v10673_v38  ;;  %v14806_v54 = vld [vmem:[#allocation150_spill] sm:$0xff]  ;;  %v14808_v38 = vld [vmem:[#allocation29_spill] sm:$0xff]  ;;  %v14813_v32 = vld [vmem:[#allocation179_spill] sm:$0xff] }
 0x60a   : > { %v3587_v17 = vpop.f32.mrf.mxu0  ;;  %v2994_v29 = vsel %vm2893_vm8, %v2865_v25, %v14803_v14  ;;  %v2296_v46 = vsel %vm2245_vm2, %v5346_v11, %v14806_v54  ;;  %4609 = vxpose.xlu1.b32.cont [7/16] (narrow) %v3585_v57, 8  ;;  %v14810_v57 = vld [vmem:[#allocation133_spill] sm:$0xff]  ;;  %v14816_v11 = vld [vmem:[#allocation70_spill] sm:$0xff] }
 0x60b   : > { %v3588_v18 = vadd.f32 %v10598_v44, %v3587_v17  ;;  %v3123_v42 = vsel %vm3022_vm10, %v2994_v29, %v10999_v4  ;;  %v11026_v24 = vsel %vm2311_vm3, %v2296_v46, %v14807_v3  ;;  %v11054_v29 = vpop.permute.xlu2 %2158  ;;  %v5347_v46 = vld [vmem:[%s5574_s10 + $0x1f8] sm:$0xff] }
 0x60c   : > { %v2479_v63 = vsel %vm2377_vm4, %v11026_v24, %v14808_v38  ;;  %v3125_v54 = vsel %vm3022_vm10, %v14816_v11, %v11054_v29  ;;  %v14818_v38 = vld [vmem:[#allocation273_spill] sm:$0xff]  ;;  %v14825_v11 = vld [vmem:[#allocation275_spill] sm:$0xff] }
 0x60d   : > { %v3963_v59 = vsel %vm2311_vm3, %v3588_v18, 0.0  ;;  %v4220_v1 = vmul.f32 %v3588_v18, %v3588_v18  ;;  %v2608_v53 = vsel %vm2506_vm5, %v2479_v63, %v14764_v8  ;;  %v14812_v8 = vld [vmem:[#allocation225_spill] sm:$0xff] }
 0x60e   : > { %v3964_v61 = vadd.f32 %v3963_v59, %v3962_v19  ;;  %v2737_v19 = vsel %vm2635_vm6, %v2608_v53, %v14767_v21 }
 0x60f   : > { %5060 = vmatmul.msk.f32.gmra.mxu0 %vm3160_vm11, %v14804_v52  ;;  %5137 = vmatmul.msk.f32.gmra.mxu3 %vm3160_vm11, %v3123_v42  ;;  %v4354_v23 = vsel %vm2311_vm3, %v4220_v1, 0.0  ;;  %v2866_v36 = vsel %vm2764_vm7, %v2737_v19, %v14809_v6 }
 0x610   : > { %5085 = vmatmul.msk.f32.gmra.mxu1 %vm3160_vm11, %v14805_v30  ;;  %5111 = vmatmul.msk.f32.gmra.mxu2 %vm3160_vm11, %v3097_v27  ;;  %v4355_v60 = vadd.f32 %v4354_v23, %v4353_v45  ;;  %v2995_v16 = vsel %vm2893_vm8, %v2866_v36, %v14810_v57  ;;  %v14814_v27 = vld [vmem:[#allocation177_spill] sm:$0xff] }
 0x611   : > { %v3124_v21 = vsel %vm3022_vm10, %v2995_v16, %v11036_v2  ;;  %v11087_v16 = vpop.permute.xlu0 %2160 }
 0x612   : > { %v3590_v35 = vpop.f32.mrf.mxu0  ;;  %4610 = vxpose.xlu1.b32.cont [8/16] (narrow) %v3588_v18, 8  ;;  %v3668_v10 = vpop.f32.mrf.mxu1  ;;  %v14815_v18 = vld [vmem:[#allocation172_spill] sm:$0xff] }
 0x613   : > { %v3591_v56 = vadd.f32 %v10598_v44, %v3590_v35  ;;  %v11058_v1 = vadd.f32 %v10598_v44, %v3668_v10  ;;  %v14823_v10 = vld [vmem:[#allocation32_spill] sm:$0xff] }
 0x615   : > { %v3965_v5 = vsel %vm2311_vm3, %v3591_v56, 0.0  ;;  %v4221_v45 = vmul.f32 %v3591_v56, %v3591_v56  ;;  %4669 = vxpose.xlu0.b32.cont [3/16] (narrow) %v11058_v1, 8 }
 0x616   : > { %v3966_v39 = vadd.f32 %v3965_v5, %v3964_v61  ;;  %v14817_v61 = vld [vmem:[#allocation175_spill] sm:$0xff] }
 0x617   : > { %5061 = vmatmul.msk.f32.gmra.mxu0 %vm3160_vm11, %v14811_v9  ;;  %5138 = vmatmul.msk.f32.gmra.mxu3 %vm3160_vm11, %v3124_v21  ;;  %v4356_v17 = vsel %vm2311_vm3, %v4221_v45, 0.0  ;;  %v2298_v3 = vsel %vm2245_vm2, %v5347_v46, %v14817_v61  ;;  %v14819_v45 = vld [vmem:[#allocation491_spill] sm:$0xff] }
 0x618   : > { %5086 = vmatmul.msk.f32.gmra.mxu1 %vm3160_vm11, %v14812_v8  ;;  %5112 = vmatmul.msk.f32.gmra.mxu2 %vm3160_vm11, %v14813_v32  ;;  %v4357_v13 = vadd.f32 %v4356_v17, %v4355_v60  ;;  %v11078_v63 = vsel %vm2311_vm3, %v2298_v3, %v14818_v38  ;;  %v14820_v8 = vld [vmem:[#allocation151_spill] sm:$0xff] }
 0x619   : > { %v14822_v32 = vld [vmem:[#allocation87_spill] sm:$0xff] }
 0x61a   : > { %v3593_v25 = vpop.f32.mrf.mxu0  ;;  %4611 = vxpose.xlu1.b32.cont [9/16] (narrow) %v3591_v56, 8 }
 0x61b   : > { %v3594_v59 = vadd.f32 %v10598_v44, %v3593_v25  ;;  %v3671_v35 = vpop.f32.mrf.mxu1 }
 0x61c   : > { %v11091_v5 = vadd.f32 %v10598_v44, %v3671_v35 }
 0x61d   : > { %v3967_v52 = vsel %vm2311_vm3, %v3594_v59, 0.0  ;;  %v4222_v30 = vmul.f32 %v3594_v59, %v3594_v59 }
 0x61e   : > { %v3968_v42 = vadd.f32 %v3967_v52, %v3966_v39  ;;  %4670 = vxpose.xlu0.b32.cont [4/16] (narrow) %v11091_v5, 8  ;;  %v14821_v39 = vld [vmem:[#allocation53_spill] sm:$0xff]  ;;  %v2482_v52 = vsel %vm2377_vm4, %v10982_v41, %v14823_v10 }
 0x61f   : > { %5062 = vmatmul.msk.f32.gmra.mxu0 %vm3160_vm11, %v14814_v27  ;;  %v4358_v23 = vsel %vm2311_vm3, %v4222_v30, 0.0  ;;  %5139 = vmatmul.msk.f32.gmra.mxu3 %vm3160_vm11, %v3125_v54  ;;  %v14824_v30 = vld [vmem:[#allocation379_spill] sm:$0xff] }
 0x620   : > { %5087 = vmatmul.msk.f32.gmra.mxu1 %vm3160_vm11, %v14815_v18  ;;  %5113 = vmatmul.msk.f32.gmra.mxu2 %vm3160_vm11, %v10686_v33  ;;  %v4359_v60 = vadd.f32 %v4358_v23, %v4357_v13  ;;  %v2481_v33 = vsel %vm2377_vm4, %v11078_v63, %v14786_v43  ;;  %v2611_v27 = vsel %vm2506_vm5, %v2482_v52, %v14824_v30  ;;  %v14826_v23 = vld [vmem:[#allocation86_spill] sm:$0xff]  ;;  %v14833_v52 = vld [vmem:[#allocation279_spill] sm:$0xff] }
 0x621   : > { %v2610_v53 = vsel %vm2506_vm5, %v2481_v33, %v14788_v7  ;;  %v14828_v33 = vld [vmem:[#allocation238_spill] sm:$0xff] }
 0x622   : > { %v3596_v19 = vpop.f32.mrf.mxu0  ;;  %v2739_v36 = vsel %vm2635_vm6, %v2610_v53, %v14789_v31  ;;  %4612 = vxpose.xlu1.b32.cont [10/16] (narrow) %v3594_v59, 8 }
 0x623   : > { %v3597_v56 = vadd.f32 %v10598_v44, %v3596_v19  ;;  %v2868_v9 = vsel %vm2764_vm7, %v2739_v36, %v14819_v45  ;;  %v14829_v19 = vld [vmem:[#allocation318_spill] sm:$0xff]  ;;  %v14830_v36 = vld [vmem:[#allocation381_spill] sm:$0xff] }
 0x624   : > { %v2997_v43 = vsel %vm2893_vm8, %v2868_v9, %v14820_v8  ;;  %v2483_v35 = vsel %vm2377_vm4, %v11026_v24, %v14829_v19 }
 0x625   : > { %v3969_v7 = vsel %vm2311_vm3, %v3597_v56, 0.0  ;;  %v4223_v21 = vmul.f32 %v3597_v56, %v3597_v56  ;;  %v3126_v17 = vsel %vm3022_vm10, %v2997_v43, %v11087_v16  ;;  %v2612_v9 = vsel %vm2506_vm5, %v2483_v35, %v14830_v36  ;;  %v14839_v36 = vld [vmem:[#allocation416_spill] sm:$0xff] }
 0x626   : > { %v3970_v31 = vadd.f32 %v3969_v7, %v3968_v42 }
 0x627   : > { %5063 = vmatmul.msk.f32.gmra.mxu0 %vm3160_vm11, %v14821_v39  ;;  %v4360_v13 = vsel %vm2311_vm3, %v4223_v21, 0.0  ;;  %5140 = vmatmul.msk.f32.gmra.mxu3 %vm3160_vm11, %v3126_v17  ;;  %v3674_v18 = vpop.f32.mrf.mxu1  ;;  %v14831_v21 = vld [vmem:[#allocation257_spill] sm:$0xff] }
 0x628   : > { %5088 = vmatmul.msk.f32.gmra.mxu1 %vm3160_vm11, %v14822_v32  ;;  %5114 = vmatmul.msk.f32.gmra.mxu2 %vm3160_vm11, %v10745_v15  ;;  %v4361_v25 = vadd.f32 %v4360_v13, %v4359_v60  ;;  %v2740_v15 = vsel %vm2635_vm6, %v2611_v27, %v14825_v11  ;;  %v11118_v46 = vadd.f32 %v10598_v44, %v3674_v18  ;;  %v14827_v60 = vld [vmem:[#allocation236_spill] sm:$0xff]  ;;  %v14832_v13 = vld [vmem:[#allocation174_spill] sm:$0xff] }
 0x629   : > { %v2869_v59 = vsel %vm2764_vm7, %v2740_v15, %v14802_v28  ;;  %v2741_v39 = vsel %vm2635_vm6, %v2612_v9, %v14831_v21 }
 0x62a   : > { %v3599_v42 = vpop.f32.mrf.mxu0  ;;  %v2998_v61 = vsel %vm2893_vm8, %v2869_v59, %v14803_v14  ;;  %4671 = vxpose.xlu0.b32.cont [5/16] (narrow) %v11118_v46, 8  ;;  %4613 = vxpose.xlu1.b32.cont [11/16] (narrow) %v3597_v56, 8  ;;  %v2870_v56 = vsel %vm2764_vm7, %v2741_v39, %v14809_v6 }
 0x62b   : > { %v3600_v54 = vadd.f32 %v10598_v44, %v3599_v42  ;;  %v3127_v28 = vsel %vm3022_vm10, %v2998_v61, %v10999_v4  ;;  %v2999_v32 = vsel %vm2893_vm8, %v2870_v56, %v14810_v57 }
 0x62c   : > { %v3128_v6 = vsel %vm3022_vm10, %v2999_v32, %v11036_v2  ;;  %v14841_v32 = vld [vmem:[#allocation171_spill] sm:$0xff] }
 0x62d   : > { %v3971_v41 = vsel %vm2311_vm3, %v3600_v54, 0.0  ;;  %v4224_v3 = vmul.f32 %v3600_v54, %v3600_v54 }
 0x62e   : > { %v3972_v38 = vadd.f32 %v3971_v41, %v3970_v31 }
 0x62f   : > { %5064 = vmatmul.msk.f32.gmra.mxu0 %vm3160_vm11, %v14826_v23  ;;  %v4362_v14 = vsel %vm2311_vm3, %v4224_v3, 0.0  ;;  %5141 = vmatmul.msk.f32.gmra.mxu3 %vm3160_vm11, %v3127_v28  ;;  %v14835_v3 = vld [vmem:[#allocation250_spill] sm:$0xff] }
 0x630   : > { %5089 = vmatmul.msk.f32.gmra.mxu1 %vm3160_vm11, %v14827_v60  ;;  %5115 = vmatmul.msk.f32.gmra.mxu2 %vm3160_vm11, %v14828_v33  ;;  %v4363_v53 = vadd.f32 %v4362_v14, %v4361_v25  ;;  %v14837_v33 = vld [vmem:[#allocation35_spill] sm:$0xff] }
 0x631   : > { %v3677_v7 = vpop.f32.mrf.mxu1  ;;  %v2485_v28 = vsel %vm2377_vm4, %v11078_v63, %v14837_v33 }
 0x632   : > { %v3602_v43 = vpop.f32.mrf.mxu0  ;;  %v11145_v31 = vadd.f32 %v10598_v44, %v3677_v7  ;;  %4614 = vxpose.xlu1.b32.cont [12/16] (narrow) %v3600_v54, 8  ;;  %v14836_v54 = vld [vmem:[#allocation71_spill] sm:$0xff] }
 0x633   : > { %v3603_v4 = vadd.f32 %v10598_v44, %v3602_v43  ;;  %v3129_v23 = vsel %vm3022_vm10, %v14836_v54, %v11054_v29 }
 0x634   : > { %4672 = vxpose.xlu0.b32.cont [6/16] (narrow) %v11145_v31, 8 }
 0x635   : > { %v3973_v24 = vsel %vm2311_vm3, %v3603_v4, 0.0  ;;  %v4225_v17 = vmul.f32 %v3603_v4, %v3603_v4 }
 0x636   : > { %v3974_v25 = vadd.f32 %v3973_v24, %v3972_v38  ;;  %v5348_v24 = vld [vmem:[%s5574_s10 + $0x208] sm:$0xff]  ;;  %s233_s10 = scalar_lea.vmem [#allocation6], %s12403_s26 }
 0x637   : > { %5065 = vmatmul.msk.f32.gmra.mxu0 %vm3160_vm11, %v14832_v13  ;;  %v4364_v57 = vsel %vm2311_vm3, %v4225_v17, 0.0  ;;  %5142 = vmatmul.msk.f32.gmra.mxu3 %vm3160_vm11, %v3128_v6  ;;  %s12421_s16 = sshll.u32 %s233_s10, 4  ;;  %s4916_s16 = int_to_ptr.vmem [resolvable:$true] %s12421_s16 }
 0x638   : > { %5090 = vmatmul.msk.f32.gmra.mxu1 %vm3160_vm11, %v14833_v52  ;;  %5116 = vmatmul.msk.f32.gmra.mxu2 %vm3160_vm11, %v10748_v0  ;;  %v4365_v27 = vadd.f32 %v4364_v57, %v4363_v53  ;;  %v14834_v0 = vld [vmem:[#allocation445_spill] sm:$0xff]  ;;  %v14838_v53 = vld [vmem:[#allocation382_spill] sm:$0xff] }
 0x639   : > { %v3680_v18 = vpop.f32.mrf.mxu1  ;;  %v2614_v19 = vsel %vm2506_vm5, %v2485_v28, %v14838_v53 }
 0x63a   : > { %v3605_v42 = vpop.f32.mrf.mxu0  ;;  %v11165_v59 = vadd.f32 %v10598_v44, %v3680_v18  ;;  %4615 = vxpose.xlu1.b32.cont [13/16] (narrow) %v3603_v4, 8  ;;  %v2743_v29 = vsel %vm2635_vm6, %v2614_v19, %v14839_v36  ;;  %v14840_v4 = vld [vmem:[#allocation165_spill] sm:$0xff]  ;;  %v11249_v36 = vpop.permute.xlu2 %2164 }
 0x63b   : > { %v3606_v15 = vadd.f32 %v10598_v44, %v3605_v42  ;;  %v2872_v7 = vsel %vm2764_vm7, %v2743_v29, %v14819_v45 }
 0x63c   : > { %4673 = vxpose.xlu0.b32.cont [7/16] (narrow) %v11165_v59, 8  ;;  %v3001_v63 = vsel %vm2893_vm8, %v2872_v7, %v14820_v8  ;;  %v14842_v8 = vld [vmem:[#allocation156_spill] sm:$0xff] }
 0x63d   : > { %v3975_v61 = vsel %vm2311_vm3, %v3606_v15, 0.0  ;;  %v4226_v41 = vmul.f32 %v3606_v15, %v3606_v15  ;;  %v3130_v45 = vsel %vm3022_vm10, %v3001_v63, %v11087_v16  ;;  %v2299_v17 = vsel %vm2245_vm2, %v5348_v24, %v14842_v8 }
 0x63e   : > { %v3976_v2 = vadd.f32 %v3975_v61, %v3974_v25  ;;  %v14843_v25 = vld [vmem:[#allocation278_spill] sm:$0xff] }
 0x63f   : > { %5066 = vmatmul.msk.f32.gmra.mxu0 %vm3160_vm11, %v14834_v0  ;;  %v4366_v38 = vsel %vm2311_vm3, %v4226_v41, 0.0  ;;  %5143 = vmatmul.msk.f32.gmra.mxu3 %vm3160_vm11, %v3129_v23  ;;  %v11214_v52 = vsel %vm2311_vm3, %v2299_v17, %v14843_v25  ;;  %v14844_v0 = vld [vmem:[#allocation42_spill] sm:$0xff]  ;;  %v14846_v23 = vld [vmem:[#allocation89_spill] sm:$0xff] }
 0x640   : > { %5091 = vmatmul.msk.f32.gmra.mxu1 %vm3160_vm11, %v14835_v3  ;;  %5117 = vmatmul.msk.f32.gmra.mxu2 %vm3160_vm11, %v10689_v47  ;;  %v4367_v60 = vadd.f32 %v4366_v38, %v4365_v27  ;;  %v11183_v14 = vpop.f32.mrf.mxu2  ;;  %v14847_v38 = vld [vmem:[#allocation226_spill] sm:$0xff] }
 0x642   : > { %v3608_v47 = vpop.f32.mrf.mxu0  ;;  %v3683_v35 = vpop.f32.mrf.mxu1  ;;  %4616 = vxpose.xlu1.b32.cont [14/16] (narrow) %v3606_v15, 8 }
 0x643   : > { %v3609_v9 = vadd.f32 %v10598_v44, %v3608_v47  ;;  %v11191_v43 = vadd.f32 %v10598_v44, %v3683_v35  ;;  %v11225_v15 = vpop.permute.xlu1 %2162 }
 0x645   : > { %v3977_v21 = vsel %vm2311_vm3, %v3609_v9, 0.0  ;;  %v4227_v39 = vmul.f32 %v3609_v9, %v3609_v9  ;;  %4674 = vxpose.xlu0.b32.cont [8/16] (narrow) %v11191_v43, 8 }
 0x646   : > { %v3978_v56 = vadd.f32 %v3977_v21, %v3976_v2  ;;  %v14845_v2 = vld [vmem:[#allocation99_spill] sm:$0xff] }
 0x647   : > { %5067 = vmatmul.msk.f32.gmra.mxu0 %vm3160_vm11, %v14840_v4  ;;  %v4368_v13 = vsel %vm2311_vm3, %v4227_v39, 0.0  ;;  %5144 = vmatmul.msk.f32.gmra.mxu3 %vm3160_vm11, %v3130_v45  ;;  %v14850_v4 = vld [vmem:[#allocation426_spill] sm:$0xff] }
 0x648   : > { %5092 = vmatmul.msk.f32.gmra.mxu1 %vm3160_vm11, %v14841_v32  ;;  %5118 = vmatmul.msk.f32.gmra.mxu2 %vm3160_vm11, %v10751_v49  ;;  %v4369_v6 = vadd.f32 %v4368_v13, %v4367_v60  ;;  %v2486_v49 = vsel %vm2377_vm4, %v11214_v52, %v14823_v10  ;;  %v14848_v60 = vld [vmem:[#allocation243_spill] sm:$0xff]  ;;  %v11268_v13 = vpop.permute.xlu0 %2166 }
 0x649   : > { %v11219_v57 = vpop.f32.mrf.mxu2  ;;  %v2615_v16 = vsel %vm2506_vm5, %v2486_v49, %v14824_v30 }
 0x64a   : > { %v3611_v27 = vpop.f32.mrf.mxu0  ;;  %v3686_v42 = vpop.f32.mrf.mxu1  ;;  %v2744_v18 = vsel %vm2635_vm6, %v2615_v16, %v14825_v11  ;;  %4617 = vxpose.xlu1.b32.cont [15/16] (narrow) %v3609_v9, 8  ;;  %v14849_v9 = vld [vmem:[#allocation215_spill] sm:$0xff] }
 0x64b   : > { %v3612_v61 = vadd.f32 %v10598_v44, %v3611_v27  ;;  %v11229_v41 = vadd.f32 %v10598_v44, %v3686_v42  ;;  %v2873_v10 = vsel %vm2764_vm7, %v2744_v18, %v14844_v0  ;;  %v14851_v27 = vld [vmem:[#allocation244_spill] sm:$0xff] }
 0x64c   : > { %v3002_v3 = vsel %vm2893_vm8, %v2873_v10, %v14845_v2  ;;  %v14852_v42 = vld [vmem:[#allocation132_spill] sm:$0xff] }
 0x64d   : > { %v3979_v30 = vsel %vm2311_vm3, %v3612_v61, 0.0  ;;  %v4228_v54 = vmul.f32 %v3612_v61, %v3612_v61  ;;  %4675 = vxpose.xlu0.b32.cont [9/16] (narrow) %v11229_v41, 8  ;;  %v3131_v33 = vsel %vm3022_vm10, %v3002_v3, %v11225_v15  ;;  %v3133_v18 = vsel %vm3022_vm10, %v14852_v42, %v11268_v13 }
 0x64e   : > { %v3980_v11 = vadd.f32 %v3979_v30, %v3978_v56  ;;  %v3132_v56 = vsel %vm3022_vm10, %v14850_v4, %v11249_v36  ;;  %v14857_v4 = vld [vmem:[#allocation384_spill] sm:$0xff] }
 0x64f   : > { %5068 = vmatmul.msk.f32.gmra.mxu0 %vm3160_vm11, %v14846_v23  ;;  %v4370_v28 = vsel %vm2311_vm3, %v4228_v54, 0.0  ;;  %5145 = vmatmul.msk.f32.gmra.mxu3 %vm3160_vm11, %v3131_v33  ;;  %v11287_v23 = vpop.permute.xlu1 %2168 }
 0x650   : > { %5093 = vmatmul.msk.f32.gmra.mxu1 %vm3160_vm11, %v14847_v38  ;;  %5119 = vmatmul.msk.f32.gmra.mxu2 %vm3160_vm11, %v14848_v60  ;;  %v4371_v53 = vadd.f32 %v4370_v28, %v4369_v6  ;;  %v14853_v28 = vld [vmem:[#allocation385_spill] sm:$0xff] }
 0x652   : > { %v11247_v19 = vpop.f32.mrf.mxu2  ;;  %4618 = vxpose.xlu1.b32.end [16/16] (narrow) %v3612_v61, 8 }
 0x654   : > { %v3614_v47 = vpop.f32.mrf.mxu0 }
 0x655   : > { %v3689_v35 = vpop.f32.mrf.mxu1  ;;  %v3615_v29 = vadd.f32 %v10598_v44, %v3614_v47  ;;  %v14855_v47 = vld [vmem:[#allocation461_spill] sm:$0xff] }
 0x656   : > { %v11253_v7 = vadd.f32 %v10598_v44, %v3689_v35  ;;  %v3134_v35 = vsel %vm3022_vm10, %v14855_v47, %v11287_v23 }
 0x657   : > { %v3981_v63 = vsel %vm2311_vm3, %v3615_v29, 0.0  ;;  %v4229_v21 = vmul.f32 %v3615_v29, %v3615_v29  ;;  %4635 = vxpose.xlu2.b32.start [1/16] (narrow) %v3615_v29, 8  ;;  %5146 = vmatmul.msk.f32.gmra.mxu3 %vm3160_vm11, %v3132_v56 }
 0x658   : > { %4676 = vxpose.xlu0.b32.cont [10/16] (narrow) %v11253_v7, 8  ;;  %v3982_v39 = vadd.f32 %v3981_v63, %v3980_v11  ;;  %5094 = vmatmul.msk.f32.gmra.mxu1 %vm3160_vm11, %v14849_v9 }
 0x659   : > { %5120 = vmatmul.msk.f32.gmra.mxu2 %vm3160_vm11, %v10754_v58  ;;  %v4372_v32 = vsel %vm2311_vm3, %v4229_v21, 0.0  ;;  %v14856_v21 = vld [vmem:[#allocation321_spill] sm:$0xff] }
 0x65a   : > { %v4373_v45 = vadd.f32 %v4372_v32, %v4371_v53  ;;  %v11266_v24 = vpop.f32.mrf.mxu2  ;;  %v14854_v53 = vld [vmem:[#allocation256_spill] sm:$0xff] }
 0x65c   : > { %v3617_v8 = vpop.f32.mrf.mxu0 }
 0x65d   : > { %v3692_v17 = vpop.f32.mrf.mxu1  ;;  %v3618_v25 = vadd.f32 %v10598_v44, %v3617_v8  ;;  %v14858_v8 = vld [vmem:[#allocation263_spill] sm:$0xff] }
 0x65e   : > { %v11272_v58 = vadd.f32 %v10598_v44, %v3692_v17 }
 0x65f   : > { %v3983_v6 = vsel %vm2311_vm3, %v3618_v25, 0.0  ;;  %v4230_v49 = vmul.f32 %v3618_v25, %v3618_v25  ;;  %4636 = vxpose.xlu2.b32.cont [2/16] (narrow) %v3618_v25, 8  ;;  %5147 = vmatmul.msk.f32.gmra.mxu3 %vm3160_vm11, %v3133_v18  ;;  %v14859_v18 = vld [vmem:[#allocation422_spill] sm:$0xff] }
 0x660   : > { %4677 = vxpose.xlu0.b32.cont [11/16] (narrow) %v11272_v58, 8  ;;  %v3984_v16 = vadd.f32 %v3983_v6, %v3982_v39  ;;  %5095 = vmatmul.msk.f32.gmra.mxu1 %vm3160_vm11, %v14851_v27  ;;  %v2490_v39 = vsel %vm2377_vm4, %v11214_v52, %v14856_v21 }
 0x661   : > { %5121 = vmatmul.msk.f32.gmra.mxu2 %vm3160_vm11, %v10817_v55  ;;  %v4374_v61 = vsel %vm2311_vm3, %v4230_v49, 0.0  ;;  %v2619_v56 = vsel %vm2506_vm5, %v2490_v39, %v14857_v4 }
 0x662   : > { %v4375_v10 = vadd.f32 %v4374_v61, %v4373_v45  ;;  %v2748_v17 = vsel %vm2635_vm6, %v2619_v56, %v14858_v8  ;;  %v14864_v56 = vld [vmem:[#allocation249_spill] sm:$0xff] }
 0x663   : > { %v11285_v3 = vpop.f32.mrf.mxu2  ;;  %v2877_v49 = vsel %vm2764_vm7, %v2748_v17, %v14844_v0 }
 0x664   : > { %v3620_v30 = vpop.f32.mrf.mxu0  ;;  %v3006_v52 = vsel %vm2893_vm8, %v2877_v49, %v14845_v2 }
 0x665   : > { %v3695_v54 = vpop.f32.mrf.mxu1  ;;  %v3621_v11 = vadd.f32 %v10598_v44, %v3620_v30  ;;  %v3135_v61 = vsel %vm3022_vm10, %v3006_v52, %v11225_v15 }
 0x666   : > { %v11291_v38 = vadd.f32 %v10598_v44, %v3695_v54 }
 0x667   : > { %v3985_v55 = vsel %vm2311_vm3, %v3621_v11, 0.0  ;;  %v4231_v60 = vmul.f32 %v3621_v11, %v3621_v11  ;;  %4637 = vxpose.xlu2.b32.cont [3/16] (narrow) %v3621_v11, 8  ;;  %5148 = vmatmul.msk.f32.gmra.mxu3 %vm3160_vm11, %v3134_v35 }
 0x668   : > { %4678 = vxpose.xlu0.b32.cont [12/16] (narrow) %v11291_v38, 8  ;;  %v3986_v33 = vadd.f32 %v3985_v55, %v3984_v16  ;;  %5096 = vmatmul.msk.f32.gmra.mxu1 %vm3160_vm11, %v14853_v28  ;;  %v14861_v28 = vld [vmem:[#allocation230_spill] sm:$0xff] }
 0x669   : > { %5122 = vmatmul.msk.f32.gmra.mxu2 %vm3160_vm11, %v14854_v53  ;;  %v4376_v29 = vsel %vm2311_vm3, %v4231_v60, 0.0  ;;  %v14862_v53 = vld [vmem:[#allocation157_spill] sm:$0xff] }
 0x66a   : > { %v4377_v63 = vadd.f32 %v4376_v29, %v4375_v10  ;;  %v11331_v10 = vpop.f32.mrf.mxu3  ;;  %v3136_v47 = vsel %vm3022_vm10, %v14862_v53, %v11249_v36 }
 0x66b   : > { %v11307_v9 = vpop.f32.mrf.mxu2  ;;  %14860 = vst [vmem:[#allocation261_spill] sm:$0xff] %v11331_v10 }
 0x66c   : > { %v3623_v32 = vpop.f32.mrf.mxu0 }
 0x66d   : > { %v3698_v45 = vpop.f32.mrf.mxu1  ;;  %v3624_v25 = vadd.f32 %v10598_v44, %v3623_v32  ;;  %v14865_v32 = vld [vmem:[#allocation418_spill] sm:$0xff] }
 0x66e   : > { %v11315_v6 = vadd.f32 %v10598_v44, %v3698_v45  ;;  %v3137_v45 = vsel %vm3022_vm10, %v14865_v32, %v11268_v13  ;;  %v14868_v13 = vld [vmem:[#allocation255_spill] sm:$0xff] }
 0x66f   : > { %v3987_v16 = vsel %vm2311_vm3, %v3624_v25, 0.0  ;;  %v4232_v27 = vmul.f32 %v3624_v25, %v3624_v25  ;;  %4638 = vxpose.xlu2.b32.cont [4/16] (narrow) %v3624_v25, 8  ;;  %5149 = vmatmul.msk.f32.gmra.mxu3 %vm3160_vm11, %v3135_v61 }
 0x670   : > { %4679 = vxpose.xlu0.b32.cont [13/16] (narrow) %v11315_v6, 8  ;;  %v3988_v42 = vadd.f32 %v3987_v16, %v3986_v33  ;;  %5097 = vmatmul.msk.f32.gmra.mxu1 %vm3160_vm11, %v14859_v18 }
 0x671   : > { %5123 = vmatmul.msk.f32.gmra.mxu2 %vm3160_vm11, %v10820_v62  ;;  %v4378_v0 = vsel %vm2311_vm3, %v4232_v27, 0.0  ;;  %v14869_v27 = vld [vmem:[#allocation176_spill] sm:$0xff] }
 0x672   : > { %v4379_v2 = vadd.f32 %v4378_v0, %v4377_v63 }
 0x673   : > { %v11333_v30 = vpop.f32.mrf.mxu2 }
 0x674   : > { %v3626_v54 = vpop.f32.mrf.mxu0 }
 0x675   : > { %v3701_v11 = vpop.f32.mrf.mxu1  ;;  %v3627_v55 = vadd.f32 %v10598_v44, %v3626_v54  ;;  %v2171_v54 = vpop.permute.xlu2 %2170 }
 0x676   : > { %v11337_v60 = vadd.f32 %v10598_v44, %v3701_v11 }
 0x677   : > { %v3989_v62 = vsel %vm2311_vm3, %v3627_v55, 0.0  ;;  %v4233_v33 = vmul.f32 %v3627_v55, %v3627_v55  ;;  %4639 = vxpose.xlu2.b32.cont [5/16] (narrow) %v3627_v55, 8  ;;  %5150 = vmatmul.msk.f32.gmra.mxu3 %vm3160_vm11, %v3136_v47  ;;  %v2173_v47 = vpop.permute.xlu0 %2172 }
 0x678   : > { %4680 = vxpose.xlu0.b32.cont [14/16] (narrow) %v11337_v60, 8  ;;  %v11341_v15 = vadd.f32 %v3989_v62, %v3988_v42  ;;  %5098 = vmatmul.msk.f32.gmra.mxu1 %vm3160_vm11, %v14861_v28  ;;  %v3138_v42 = vsel %vm3022_vm10, %v14869_v27, %v11287_v23  ;;  %v14871_v23 = vld [vmem:[#allocation149_spill] sm:$0xff] }
 0x679   : > { %5124 = vmatmul.msk.f32.gmra.mxu2 %vm3160_vm11, %v10896_v20  ;;  %v4380_v44 = vsel %vm2311_vm3, %v4233_v33, 0.0  ;;  %v11361_v20 = vld [vmem:[%s12501_s2] ss:$0 sm:$0xff]  ;;  %v3139_v62 = vsel %vm3022_vm10, %v14871_v23, %v2171_v54 }
 0x67a   : > { %v11352_v35 = vadd.f32 %v4380_v44, %v4379_v2  ;;  %v11356_v63 = vpop.f32.mrf.mxu3  ;;  %v11407_v11 = vadd.f32 %v11361_v20, %v11183_v14  ;;  %v11427_v44 = vadd.f32 %v11361_v20, %v11219_v57  ;;  %v11470_v23 = vadd.f32 %v11361_v20, %v11266_v24 }
 0x67b   : > { %v11354_v29 = vpop.f32.mrf.mxu2  ;;  %14863 = vst [vmem:[#allocation266_spill] sm:$0xff] %v11356_v63 }
 0x67c   : > { %v3629_v21 = vpop.f32.mrf.mxu0  ;;  %14877 = vst [vmem:[#allocation283_spill] sm:$0xff] %v11470_v23 }
 0x67d   : > { %v3704_v39 = vpop.f32.mrf.mxu1  ;;  %v11364_v4 = vadd.f32 %v11361_v20, %v3629_v21 }
 0x67e   : > { %v11367_v36 = vadd.f32 %v11361_v20, %v3704_v39 }
 0x67f   : > { %4640 = vxpose.xlu2.b32.cont [6/16] (narrow) %v11364_v4, 8  ;;  %5151 = vmatmul.msk.f32.gmra.mxu3 %vm3160_vm11, %v3137_v45  ;;  %v11443_v45 = vpop.permute.xlu1 %2174 }
 0x680   : > { %4681 = vxpose.xlu0.b32.cont [15/16] (narrow) %v11367_v36, 8  ;;  %5099 = vmatmul.msk.f32.gmra.mxu1 %vm3160_vm11, %v14864_v56 }
 0x681   : > { %5125 = vmatmul.msk.f32.gmra.mxu2 %vm3160_vm11, %v10811_v37  ;;  %v14867_v37 = vld [vmem:[#allocation260_spill] sm:$0xff] }
 0x682   : > { %v11381_v17 = vpop.f32.mrf.mxu3 }
 0x683   : > { %v11379_v8 = vpop.f32.mrf.mxu2  ;;  %14866 = vst [vmem:[#allocation271_spill] sm:$0xff] %v11381_v17 }
 0x684   : > { %v3632_v25 = vpop.f32.mrf.mxu0 }
 0x685   : > { %v3707_v49 = vpop.f32.mrf.mxu1  ;;  %v11384_v52 = vadd.f32 %v11361_v20, %v3632_v25  ;;  %v11447_v25 = vadd.f32 %v11361_v20, %v11247_v19 }
 0x686   : > { %v11387_v16 = vadd.f32 %v11361_v20, %v3707_v49 }
 0x687   : > { %4641 = vxpose.xlu2.b32.cont [7/16] (narrow) %v11384_v52, 8  ;;  %5152 = vmatmul.msk.f32.gmra.mxu3 %vm3160_vm11, %v3138_v42 }
 0x688   : > { %4682 = vxpose.xlu0.b32.end [16/16] (narrow) %v11387_v16, 8  ;;  %5100 = vmatmul.msk.f32.gmra.mxu1 %vm3160_vm11, %v14867_v37  ;;  %v14875_v37 = vld [vmem:[#allocation441_spill] sm:$0xff] }
 0x689   : > { %5126 = vmatmul.msk.f32.gmra.mxu2 %vm3160_vm11, %v14868_v13  ;;  %v3141_v13 = vsel %vm3022_vm10, %v14875_v37, %v11443_v45  ;;  %v11488_v37 = vadd.f32 %v11361_v20, %v11285_v3 }
 0x68a   : > { %v11401_v61 = vpop.f32.mrf.mxu3 }
 0x68b   : > { %v11399_v18 = vpop.f32.mrf.mxu2  ;;  %14870 = vst [vmem:[#allocation277_spill] sm:$0xff] %v11401_v61 }
 0x68c   : > { %v3635_v0 = vpop.f32.mrf.mxu0  ;;  %14880 = vst [vmem:[#allocation377_spill] sm:$0xff] %v11488_v37 }
 0x68d   : > { %v11403_v2 = vpop.f32.mrf.mxu1  ;;  %v11410_v55 = vadd.f32 %v11361_v20, %v3635_v0  ;;  %v11466_v0 = vpop.permute.xlu2 %2176 }
 0x68f   : > { %4642 = vxpose.xlu2.b32.cont [8/16] (narrow) %v11410_v55, 8  ;;  %5153 = vmatmul.msk.f32.gmra.mxu3 %vm3160_vm11, %v3139_v62 }
 0x690   : > { %4731 = vxpose.xlu0.b32.start [1/16] (narrow) %v11407_v11, 8 }
 0x691   : > { %5127 = vmatmul.msk.f32.gmra.mxu2 %vm3160_vm11, %v10814_v12  ;;  %v14873_v12 = vld [vmem:[#allocation181_spill] sm:$0xff] }
 0x692   : > { %v11421_v28 = vpop.f32.mrf.mxu3  ;;  %v3140_v39 = vsel %vm3022_vm10, %v14873_v12, %v2173_v47 }
 0x693   : > { %v11419_v33 = vpop.f32.mrf.mxu2  ;;  %14872 = vst [vmem:[#allocation281_spill] sm:$0xff] %v11421_v28  ;;  %v4236_v28 = vmul.f32 %v11410_v55, %v11410_v55 }
 0x694   : > { %v3638_v14 = vpop.f32.mrf.mxu0 }
 0x695   : > { %v11423_v53 = vpop.f32.mrf.mxu1  ;;  %v11430_v21 = vadd.f32 %v11361_v20, %v3638_v14  ;;  %v14878_v14 = vld [vmem:[#allocation186_spill] sm:$0xff] }
 0x696   : > { %v3142_v12 = vsel %vm3022_vm10, %v14878_v14, %v11466_v0 }
 0x697   : > { %4643 = vxpose.xlu2.b32.cont [9/16] (narrow) %v11430_v21, 8  ;;  %5154 = vmatmul.msk.f32.gmra.mxu3 %vm3160_vm11, %v3140_v39 }
 0x698   : > { %4732 = vxpose.xlu0.b32.cont [2/16] (narrow) %v11427_v44, 8 }
 0x699   : > { %5128 = vmatmul.msk.f32.gmra.mxu2 %vm3160_vm11, %v10879_v48 }
 0x69a   : > { %v11441_v32 = vpop.f32.mrf.mxu3 }
 0x69b   : > { %v11439_v56 = vpop.f32.mrf.mxu2  ;;  %14874 = vst [vmem:[#allocation282_spill] sm:$0xff] %v11441_v32 }
 0x69c   : > { %v3641_v57 = vpop.f32.mrf.mxu0 }
 0x69d   : > { %v11450_v49 = vadd.f32 %v11361_v20, %v3641_v57  ;;  %v11452_v48 = vpop.f32.mrf.mxu1 }
 0x69f   : > { %4644 = vxpose.xlu2.b32.cont [10/16] (narrow) %v11450_v49, 8  ;;  %5155 = vmatmul.msk.f32.gmra.mxu3 %vm3160_vm11, %v3141_v13 }
 0x6a0   : > { %4733 = vxpose.xlu0.b32.cont [3/16] (narrow) %v11447_v25, 8 }
 0x6a1   : > { %5129 = vmatmul.msk.f32.gmra.mxu2 %vm3160_vm11, %v10677_v51 }
 0x6a2   : > { %v11464_v27 = vpop.f32.mrf.mxu3 }
 0x6a3   : > { %v11462_v19 = vpop.f32.mrf.mxu2  ;;  %14876 = vst [vmem:[#allocation326_spill] sm:$0xff] %v11464_v27 }
 0x6a4   : > { %v3644_v42 = vpop.f32.mrf.mxu0 }
 0x6a5   : > { %v3645_v62 = vadd.f32 %v11361_v20, %v3644_v42  ;;  %v11473_v51 = vpop.f32.mrf.mxu1 }
 0x6a7   : > { %4645 = vxpose.xlu2.b32.cont [11/16] (narrow) %v3645_v62, 8  ;;  %5156 = vmatmul.msk.f32.gmra.mxu3 %vm3160_vm11, %v3142_v12 }
 0x6a8   : > { %4734 = vxpose.xlu0.b32.cont [4/16] (narrow) %v11470_v23, 8 }
 0x6a9   : > { %5130 = vmatmul.msk.f32.gmra.mxu2 %vm3160_vm11, %v10883_v34  ;;  %v14881_v34 = vld [vmem:[#allocation420_spill] sm:$0xff] }
 0x6aa   : > { %v11484_v24 = vpop.f32.mrf.mxu3  ;;  %v3143_v14 = vsel %vm3022_vm10, %v14881_v34, %v2171_v54  ;;  %v4234_v54 = vmul.f32 %v11364_v4, %v11364_v4 }
 0x6ab   : > { %v11482_v39 = vpop.f32.mrf.mxu2  ;;  %14879 = vst [vmem:[#allocation330_spill] sm:$0xff] %v11484_v24 }
 0x6ac   : > { %v3647_v57 = vpop.f32.mrf.mxu0 }
 0x6ad   : > { %v3648_v13 = vadd.f32 %v11361_v20, %v3647_v57  ;;  %v11491_v42 = vpop.f32.mrf.mxu1  ;;  %v11505_v57 = vadd.f32 %v11361_v20, %v11307_v9  ;;  %v3991_v9 = vsel %vm2311_vm3, %v11364_v4, 0.0 }
 0x6ae   : > { %v3992_v4 = vadd.f32 %v3991_v9, %v11341_v15  ;;  %v4386_v15 = vsel %vm2311_vm3, %v4236_v28, 0.0  ;;  %v3997_v9 = vsel %vm2311_vm3, %v11430_v21, 0.0  ;;  %v3999_v28 = vsel %vm2311_vm3, %v11450_v49, 0.0 }
 0x6af   : > { %4646 = vxpose.xlu2.b32.cont [12/16] (narrow) %v3648_v13, 8  ;;  %5157 = vmatmul.msk.f32.gmra.mxu3 %vm3160_vm11, %v3143_v14  ;;  %14883 = vst [vmem:[#allocation393_spill] sm:$0xff] %v11505_v57  ;;  %v4235_v14 = vmul.f32 %v11384_v52, %v11384_v52 }
 0x6b0   : > { %4735 = vxpose.xlu0.b32.cont [5/16] (narrow) %v11488_v37, 8  ;;  %v4240_v37 = vmul.f32 %v3648_v13, %v3648_v13 }
 0x6b1   : > { %5131 = vmatmul.msk.f32.gmra.mxu2 %vm3160_vm11, %v10929_v22  ;;  %v14884_v22 = vld [vmem:[#allocation450_spill] sm:$0xff] }
 0x6b2   : > { %v11501_v24 = vpop.f32.mrf.mxu3  ;;  %v3144_v34 = vsel %vm3022_vm10, %v14884_v22, %v2173_v47 }
 0x6b3   : > { %v11499_v12 = vpop.f32.mrf.mxu2  ;;  %14882 = vst [vmem:[#allocation178_spill] sm:$0xff] %v11501_v24  ;;  %v3993_v24 = vsel %vm2311_vm3, %v11384_v52, 0.0  ;;  %v4237_v52 = vmul.f32 %v11430_v21, %v11430_v21 }
 0x6b4   : > { %v3650_v3 = vpop.f32.mrf.mxu0  ;;  %v3994_v10 = vadd.f32 %v3993_v24, %v3992_v4  ;;  %v4239_v24 = vmul.f32 %v3645_v62, %v3645_v62 }
 0x6b5   : > { %v3651_v27 = vadd.f32 %v11361_v20, %v3650_v3  ;;  %v11508_v32 = vpop.f32.mrf.mxu1  ;;  %v4382_v3 = vsel %vm2311_vm3, %v4234_v54, 0.0  ;;  %v3995_v54 = vsel %vm2311_vm3, %v11410_v55, 0.0  ;;  %v14887_v55 = vld [vmem:[#allocation152_spill] sm:$0xff] }
 0x6b7   : > { %4647 = vxpose.xlu2.b32.cont [13/16] (narrow) %v3651_v27, 8  ;;  %5158 = vmatmul.msk.f32.gmra.mxu3 %vm3160_vm11, %v3144_v34  ;;  %v4384_v34 = vsel %vm2311_vm3, %v4235_v14, 0.0  ;;  %v4238_v14 = vmul.f32 %v11450_v49, %v11450_v49 }
 0x6b8   : > { %4736 = vxpose.xlu0.b32.cont [6/16] (narrow) %v11505_v57, 8  ;;  %v3996_v57 = vadd.f32 %v3995_v54, %v3994_v10 }
 0x6b9   : > { %5132 = vmatmul.msk.f32.gmra.mxu2 %vm3160_vm11, %v10740_v26  ;;  %v11531_v26 = vadd.f32 %v11361_v20, %v11333_v30  ;;  %v4383_v30 = vadd.f32 %v4382_v3, %v11352_v35  ;;  %v4388_v35 = vsel %vm2311_vm3, %v4237_v52, 0.0  ;;  %v4390_v4 = vsel %vm2311_vm3, %v4238_v14, 0.0 }
 0x6ba   : > { %v11534_v22 = vpop.f32.mrf.mxu3  ;;  %v3998_v3 = vadd.f32 %v3997_v9, %v3996_v57  ;;  %v4392_v57 = vsel %vm2311_vm3, %v4239_v24, 0.0  ;;  %v4394_v14 = vsel %vm2311_vm3, %v4240_v37, 0.0 }
 0x6bb   : > { %v11527_v47 = vpop.f32.mrf.mxu2  ;;  %14885 = vst [vmem:[#allocation423_spill] sm:$0xff] %v11531_v26 }
 0x6bc   : > { %14886 = vst [vmem:[#allocation173_spill] sm:$0xff] %v11534_v22  ;;  %v3653_v61 = vpop.f32.mrf.mxu0  ;;  %v4385_v22 = vadd.f32 %v4384_v34, %v4383_v30  ;;  %v4000_v34 = vadd.f32 %v3999_v28, %v3998_v3  ;;  %v4241_v30 = vmul.f32 %v3651_v27, %v3651_v27 }
 0x6bd   : > { %v3654_v17 = vadd.f32 %v11361_v20, %v3653_v61  ;;  %v11542_v63 = vpop.f32.mrf.mxu1  ;;  %v3145_v61 = vsel %vm3022_vm10, %v14887_v55, %v11443_v45  ;;  %v11562_v45 = vadd.f32 %v11361_v20, %v11354_v29 }
 0x6be   : > { %v4387_v21 = vadd.f32 %v4386_v15, %v4385_v22  ;;  %v4003_v22 = vsel %vm2311_vm3, %v3648_v13, 0.0  ;;  %v4396_v24 = vsel %vm2311_vm3, %v4241_v30, 0.0  ;;  %v11591_v30 = vpop.permute.xlu0 %2178 }
 0x6bf   : > { %4648 = vxpose.xlu2.b32.cont [14/16] (narrow) %v3654_v17, 8  ;;  %5159 = vmatmul.msk.f32.gmra.mxu3 %vm3160_vm11, %v3145_v61  ;;  %v4242_v55 = vmul.f32 %v3654_v17, %v3654_v17  ;;  %v14888_v61 = vld [vmem:[#allocation52_spill] sm:$0xff] }
 0x6c0   : > { %4737 = vxpose.xlu0.b32.cont [7/16] (narrow) %v11531_v26, 8  ;;  %v4001_v26 = vsel %vm2311_vm3, %v3645_v62, 0.0  ;;  %v4389_v10 = vadd.f32 %v4388_v35, %v4387_v21  ;;  %v3146_v13 = vsel %vm3022_vm10, %v14888_v61, %v11466_v0 }
 0x6c1   : > { %v4002_v29 = vadd.f32 %v4001_v26, %v4000_v34  ;;  %v4007_v26 = vsel %vm2311_vm3, %v3654_v17, 0.0  ;;  %v11595_v17 = vadd.f32 %v11361_v20, %v11379_v8  ;;  %v4246_v8 = vmul.f32 %v10920_v40, %v10920_v40 }
 0x6c2   : > { %v11567_v49 = vpop.f32.mrf.mxu3  ;;  %v4391_v9 = vadd.f32 %v4390_v4, %v4389_v10 }
 0x6c3   : > { %v3806_v23 = vpop.f32.mrf.mxu2  ;;  %v4004_v28 = vadd.f32 %v4003_v22, %v4002_v29 }
 0x6c4   : > { %v11565_v54 = vadd.f32 %v11361_v20, %v3806_v23  ;;  %v3656_v52 = vpop.f32.mrf.mxu0  ;;  %v4005_v23 = vsel %vm2311_vm3, %v3651_v27, 0.0  ;;  %v4393_v35 = vadd.f32 %v4392_v57, %v4391_v9  ;;  %v4398_v27 = vsel %vm2311_vm3, %v4242_v55, 0.0 }
 0x6c5   : > { %v3657_v62 = vadd.f32 %v11361_v20, %v3656_v52  ;;  %v11572_v15 = vpop.f32.mrf.mxu1  ;;  %v4006_v3 = vadd.f32 %v4005_v23, %v4004_v28  ;;  %v4245_v55 = vmul.f32 %v10869_v50, %v10869_v50 }
 0x6c6   : > { %4763 = vxpose.xlu1.b32.start [1/16] (narrow) %v11565_v54, 8  ;;  %v4395_v37 = vadd.f32 %v4394_v14, %v4393_v35 }
 0x6c7   : > { %4649 = vxpose.xlu2.b32.cont [15/16] (narrow) %v3657_v62, 8  ;;  %v4243_v21 = vmul.f32 %v3657_v62, %v3657_v62  ;;  %5160 = vmatmul.msk.f32.gmra.mxu3 %vm3160_vm11, %v3146_v13  ;;  %v4009_v4 = vsel %vm2311_vm3, %v3657_v62, 0.0  ;;  %v4008_v52 = vadd.f32 %v4007_v26, %v4006_v3 }
 0x6c8   : > { %4738 = vxpose.xlu0.b32.cont [8/16] (narrow) %v11562_v45, 8  ;;  %v4397_v34 = vadd.f32 %v4396_v24, %v4395_v37  ;;  %v14889_v24 = vld [vmem:[#allocation456_spill] sm:$0xff] }
 0x6c9   : > { %v4400_v9 = vsel %vm2311_vm3, %v4243_v21, 0.0  ;;  %v4010_v23 = vadd.f32 %v4009_v4, %v4008_v52  ;;  %v3147_v26 = vsel %vm3022_vm10, %v14889_v24, %v11591_v30  ;;  %v4013_v21 = vsel %vm2311_vm3, %v10869_v50, 0.0 }
 0x6ca   : > { %v11589_v57 = vpop.f32.mrf.mxu3  ;;  %v4399_v14 = vadd.f32 %v4398_v27, %v4397_v34  ;;  %v4404_v4 = vsel %vm2311_vm3, %v4245_v55, 0.0  ;;  %v4247_v34 = vmul.f32 %v11058_v1, %v11058_v1  ;;  %v4248_v55 = vmul.f32 %v11091_v5, %v11091_v5 }
 0x6cb   : > { %v3809_v10 = vpop.f32.mrf.mxu2  ;;  %v4249_v24 = vmul.f32 %v11118_v46, %v11118_v46 }
 0x6cc   : > { %v11587_v0 = vadd.f32 %v11361_v20, %v3809_v10  ;;  %v3659_v22 = vpop.f32.mrf.mxu0  ;;  %v4401_v35 = vadd.f32 %v4400_v9, %v4399_v14  ;;  %v4015_v10 = vsel %vm2311_vm3, %v10920_v40, 0.0  ;;  %v11632_v40 = vadd.f32 %v11361_v20, %v11399_v18 }
 0x6cd   : > { %v3660_v29 = vadd.f32 %v11361_v20, %v3659_v22  ;;  %v11599_v62 = vpop.f32.mrf.mxu1  ;;  %v4406_v22 = vsel %vm2311_vm3, %v4246_v8, 0.0  ;;  %v4250_v18 = vmul.f32 %v11145_v31, %v11145_v31 }
 0x6ce   : > { %4764 = vxpose.xlu1.b32.cont [2/16] (narrow) %v11587_v0, 8 }
 0x6cf   : > { %v4011_v61 = vsel %vm2311_vm3, %v3660_v29, 0.0  ;;  %v4244_v13 = vmul.f32 %v3660_v29, %v3660_v29  ;;  %4650 = vxpose.xlu2.b32.end [16/16] (narrow) %v3660_v29, 8  ;;  %5161 = vmatmul.msk.f32.gmra.mxu3 %vm3160_vm11, %v3147_v26 }
 0x6d0   : > { %4739 = vxpose.xlu0.b32.cont [9/16] (narrow) %v11595_v17, 8  ;;  %v4012_v28 = vadd.f32 %v4011_v61, %v4010_v23  ;;  %v4017_v23 = vsel %vm2311_vm3, %v11058_v1, 0.0  ;;  %v11636_v61 = vadd.f32 %v11361_v20, %v11403_v2  ;;  %v4019_v1 = vsel %vm2311_vm3, %v11091_v5, 0.0 }
 0x6d1   : > { %v4402_v37 = vsel %vm2311_vm3, %v4244_v13, 0.0  ;;  %v4021_v5 = vsel %vm2311_vm3, %v11118_v46, 0.0 }
 0x6d2   : > { %v4014_v3 = vadd.f32 %v4013_v21, %v4012_v28  ;;  %v4403_v27 = vadd.f32 %v4402_v37, %v4401_v35  ;;  %v11624_v14 = vpop.f32.mrf.mxu3  ;;  %v4408_v28 = vsel %vm2311_vm3, %v4247_v34, 0.0  ;;  %v14890_v21 = vld [vmem:[#allocation187_spill] sm:$0xff]  ;;  %v4023_v34 = vsel %vm2311_vm3, %v11145_v31, 0.0 }
 0x6d3   : > { %v3812_v52 = vpop.f32.mrf.mxu2  ;;  %v3148_v37 = vsel %vm3022_vm10, %v14890_v21, %v11591_v30  ;;  %v11674_v31 = vadd.f32 %v11361_v20, %v11419_v33  ;;  %v4254_v33 = vmul.f32 %v11253_v7, %v11253_v7 }
 0x6d4   : > { %v4016_v9 = vadd.f32 %v4015_v10, %v4014_v3  ;;  %v4405_v29 = vadd.f32 %v4404_v4, %v4403_v27  ;;  %v11622_v50 = vadd.f32 %v11361_v20, %v3812_v52  ;;  %v4410_v3 = vsel %vm2311_vm3, %v4248_v55, 0.0 }
 0x6d5   : > { %v11638_v13 = vpop.f32.mrf.mxu1  ;;  %v4412_v10 = vsel %vm2311_vm3, %v4249_v24, 0.0  ;;  %v4251_v52 = vmul.f32 %v11165_v59, %v11165_v59 }
 0x6d6   : > { %v4018_v8 = vadd.f32 %v4017_v23, %v4016_v9  ;;  %v4407_v35 = vadd.f32 %v4406_v22, %v4405_v29  ;;  %4765 = vxpose.xlu1.b32.cont [3/16] (narrow) %v11622_v50, 8  ;;  %v4414_v9 = vsel %vm2311_vm3, %v4250_v18, 0.0 }
 0x6d7   : > { %4699 = vxpose.xlu2.b32.start [1/16] (narrow) %v11636_v61, 8  ;;  %5162 = vmatmul.msk.f32.gmra.mxu3 %vm3160_vm11, %v3148_v37  ;;  %v14891_v37 = vld [vmem:[#allocation457_spill] sm:$0xff] }
 0x6d8   : > { %4740 = vxpose.xlu0.b32.cont [10/16] (narrow) %v11632_v40, 8  ;;  %v4020_v2 = vadd.f32 %v4019_v1, %v4018_v8  ;;  %v4409_v26 = vadd.f32 %v4408_v28, %v4407_v35  ;;  %v4025_v8 = vsel %vm2311_vm3, %v11165_v59, 0.0  ;;  %v4252_v35 = vmul.f32 %v11191_v43, %v11191_v43 }
 0x6d9   : > { %v11678_v28 = vadd.f32 %v11361_v20, %v11423_v53  ;;  %v4027_v59 = vsel %vm2311_vm3, %v11191_v43, 0.0  ;;  %v4029_v43 = vsel %vm2311_vm3, %v11229_v41, 0.0 }
 0x6da   : > { %v4022_v27 = vadd.f32 %v4021_v5, %v4020_v2  ;;  %v4411_v4 = vadd.f32 %v4410_v3, %v4409_v26  ;;  %v11666_v46 = vpop.f32.mrf.mxu3  ;;  %v4416_v2 = vsel %vm2311_vm3, %v4251_v52, 0.0  ;;  %v4253_v26 = vmul.f32 %v11229_v41, %v11229_v41 }
 0x6db   : > { %v3149_v3 = vsel %vm3022_vm10, %v14891_v37, %v11591_v30  ;;  %v4418_v5 = vsel %vm2311_vm3, %v4252_v35, 0.0  ;;  %v4255_v52 = vmul.f32 %v11272_v58, %v11272_v58  ;;  %v4033_v35 = vsel %vm2311_vm3, %v11272_v58, 0.0  ;;  %v14892_v37 = vld [vmem:[#allocation51_spill] sm:$0xff] }
 0x6dc   : > { %v3815_v22 = vpop.f32.mrf.mxu2  ;;  %v4024_v29 = vadd.f32 %v4023_v34, %v4022_v27  ;;  %v4413_v23 = vadd.f32 %v4412_v10, %v4411_v4  ;;  %v4420_v10 = vsel %vm2311_vm3, %v4253_v26, 0.0  ;;  %v4031_v34 = vsel %vm2311_vm3, %v11253_v7, 0.0 }
 0x6dd   : > { %v11664_v55 = vadd.f32 %v11361_v20, %v3815_v22  ;;  %v11680_v1 = vpop.f32.mrf.mxu1  ;;  %v11716_v7 = vadd.f32 %v11361_v20, %v11439_v56  ;;  %v4035_v58 = vsel %vm2311_vm3, %v11291_v38, 0.0  ;;  %v4258_v56 = vmul.f32 %v11337_v60, %v11337_v60 }
 0x6de   : > { %v4026_v24 = vadd.f32 %v4025_v8, %v4024_v29  ;;  %v4415_v18 = vadd.f32 %v4414_v9, %v4413_v23  ;;  %v4422_v9 = vsel %vm2311_vm3, %v4254_v33, 0.0  ;;  %v4424_v33 = vsel %vm2311_vm3, %v4255_v52, 0.0 }
 0x6df   : > { %4766 = vxpose.xlu1.b32.cont [4/16] (narrow) %v11664_v55, 8  ;;  %4700 = vxpose.xlu2.b32.cont [2/16] (narrow) %v11678_v28, 8 }
 0x6e0   : > { %4741 = vxpose.xlu0.b32.cont [11/16] (narrow) %v11674_v31, 8  ;;  %v4028_v53 = vadd.f32 %v4027_v59, %v4026_v24  ;;  %v4417_v21 = vadd.f32 %v4416_v2, %v4415_v18  ;;  %5163 = vmatmul.msk.f32.gmra.mxu3 %vm3160_vm11, %v3149_v3  ;;  %v4256_v24 = vmul.f32 %v11291_v38, %v11291_v38  ;;  %v4037_v38 = vsel %vm2311_vm3, %v11315_v6, 0.0 }
 0x6e1   : > { %v3717_v18 = vadd.f32 %v11361_v20, %v11452_v48  ;;  %v3150_v3 = vsel %vm3022_vm10, %v14892_v37, %v11591_v30  ;;  %v4430_v30 = vsel %vm2311_vm3, %v4258_v56, 0.0 }
 0x6e2   : > { %v4030_v27 = vadd.f32 %v4029_v43, %v4028_v53  ;;  %v4419_v4 = vadd.f32 %v4418_v5, %v4417_v21  ;;  %v11708_v41 = vpop.f32.mrf.mxu3  ;;  %v4257_v53 = vmul.f32 %v11315_v6, %v11315_v6  ;;  %v4426_v5 = vsel %vm2311_vm3, %v4256_v24, 0.0 }
 0x6e3   : > { %v3720_v24 = vadd.f32 %v11361_v20, %v11473_v51 }
 0x6e4   : > { %v3818_v22 = vpop.f32.mrf.mxu2  ;;  %v4032_v29 = vadd.f32 %v4031_v34, %v4030_v27  ;;  %v4421_v23 = vadd.f32 %v4420_v10, %v4419_v4  ;;  %v4428_v4 = vsel %vm2311_vm3, %v4257_v53, 0.0  ;;  %v4039_v10 = vsel %vm2311_vm3, %v11337_v60, 0.0 }
 0x6e5   : > { %v11706_v8 = vadd.f32 %v11361_v20, %v3818_v22  ;;  %v11720_v2 = vpop.f32.mrf.mxu1  ;;  %v4259_v34 = vmul.f32 %v11367_v36, %v11367_v36  ;;  %v11755_v60 = vadd.f32 %v11361_v20, %v11462_v19  ;;  %v4261_v53 = vmul.f32 %v11636_v61, %v11636_v61 }
 0x6e6   : > { %v4034_v59 = vadd.f32 %v4033_v35, %v4032_v29  ;;  %v4423_v26 = vadd.f32 %v4422_v9, %v4421_v23  ;;  %v4041_v23 = vsel %vm2311_vm3, %v11367_v36, 0.0  ;;  %v4260_v35 = vmul.f32 %v11387_v16, %v11387_v16 }
 0x6e7   : > { %4767 = vxpose.xlu1.b32.cont [5/16] (narrow) %v11706_v8, 8  ;;  %4701 = vxpose.xlu2.b32.cont [3/16] (narrow) %v3717_v18, 8  ;;  %v4043_v36 = vsel %vm2311_vm3, %v11387_v16, 0.0  ;;  %v4262_v19 = vmul.f32 %v11678_v28, %v11678_v28  ;;  %v4436_v16 = vsel %vm2311_vm3, %v4261_v53, 0.0 }
 0x6e8   : > { %4742 = vxpose.xlu0.b32.cont [12/16] (narrow) %v11716_v7, 8  ;;  %v4036_v48 = vadd.f32 %v4035_v58, %v4034_v59  ;;  %v4425_v21 = vadd.f32 %v4424_v33, %v4423_v26  ;;  %5164 = vmatmul.msk.f32.gmra.mxu3 %vm3160_vm11, %v3150_v3  ;;  %v4432_v58 = vsel %vm2311_vm3, %v4259_v34, 0.0 }
 0x6ea   : > { %v4427_v43 = vadd.f32 %v4426_v5, %v4425_v21  ;;  %v4038_v27 = vadd.f32 %v4037_v38, %v4036_v48  ;;  %v11747_v6 = vpop.f32.mrf.mxu3  ;;  %v4434_v48 = vsel %vm2311_vm3, %v4260_v35, 0.0  ;;  %v4045_v21 = vsel %vm2311_vm3, %v11636_v61, 0.0 }
 0x6eb   : > { %v4047_v5 = vsel %vm2311_vm3, %v11678_v28, 0.0  ;;  %v4263_v38 = vmul.f32 %v3717_v18, %v3717_v18  ;;  %v11787_v28 = vadd.f32 %v11361_v20, %v11482_v39 }
 0x6ec   : > { %v3821_v52 = vpop.f32.mrf.mxu2  ;;  %v4040_v22 = vadd.f32 %v4039_v10, %v4038_v27  ;;  %v4429_v9 = vadd.f32 %v4428_v4, %v4427_v43  ;;  %v3723_v43 = vadd.f32 %v11361_v20, %v11491_v42  ;;  %v4438_v4 = vsel %vm2311_vm3, %v4262_v19, 0.0 }
 0x6ed   : > { %v11745_v29 = vadd.f32 %v11361_v20, %v3821_v52  ;;  %v11759_v59 = vpop.f32.mrf.mxu1  ;;  %v3726_v42 = vadd.f32 %v11361_v20, %v11508_v32 }
 0x6ee   : > { %v4042_v26 = vadd.f32 %v4041_v23, %v4040_v22  ;;  %v4431_v33 = vadd.f32 %v4430_v30, %v4429_v9  ;;  %v4049_v30 = vsel %vm2311_vm3, %v3717_v18, 0.0  ;;  %v4264_v22 = vmul.f32 %v3720_v24, %v3720_v24 }
 0x6ef   : > { %4768 = vxpose.xlu1.b32.cont [6/16] (narrow) %v11745_v29, 8  ;;  %4702 = vxpose.xlu2.b32.cont [4/16] (narrow) %v3720_v24, 8  ;;  %v11798_v18 = vadd.f32 %v11361_v20, %v11542_v63  ;;  %v4053_v53 = vsel %vm2311_vm3, %v3723_v43, 0.0  ;;  %v4266_v19 = vmul.f32 %v3726_v42, %v3726_v42  ;;  %v4055_v63 = vsel %vm2311_vm3, %v3726_v42, 0.0 }
 0x6f0   : > { %4743 = vxpose.xlu0.b32.cont [13/16] (narrow) %v11755_v60, 8  ;;  %v4044_v51 = vadd.f32 %v4043_v36, %v4042_v26  ;;  %v4433_v56 = vadd.f32 %v4432_v58, %v4431_v33  ;;  %v4440_v26 = vsel %vm2311_vm3, %v4263_v38, 0.0  ;;  %v4051_v33 = vsel %vm2311_vm3, %v3720_v24, 0.0 }
 0x6f1   : > { %v4265_v58 = vmul.f32 %v3723_v43, %v3723_v43  ;;  %v4442_v36 = vsel %vm2311_vm3, %v4264_v22, 0.0 }
 0x6f2   : > { %v4046_v37 = vadd.f32 %v4045_v21, %v4044_v51  ;;  %v4435_v3 = vadd.f32 %v4434_v48, %v4433_v56  ;;  %v11782_v61 = vpop.f32.mrf.mxu3  ;;  %v11805_v51 = vadd.f32 %v11361_v20, %v11572_v15  ;;  %v4267_v21 = vmul.f32 %v11798_v18, %v11798_v18 }
 0x6f3   : > { %v4444_v48 = vsel %vm2311_vm3, %v4265_v58, 0.0 }
 0x6f4   : > { %v3824_v27 = vpop.f32.mrf.mxu2  ;;  %v4048_v10 = vadd.f32 %v4047_v5, %v4046_v37  ;;  %v4437_v34 = vadd.f32 %v4436_v16, %v4435_v3  ;;  %v11813_v37 = vadd.f32 %v11361_v20, %v11599_v62  ;;  %v11817_v16 = vadd.f32 %v11361_v20, %v11499_v12 }
 0x6f5   : > { %v11780_v52 = vadd.f32 %v11361_v20, %v3824_v27  ;;  %v11791_v9 = vpop.f32.mrf.mxu1  ;;  %v4446_v27 = vsel %vm2311_vm3, %v4266_v19, 0.0  ;;  %v4268_v62 = vmul.f32 %v11805_v51, %v11805_v51  ;;  %v4448_v22 = vsel %vm2311_vm3, %v4267_v21, 0.0 }
 0x6f6   : > { %v4050_v23 = vadd.f32 %v4049_v30, %v4048_v10  ;;  %v4439_v35 = vadd.f32 %v4438_v4, %v4437_v34  ;;  %v4057_v4 = vsel %vm2311_vm3, %v11798_v18, 0.0  ;;  %v11831_v10 = vadd.f32 %v11361_v20, %v11638_v13 }
 0x6f7   : > { %4769 = vxpose.xlu1.b32.cont [7/16] (narrow) %v11780_v52, 8  ;;  %4703 = vxpose.xlu2.b32.cont [5/16] (narrow) %v3723_v43, 8  ;;  %v4450_v58 = vsel %vm2311_vm3, %v4268_v62, 0.0 }
 0x6f8   : > { %4744 = vxpose.xlu0.b32.cont [14/16] (narrow) %v11787_v28, 8  ;;  %v4052_v39 = vadd.f32 %v4051_v33, %v4050_v23  ;;  %v4441_v32 = vadd.f32 %v4440_v26, %v4439_v35  ;;  %v4059_v23 = vsel %vm2311_vm3, %v11805_v51, 0.0  ;;  %v4269_v35 = vmul.f32 %v11813_v37, %v11813_v37 }
 0x6f9   : > { %v11841_v26 = vadd.f32 %v11361_v20, %v11680_v1  ;;  %v4063_v19 = vsel %vm2311_vm3, %v11831_v10, 0.0 }
 0x6fa   : > { %v4054_v24 = vadd.f32 %v4053_v53, %v4052_v39  ;;  %v4443_v56 = vadd.f32 %v4442_v36, %v4441_v32  ;;  %v11822_v43 = vpop.f32.mrf.mxu3  ;;  %v4061_v39 = vsel %vm2311_vm3, %v11813_v37, 0.0  ;;  %v4270_v32 = vmul.f32 %v11831_v10, %v11831_v10 }
 0x6fb   : > { %v11851_v36 = vadd.f32 %v11361_v20, %v11720_v2 }
 0x6fc   : > { %v3827_v3 = vpop.f32.mrf.mxu2  ;;  %v4056_v15 = vadd.f32 %v4055_v63, %v4054_v24  ;;  %v4445_v5 = vadd.f32 %v4444_v48, %v4443_v56  ;;  %v4271_v24 = vmul.f32 %v11841_v26, %v11841_v26  ;;  %v11860_v56 = vadd.f32 %v11361_v20, %v11759_v59 }
 0x6fd   : > { %v11820_v38 = vadd.f32 %v11361_v20, %v3827_v3  ;;  %v3752_v12 = vpop.f32.mrf.mxu1  ;;  %v11864_v63 = vadd.f32 %v11361_v20, %v11527_v47  ;;  %v4272_v59 = vmul.f32 %v11851_v36, %v11851_v36 }
 0x6fe   : > { %v4058_v34 = vadd.f32 %v4057_v4, %v4056_v15  ;;  %v4447_v30 = vadd.f32 %v4446_v27, %v4445_v5  ;;  %v4454_v5 = vsel %vm2311_vm3, %v4270_v32, 0.0  ;;  %v4065_v27 = vsel %vm2311_vm3, %v11841_v26, 0.0 }
 0x6ff   : > { %4770 = vxpose.xlu1.b32.cont [8/16] (narrow) %v11820_v38, 8  ;;  %4704 = vxpose.xlu2.b32.cont [6/16] (narrow) %v3726_v42, 8  ;;  %v4452_v42 = vsel %vm2311_vm3, %v4269_v35, 0.0  ;;  %v11878_v4 = vadd.f32 %v11361_v20, %v11791_v9  ;;  %v11887_v35 = vadd.f32 %v11361_v20, %v3752_v12 }
 0x700   : > { %4745 = vxpose.xlu0.b32.cont [15/16] (narrow) %v11817_v16, 8  ;;  %v4060_v13 = vadd.f32 %v4059_v23, %v4058_v34  ;;  %v4449_v33 = vadd.f32 %v4448_v22, %v4447_v30  ;;  %v4456_v30 = vsel %vm2311_vm3, %v4271_v24, 0.0  ;;  %v4067_v22 = vsel %vm2311_vm3, %v11851_v36, 0.0 }
 0x701   : > { %v4273_v23 = vmul.f32 %v11860_v56, %v11860_v56 }
 0x702   : > { %v4062_v53 = vadd.f32 %v4061_v39, %v4060_v13  ;;  %v4451_v1 = vadd.f32 %v4450_v58, %v4449_v33  ;;  %v11869_v15 = vpop.f32.mrf.mxu3  ;;  %v4458_v33 = vsel %vm2311_vm3, %v4272_v59, 0.0  ;;  %v4069_v58 = vsel %vm2311_vm3, %v11860_v56, 0.0 }
 0x703   : > { %v4274_v39 = vmul.f32 %v11878_v4, %v11878_v4  ;;  %v4073_v59 = vsel %vm2311_vm3, %v11887_v35, 0.0 }
 0x704   : > { %v3830_v48 = vpop.f32.mrf.mxu2  ;;  %v4453_v2 = vadd.f32 %v4452_v42, %v4451_v1  ;;  %v4064_v21 = vadd.f32 %v4063_v19, %v4062_v53  ;;  %v4460_v1 = vsel %vm2311_vm3, %v4273_v23, 0.0  ;;  %v4275_v42 = vmul.f32 %v11887_v35, %v11887_v35 }
 0x705   : > { %v11867_v3 = vadd.f32 %v11361_v20, %v3830_v48  ;;  %v3755_v34 = vpop.f32.mrf.mxu1 }
 0x706   : > { %v4455_v47 = vadd.f32 %v4454_v5, %v4453_v2  ;;  %v4066_v62 = vadd.f32 %v4065_v27, %v4064_v21  ;;  %v11897_v32 = vadd.f32 %v11361_v20, %v3755_v34  ;;  %v11911_v5 = vadd.f32 %v11361_v20, %v11782_v61 }
 0x707   : > { %4771 = vxpose.xlu1.b32.cont [9/16] (narrow) %v11867_v3, 8  ;;  %4705 = vxpose.xlu2.b32.cont [7/16] (narrow) %v11798_v18, 8  ;;  %v4071_v18 = vsel %vm2311_vm3, %v11878_v4, 0.0  ;;  %v4462_v27 = vsel %vm2311_vm3, %v4274_v39, 0.0 }
 0x708   : > { %4746 = vxpose.xlu0.b32.end [16/16] (narrow) %v11864_v63, 8  ;;  %v4457_v9 = vadd.f32 %v4456_v30, %v4455_v47  ;;  %v4068_v13 = vadd.f32 %v4067_v22, %v4066_v62  ;;  %v4276_v47 = vmul.f32 %v11897_v32, %v11897_v32  ;;  %v4277_v30 = vmul.f32 %v11407_v11, %v11407_v11 }
 0x709   : > { %v4464_v22 = vsel %vm2311_vm3, %v4275_v42, 0.0  ;;  %v4075_v61 = vsel %vm2311_vm3, %v11897_v32, 0.0 }
 0x70a   : > { %v4459_v53 = vadd.f32 %v4458_v33, %v4457_v9  ;;  %v4070_v12 = vadd.f32 %v4069_v58, %v4068_v13  ;;  %v11907_v21 = vpop.f32.mrf.mxu3  ;;  %v4077_v13 = vsel %vm2311_vm3, %v11407_v11, 0.0  ;;  %v4278_v33 = vmul.f32 %v11427_v44, %v11427_v44 }
 0x70b   : > { %v4466_v58 = vsel %vm2311_vm3, %v4276_v47, 0.0 }
 0x70c   : > { %v3833_v19 = vpop.f32.mrf.mxu2  ;;  %v4461_v24 = vadd.f32 %v4460_v1, %v4459_v53  ;;  %v4072_v48 = vadd.f32 %v4071_v18, %v4070_v12  ;;  %v4468_v12 = vsel %vm2311_vm3, %v4277_v30, 0.0  ;;  %v4079_v1 = vsel %vm2311_vm3, %v11427_v44, 0.0 }
 0x70d   : > { %v11905_v2 = vadd.f32 %v11361_v20, %v3833_v19  ;;  %v11948_v44 = vadd.f32 %v11361_v20, %v11822_v43 }
 0x70e   : > { %v4463_v62 = vadd.f32 %v4462_v27, %v4461_v24  ;;  %v4074_v34 = vadd.f32 %v4073_v59, %v4072_v48  ;;  %v4470_v48 = vsel %vm2311_vm3, %v4278_v33, 0.0  ;;  %v4081_v27 = vsel %vm2311_vm3, %v11447_v25, 0.0  ;;  %v14893_v59 = vld [vmem:[#allocation283_spill] sm:$0xff]  ;;  %v14895_v33 = vld [vmem:[#allocation393_spill] sm:$0xff] }
 0x70f   : > { %4772 = vxpose.xlu1.b32.cont [10/16] (narrow) %v11905_v2, 8  ;;  %4706 = vxpose.xlu2.b32.cont [8/16] (narrow) %v11805_v51, 8  ;;  %v4279_v51 = vmul.f32 %v11447_v25, %v11447_v25  ;;  %v4280_v47 = vmul.f32 %v14893_v59, %v14893_v59 }
 0x710   : > { %4827 = vxpose.xlu0.b32.start [1/16] (narrow) %v11911_v5, 8  ;;  %v4465_v23 = vadd.f32 %v4464_v22, %v4463_v62  ;;  %v4076_v9 = vadd.f32 %v4075_v61, %v4074_v34  ;;  %v4083_v22 = vsel %vm2311_vm3, %v14893_v59, 0.0  ;;  %v14894_v61 = vld [vmem:[#allocation377_spill] sm:$0xff] }
 0x711   : > { %v4472_v30 = vsel %vm2311_vm3, %v4279_v51, 0.0  ;;  %v4474_v43 = vsel %vm2311_vm3, %v4280_v47, 0.0  ;;  %v4284_v47 = vmul.f32 %v11562_v45, %v11562_v45 }
 0x712   : > { %v4078_v39 = vadd.f32 %v4077_v13, %v4076_v9  ;;  %v4467_v53 = vadd.f32 %v4466_v58, %v4465_v23  ;;  %v11939_v24 = vpop.f32.mrf.mxu3  ;;  %v4281_v23 = vmul.f32 %v14894_v61, %v14894_v61  ;;  %v4085_v13 = vsel %vm2311_vm3, %v14894_v61, 0.0 }
 0x713   : > { %v4282_v58 = vmul.f32 %v14895_v33, %v14895_v33 }
 0x714   : > { %v3836_v18 = vpop.f32.mrf.mxu2  ;;  %v4080_v42 = vadd.f32 %v4079_v1, %v4078_v39  ;;  %v4469_v19 = vadd.f32 %v4468_v12, %v4467_v53  ;;  %v4476_v12 = vsel %vm2311_vm3, %v4281_v23, 0.0  ;;  %v4087_v1 = vsel %vm2311_vm3, %v14895_v33, 0.0 }
 0x715   : > { %v11937_v11 = vadd.f32 %v11361_v20, %v3836_v18  ;;  %v4091_v23 = vsel %vm2311_vm3, %v11562_v45, 0.0  ;;  %v4286_v33 = vmul.f32 %v11632_v40, %v11632_v40 }
 0x716   : > { %v4082_v62 = vadd.f32 %v4081_v27, %v4080_v42  ;;  %v4471_v34 = vadd.f32 %v4470_v48, %v4469_v19  ;;  %v4478_v27 = vsel %vm2311_vm3, %v4282_v58, 0.0 }
 0x717   : > { %4773 = vxpose.xlu1.b32.cont [11/16] (narrow) %v11937_v11, 8  ;;  %4707 = vxpose.xlu2.b32.cont [9/16] (narrow) %v11813_v37, 8  ;;  %v14896_v37 = vld [vmem:[#allocation423_spill] sm:$0xff] }
 0x718   : > { %4828 = vxpose.xlu0.b32.cont [2/16] (narrow) %v11948_v44, 8  ;;  %v4084_v25 = vadd.f32 %v4083_v22, %v4082_v62  ;;  %v4473_v9 = vadd.f32 %v4472_v30, %v4471_v34  ;;  %v4283_v51 = vmul.f32 %v14896_v37, %v14896_v37  ;;  %v4089_v59 = vsel %vm2311_vm3, %v14896_v37, 0.0 }
 0x719   : > { %v11978_v62 = vadd.f32 %v11361_v20, %v11869_v15 }
 0x71a   : > { %v4086_v39 = vadd.f32 %v4085_v13, %v4084_v25  ;;  %v4475_v53 = vadd.f32 %v4474_v43, %v4473_v9  ;;  %v11980_v22 = vpop.f32.mrf.mxu3  ;;  %v4480_v61 = vsel %vm2311_vm3, %v4283_v51, 0.0  ;;  %v4285_v25 = vmul.f32 %v11595_v17, %v11595_v17 }
 0x71b   : > { %v4482_v43 = vsel %vm2311_vm3, %v4284_v47, 0.0  ;;  %v4093_v13 = vsel %vm2311_vm3, %v11595_v17, 0.0  ;;  %v4486_v17 = vsel %vm2311_vm3, %v4286_v33, 0.0  ;;  %v4099_v47 = vsel %vm2311_vm3, %v11716_v7, 0.0 }
 0x71c   : > { %v3839_v18 = vpop.f32.mrf.mxu2  ;;  %v4088_v42 = vadd.f32 %v4087_v1, %v4086_v39  ;;  %v4477_v19 = vadd.f32 %v4476_v12, %v4475_v53  ;;  %v4484_v45 = vsel %vm2311_vm3, %v4285_v25, 0.0  ;;  %v4095_v53 = vsel %vm2311_vm3, %v11632_v40, 0.0 }
 0x71d   : > { %v11969_v48 = vadd.f32 %v11361_v20, %v3839_v18  ;;  %v4097_v18 = vsel %vm2311_vm3, %v11674_v31, 0.0  ;;  %v12010_v40 = vadd.f32 %v11361_v20, %v11907_v21 }
 0x71e   : > { %v4090_v34 = vadd.f32 %v4089_v59, %v4088_v42  ;;  %v4479_v30 = vadd.f32 %v4478_v27, %v4477_v19  ;;  %v4288_v42 = vmul.f32 %v11716_v7, %v11716_v7 }
 0x71f   : > { %4774 = vxpose.xlu1.b32.cont [12/16] (narrow) %v11969_v48, 8  ;;  %4708 = vxpose.xlu2.b32.cont [10/16] (narrow) %v11831_v10, 8  ;;  %v4287_v10 = vmul.f32 %v11674_v31, %v11674_v31 }
 0x720   : > { %4829 = vxpose.xlu0.b32.cont [3/16] (narrow) %v11978_v62, 8  ;;  %v4092_v15 = vadd.f32 %v4091_v23, %v4090_v34  ;;  %v4481_v9 = vadd.f32 %v4480_v61, %v4479_v30  ;;  %v4289_v34 = vmul.f32 %v11755_v60, %v11755_v60  ;;  %v4490_v21 = vsel %vm2311_vm3, %v4288_v42, 0.0 }
 0x721   : > { %v4488_v59 = vsel %vm2311_vm3, %v4287_v10, 0.0  ;;  %v4101_v61 = vsel %vm2311_vm3, %v11755_v60, 0.0  ;;  %v4290_v23 = vmul.f32 %v11787_v28, %v11787_v28  ;;  %v12035_v60 = vld [vmem:[%s12501_s2] ss:$0 sm:$0xff]  ;;  %v4109_v42 = vsel %vm2311_vm3, %v11565_v54, 0.0 }
 0x722   : > { %v4094_v58 = vadd.f32 %v4093_v13, %v4092_v15  ;;  %v4483_v39 = vadd.f32 %v4482_v43, %v4481_v9  ;;  %v4492_v15 = vsel %vm2311_vm3, %v4289_v34, 0.0  ;;  %v4291_v9 = vmul.f32 %v11817_v16, %v11817_v16 }
 0x723   : > { %v4295_v34 = vmul.f32 %v11622_v50, %v11622_v50 }
 0x724   : > { %v3842_v12 = vpop.f32.mrf.mxu2  ;;  %v4096_v1 = vadd.f32 %v4095_v53, %v4094_v58  ;;  %v4485_v37 = vadd.f32 %v4484_v45, %v4483_v39  ;;  %v4494_v39 = vsel %vm2311_vm3, %v4290_v23, 0.0  ;;  %v4105_v45 = vsel %vm2311_vm3, %v11817_v16, 0.0 }
 0x725   : > { %v12001_v51 = vadd.f32 %v11361_v20, %v3842_v12  ;;  %v12020_v20 = vpop.f32.mrf.mxu3  ;;  %v12047_v53 = vadd.f32 %v12035_v60, %v11939_v24  ;;  %v4113_v23 = vsel %vm2311_vm3, %v11622_v50, 0.0 }
 0x726   : > { %v4098_v19 = vadd.f32 %v4097_v18, %v4096_v1  ;;  %v4487_v27 = vadd.f32 %v4486_v17, %v4485_v37  ;;  %v4496_v1 = vsel %vm2311_vm3, %v4291_v9, 0.0  ;;  %v4107_v37 = vsel %vm2311_vm3, %v11864_v63, 0.0 }
 0x727   : > { %4775 = vxpose.xlu1.b32.cont [13/16] (narrow) %v12001_v51, 8  ;;  %4709 = vxpose.xlu2.b32.cont [11/16] (narrow) %v11841_v26, 8  ;;  %v4103_v26 = vsel %vm2311_vm3, %v11787_v28, 0.0  ;;  %v4292_v28 = vmul.f32 %v11864_v63, %v11864_v63  ;;  %v4293_v17 = vmul.f32 %v11565_v54, %v11565_v54  ;;  %v4115_v9 = vsel %vm2311_vm3, %v11664_v55, 0.0 }
 0x728   : > { %4830 = vxpose.xlu0.b32.cont [4/16] (narrow) %v12010_v40, 8  ;;  %v4100_v31 = vadd.f32 %v4099_v47, %v4098_v19  ;;  %v4489_v30 = vadd.f32 %v4488_v59, %v4487_v27  ;;  %v4294_v19 = vmul.f32 %v11587_v0, %v11587_v0 }
 0x729   : > { %v4498_v24 = vsel %vm2311_vm3, %v4292_v28, 0.0  ;;  %v4500_v47 = vsel %vm2311_vm3, %v4293_v17, 0.0 }
 0x72a   : > { %v4491_v7 = vadd.f32 %v4490_v21, %v4489_v30  ;;  %v4102_v25 = vadd.f32 %v4101_v61, %v4100_v31  ;;  %v4502_v54 = vsel %vm2311_vm3, %v4294_v19, 0.0 }
 0x72c   : > { %v3845_v43 = vpop.f32.mrf.mxu2  ;;  %v4104_v13 = vadd.f32 %v4103_v26, %v4102_v25  ;;  %v4493_v33 = vadd.f32 %v4492_v15, %v4491_v7  ;;  %v4296_v7 = vmul.f32 %v11664_v55, %v11664_v55  ;;  %v4504_v26 = vsel %vm2311_vm3, %v4295_v34, 0.0 }
 0x72d   : > { %v12038_v58 = vadd.f32 %v12035_v60, %v3845_v43  ;;  %v3923_v63 = vpop.f32.mrf.mxu3  ;;  %v4297_v43 = vmul.f32 %v11706_v8, %v11706_v8  ;;  %v4125_v34 = vsel %vm2311_vm3, %v11867_v3, 0.0 }
 0x72e   : > { %v4106_v10 = vadd.f32 %v4105_v45, %v4104_v13  ;;  %v4495_v12 = vadd.f32 %v4494_v39, %v4493_v33  ;;  %v4117_v33 = vsel %vm2311_vm3, %v11706_v8, 0.0  ;;  %v4298_v39 = vmul.f32 %v11745_v29, %v11745_v29 }
 0x72f   : > { %4776 = vxpose.xlu1.b32.cont [14/16] (narrow) %v12038_v58, 8  ;;  %4710 = vxpose.xlu2.b32.cont [12/16] (narrow) %v11851_v36, 8  ;;  %v4111_v36 = vsel %vm2311_vm3, %v11587_v0, 0.0  ;;  %v12077_v0 = vadd.f32 %v12035_v60, %v11980_v22  ;;  %v4506_v22 = vsel %vm2311_vm3, %v4296_v7, 0.0  ;;  %v4508_v55 = vsel %vm2311_vm3, %v4297_v43, 0.0 }
 0x730   : > { %4831 = vxpose.xlu0.b32.cont [5/16] (narrow) %v12047_v53, 8  ;;  %v4108_v16 = vadd.f32 %v4107_v37, %v4106_v10  ;;  %v4497_v18 = vadd.f32 %v4496_v1, %v4495_v12  ;;  %v4119_v10 = vsel %vm2311_vm3, %v11745_v29, 0.0  ;;  %v4510_v8 = vsel %vm2311_vm3, %v4298_v39, 0.0 }
 0x731   : > { %v12105_v29 = vadd.f32 %v12035_v60, %v12020_v20  ;;  %v4133_v39 = vsel %vm2311_vm3, %v12001_v51, 0.0 }
 0x732   : > { %v4110_v27 = vadd.f32 %v4109_v42, %v4108_v16  ;;  %v4499_v59 = vadd.f32 %v4498_v24, %v4497_v18  ;;  %v4121_v18 = vsel %vm2311_vm3, %v11780_v52, 0.0  ;;  %v4300_v24 = vmul.f32 %v11820_v38, %v11820_v38 }
 0x734   : > { %v3848_v31 = vpop.f32.mrf.mxu2  ;;  %v4112_v30 = vadd.f32 %v4111_v36, %v4110_v27  ;;  %v4501_v21 = vadd.f32 %v4500_v47, %v4499_v59  ;;  %v4123_v59 = vsel %vm2311_vm3, %v11820_v38, 0.0  ;;  %v4301_v47 = vmul.f32 %v11867_v3, %v11867_v3 }
 0x735   : > { %v12068_v61 = vadd.f32 %v12035_v60, %v3848_v31  ;;  %v3926_v17 = vpop.f32.mrf.mxu3  ;;  %v4514_v20 = vsel %vm2311_vm3, %v4300_v24, 0.0  ;;  %v4302_v31 = vmul.f32 %v11905_v2, %v11905_v2  ;;  %v4129_v3 = vsel %vm2311_vm3, %v11937_v11, 0.0 }
 0x736   : > { %v4114_v25 = vadd.f32 %v4113_v23, %v4112_v30  ;;  %v4503_v15 = vadd.f32 %v4502_v54, %v4501_v21  ;;  %v4516_v38 = vsel %vm2311_vm3, %v4301_v47, 0.0  ;;  %v4127_v54 = vsel %vm2311_vm3, %v11905_v2, 0.0  ;;  %v14899_v47 = vld [vmem:[#allocation271_spill] sm:$0xff] }
 0x737   : > { %4777 = vxpose.xlu1.b32.cont [15/16] (narrow) %v12068_v61, 8  ;;  %4711 = vxpose.xlu2.b32.cont [13/16] (narrow) %v11860_v56, 8  ;;  %v4299_v56 = vmul.f32 %v11780_v52, %v11780_v52  ;;  %v4137_v24 = vsel %vm2311_vm3, %v12068_v61, 0.0 }
 0x738   : > { %4832 = vxpose.xlu0.b32.cont [6/16] (narrow) %v12077_v0, 8  ;;  %v4116_v50 = vadd.f32 %v4115_v9, %v4114_v25  ;;  %v4505_v13 = vadd.f32 %v4504_v26, %v4503_v15  ;;  %v4518_v25 = vsel %vm2311_vm3, %v4302_v31, 0.0  ;;  %v4304_v15 = vmul.f32 %v11969_v48, %v11969_v48 }
 0x739   : > { %v4512_v27 = vsel %vm2311_vm3, %v4299_v56, 0.0  ;;  %v12130_v26 = vadd.f32 %v12035_v60, %v3923_v63 }
 0x73a   : > { %v4118_v45 = vadd.f32 %v4117_v33, %v4116_v50  ;;  %v4507_v28 = vadd.f32 %v4506_v22, %v4505_v13  ;;  %v4131_v13 = vsel %vm2311_vm3, %v11969_v48, 0.0  ;;  %v4305_v22 = vmul.f32 %v12001_v51, %v12001_v51  ;;  %v14897_v48 = vld [vmem:[#allocation261_spill] sm:$0xff] }
 0x73b   : > { %v4522_v63 = vsel %vm2311_vm3, %v4304_v15, 0.0 }
 0x73c   : > { %v3851_v12 = vpop.f32.mrf.mxu2  ;;  %v4120_v1 = vadd.f32 %v4119_v10, %v4118_v45  ;;  %v4509_v37 = vadd.f32 %v4508_v55, %v4507_v28  ;;  %v4306_v45 = vmul.f32 %v12038_v58, %v12038_v58  ;;  %v3855_v10 = vadd.f32 %v12035_v60, %v14897_v48  ;;  %v14903_v48 = vld [vmem:[#allocation326_spill] sm:$0xff] }
 0x73d   : > { %v3852_v16 = vadd.f32 %v12035_v60, %v3851_v12  ;;  %v3929_v50 = vpop.f32.mrf.mxu3  ;;  %v4524_v56 = vsel %vm2311_vm3, %v4305_v22, 0.0  ;;  %v4307_v12 = vmul.f32 %v12068_v61, %v12068_v61  ;;  %v14902_v22 = vld [vmem:[#allocation282_spill] sm:$0xff] }
 0x73e   : > { %v4122_v42 = vadd.f32 %v4121_v18, %v4120_v1  ;;  %v4511_v19 = vadd.f32 %v4510_v8, %v4509_v37  ;;  %v14898_v1 = vld [vmem:[#allocation266_spill] sm:$0xff]  ;;  %v4526_v18 = vsel %vm2311_vm3, %v4306_v45, 0.0 }
 0x73f   : > { %4778 = vxpose.xlu1.b32.end [16/16] (narrow) %v3852_v16, 8  ;;  %4712 = vxpose.xlu2.b32.cont [14/16] (narrow) %v11878_v4, 8  ;;  %v4303_v4 = vmul.f32 %v11937_v11, %v11937_v11  ;;  %v12153_v37 = vadd.f32 %v12035_v60, %v14898_v1 }
 0x740   : > { %4833 = vxpose.xlu0.b32.cont [7/16] (narrow) %v12105_v29, 8  ;;  %v4124_v52 = vadd.f32 %v4123_v59, %v4122_v42  ;;  %v4513_v36 = vadd.f32 %v4512_v27, %v4511_v19  ;;  %v12159_v42 = vadd.f32 %v12035_v60, %v3926_v17  ;;  %v4308_v19 = vmul.f32 %v3852_v16, %v3852_v16 }
 0x741   : > { %v4520_v2 = vsel %vm2311_vm3, %v4303_v4, 0.0  ;;  %v4309_v59 = vmul.f32 %v3855_v10, %v3855_v10  ;;  %v4310_v61 = vmul.f32 %v12153_v37, %v12153_v37 }
 0x742   : > { %v4126_v30 = vadd.f32 %v4125_v34, %v4124_v52  ;;  %v4515_v21 = vadd.f32 %v4514_v20, %v4513_v36  ;;  %v12163_v52 = vadd.f32 %v12035_v60, %v14899_v47  ;;  %v4528_v36 = vsel %vm2311_vm3, %v4307_v12, 0.0  ;;  %v14905_v47 = vld [vmem:[#allocation178_spill] sm:$0xff] }
 0x743   : > { %v4139_v20 = vsel %vm2311_vm3, %v3852_v16, 0.0  ;;  %v4534_v15 = vsel %vm2311_vm3, %v4310_v61, 0.0 }
 0x744   : > { %v4128_v23 = vadd.f32 %v4127_v54, %v4126_v30  ;;  %v4517_v7 = vadd.f32 %v4516_v38, %v4515_v21  ;;  %v4141_v30 = vsel %vm2311_vm3, %v3855_v10, 0.0  ;;  %v14900_v21 = vld [vmem:[#allocation277_spill] sm:$0xff]  ;;  %v4530_v54 = vsel %vm2311_vm3, %v4308_v19, 0.0 }
 0x745   : > { %v3932_v31 = vpop.f32.mrf.mxu3  ;;  %v12174_v38 = vadd.f32 %v12035_v60, %v14900_v21 }
 0x746   : > { %v4519_v9 = vadd.f32 %v4518_v25, %v4517_v7  ;;  %v4130_v43 = vadd.f32 %v4129_v3, %v4128_v23  ;;  %v4143_v23 = vsel %vm2311_vm3, %v12153_v37, 0.0  ;;  %v4311_v7 = vmul.f32 %v12163_v52, %v12163_v52  ;;  %v14901_v25 = vld [vmem:[#allocation281_spill] sm:$0xff] }
 0x747   : > { %4713 = vxpose.xlu2.b32.cont [15/16] (narrow) %v11887_v35, 8  ;;  %v4135_v35 = vsel %vm2311_vm3, %v12038_v58, 0.0  ;;  %v12184_v3 = vadd.f32 %v12035_v60, %v14901_v25 }
 0x748   : > { %4834 = vxpose.xlu0.b32.cont [8/16] (narrow) %v12130_v26, 8  ;;  %v4521_v11 = vadd.f32 %v4520_v2, %v4519_v9  ;;  %v4132_v33 = vadd.f32 %v4131_v13, %v4130_v43  ;;  %v4145_v2 = vsel %vm2311_vm3, %v12163_v52, 0.0  ;;  %v4312_v13 = vmul.f32 %v12174_v38, %v12174_v38 }
 0x749   : > { %v4536_v45 = vsel %vm2311_vm3, %v4311_v7, 0.0  ;;  %v4149_v1 = vsel %vm2311_vm3, %v12184_v3, 0.0 }
 0x74a   : > { %v4523_v28 = vadd.f32 %v4522_v63, %v4521_v11  ;;  %v4134_v55 = vadd.f32 %v4133_v39, %v4132_v33  ;;  %v12193_v11 = vadd.f32 %v12035_v60, %v14902_v22  ;;  %v12196_v33 = vadd.f32 %v12035_v60, %v3929_v50 }
 0x74b   : > { %v4538_v12 = vsel %vm2311_vm3, %v4312_v13, 0.0  ;;  %v12256_v22 = vadd.f32 %v12035_v60, %v11589_v57 }
 0x74c   : > { %v4525_v51 = vadd.f32 %v4524_v56, %v4523_v28  ;;  %v4136_v8 = vadd.f32 %v4135_v35, %v4134_v55  ;;  %v4147_v28 = vsel %vm2311_vm3, %v12174_v38, 0.0  ;;  %v4313_v55 = vmul.f32 %v12184_v3, %v12184_v3 }
 0x74d   : > { %v12205_v56 = vadd.f32 %v12035_v60, %v14903_v48 }
 0x74e   : > { %v4527_v27 = vadd.f32 %v4526_v18, %v4525_v51  ;;  %v4138_v58 = vadd.f32 %v4137_v24, %v4136_v8  ;;  %v4314_v51 = vmul.f32 %v12193_v11, %v12193_v11  ;;  %v14904_v8 = vld [vmem:[#allocation330_spill] sm:$0xff] }
 0x74f   : > { %4714 = vxpose.xlu2.b32.end [16/16] (narrow) %v11897_v32, 8  ;;  %v4532_v32 = vsel %vm2311_vm3, %v4309_v59, 0.0  ;;  %v12215_v18 = vadd.f32 %v12035_v60, %v14904_v8  ;;  %v4315_v59 = vmul.f32 %v12205_v56, %v12205_v56  ;;  %v4153_v21 = vsel %vm2311_vm3, %v12205_v56, 0.0 }
 0x750   : > { %4835 = vxpose.xlu0.b32.cont [9/16] (narrow) %v12159_v42, 8  ;;  %v4529_v17 = vadd.f32 %v4528_v36, %v4527_v27  ;;  %v4140_v34 = vadd.f32 %v4139_v20, %v4138_v58  ;;  %v3935_v27 = vpop.f32.mrf.mxu3  ;;  %v4151_v58 = vsel %vm2311_vm3, %v12193_v11, 0.0  ;;  %v12224_v36 = vadd.f32 %v12035_v60, %v14905_v47  ;;  %v14906_v20 = vld [vmem:[#allocation173_spill] sm:$0xff] }
 0x751   : > { %v12228_v61 = vadd.f32 %v12035_v60, %v14906_v20  ;;  %v4155_v7 = vsel %vm2311_vm3, %v12215_v18, 0.0 }
 0x752   : > { %v4142_v4 = vadd.f32 %v4141_v30, %v4140_v34  ;;  %v4531_v16 = vadd.f32 %v4530_v54, %v4529_v17  ;;  %v4542_v30 = vsel %vm2311_vm3, %v4314_v51, 0.0  ;;  %v4316_v54 = vmul.f32 %v12215_v18, %v12215_v18 }
 0x753   : > { %v4317_v25 = vmul.f32 %v12224_v36, %v12224_v36  ;;  %v4157_v13 = vsel %vm2311_vm3, %v12224_v36, 0.0  ;;  %v12277_v51 = vadd.f32 %v12035_v60, %v3935_v27 }
 0x754   : > { %v4144_v9 = vadd.f32 %v4143_v23, %v4142_v4  ;;  %v4533_v43 = vadd.f32 %v4532_v32, %v4531_v16  ;;  %v12236_v4 = vadd.f32 %v12035_v60, %v3932_v31  ;;  %v4544_v23 = vsel %vm2311_vm3, %v4315_v59, 0.0 }
 0x755   : > { %v4318_v31 = vmul.f32 %v12228_v61, %v12228_v61 }
 0x756   : > { %v4146_v63 = vadd.f32 %v4145_v2, %v4144_v9  ;;  %v4535_v39 = vadd.f32 %v4534_v15, %v4533_v43  ;;  %v12245_v15 = vadd.f32 %v12035_v60, %v11567_v49  ;;  %v4546_v2 = vsel %vm2311_vm3, %v4316_v54, 0.0 }
 0x757   : > { %4795 = vxpose.xlu2.b32.start [1/16] (narrow) %v3855_v10, 8  ;;  %v4540_v10 = vsel %vm2311_vm3, %v4313_v55, 0.0  ;;  %v4550_v55 = vsel %vm2311_vm3, %v4318_v31, 0.0 }
 0x758   : > { %4836 = vxpose.xlu0.b32.cont [10/16] (narrow) %v12196_v33, 8  ;;  %v4148_v35 = vadd.f32 %v4147_v28, %v4146_v63  ;;  %v4537_v50 = vadd.f32 %v4536_v45, %v4535_v39  ;;  %v4159_v39 = vsel %vm2311_vm3, %v12228_v61, 0.0  ;;  %v4319_v45 = vmul.f32 %v12245_v15, %v12245_v15  ;;  %v3938_v57 = vpop.f32.mrf.mxu3 }
 0x759   : > { %v12265_v28 = vadd.f32 %v12035_v60, %v11624_v14 }
 0x75a   : > { %v4150_v24 = vadd.f32 %v4149_v1, %v4148_v35  ;;  %v4539_v19 = vadd.f32 %v4538_v12, %v4537_v50  ;;  %v4161_v50 = vsel %vm2311_vm3, %v12245_v15, 0.0  ;;  %v4320_v12 = vmul.f32 %v12256_v22, %v12256_v22 }
 0x75b   : > { %v12274_v1 = vadd.f32 %v12035_v60, %v11666_v46  ;;  %v4165_v47 = vsel %vm2311_vm3, %v12265_v28, 0.0 }
 0x75c   : > { %v4152_v17 = vadd.f32 %v4151_v58, %v4150_v24  ;;  %v4541_v34 = vadd.f32 %v4540_v10, %v4539_v19  ;;  %v4552_v24 = vsel %vm2311_vm3, %v4319_v45, 0.0  ;;  %v4163_v19 = vsel %vm2311_vm3, %v12256_v22, 0.0 }
 0x75d   : > { %v4321_v10 = vmul.f32 %v12265_v28, %v12265_v28  ;;  %v12286_v58 = vadd.f32 %v12035_v60, %v11708_v41  ;;  %v4554_v59 = vsel %vm2311_vm3, %v4320_v12, 0.0  ;;  %v4322_v20 = vmul.f32 %v12274_v1, %v12274_v1 }
 0x75e   : > { %v4154_v16 = vadd.f32 %v4153_v21, %v4152_v17  ;;  %v4543_v32 = vadd.f32 %v4542_v30, %v4541_v34  ;;  %v12297_v17 = vadd.f32 %v12035_v60, %v11747_v6  ;;  %v4167_v30 = vsel %vm2311_vm3, %v12274_v1, 0.0 }
 0x75f   : > { %4796 = vxpose.xlu2.b32.cont [2/16] (narrow) %v12153_v37, 8  ;;  %v4548_v37 = vsel %vm2311_vm3, %v4317_v25, 0.0  ;;  %v4323_v21 = vmul.f32 %v12286_v58, %v12286_v58  ;;  %v4326_v45 = vmul.f32 %v11948_v44, %v11948_v44 }
 0x760   : > { %4837 = vxpose.xlu0.b32.cont [11/16] (narrow) %v12236_v4, 8  ;;  %v4156_v9 = vadd.f32 %v4155_v7, %v4154_v16  ;;  %v4545_v43 = vadd.f32 %v4544_v23, %v4543_v32  ;;  %v4558_v32 = vsel %vm2311_vm3, %v4322_v20, 0.0  ;;  %v4169_v23 = vsel %vm2311_vm3, %v12286_v58, 0.0 }
 0x761   : > { %v4324_v6 = vmul.f32 %v12297_v17, %v12297_v17  ;;  %v12310_v7 = vadd.f32 %v12035_v60, %v3938_v57  ;;  %v4175_v57 = vsel %vm2311_vm3, %v11948_v44, 0.0 }
 0x762   : > { %v4158_v49 = vadd.f32 %v4157_v13, %v4156_v9  ;;  %v4547_v63 = vadd.f32 %v4546_v2, %v4545_v43  ;;  %v3941_v9 = vpop.f32.mrf.mxu3  ;;  %v4560_v43 = vsel %vm2311_vm3, %v4323_v21, 0.0  ;;  %v4171_v2 = vsel %vm2311_vm3, %v12297_v17, 0.0 }
 0x763   : > { %v4325_v13 = vmul.f32 %v11911_v5, %v11911_v5  ;;  %v4331_v21 = vmul.f32 %v12105_v29, %v12105_v29 }
 0x764   : > { %v4160_v48 = vadd.f32 %v4159_v39, %v4158_v49  ;;  %v4549_v35 = vadd.f32 %v4548_v37, %v4547_v63  ;;  %v4562_v37 = vsel %vm2311_vm3, %v4324_v6, 0.0  ;;  %v4173_v39 = vsel %vm2311_vm3, %v11911_v5, 0.0 }
 0x765   : > { %v4177_v5 = vsel %vm2311_vm3, %v11978_v62, 0.0 }
 0x766   : > { %v4162_v14 = vadd.f32 %v4161_v50, %v4160_v48  ;;  %v4551_v8 = vadd.f32 %v4550_v55, %v4549_v35  ;;  %v4564_v35 = vsel %vm2311_vm3, %v4325_v13, 0.0 }
 0x767   : > { %4797 = vxpose.xlu2.b32.cont [3/16] (narrow) %v12163_v52, 8  ;;  %v4556_v52 = vsel %vm2311_vm3, %v4321_v10, 0.0 }
 0x768   : > { %4838 = vxpose.xlu0.b32.cont [12/16] (narrow) %v12277_v51, 8  ;;  %v4164_v46 = vadd.f32 %v4163_v19, %v4162_v14  ;;  %v4553_v27 = vadd.f32 %v4552_v24, %v4551_v8  ;;  %v4566_v14 = vsel %vm2311_vm3, %v4326_v45, 0.0  ;;  %v4328_v8 = vmul.f32 %v12010_v40, %v12010_v40 }
 0x769   : > { %v12335_v24 = vadd.f32 %v12035_v60, %v3941_v9  ;;  %v4576_v9 = vsel %vm2311_vm3, %v4331_v21, 0.0 }
 0x76a   : > { %v4555_v41 = vadd.f32 %v4554_v59, %v4553_v27  ;;  %v4166_v34 = vadd.f32 %v4165_v47, %v4164_v46  ;;  %v4179_v46 = vsel %vm2311_vm3, %v12010_v40, 0.0  ;;  %v4329_v27 = vmul.f32 %v12047_v53, %v12047_v53  ;;  %v3944_v47 = vpop.f32.mrf.mxu3 }
 0x76b   : > { %v4570_v20 = vsel %vm2311_vm3, %v4328_v8, 0.0  ;;  %v3945_v6 = vadd.f32 %v12035_v60, %v3944_v47  ;;  %v4337_v8 = vmul.f32 %v12310_v7, %v12310_v7 }
 0x76c   : > { %v4168_v54 = vadd.f32 %v4167_v30, %v4166_v34  ;;  %v4557_v16 = vadd.f32 %v4556_v52, %v4555_v41  ;;  %v4181_v41 = vsel %vm2311_vm3, %v12047_v53, 0.0  ;;  %v4330_v34 = vmul.f32 %v12077_v0, %v12077_v0 }
 0x76d   : > { %v4572_v30 = vsel %vm2311_vm3, %v4329_v27, 0.0  ;;  %v4185_v53 = vsel %vm2311_vm3, %v12105_v29, 0.0 }
 0x76e   : > { %v4170_v25 = vadd.f32 %v4169_v23, %v4168_v54  ;;  %v4559_v31 = vadd.f32 %v4558_v32, %v4557_v16  ;;  %v4574_v32 = vsel %vm2311_vm3, %v4330_v34, 0.0  ;;  %v4332_v23 = vmul.f32 %v12130_v26, %v12130_v26 }
 0x76f   : > { %4798 = vxpose.xlu2.b32.cont [4/16] (narrow) %v12174_v38, 8  ;;  %v4327_v38 = vmul.f32 %v11978_v62, %v11978_v62 }
 0x770   : > { %4839 = vxpose.xlu0.b32.cont [13/16] (narrow) %v12310_v7, 8  ;;  %v4172_v49 = vadd.f32 %v4171_v2, %v4170_v25  ;;  %v4561_v63 = vadd.f32 %v4560_v43, %v4559_v31  ;;  %v4333_v43 = vmul.f32 %v12159_v42, %v12159_v42  ;;  %v4578_v13 = vsel %vm2311_vm3, %v4332_v23, 0.0 }
 0x771   : > { %v4568_v44 = vsel %vm2311_vm3, %v4327_v38, 0.0  ;;  %v4336_v38 = vmul.f32 %v12277_v51, %v12277_v51 }
 0x772   : > { %v4174_v55 = vadd.f32 %v4173_v39, %v4172_v49  ;;  %v4563_v48 = vadd.f32 %v4562_v37, %v4561_v63  ;;  %v4189_v49 = vsel %vm2311_vm3, %v12159_v42, 0.0  ;;  %v4334_v63 = vmul.f32 %v12196_v33, %v12196_v33  ;;  %v3947_v45 = vpop.f32.mrf.mxu3 }
 0x773   : > { %v4193_v42 = vsel %vm2311_vm3, %v12236_v4, 0.0 }
 0x774   : > { %v4176_v50 = vadd.f32 %v4175_v57, %v4174_v55  ;;  %v4565_v12 = vadd.f32 %v4564_v35, %v4563_v48  ;;  %v4191_v55 = vsel %vm2311_vm3, %v12196_v33, 0.0  ;;  %v4582_v57 = vsel %vm2311_vm3, %v4334_v63, 0.0 }
 0x775   : > { %v4195_v33 = vsel %vm2311_vm3, %v12277_v51, 0.0  ;;  %v4588_v51 = vsel %vm2311_vm3, %v4337_v8, 0.0 }
 0x776   : > { %v4178_v19 = vadd.f32 %v4177_v5, %v4176_v50  ;;  %v4567_v10 = vadd.f32 %v4566_v14, %v4565_v12  ;;  %v3948_v50 = vadd.f32 %v12035_v60, %v3947_v45  ;;  %v4197_v60 = vsel %vm2311_vm3, %v12310_v7, 0.0 }
 0x777   : > { %4799 = vxpose.xlu2.b32.cont [5/16] (narrow) %v12184_v3, 8  ;;  %v4183_v3 = vsel %vm2311_vm3, %v12077_v0, 0.0  ;;  %v4187_v0 = vsel %vm2311_vm3, %v12130_v26, 0.0  ;;  %v4580_v26 = vsel %vm2311_vm3, %v4333_v43, 0.0 }
 0x778   : > { %4840 = vxpose.xlu0.b32.cont [14/16] (narrow) %v12335_v24, 8  ;;  %v4180_v62 = vadd.f32 %v4179_v46, %v4178_v19  ;;  %v4569_v59 = vadd.f32 %v4568_v44, %v4567_v10  ;;  %v4586_v10 = vsel %vm2311_vm3, %v4336_v38, 0.0  ;;  %v4338_v44 = vmul.f32 %v12335_v24, %v12335_v24 }
 0x779   : > { %v4340_v34 = vmul.f32 %v3948_v50, %v3948_v50 }
 0x77a   : > { %v4182_v52 = vadd.f32 %v4181_v41, %v4180_v62  ;;  %v4571_v40 = vadd.f32 %v4570_v20, %v4569_v59  ;;  %v4199_v62 = vsel %vm2311_vm3, %v12335_v24, 0.0  ;;  %v4339_v59 = vmul.f32 %v3945_v6, %v3945_v6 }
 0x77b   : > { %v4590_v20 = vsel %vm2311_vm3, %v4338_v44, 0.0  ;;  %v4201_v41 = vsel %vm2311_vm3, %v3945_v6, 0.0  ;;  %v4594_v21 = vsel %vm2311_vm3, %v4340_v34, 0.0 }
 0x77c   : > { %v4184_v54 = vadd.f32 %v4183_v3, %v4182_v52  ;;  %v4573_v16 = vadd.f32 %v4572_v30, %v4571_v40  ;;  %v4592_v40 = vsel %vm2311_vm3, %v4339_v59, 0.0  ;;  %v4203_v30 = vsel %vm2311_vm3, %v3948_v50, 0.0 }
 0x77e   : > { %v4186_v25 = vadd.f32 %v4185_v53, %v4184_v54  ;;  %v4575_v31 = vadd.f32 %v4574_v32, %v4573_v16 }
 0x77f   : > { %4800 = vxpose.xlu2.b32.cont [6/16] (narrow) %v12193_v11, 8  ;;  %v4335_v11 = vmul.f32 %v12236_v4, %v12236_v4 }
 0x780   : > { %4841 = vxpose.xlu0.b32.cont [15/16] (narrow) %v3945_v6, 8  ;;  %v4188_v2 = vadd.f32 %v4187_v0, %v4186_v25  ;;  %v4577_v29 = vadd.f32 %v4576_v9, %v4575_v31 }
 0x781   : > { %v4584_v5 = vsel %vm2311_vm3, %v4335_v11, 0.0 }
 0x782   : > { %v4190_v37 = vadd.f32 %v4189_v49, %v4188_v2  ;;  %v4579_v39 = vadd.f32 %v4578_v13, %v4577_v29 }
 0x784   : > { %v4192_v48 = vadd.f32 %v4191_v55, %v4190_v37  ;;  %v4581_v35 = vadd.f32 %v4580_v26, %v4579_v39 }
 0x786   : > { %v4583_v12 = vadd.f32 %v4582_v57, %v4581_v35  ;;  %v4194_v14 = vadd.f32 %v4193_v42, %v4192_v48 }
 0x787   : > { %4801 = vxpose.xlu2.b32.cont [7/16] (narrow) %v12205_v56, 8 }
 0x788   : > { %4842 = vxpose.xlu0.b32.end [16/16] (narrow) %v3948_v50, 8  ;;  %v4585_v19 = vadd.f32 %v4584_v5, %v4583_v12  ;;  %v4196_v4 = vadd.f32 %v4195_v33, %v4194_v14 }
 0x78a   : > { %v4587_v46 = vadd.f32 %v4586_v10, %v4585_v19  ;;  %v4198_v27 = vadd.f32 %v4197_v60, %v4196_v4 }
 0x78c   : > { %v4589_v56 = vadd.f32 %v4588_v51, %v4587_v46  ;;  %v4200_v47 = vadd.f32 %v4199_v62, %v4198_v27 }
 0x78e   : > { %v4591_v7 = vadd.f32 %v4590_v20, %v4589_v56  ;;  %v4202_v52 = vadd.f32 %v4201_v41, %v4200_v47 }
 0x78f   : > { %4802 = vxpose.xlu2.b32.cont [8/16] (narrow) %v12215_v18, 8 }
 0x790   : > { %v4593_v24 = vadd.f32 %v4592_v40, %v4591_v7  ;;  %v4204_v3 = vadd.f32 %v4203_v30, %v4202_v52 }
 0x792   : > { %v4205_v54 = vrot.slane %v4204_v3, 4  ;;  %v4595_v16 = vadd.f32 %v4594_v21, %v4593_v24 }
 0x794   : > { %v4206_v32 = vadd.f32 %v4205_v54, %v4204_v3  ;;  %v4596_v53 = vrot.slane %v4595_v16, 4 }
 0x796   : > { %v4207_v23 = vrot.slane %v4206_v32, 2  ;;  %v4597_v6 = vadd.f32 %v4596_v53, %v4595_v16 }
 0x797   : > { %4803 = vxpose.xlu2.b32.cont [9/16] (narrow) %v12224_v36, 8 }
 0x798   : > { %v4598_v18 = vrot.slane %v4597_v6, 2  ;;  %v4208_v25 = vadd.f32 %v4207_v23, %v4206_v32 }
 0x79a   : > { %v4599_v31 = vadd.f32 %v4598_v18, %v4597_v6  ;;  %v4209_v9 = vrot.slane %v4208_v25, 1 }
 0x79c   : > { %v4210_v36 = vadd.f32 %v4209_v9, %v4208_v25  ;;  %v4600_v0 = vrot.slane %v4599_v31, 1 }
 0x79e   : > { %4212 = vst.msk [vmem:[%s227_s13] sm:$0x1] %vm4211_vm12, %v4210_v36  ;;  %v4601_v43 = vadd.f32 %v4600_v0, %v4599_v31 }
 0x79f   : > { %4804 = vxpose.xlu2.b32.cont [10/16] (narrow) %v12228_v61, 8 }
 0x7a0   : > { %5378 = shalt.err (!%p5375_p3)
}
 0x7a1   : > { %5188 = dma.vmem_to_hbm [thread:$0]  (%p5554_p5), %s4903_s14, 16, %s4905_s15, %s4873_s25   ;;  %4602 = vst.msk [vmem:[%s233_s10] sm:$0x1] %vm4211_vm12, %v4601_v43 }
 0x7a2   : > { %s5393_s8 = sshra.s32 %s4918_s17, 4  ;;  %s5399_s6 = scalar_lea.hbm %s12504_s5, 2  ;;  %s5394_s8 = int_to_ptr.hbm [resolvable:$true] %s5393_s8 }
 0x7a3   : > { %s5395_s13 = scalar_lea.hbm %s5394_s8, 1  ;;  %p5400_p9 = scmp.lt.s32.totalorder %s5394_s8, %s12504_s5 }
 0x7a4   : > { %p5396_p4 = scmp.ne.s32.totalorder %s5394_s8, %s5395_s13  ;;  %p5401_p10 = scmp.lt.s32.totalorder %s5399_s6, %s5395_s13 }
 0x7a6   : > { %p5397_p7 = pnand %p5396_p4, %p5554_p5  ;;  %p5402_p11 = por %p5401_p10, %p5400_p9 }
 0x7a8   : > { %p5398_p8 = pneg %p5397_p7 }
 0x7aa   : > { %p5403_p12 = pnand %p5402_p11, %p5398_p8 }
 0x7ac   : > { %5406 = shalt.err (!%p5403_p12)
}
 0x7ad   : > { %5189 = dma.vmem_to_hbm [thread:$0]  (%p5554_p5), %s4916_s16, 16, %s4918_s17, %s4873_s25   ;;  %4805 = vxpose.xlu2.b32.cont [11/16] (narrow) %v12245_v15, 8  ;;  %v4651_v61 = vpop.trf.xlu2  ;;  %v4683_v2 = vpop.trf.xlu0 }
 0x7ae   : > { %s5034_s14 = sshll.u32 %s12403_s26, 6  ;;  %v4619_v29 = vpop.trf.xlu1  ;;  %s5170_s10 = sshll.u32 %s5535_s22, 6 }
 0x7af   : > { %s221_s15 = scalar_lea.vmem [#allocation2], %s5034_s14  ;;  %s4887_s25 = scalar_lea.hbm %s12502_s3, %s5170_s10 }
 0x7b0   : > { %4860 = vst [vmem:[%s221_s15 + $0x8] sm:$0xff] %v4651_v61  ;;  %s4889_s11 = sshll.u32 %s221_s15, 4  ;;  %s4891_s12 = sshll.u32 %s4887_s25, 4  ;;  %s4890_s11 = int_to_ptr.vmem [resolvable:$true] %s4889_s11  ;;  %s4892_s12 = int_to_ptr.hbm [resolvable:$true] %s4891_s12 }
 0x7b1   : > { %4861 = vst [vmem:[%s221_s15 + $0x10] sm:$0xff] %v4683_v2  ;;  %s4868_s8 = scalar_lea.sflag [#allocation3], %s12403_s26  ;;  %s5421_s13 = sshra.s32 %s4892_s12, 4  ;;  %s5422_s13 = int_to_ptr.hbm [resolvable:$true] %s5421_s13 }
 0x7b2   : > { %4859 = vst [vmem:[%s221_s15] sm:$0xff] %v4619_v29  ;;  %s5423_s23 = scalar_lea.hbm %s5422_s13, 64  ;;  %s5427_s6 = scalar_lea.hbm %s12502_s3, 128 }
 0x7b3   : > { %p5424_p13 = scmp.ne.s32.totalorder %s5422_s13, %s5423_s23  ;;  %p5428_p2 = scmp.lt.s32.totalorder %s5422_s13, %s12502_s3 }
 0x7b4   : > { %p5429_p3 = scmp.lt.s32.totalorder %s5427_s6, %s5423_s23 }
 0x7b5   : > { %4806 = vxpose.xlu2.b32.cont [12/16] (narrow) %v12256_v22, 8  ;;  %v4715_v13 = vpop.trf.xlu2  ;;  %v4747_v49 = vpop.trf.xlu0  ;;  %p5425_p0 = pnand %p5424_p13, %p5554_p5 }
 0x7b6   : > { %4862 = vst [vmem:[%s221_s15 + $0x18] sm:$0xff] %v4715_v13  ;;  %v4779_v63 = vpop.trf.xlu1  ;;  %p5430_p4 = por %p5429_p3, %p5428_p2 }
 0x7b7   : > { %4863 = vst [vmem:[%s221_s15 + $0x20] sm:$0xff] %v4747_v49  ;;  %p5426_p1 = pneg %p5425_p0 }
 0x7b8   : > { %4864 = vst [vmem:[%s221_s15 + $0x28] sm:$0xff] %v4779_v63 }
 0x7b9   : > { %p5431_p7 = pnand %p5430_p4, %p5426_p1 }
 0x7bd   : > { %4807 = vxpose.xlu2.b32.cont [13/16] (narrow) %v12265_v28, 8  ;;  %v4843_v15 = vpop.trf.xlu0 }
 0x7be   : > { %4866 = vst [vmem:[%s221_s15 + $0x38] sm:$0xff] %v4843_v15 }
 0x7c5   : > { %4808 = vxpose.xlu2.b32.cont [14/16] (narrow) %v12274_v1, 8 }
 0x7cd   : > { %4809 = vxpose.xlu2.b32.cont [15/16] (narrow) %v12286_v58, 8 }
 0x7d5   : > { %4810 = vxpose.xlu2.b32.end [16/16] (narrow) %v12297_v17, 8 }
 0x7f6   : > { %v4811_v22 = vpop.trf.xlu2 }
 0x7f7   : > { %4865 = vst [vmem:[%s221_s15 + $0x30] sm:$0xff] %v4811_v22 }
 0x7f8   : > { %5434 = shalt.err (!%p5431_p7)
}
 0x7f9   : > { %5187 = dma.vmem_to_hbm [thread:$0]  (%p5554_p5), %s4890_s11, 1024, %s4892_s12, %s4868_s8  }
 0x7fa PF: > { %p5203_p8 = scmp.ge.s32.totalorder %s5473_s21, 2  ;;  %s4929_s26 = sand.u32 1, %s5461_s18  }
 0x7fb   : > { %s4930_s14 = scalar_lea.sflag [#allocation3], %s4929_s26 }
 0x7fc   : > { %p5194_p9 = pnand %p5203_p8, %p5558_p6 }
 0x7fe   : > { %p5195_p10 = pneg %p5194_p9 }
 0x800   : > { %5452 = dma.done.wait (%p5195_p10), %s4930_s14, 1024  }
 0x801   : > { %5454 = vsyncadd (%p5195_p10), %s4930_s14, 4294966272  ;;  %s14907_s15 = sadd.s32 4294967294, %s5473_s21  }
 0x802   : > { %s4939_s10 = sand.u32 1, %s14907_s15  }
 0x803   : > { %s4940_s16 = scalar_lea.sflag [#allocation5], %s4939_s10 }
 0x804   : > { %5456 = dma.done.wait (%p5195_p10), %s4940_s16, 32  }
 0x805   : > { %5458 = vsyncadd (%p5195_p10), %s4940_s16, 4294967264  ;;  %p19_p5 = scmp.ge.s32.totalorder %s5539_s24, 4   ;;  %s14908_s18 = smov %s5465_s19 }
 0x806   : > { %s14909_s19 = smov %s5469_s20  ;;  %s14910_s20 = smov %s5552_s27 }
 0x807   : > { %s14911_s21 = smov %s5539_s24  ;;  %21 = sbr.rel (!%p19_p5) target bundleno = 5 (0x5), region = 99 }
 0x80c   :  { %4954 = vsyncpa [#allocation3], 1 }
 0x80d   :  { %4956 = vsyncpa [#allocation3 + $0x1], 1 }
 0x80e   :  { %4957 = vsyncpa [#allocation5], 1 }
 0x80f   :  { %4959 = vsyncpa [#allocation5 + $0x1], 1 }

</bundles_post_ra>
